<compile_context>
chip_gen: v7x
topology: tpu7x:2x2x1
jax: 0.10.0
libtpu: 0.0.40
codegen_flags: <defaults>
</compile_context>

<pallas_src>
import jax
import jax.numpy as jnp
from jax import lax
from jax.experimental import pallas as pl
from jax.experimental.pallas import tpu as pltpu


# Tap enumeration shared by weight packing, mask building and the kernel.
_TAPS = tuple((dh, dw) for dh in (-1, 0, 1) for dw in (-1, 0, 1))


def _make_rir_kernel(C, H, W, n_blocks):
    HW = H * W
    n_layers = 2 * n_blocks + 1

    def rir_kernel(x_ref, convw_ref, se1t_ref, se2_ref, mask_ref, o_ref):
        # x_ref:     (G, C, HW)          images this step, channels on sublanes
        # convw_ref: (n_layers, C, 9*C)  tap-major conv weights, f32
        # se1t_ref:  (n_blocks, C, C)    SE fc1 weights, TRANSPOSED (in, out)
        # se2_ref:   (n_blocks, C, C)    SE fc2 weights (out, in)
        # mask_ref:  (9, 1, HW)          per-tap zero-pad boundary masks, f32
        # o_ref:     (G, C, HW)
        x = x_ref[...].astype(jnp.float32)
        G = x.shape[0]

        # Hoist the 9 boundary predicates once; reused by every conv layer.
        tap_ok = [mask_ref[t][None] > 0.5 for t in range(9)]   # (1, 1, HW) bool each

        def conv3x3(h, layer):
            # h: (G, C, HW) f32 -> (G, C, HW) f32.  Pure-VPU broadcast-FMA
            # conv: at C=4 this beats building a (9C, HW) im2col patch.
            w = convw_ref[layer]                                   # (C, 9C)
            out = jnp.zeros((G, C, HW), jnp.float32)
            for t, (dh, dw) in enumerate(_TAPS):
                d = dh * W + dw
                if d == 0:
                    s = h
                else:
                    # s[..., p] = h[..., p + d]; wrapped lanes are zeroed by the mask.
                    s = pltpu.roll(h, (-d) % HW, axis=2)
                    s = jnp.where(tap_ok[t], s, 0.0)
                for ci in range(C):
                    wcol = w[:, t * C + ci:t * C + ci + 1]         # (C, 1) out-channel column
                    out = out + wcol[None, :, :] * s[:, ci:ci + 1, :]
            return out

        h = x
        for blk in range(n_blocks):
            # RB body: conv -> relu -> conv -> relu
            r = jnp.maximum(conv3x3(h, 2 * blk), 0.0)
            r = jnp.maximum(conv3x3(r, 2 * blk + 1), 0.0)
            # SELayer(C, reduction=1): avg-pool + fc/relu/fc/sigmoid, on the VPU.
            y = jnp.mean(r, axis=2, keepdims=True)                                    # (G, C, 1)
            z = jnp.maximum(
                jnp.sum(se1t_ref[blk][None, :, :] * y, axis=1, keepdims=True), 0.0)   # (G, 1, C)
            gate = jax.nn.sigmoid(
                jnp.sum(se2_ref[blk][None, :, :] * z, axis=2, keepdims=True))         # (G, C, 1)
            h = r * gate + h                                                           # RB residual
        res = conv3x3(h, n_layers - 1) + x                                             # global residual
        o_ref[...] = jnp.maximum(res, 0.0).astype(o_ref.dtype)                         # final ReLU

    return rir_kernel


def _images_per_step(batch):
    """One image per grid step on 2-TensorCore chips (v7x-class) so the
    'parallel' grid axis shards across cores; the whole batch per step on
    single-TC chips (v5e/v6e) to avoid per-grid-step overhead."""
    try:
        kind = jax.devices()[0].device_kind.lower()
    except Exception:
        kind = ""
    if "v7" in kind or "7x" in kind or "tpu7" in kind:
        return 1
    return batch


def rir_forward(x_nchw, conv_weights, se1_weights, se2_weights,
                imgs_per_step=None):
    """RIR forward.

    x_nchw:       (B, C, H, W) float32
    conv_weights: list of 2*n_blocks+1 arrays (C, C, 3, 3)   (PyTorch OIHW)
    se1_weights:  list of n_blocks arrays (C, C)              (nn.Linear (out,in))
    se2_weights:  list of n_blocks arrays (C, C)
    """
    B, C, H, W = x_nchw.shape
    n_blocks = len(se1_weights)
    assert len(conv_weights) == 2 * n_blocks + 1
    assert len(se2_weights) == n_blocks
    HW = H * W
    n_layers = 2 * n_blocks + 1

    G = _images_per_step(B) if imgs_per_step is None else imgs_per_step
    G = max(1, min(G, B))
    while B % G:             # keep the grid exact
        G -= 1

    # Conv weight (Cout, Cin, 3, 3) -> tap-major (Cout, 9*Cin), col = (kh*3+kw)*Cin + ci.
    convw = jnp.stack([jnp.transpose(w, (0, 2, 3, 1)).reshape(C, 9 * C)
                       for w in conv_weights]).astype(jnp.float32)
    se1t = jnp.stack([w.T for w in se1_weights]).astype(jnp.float32)   # (n_blocks, Cin, Cout)
    se2 = jnp.stack(se2_weights).astype(jnp.float32)                   # (n_blocks, Cout, Cin)

    # Zero-padding boundary masks for the 9 conv taps, precomputed once.
    q = jnp.arange(HW, dtype=jnp.int32)
    row, col = q // W, q % W
    mask9 = jnp.stack([
        ((row + dh >= 0) & (row + dh < H) & (col + dw >= 0) & (col + dw < W))
        for dh, dw in _TAPS]).astype(jnp.float32).reshape(9, 1, HW)

    x_flat = x_nchw.reshape(B, C, HW)            # free reshape (NCHW native layout)

    kernel = _make_rir_kernel(C, H, W, n_blocks)

    out_flat = pl.pallas_call(
        kernel,
        out_shape=jax.ShapeDtypeStruct((B, C, HW), x_nchw.dtype),
        grid_spec=pltpu.PrefetchScalarGridSpec(
            num_scalar_prefetch=0,
            grid=(B // G,),
            in_specs=[
                pl.BlockSpec((G, C, HW), lambda b: (b, 0, 0)),
                pl.BlockSpec((n_layers, C, 9 * C), lambda b: (0, 0, 0)),
                pl.BlockSpec((n_blocks, C, C), lambda b: (0, 0, 0)),
                pl.BlockSpec((n_blocks, C, C), lambda b: (0, 0, 0)),
                pl.BlockSpec((9, 1, HW), lambda b: (0, 0, 0)),
            ],
            out_specs=pl.BlockSpec((G, C, HW), lambda b: (b, 0, 0)),
        ),
        compiler_params=pltpu.CompilerParams(
            dimension_semantics=("parallel",)),
    )(x_flat, convw, se1t, se2, mask9)

    return out_flat.reshape(B, C, H, W)


def _reference(x, conv_weights, se1_weights, se2_weights):
    """Pure-JAX f32 reference mirroring the PyTorch RIR module."""
    def conv(h, w):
        return lax.conv_general_dilated(
            h, w, window_strides=(1, 1), padding=((1, 1), (1, 1)),
            dimension_numbers=("NCHW", "OIHW", "NCHW"))

    n_blocks = len(se1_weights)
    h = x
    for i in range(n_blocks):
        r = jax.nn.relu(conv(h, conv_weights[2 * i]))
        r = jax.nn.relu(conv(r, conv_weights[2 * i + 1]))
        y = jnp.mean(r, axis=(2, 3))                       # AdaptiveAvgPool2d(1)
        z = jax.nn.relu(y @ se1_weights[i].T)              # Linear, no bias
        z = jax.nn.sigmoid(z @ se2_weights[i].T)
        h = r * z[:, :, None, None] + h
    res = conv(h, conv_weights[-1]) + x
    return jax.nn.relu(res)


if __name__ == "__main__":
    key = jax.random.PRNGKey(0)
    n_feats, n_blocks = 4, 2
    B, H, W = 2, 16, 16
    n_convs = 2 * n_blocks + 1

    keys = jax.random.split(key, 1 + n_convs + 2 * n_blocks)
    x = jax.random.normal(keys[0], (B, n_feats, H, W), dtype=jnp.float32)
    conv_weights = [
        jax.random.normal(keys[1 + i], (n_feats, n_feats, 3, 3),
                          dtype=jnp.float32) * 0.1
        for i in range(n_convs)]
    se1_weights = [
        jax.random.normal(keys[1 + n_convs + i], (n_feats, n_feats),
                          dtype=jnp.float32) * 0.5
        for i in range(n_blocks)]
    se2_weights = [
        jax.random.normal(keys[1 + n_convs + n_blocks + i], (n_feats, n_feats),
                          dtype=jnp.float32) * 0.5
        for i in range(n_blocks)]

    out = jax.block_until_ready(
        rir_forward(x, conv_weights, se1_weights, se2_weights))
    ref = jax.block_until_ready(
        _reference(x, conv_weights, se1_weights, se2_weights))

    assert out.shape == (B, n_feats, H, W), out.shape
    max_err = float(jnp.max(jnp.abs(out - ref)))
    # Everything is f32 end-to-end now -> tight tolerance.
    assert jnp.allclose(out, ref, atol=1e-3, rtol=1e-3), max_err
    print("KERNEL_OK")
</pallas_src>

<mosaic_0001>
module attributes {stable_mosaic.version = 11 : i64} {
  func.func @rir_kernel(%arg0: i32, %arg1: memref<2x4x256xf32, #tpu.memory_space<vmem>>, %arg2: memref<5x4x36xf32, #tpu.memory_space<vmem>>, %arg3: memref<2x4x4xf32, #tpu.memory_space<vmem>>, %arg4: memref<2x4x4xf32, #tpu.memory_space<vmem>>, %arg5: memref<9x1x256xf32, #tpu.memory_space<vmem>>, %arg6: memref<2x4x256xf32, #tpu.memory_space<vmem>>) attributes {dimension_semantics = [#tpu.dimension_semantics<parallel>], iteration_bounds = array<i64: 1>, scalar_prefetch = 0 : i64, scratch_operands = 0 : i64, tpu.core_type = #tpu.core_type<tc>, window_params = [{transform_indices = @transform_0, window_bounds = array<i64: 2, 4, 256>}, {pipeline_mode = #tpu.pipeline_mode<synchronous>, transform_indices = @transform_1, window_bounds = array<i64: 5, 4, 36>}, {pipeline_mode = #tpu.pipeline_mode<synchronous>, transform_indices = @transform_2, window_bounds = array<i64: 2, 4, 4>}, {pipeline_mode = #tpu.pipeline_mode<synchronous>, transform_indices = @transform_3, window_bounds = array<i64: 2, 4, 4>}, {pipeline_mode = #tpu.pipeline_mode<synchronous>, transform_indices = @transform_4, window_bounds = array<i64: 9, 1, 256>}, {transform_indices = @transform_5, window_bounds = array<i64: 2, 4, 256>}]} {
    %c0 = arith.constant 0 : index
    %c0_0 = arith.constant 0 : index
    %c0_1 = arith.constant 0 : index
    %0 = vector.load %arg1[%c0, %c0_0, %c0_1] : memref<2x4x256xf32, #tpu.memory_space<vmem>>, vector<2x4x256xf32>
    %c0_2 = arith.constant 0 : index
    %c0_3 = arith.constant 0 : index
    %c0_4 = arith.constant 0 : index
    %1 = vector.load %arg5[%c0_2, %c0_3, %c0_4] : memref<9x1x256xf32, #tpu.memory_space<vmem>>, vector<1x1x256xf32>
    %2 = vector.shape_cast %1 : vector<1x1x256xf32> to vector<1x256xf32>
    %3 = vector.shape_cast %2 : vector<1x256xf32> to vector<1x1x256xf32>
    %cst = arith.constant 5.000000e-01 : f32
    %4 = vector.broadcast %cst : f32 to vector<1x1x256xf32>
    %5 = arith.cmpf ogt, %3, %4 : vector<1x1x256xf32>
    %c1 = arith.constant 1 : index
    %c0_5 = arith.constant 0 : index
    %c0_6 = arith.constant 0 : index
    %6 = vector.load %arg5[%c1, %c0_5, %c0_6] : memref<9x1x256xf32, #tpu.memory_space<vmem>>, vector<1x1x256xf32>
    %7 = vector.shape_cast %6 : vector<1x1x256xf32> to vector<1x256xf32>
    %8 = vector.shape_cast %7 : vector<1x256xf32> to vector<1x1x256xf32>
    %cst_7 = arith.constant 5.000000e-01 : f32
    %9 = vector.broadcast %cst_7 : f32 to vector<1x1x256xf32>
    %10 = arith.cmpf ogt, %8, %9 : vector<1x1x256xf32>
    %c2 = arith.constant 2 : index
    %c0_8 = arith.constant 0 : index
    %c0_9 = arith.constant 0 : index
    %11 = vector.load %arg5[%c2, %c0_8, %c0_9] : memref<9x1x256xf32, #tpu.memory_space<vmem>>, vector<1x1x256xf32>
    %12 = vector.shape_cast %11 : vector<1x1x256xf32> to vector<1x256xf32>
    %13 = vector.shape_cast %12 : vector<1x256xf32> to vector<1x1x256xf32>
    %cst_10 = arith.constant 5.000000e-01 : f32
    %14 = vector.broadcast %cst_10 : f32 to vector<1x1x256xf32>
    %15 = arith.cmpf ogt, %13, %14 : vector<1x1x256xf32>
    %c3 = arith.constant 3 : index
    %c0_11 = arith.constant 0 : index
    %c0_12 = arith.constant 0 : index
    %16 = vector.load %arg5[%c3, %c0_11, %c0_12] : memref<9x1x256xf32, #tpu.memory_space<vmem>>, vector<1x1x256xf32>
    %17 = vector.shape_cast %16 : vector<1x1x256xf32> to vector<1x256xf32>
    %18 = vector.shape_cast %17 : vector<1x256xf32> to vector<1x1x256xf32>
    %cst_13 = arith.constant 5.000000e-01 : f32
    %19 = vector.broadcast %cst_13 : f32 to vector<1x1x256xf32>
    %20 = arith.cmpf ogt, %18, %19 : vector<1x1x256xf32>
    %c5 = arith.constant 5 : index
    %c0_14 = arith.constant 0 : index
    %c0_15 = arith.constant 0 : index
    %21 = vector.load %arg5[%c5, %c0_14, %c0_15] : memref<9x1x256xf32, #tpu.memory_space<vmem>>, vector<1x1x256xf32>
    %22 = vector.shape_cast %21 : vector<1x1x256xf32> to vector<1x256xf32>
    %23 = vector.shape_cast %22 : vector<1x256xf32> to vector<1x1x256xf32>
    %cst_16 = arith.constant 5.000000e-01 : f32
    %24 = vector.broadcast %cst_16 : f32 to vector<1x1x256xf32>
    %25 = arith.cmpf ogt, %23, %24 : vector<1x1x256xf32>
    %c6 = arith.constant 6 : index
    %c0_17 = arith.constant 0 : index
    %c0_18 = arith.constant 0 : index
    %26 = vector.load %arg5[%c6, %c0_17, %c0_18] : memref<9x1x256xf32, #tpu.memory_space<vmem>>, vector<1x1x256xf32>
    %27 = vector.shape_cast %26 : vector<1x1x256xf32> to vector<1x256xf32>
    %28 = vector.shape_cast %27 : vector<1x256xf32> to vector<1x1x256xf32>
    %cst_19 = arith.constant 5.000000e-01 : f32
    %29 = vector.broadcast %cst_19 : f32 to vector<1x1x256xf32>
    %30 = arith.cmpf ogt, %28, %29 : vector<1x1x256xf32>
    %c7 = arith.constant 7 : index
    %c0_20 = arith.constant 0 : index
    %c0_21 = arith.constant 0 : index
    %31 = vector.load %arg5[%c7, %c0_20, %c0_21] : memref<9x1x256xf32, #tpu.memory_space<vmem>>, vector<1x1x256xf32>
    %32 = vector.shape_cast %31 : vector<1x1x256xf32> to vector<1x256xf32>
    %33 = vector.shape_cast %32 : vector<1x256xf32> to vector<1x1x256xf32>
    %cst_22 = arith.constant 5.000000e-01 : f32
    %34 = vector.broadcast %cst_22 : f32 to vector<1x1x256xf32>
    %35 = arith.cmpf ogt, %33, %34 : vector<1x1x256xf32>
    %c8 = arith.constant 8 : index
    %c0_23 = arith.constant 0 : index
    %c0_24 = arith.constant 0 : index
    %36 = vector.load %arg5[%c8, %c0_23, %c0_24] : memref<9x1x256xf32, #tpu.memory_space<vmem>>, vector<1x1x256xf32>
    %37 = vector.shape_cast %36 : vector<1x1x256xf32> to vector<1x256xf32>
    %38 = vector.shape_cast %37 : vector<1x256xf32> to vector<1x1x256xf32>
    %cst_25 = arith.constant 5.000000e-01 : f32
    %39 = vector.broadcast %cst_25 : f32 to vector<1x1x256xf32>
    %40 = arith.cmpf ogt, %38, %39 : vector<1x1x256xf32>
    %c0_26 = arith.constant 0 : index
    %c0_27 = arith.constant 0 : index
    %c0_28 = arith.constant 0 : index
    %41 = vector.load %arg2[%c0_26, %c0_27, %c0_28] : memref<5x4x36xf32, #tpu.memory_space<vmem>>, vector<1x4x36xf32>
    %42 = vector.shape_cast %41 : vector<1x4x36xf32> to vector<4x36xf32>
    %cst_29 = arith.constant 0.000000e+00 : f32
    %43 = vector.broadcast %cst_29 : f32 to vector<2x4x256xf32>
    %c17_i32 = arith.constant 17 : i32
    %44 = tpu.dynamic_rotate %0 by %c17_i32 dim 2 : vector<2x4x256xf32>, i32 -> vector<2x4x256xf32>
    %cst_30 = arith.constant 0.000000e+00 : f32
    %45 = vector.shape_cast %5 : vector<1x1x256xi1> to vector<1x1x256xi1>
    %46 = vector.broadcast %45 : vector<1x1x256xi1> to vector<2x4x256xi1>
    %47 = vector.broadcast %cst_30 : f32 to vector<2x4x256xf32>
    %48 = arith.select %46, %44, %47 : vector<2x4x256xi1>, vector<2x4x256xf32>
    %49 = vector.extract_strided_slice %42 {offsets = [0, 0], sizes = [4, 1], strides = [1, 1]} : vector<4x36xf32> to vector<4x1xf32>
    %50 = vector.shape_cast %49 : vector<4x1xf32> to vector<1x4x1xf32>
    %51 = vector.extract_strided_slice %48 {offsets = [0, 0, 0], sizes = [2, 1, 256], strides = [1, 1, 1]} : vector<2x4x256xf32> to vector<2x1x256xf32>
    %52 = vector.broadcast %50 : vector<1x4x1xf32> to vector<2x4x256xf32>
    %53 = vector.broadcast %51 : vector<2x1x256xf32> to vector<2x4x256xf32>
    %54 = arith.mulf %52, %53 : vector<2x4x256xf32>
    %55 = arith.addf %43, %54 : vector<2x4x256xf32>
    %56 = vector.extract_strided_slice %42 {offsets = [0, 1], sizes = [4, 1], strides = [1, 1]} : vector<4x36xf32> to vector<4x1xf32>
    %57 = vector.shape_cast %56 : vector<4x1xf32> to vector<1x4x1xf32>
    %58 = vector.extract_strided_slice %48 {offsets = [0, 1, 0], sizes = [2, 1, 256], strides = [1, 1, 1]} : vector<2x4x256xf32> to vector<2x1x256xf32>
    %59 = vector.broadcast %57 : vector<1x4x1xf32> to vector<2x4x256xf32>
    %60 = vector.broadcast %58 : vector<2x1x256xf32> to vector<2x4x256xf32>
    %61 = arith.mulf %59, %60 : vector<2x4x256xf32>
    %62 = arith.addf %55, %61 : vector<2x4x256xf32>
    %63 = vector.extract_strided_slice %42 {offsets = [0, 2], sizes = [4, 1], strides = [1, 1]} : vector<4x36xf32> to vector<4x1xf32>
    %64 = vector.shape_cast %63 : vector<4x1xf32> to vector<1x4x1xf32>
    %65 = vector.extract_strided_slice %48 {offsets = [0, 2, 0], sizes = [2, 1, 256], strides = [1, 1, 1]} : vector<2x4x256xf32> to vector<2x1x256xf32>
    %66 = vector.broadcast %64 : vector<1x4x1xf32> to vector<2x4x256xf32>
    %67 = vector.broadcast %65 : vector<2x1x256xf32> to vector<2x4x256xf32>
    %68 = arith.mulf %66, %67 : vector<2x4x256xf32>
    %69 = arith.addf %62, %68 : vector<2x4x256xf32>
    %70 = vector.extract_strided_slice %42 {offsets = [0, 3], sizes = [4, 1], strides = [1, 1]} : vector<4x36xf32> to vector<4x1xf32>
    %71 = vector.shape_cast %70 : vector<4x1xf32> to vector<1x4x1xf32>
    %72 = vector.extract_strided_slice %48 {offsets = [0, 3, 0], sizes = [2, 1, 256], strides = [1, 1, 1]} : vector<2x4x256xf32> to vector<2x1x256xf32>
    %73 = vector.broadcast %71 : vector<1x4x1xf32> to vector<2x4x256xf32>
    %74 = vector.broadcast %72 : vector<2x1x256xf32> to vector<2x4x256xf32>
    %75 = arith.mulf %73, %74 : vector<2x4x256xf32>
    %76 = arith.addf %69, %75 : vector<2x4x256xf32>
    %c16_i32 = arith.constant 16 : i32
    %77 = tpu.dynamic_rotate %0 by %c16_i32 dim 2 : vector<2x4x256xf32>, i32 -> vector<2x4x256xf32>
    %cst_31 = arith.constant 0.000000e+00 : f32
    %78 = vector.shape_cast %10 : vector<1x1x256xi1> to vector<1x1x256xi1>
    %79 = vector.broadcast %78 : vector<1x1x256xi1> to vector<2x4x256xi1>
    %80 = vector.broadcast %cst_31 : f32 to vector<2x4x256xf32>
    %81 = arith.select %79, %77, %80 : vector<2x4x256xi1>, vector<2x4x256xf32>
    %82 = vector.extract_strided_slice %42 {offsets = [0, 4], sizes = [4, 1], strides = [1, 1]} : vector<4x36xf32> to vector<4x1xf32>
    %83 = vector.shape_cast %82 : vector<4x1xf32> to vector<1x4x1xf32>
    %84 = vector.extract_strided_slice %81 {offsets = [0, 0, 0], sizes = [2, 1, 256], strides = [1, 1, 1]} : vector<2x4x256xf32> to vector<2x1x256xf32>
    %85 = vector.broadcast %83 : vector<1x4x1xf32> to vector<2x4x256xf32>
    %86 = vector.broadcast %84 : vector<2x1x256xf32> to vector<2x4x256xf32>
    %87 = arith.mulf %85, %86 : vector<2x4x256xf32>
    %88 = arith.addf %76, %87 : vector<2x4x256xf32>
    %89 = vector.extract_strided_slice %42 {offsets = [0, 5], sizes = [4, 1], strides = [1, 1]} : vector<4x36xf32> to vector<4x1xf32>
    %90 = vector.shape_cast %89 : vector<4x1xf32> to vector<1x4x1xf32>
    %91 = vector.extract_strided_slice %81 {offsets = [0, 1, 0], sizes = [2, 1, 256], strides = [1, 1, 1]} : vector<2x4x256xf32> to vector<2x1x256xf32>
    %92 = vector.broadcast %90 : vector<1x4x1xf32> to vector<2x4x256xf32>
    %93 = vector.broadcast %91 : vector<2x1x256xf32> to vector<2x4x256xf32>
    %94 = arith.mulf %92, %93 : vector<2x4x256xf32>
    %95 = arith.addf %88, %94 : vector<2x4x256xf32>
    %96 = vector.extract_strided_slice %42 {offsets = [0, 6], sizes = [4, 1], strides = [1, 1]} : vector<4x36xf32> to vector<4x1xf32>
    %97 = vector.shape_cast %96 : vector<4x1xf32> to vector<1x4x1xf32>
    %98 = vector.extract_strided_slice %81 {offsets = [0, 2, 0], sizes = [2, 1, 256], strides = [1, 1, 1]} : vector<2x4x256xf32> to vector<2x1x256xf32>
    %99 = vector.broadcast %97 : vector<1x4x1xf32> to vector<2x4x256xf32>
    %100 = vector.broadcast %98 : vector<2x1x256xf32> to vector<2x4x256xf32>
    %101 = arith.mulf %99, %100 : vector<2x4x256xf32>
    %102 = arith.addf %95, %101 : vector<2x4x256xf32>
    %103 = vector.extract_strided_slice %42 {offsets = [0, 7], sizes = [4, 1], strides = [1, 1]} : vector<4x36xf32> to vector<4x1xf32>
    %104 = vector.shape_cast %103 : vector<4x1xf32> to vector<1x4x1xf32>
    %105 = vector.extract_strided_slice %81 {offsets = [0, 3, 0], sizes = [2, 1, 256], strides = [1, 1, 1]} : vector<2x4x256xf32> to vector<2x1x256xf32>
    %106 = vector.broadcast %104 : vector<1x4x1xf32> to vector<2x4x256xf32>
    %107 = vector.broadcast %105 : vector<2x1x256xf32> to vector<2x4x256xf32>
    %108 = arith.mulf %106, %107 : vector<2x4x256xf32>
    %109 = arith.addf %102, %108 : vector<2x4x256xf32>
    %c15_i32 = arith.constant 15 : i32
    %110 = tpu.dynamic_rotate %0 by %c15_i32 dim 2 : vector<2x4x256xf32>, i32 -> vector<2x4x256xf32>
    %cst_32 = arith.constant 0.000000e+00 : f32
    %111 = vector.shape_cast %15 : vector<1x1x256xi1> to vector<1x1x256xi1>
    %112 = vector.broadcast %111 : vector<1x1x256xi1> to vector<2x4x256xi1>
    %113 = vector.broadcast %cst_32 : f32 to vector<2x4x256xf32>
    %114 = arith.select %112, %110, %113 : vector<2x4x256xi1>, vector<2x4x256xf32>
    %115 = vector.extract_strided_slice %42 {offsets = [0, 8], sizes = [4, 1], strides = [1, 1]} : vector<4x36xf32> to vector<4x1xf32>
    %116 = vector.shape_cast %115 : vector<4x1xf32> to vector<1x4x1xf32>
    %117 = vector.extract_strided_slice %114 {offsets = [0, 0, 0], sizes = [2, 1, 256], strides = [1, 1, 1]} : vector<2x4x256xf32> to vector<2x1x256xf32>
    %118 = vector.broadcast %116 : vector<1x4x1xf32> to vector<2x4x256xf32>
    %119 = vector.broadcast %117 : vector<2x1x256xf32> to vector<2x4x256xf32>
    %120 = arith.mulf %118, %119 : vector<2x4x256xf32>
    %121 = arith.addf %109, %120 : vector<2x4x256xf32>
    %122 = vector.extract_strided_slice %42 {offsets = [0, 9], sizes = [4, 1], strides = [1, 1]} : vector<4x36xf32> to vector<4x1xf32>
    %123 = vector.shape_cast %122 : vector<4x1xf32> to vector<1x4x1xf32>
    %124 = vector.extract_strided_slice %114 {offsets = [0, 1, 0], sizes = [2, 1, 256], strides = [1, 1, 1]} : vector<2x4x256xf32> to vector<2x1x256xf32>
    %125 = vector.broadcast %123 : vector<1x4x1xf32> to vector<2x4x256xf32>
    %126 = vector.broadcast %124 : vector<2x1x256xf32> to vector<2x4x256xf32>
    %127 = arith.mulf %125, %126 : vector<2x4x256xf32>
    %128 = arith.addf %121, %127 : vector<2x4x256xf32>
    %129 = vector.extract_strided_slice %42 {offsets = [0, 10], sizes = [4, 1], strides = [1, 1]} : vector<4x36xf32> to vector<4x1xf32>
    %130 = vector.shape_cast %129 : vector<4x1xf32> to vector<1x4x1xf32>
    %131 = vector.extract_strided_slice %114 {offsets = [0, 2, 0], sizes = [2, 1, 256], strides = [1, 1, 1]} : vector<2x4x256xf32> to vector<2x1x256xf32>
    %132 = vector.broadcast %130 : vector<1x4x1xf32> to vector<2x4x256xf32>
    %133 = vector.broadcast %131 : vector<2x1x256xf32> to vector<2x4x256xf32>
    %134 = arith.mulf %132, %133 : vector<2x4x256xf32>
    %135 = arith.addf %128, %134 : vector<2x4x256xf32>
    %136 = vector.extract_strided_slice %42 {offsets = [0, 11], sizes = [4, 1], strides = [1, 1]} : vector<4x36xf32> to vector<4x1xf32>
    %137 = vector.shape_cast %136 : vector<4x1xf32> to vector<1x4x1xf32>
    %138 = vector.extract_strided_slice %114 {offsets = [0, 3, 0], sizes = [2, 1, 256], strides = [1, 1, 1]} : vector<2x4x256xf32> to vector<2x1x256xf32>
    %139 = vector.broadcast %137 : vector<1x4x1xf32> to vector<2x4x256xf32>
    %140 = vector.broadcast %138 : vector<2x1x256xf32> to vector<2x4x256xf32>
    %141 = arith.mulf %139, %140 : vector<2x4x256xf32>
    %142 = arith.addf %135, %141 : vector<2x4x256xf32>
    %c1_i32 = arith.constant 1 : i32
    %143 = tpu.dynamic_rotate %0 by %c1_i32 dim 2 : vector<2x4x256xf32>, i32 -> vector<2x4x256xf32>
    %cst_33 = arith.constant 0.000000e+00 : f32
    %144 = vector.shape_cast %20 : vector<1x1x256xi1> to vector<1x1x256xi1>
    %145 = vector.broadcast %144 : vector<1x1x256xi1> to vector<2x4x256xi1>
    %146 = vector.broadcast %cst_33 : f32 to vector<2x4x256xf32>
    %147 = arith.select %145, %143, %146 : vector<2x4x256xi1>, vector<2x4x256xf32>
    %148 = vector.extract_strided_slice %42 {offsets = [0, 12], sizes = [4, 1], strides = [1, 1]} : vector<4x36xf32> to vector<4x1xf32>
    %149 = vector.shape_cast %148 : vector<4x1xf32> to vector<1x4x1xf32>
    %150 = vector.extract_strided_slice %147 {offsets = [0, 0, 0], sizes = [2, 1, 256], strides = [1, 1, 1]} : vector<2x4x256xf32> to vector<2x1x256xf32>
    %151 = vector.broadcast %149 : vector<1x4x1xf32> to vector<2x4x256xf32>
    %152 = vector.broadcast %150 : vector<2x1x256xf32> to vector<2x4x256xf32>
    %153 = arith.mulf %151, %152 : vector<2x4x256xf32>
    %154 = arith.addf %142, %153 : vector<2x4x256xf32>
    %155 = vector.extract_strided_slice %42 {offsets = [0, 13], sizes = [4, 1], strides = [1, 1]} : vector<4x36xf32> to vector<4x1xf32>
    %156 = vector.shape_cast %155 : vector<4x1xf32> to vector<1x4x1xf32>
    %157 = vector.extract_strided_slice %147 {offsets = [0, 1, 0], sizes = [2, 1, 256], strides = [1, 1, 1]} : vector<2x4x256xf32> to vector<2x1x256xf32>
    %158 = vector.broadcast %156 : vector<1x4x1xf32> to vector<2x4x256xf32>
    %159 = vector.broadcast %157 : vector<2x1x256xf32> to vector<2x4x256xf32>
    %160 = arith.mulf %158, %159 : vector<2x4x256xf32>
    %161 = arith.addf %154, %160 : vector<2x4x256xf32>
    %162 = vector.extract_strided_slice %42 {offsets = [0, 14], sizes = [4, 1], strides = [1, 1]} : vector<4x36xf32> to vector<4x1xf32>
    %163 = vector.shape_cast %162 : vector<4x1xf32> to vector<1x4x1xf32>
    %164 = vector.extract_strided_slice %147 {offsets = [0, 2, 0], sizes = [2, 1, 256], strides = [1, 1, 1]} : vector<2x4x256xf32> to vector<2x1x256xf32>
    %165 = vector.broadcast %163 : vector<1x4x1xf32> to vector<2x4x256xf32>
    %166 = vector.broadcast %164 : vector<2x1x256xf32> to vector<2x4x256xf32>
    %167 = arith.mulf %165, %166 : vector<2x4x256xf32>
    %168 = arith.addf %161, %167 : vector<2x4x256xf32>
    %169 = vector.extract_strided_slice %42 {offsets = [0, 15], sizes = [4, 1], strides = [1, 1]} : vector<4x36xf32> to vector<4x1xf32>
    %170 = vector.shape_cast %169 : vector<4x1xf32> to vector<1x4x1xf32>
    %171 = vector.extract_strided_slice %147 {offsets = [0, 3, 0], sizes = [2, 1, 256], strides = [1, 1, 1]} : vector<2x4x256xf32> to vector<2x1x256xf32>
    %172 = vector.broadcast %170 : vector<1x4x1xf32> to vector<2x4x256xf32>
    %173 = vector.broadcast %171 : vector<2x1x256xf32> to vector<2x4x256xf32>
    %174 = arith.mulf %172, %173 : vector<2x4x256xf32>
    %175 = arith.addf %168, %174 : vector<2x4x256xf32>
    %176 = vector.extract_strided_slice %42 {offsets = [0, 16], sizes = [4, 1], strides = [1, 1]} : vector<4x36xf32> to vector<4x1xf32>
    %177 = vector.shape_cast %176 : vector<4x1xf32> to vector<1x4x1xf32>
    %178 = vector.extract_strided_slice %0 {offsets = [0, 0, 0], sizes = [2, 1, 256], strides = [1, 1, 1]} : vector<2x4x256xf32> to vector<2x1x256xf32>
    %179 = vector.broadcast %177 : vector<1x4x1xf32> to vector<2x4x256xf32>
    %180 = vector.broadcast %178 : vector<2x1x256xf32> to vector<2x4x256xf32>
    %181 = arith.mulf %179, %180 : vector<2x4x256xf32>
    %182 = arith.addf %175, %181 : vector<2x4x256xf32>
    %183 = vector.extract_strided_slice %42 {offsets = [0, 17], sizes = [4, 1], strides = [1, 1]} : vector<4x36xf32> to vector<4x1xf32>
    %184 = vector.shape_cast %183 : vector<4x1xf32> to vector<1x4x1xf32>
    %185 = vector.extract_strided_slice %0 {offsets = [0, 1, 0], sizes = [2, 1, 256], strides = [1, 1, 1]} : vector<2x4x256xf32> to vector<2x1x256xf32>
    %186 = vector.broadcast %184 : vector<1x4x1xf32> to vector<2x4x256xf32>
    %187 = vector.broadcast %185 : vector<2x1x256xf32> to vector<2x4x256xf32>
    %188 = arith.mulf %186, %187 : vector<2x4x256xf32>
    %189 = arith.addf %182, %188 : vector<2x4x256xf32>
    %190 = vector.extract_strided_slice %42 {offsets = [0, 18], sizes = [4, 1], strides = [1, 1]} : vector<4x36xf32> to vector<4x1xf32>
    %191 = vector.shape_cast %190 : vector<4x1xf32> to vector<1x4x1xf32>
    %192 = vector.extract_strided_slice %0 {offsets = [0, 2, 0], sizes = [2, 1, 256], strides = [1, 1, 1]} : vector<2x4x256xf32> to vector<2x1x256xf32>
    %193 = vector.broadcast %191 : vector<1x4x1xf32> to vector<2x4x256xf32>
    %194 = vector.broadcast %192 : vector<2x1x256xf32> to vector<2x4x256xf32>
    %195 = arith.mulf %193, %194 : vector<2x4x256xf32>
    %196 = arith.addf %189, %195 : vector<2x4x256xf32>
    %197 = vector.extract_strided_slice %42 {offsets = [0, 19], sizes = [4, 1], strides = [1, 1]} : vector<4x36xf32> to vector<4x1xf32>
    %198 = vector.shape_cast %197 : vector<4x1xf32> to vector<1x4x1xf32>
    %199 = vector.extract_strided_slice %0 {offsets = [0, 3, 0], sizes = [2, 1, 256], strides = [1, 1, 1]} : vector<2x4x256xf32> to vector<2x1x256xf32>
    %200 = vector.broadcast %198 : vector<1x4x1xf32> to vector<2x4x256xf32>
    %201 = vector.broadcast %199 : vector<2x1x256xf32> to vector<2x4x256xf32>
    %202 = arith.mulf %200, %201 : vector<2x4x256xf32>
    %203 = arith.addf %196, %202 : vector<2x4x256xf32>
    %c255_i32 = arith.constant 255 : i32
    %204 = tpu.dynamic_rotate %0 by %c255_i32 dim 2 : vector<2x4x256xf32>, i32 -> vector<2x4x256xf32>
    %cst_34 = arith.constant 0.000000e+00 : f32
    %205 = vector.shape_cast %25 : vector<1x1x256xi1> to vector<1x1x256xi1>
    %206 = vector.broadcast %205 : vector<1x1x256xi1> to vector<2x4x256xi1>
    %207 = vector.broadcast %cst_34 : f32 to vector<2x4x256xf32>
    %208 = arith.select %206, %204, %207 : vector<2x4x256xi1>, vector<2x4x256xf32>
    %209 = vector.extract_strided_slice %42 {offsets = [0, 20], sizes = [4, 1], strides = [1, 1]} : vector<4x36xf32> to vector<4x1xf32>
    %210 = vector.shape_cast %209 : vector<4x1xf32> to vector<1x4x1xf32>
    %211 = vector.extract_strided_slice %208 {offsets = [0, 0, 0], sizes = [2, 1, 256], strides = [1, 1, 1]} : vector<2x4x256xf32> to vector<2x1x256xf32>
    %212 = vector.broadcast %210 : vector<1x4x1xf32> to vector<2x4x256xf32>
    %213 = vector.broadcast %211 : vector<2x1x256xf32> to vector<2x4x256xf32>
    %214 = arith.mulf %212, %213 : vector<2x4x256xf32>
    %215 = arith.addf %203, %214 : vector<2x4x256xf32>
    %216 = vector.extract_strided_slice %42 {offsets = [0, 21], sizes = [4, 1], strides = [1, 1]} : vector<4x36xf32> to vector<4x1xf32>
    %217 = vector.shape_cast %216 : vector<4x1xf32> to vector<1x4x1xf32>
    %218 = vector.extract_strided_slice %208 {offsets = [0, 1, 0], sizes = [2, 1, 256], strides = [1, 1, 1]} : vector<2x4x256xf32> to vector<2x1x256xf32>
    %219 = vector.broadcast %217 : vector<1x4x1xf32> to vector<2x4x256xf32>
    %220 = vector.broadcast %218 : vector<2x1x256xf32> to vector<2x4x256xf32>
    %221 = arith.mulf %219, %220 : vector<2x4x256xf32>
    %222 = arith.addf %215, %221 : vector<2x4x256xf32>
    %223 = vector.extract_strided_slice %42 {offsets = [0, 22], sizes = [4, 1], strides = [1, 1]} : vector<4x36xf32> to vector<4x1xf32>
    %224 = vector.shape_cast %223 : vector<4x1xf32> to vector<1x4x1xf32>
    %225 = vector.extract_strided_slice %208 {offsets = [0, 2, 0], sizes = [2, 1, 256], strides = [1, 1, 1]} : vector<2x4x256xf32> to vector<2x1x256xf32>
    %226 = vector.broadcast %224 : vector<1x4x1xf32> to vector<2x4x256xf32>
    %227 = vector.broadcast %225 : vector<2x1x256xf32> to vector<2x4x256xf32>
    %228 = arith.mulf %226, %227 : vector<2x4x256xf32>
    %229 = arith.addf %222, %228 : vector<2x4x256xf32>
    %230 = vector.extract_strided_slice %42 {offsets = [0, 23], sizes = [4, 1], strides = [1, 1]} : vector<4x36xf32> to vector<4x1xf32>
    %231 = vector.shape_cast %230 : vector<4x1xf32> to vector<1x4x1xf32>
    %232 = vector.extract_strided_slice %208 {offsets = [0, 3, 0], sizes = [2, 1, 256], strides = [1, 1, 1]} : vector<2x4x256xf32> to vector<2x1x256xf32>
    %233 = vector.broadcast %231 : vector<1x4x1xf32> to vector<2x4x256xf32>
    %234 = vector.broadcast %232 : vector<2x1x256xf32> to vector<2x4x256xf32>
    %235 = arith.mulf %233, %234 : vector<2x4x256xf32>
    %236 = arith.addf %229, %235 : vector<2x4x256xf32>
    %c241_i32 = arith.constant 241 : i32
    %237 = tpu.dynamic_rotate %0 by %c241_i32 dim 2 : vector<2x4x256xf32>, i32 -> vector<2x4x256xf32>
    %cst_35 = arith.constant 0.000000e+00 : f32
    %238 = vector.shape_cast %30 : vector<1x1x256xi1> to vector<1x1x256xi1>
    %239 = vector.broadcast %238 : vector<1x1x256xi1> to vector<2x4x256xi1>
    %240 = vector.broadcast %cst_35 : f32 to vector<2x4x256xf32>
    %241 = arith.select %239, %237, %240 : vector<2x4x256xi1>, vector<2x4x256xf32>
    %242 = vector.extract_strided_slice %42 {offsets = [0, 24], sizes = [4, 1], strides = [1, 1]} : vector<4x36xf32> to vector<4x1xf32>
    %243 = vector.shape_cast %242 : vector<4x1xf32> to vector<1x4x1xf32>
    %244 = vector.extract_strided_slice %241 {offsets = [0, 0, 0], sizes = [2, 1, 256], strides = [1, 1, 1]} : vector<2x4x256xf32> to vector<2x1x256xf32>
    %245 = vector.broadcast %243 : vector<1x4x1xf32> to vector<2x4x256xf32>
    %246 = vector.broadcast %244 : vector<2x1x256xf32> to vector<2x4x256xf32>
    %247 = arith.mulf %245, %246 : vector<2x4x256xf32>
    %248 = arith.addf %236, %247 : vector<2x4x256xf32>
    %249 = vector.extract_strided_slice %42 {offsets = [0, 25], sizes = [4, 1], strides = [1, 1]} : vector<4x36xf32> to vector<4x1xf32>
    %250 = vector.shape_cast %249 : vector<4x1xf32> to vector<1x4x1xf32>
    %251 = vector.extract_strided_slice %241 {offsets = [0, 1, 0], sizes = [2, 1, 256], strides = [1, 1, 1]} : vector<2x4x256xf32> to vector<2x1x256xf32>
    %252 = vector.broadcast %250 : vector<1x4x1xf32> to vector<2x4x256xf32>
    %253 = vector.broadcast %251 : vector<2x1x256xf32> to vector<2x4x256xf32>
    %254 = arith.mulf %252, %253 : vector<2x4x256xf32>
    %255 = arith.addf %248, %254 : vector<2x4x256xf32>
    %256 = vector.extract_strided_slice %42 {offsets = [0, 26], sizes = [4, 1], strides = [1, 1]} : vector<4x36xf32> to vector<4x1xf32>
    %257 = vector.shape_cast %256 : vector<4x1xf32> to vector<1x4x1xf32>
    %258 = vector.extract_strided_slice %241 {offsets = [0, 2, 0], sizes = [2, 1, 256], strides = [1, 1, 1]} : vector<2x4x256xf32> to vector<2x1x256xf32>
    %259 = vector.broadcast %257 : vector<1x4x1xf32> to vector<2x4x256xf32>
    %260 = vector.broadcast %258 : vector<2x1x256xf32> to vector<2x4x256xf32>
    %261 = arith.mulf %259, %260 : vector<2x4x256xf32>
    %262 = arith.addf %255, %261 : vector<2x4x256xf32>
    %263 = vector.extract_strided_slice %42 {offsets = [0, 27], sizes = [4, 1], strides = [1, 1]} : vector<4x36xf32> to vector<4x1xf32>
    %264 = vector.shape_cast %263 : vector<4x1xf32> to vector<1x4x1xf32>
    %265 = vector.extract_strided_slice %241 {offsets = [0, 3, 0], sizes = [2, 1, 256], strides = [1, 1, 1]} : vector<2x4x256xf32> to vector<2x1x256xf32>
    %266 = vector.broadcast %264 : vector<1x4x1xf32> to vector<2x4x256xf32>
    %267 = vector.broadcast %265 : vector<2x1x256xf32> to vector<2x4x256xf32>
    %268 = arith.mulf %266, %267 : vector<2x4x256xf32>
    %269 = arith.addf %262, %268 : vector<2x4x256xf32>
    %c240_i32 = arith.constant 240 : i32
    %270 = tpu.dynamic_rotate %0 by %c240_i32 dim 2 : vector<2x4x256xf32>, i32 -> vector<2x4x256xf32>
    %cst_36 = arith.constant 0.000000e+00 : f32
    %271 = vector.shape_cast %35 : vector<1x1x256xi1> to vector<1x1x256xi1>
    %272 = vector.broadcast %271 : vector<1x1x256xi1> to vector<2x4x256xi1>
    %273 = vector.broadcast %cst_36 : f32 to vector<2x4x256xf32>
    %274 = arith.select %272, %270, %273 : vector<2x4x256xi1>, vector<2x4x256xf32>
    %275 = vector.extract_strided_slice %42 {offsets = [0, 28], sizes = [4, 1], strides = [1, 1]} : vector<4x36xf32> to vector<4x1xf32>
    %276 = vector.shape_cast %275 : vector<4x1xf32> to vector<1x4x1xf32>
    %277 = vector.extract_strided_slice %274 {offsets = [0, 0, 0], sizes = [2, 1, 256], strides = [1, 1, 1]} : vector<2x4x256xf32> to vector<2x1x256xf32>
    %278 = vector.broadcast %276 : vector<1x4x1xf32> to vector<2x4x256xf32>
    %279 = vector.broadcast %277 : vector<2x1x256xf32> to vector<2x4x256xf32>
    %280 = arith.mulf %278, %279 : vector<2x4x256xf32>
    %281 = arith.addf %269, %280 : vector<2x4x256xf32>
    %282 = vector.extract_strided_slice %42 {offsets = [0, 29], sizes = [4, 1], strides = [1, 1]} : vector<4x36xf32> to vector<4x1xf32>
    %283 = vector.shape_cast %282 : vector<4x1xf32> to vector<1x4x1xf32>
    %284 = vector.extract_strided_slice %274 {offsets = [0, 1, 0], sizes = [2, 1, 256], strides = [1, 1, 1]} : vector<2x4x256xf32> to vector<2x1x256xf32>
    %285 = vector.broadcast %283 : vector<1x4x1xf32> to vector<2x4x256xf32>
    %286 = vector.broadcast %284 : vector<2x1x256xf32> to vector<2x4x256xf32>
    %287 = arith.mulf %285, %286 : vector<2x4x256xf32>
    %288 = arith.addf %281, %287 : vector<2x4x256xf32>
    %289 = vector.extract_strided_slice %42 {offsets = [0, 30], sizes = [4, 1], strides = [1, 1]} : vector<4x36xf32> to vector<4x1xf32>
    %290 = vector.shape_cast %289 : vector<4x1xf32> to vector<1x4x1xf32>
    %291 = vector.extract_strided_slice %274 {offsets = [0, 2, 0], sizes = [2, 1, 256], strides = [1, 1, 1]} : vector<2x4x256xf32> to vector<2x1x256xf32>
    %292 = vector.broadcast %290 : vector<1x4x1xf32> to vector<2x4x256xf32>
    %293 = vector.broadcast %291 : vector<2x1x256xf32> to vector<2x4x256xf32>
    %294 = arith.mulf %292, %293 : vector<2x4x256xf32>
    %295 = arith.addf %288, %294 : vector<2x4x256xf32>
    %296 = vector.extract_strided_slice %42 {offsets = [0, 31], sizes = [4, 1], strides = [1, 1]} : vector<4x36xf32> to vector<4x1xf32>
    %297 = vector.shape_cast %296 : vector<4x1xf32> to vector<1x4x1xf32>
    %298 = vector.extract_strided_slice %274 {offsets = [0, 3, 0], sizes = [2, 1, 256], strides = [1, 1, 1]} : vector<2x4x256xf32> to vector<2x1x256xf32>
    %299 = vector.broadcast %297 : vector<1x4x1xf32> to vector<2x4x256xf32>
    %300 = vector.broadcast %298 : vector<2x1x256xf32> to vector<2x4x256xf32>
    %301 = arith.mulf %299, %300 : vector<2x4x256xf32>
    %302 = arith.addf %295, %301 : vector<2x4x256xf32>
    %c239_i32 = arith.constant 239 : i32
    %303 = tpu.dynamic_rotate %0 by %c239_i32 dim 2 : vector<2x4x256xf32>, i32 -> vector<2x4x256xf32>
    %cst_37 = arith.constant 0.000000e+00 : f32
    %304 = vector.shape_cast %40 : vector<1x1x256xi1> to vector<1x1x256xi1>
    %305 = vector.broadcast %304 : vector<1x1x256xi1> to vector<2x4x256xi1>
    %306 = vector.broadcast %cst_37 : f32 to vector<2x4x256xf32>
    %307 = arith.select %305, %303, %306 : vector<2x4x256xi1>, vector<2x4x256xf32>
    %308 = vector.extract_strided_slice %42 {offsets = [0, 32], sizes = [4, 1], strides = [1, 1]} : vector<4x36xf32> to vector<4x1xf32>
    %309 = vector.shape_cast %308 : vector<4x1xf32> to vector<1x4x1xf32>
    %310 = vector.extract_strided_slice %307 {offsets = [0, 0, 0], sizes = [2, 1, 256], strides = [1, 1, 1]} : vector<2x4x256xf32> to vector<2x1x256xf32>
    %311 = vector.broadcast %309 : vector<1x4x1xf32> to vector<2x4x256xf32>
    %312 = vector.broadcast %310 : vector<2x1x256xf32> to vector<2x4x256xf32>
    %313 = arith.mulf %311, %312 : vector<2x4x256xf32>
    %314 = arith.addf %302, %313 : vector<2x4x256xf32>
    %315 = vector.extract_strided_slice %42 {offsets = [0, 33], sizes = [4, 1], strides = [1, 1]} : vector<4x36xf32> to vector<4x1xf32>
    %316 = vector.shape_cast %315 : vector<4x1xf32> to vector<1x4x1xf32>
    %317 = vector.extract_strided_slice %307 {offsets = [0, 1, 0], sizes = [2, 1, 256], strides = [1, 1, 1]} : vector<2x4x256xf32> to vector<2x1x256xf32>
    %318 = vector.broadcast %316 : vector<1x4x1xf32> to vector<2x4x256xf32>
    %319 = vector.broadcast %317 : vector<2x1x256xf32> to vector<2x4x256xf32>
    %320 = arith.mulf %318, %319 : vector<2x4x256xf32>
    %321 = arith.addf %314, %320 : vector<2x4x256xf32>
    %322 = vector.extract_strided_slice %42 {offsets = [0, 34], sizes = [4, 1], strides = [1, 1]} : vector<4x36xf32> to vector<4x1xf32>
    %323 = vector.shape_cast %322 : vector<4x1xf32> to vector<1x4x1xf32>
    %324 = vector.extract_strided_slice %307 {offsets = [0, 2, 0], sizes = [2, 1, 256], strides = [1, 1, 1]} : vector<2x4x256xf32> to vector<2x1x256xf32>
    %325 = vector.broadcast %323 : vector<1x4x1xf32> to vector<2x4x256xf32>
    %326 = vector.broadcast %324 : vector<2x1x256xf32> to vector<2x4x256xf32>
    %327 = arith.mulf %325, %326 : vector<2x4x256xf32>
    %328 = arith.addf %321, %327 : vector<2x4x256xf32>
    %329 = vector.extract_strided_slice %42 {offsets = [0, 35], sizes = [4, 1], strides = [1, 1]} : vector<4x36xf32> to vector<4x1xf32>
    %330 = vector.shape_cast %329 : vector<4x1xf32> to vector<1x4x1xf32>
    %331 = vector.extract_strided_slice %307 {offsets = [0, 3, 0], sizes = [2, 1, 256], strides = [1, 1, 1]} : vector<2x4x256xf32> to vector<2x1x256xf32>
    %332 = vector.broadcast %330 : vector<1x4x1xf32> to vector<2x4x256xf32>
    %333 = vector.broadcast %331 : vector<2x1x256xf32> to vector<2x4x256xf32>
    %334 = arith.mulf %332, %333 : vector<2x4x256xf32>
    %335 = arith.addf %328, %334 : vector<2x4x256xf32>
    %cst_38 = arith.constant 0.000000e+00 : f32
    %336 = vector.broadcast %cst_38 : f32 to vector<2x4x256xf32>
    %337 = arith.maximumf %335, %336 : vector<2x4x256xf32>
    %c1_39 = arith.constant 1 : index
    %c0_40 = arith.constant 0 : index
    %c0_41 = arith.constant 0 : index
    %338 = vector.load %arg2[%c1_39, %c0_40, %c0_41] : memref<5x4x36xf32, #tpu.memory_space<vmem>>, vector<1x4x36xf32>
    %339 = vector.shape_cast %338 : vector<1x4x36xf32> to vector<4x36xf32>
    %cst_42 = arith.constant 0.000000e+00 : f32
    %340 = vector.broadcast %cst_42 : f32 to vector<2x4x256xf32>
    %c17_i32_43 = arith.constant 17 : i32
    %341 = tpu.dynamic_rotate %337 by %c17_i32_43 dim 2 : vector<2x4x256xf32>, i32 -> vector<2x4x256xf32>
    %cst_44 = arith.constant 0.000000e+00 : f32
    %342 = vector.shape_cast %5 : vector<1x1x256xi1> to vector<1x1x256xi1>
    %343 = vector.broadcast %342 : vector<1x1x256xi1> to vector<2x4x256xi1>
    %344 = vector.broadcast %cst_44 : f32 to vector<2x4x256xf32>
    %345 = arith.select %343, %341, %344 : vector<2x4x256xi1>, vector<2x4x256xf32>
    %346 = vector.extract_strided_slice %339 {offsets = [0, 0], sizes = [4, 1], strides = [1, 1]} : vector<4x36xf32> to vector<4x1xf32>
    %347 = vector.shape_cast %346 : vector<4x1xf32> to vector<1x4x1xf32>
    %348 = vector.extract_strided_slice %345 {offsets = [0, 0, 0], sizes = [2, 1, 256], strides = [1, 1, 1]} : vector<2x4x256xf32> to vector<2x1x256xf32>
    %349 = vector.broadcast %347 : vector<1x4x1xf32> to vector<2x4x256xf32>
    %350 = vector.broadcast %348 : vector<2x1x256xf32> to vector<2x4x256xf32>
    %351 = arith.mulf %349, %350 : vector<2x4x256xf32>
    %352 = arith.addf %340, %351 : vector<2x4x256xf32>
    %353 = vector.extract_strided_slice %339 {offsets = [0, 1], sizes = [4, 1], strides = [1, 1]} : vector<4x36xf32> to vector<4x1xf32>
    %354 = vector.shape_cast %353 : vector<4x1xf32> to vector<1x4x1xf32>
    %355 = vector.extract_strided_slice %345 {offsets = [0, 1, 0], sizes = [2, 1, 256], strides = [1, 1, 1]} : vector<2x4x256xf32> to vector<2x1x256xf32>
    %356 = vector.broadcast %354 : vector<1x4x1xf32> to vector<2x4x256xf32>
    %357 = vector.broadcast %355 : vector<2x1x256xf32> to vector<2x4x256xf32>
    %358 = arith.mulf %356, %357 : vector<2x4x256xf32>
    %359 = arith.addf %352, %358 : vector<2x4x256xf32>
    %360 = vector.extract_strided_slice %339 {offsets = [0, 2], sizes = [4, 1], strides = [1, 1]} : vector<4x36xf32> to vector<4x1xf32>
    %361 = vector.shape_cast %360 : vector<4x1xf32> to vector<1x4x1xf32>
    %362 = vector.extract_strided_slice %345 {offsets = [0, 2, 0], sizes = [2, 1, 256], strides = [1, 1, 1]} : vector<2x4x256xf32> to vector<2x1x256xf32>
    %363 = vector.broadcast %361 : vector<1x4x1xf32> to vector<2x4x256xf32>
    %364 = vector.broadcast %362 : vector<2x1x256xf32> to vector<2x4x256xf32>
    %365 = arith.mulf %363, %364 : vector<2x4x256xf32>
    %366 = arith.addf %359, %365 : vector<2x4x256xf32>
    %367 = vector.extract_strided_slice %339 {offsets = [0, 3], sizes = [4, 1], strides = [1, 1]} : vector<4x36xf32> to vector<4x1xf32>
    %368 = vector.shape_cast %367 : vector<4x1xf32> to vector<1x4x1xf32>
    %369 = vector.extract_strided_slice %345 {offsets = [0, 3, 0], sizes = [2, 1, 256], strides = [1, 1, 1]} : vector<2x4x256xf32> to vector<2x1x256xf32>
    %370 = vector.broadcast %368 : vector<1x4x1xf32> to vector<2x4x256xf32>
    %371 = vector.broadcast %369 : vector<2x1x256xf32> to vector<2x4x256xf32>
    %372 = arith.mulf %370, %371 : vector<2x4x256xf32>
    %373 = arith.addf %366, %372 : vector<2x4x256xf32>
    %c16_i32_45 = arith.constant 16 : i32
    %374 = tpu.dynamic_rotate %337 by %c16_i32_45 dim 2 : vector<2x4x256xf32>, i32 -> vector<2x4x256xf32>
    %cst_46 = arith.constant 0.000000e+00 : f32
    %375 = vector.shape_cast %10 : vector<1x1x256xi1> to vector<1x1x256xi1>
    %376 = vector.broadcast %375 : vector<1x1x256xi1> to vector<2x4x256xi1>
    %377 = vector.broadcast %cst_46 : f32 to vector<2x4x256xf32>
    %378 = arith.select %376, %374, %377 : vector<2x4x256xi1>, vector<2x4x256xf32>
    %379 = vector.extract_strided_slice %339 {offsets = [0, 4], sizes = [4, 1], strides = [1, 1]} : vector<4x36xf32> to vector<4x1xf32>
    %380 = vector.shape_cast %379 : vector<4x1xf32> to vector<1x4x1xf32>
    %381 = vector.extract_strided_slice %378 {offsets = [0, 0, 0], sizes = [2, 1, 256], strides = [1, 1, 1]} : vector<2x4x256xf32> to vector<2x1x256xf32>
    %382 = vector.broadcast %380 : vector<1x4x1xf32> to vector<2x4x256xf32>
    %383 = vector.broadcast %381 : vector<2x1x256xf32> to vector<2x4x256xf32>
    %384 = arith.mulf %382, %383 : vector<2x4x256xf32>
    %385 = arith.addf %373, %384 : vector<2x4x256xf32>
    %386 = vector.extract_strided_slice %339 {offsets = [0, 5], sizes = [4, 1], strides = [1, 1]} : vector<4x36xf32> to vector<4x1xf32>
    %387 = vector.shape_cast %386 : vector<4x1xf32> to vector<1x4x1xf32>
    %388 = vector.extract_strided_slice %378 {offsets = [0, 1, 0], sizes = [2, 1, 256], strides = [1, 1, 1]} : vector<2x4x256xf32> to vector<2x1x256xf32>
    %389 = vector.broadcast %387 : vector<1x4x1xf32> to vector<2x4x256xf32>
    %390 = vector.broadcast %388 : vector<2x1x256xf32> to vector<2x4x256xf32>
    %391 = arith.mulf %389, %390 : vector<2x4x256xf32>
    %392 = arith.addf %385, %391 : vector<2x4x256xf32>
    %393 = vector.extract_strided_slice %339 {offsets = [0, 6], sizes = [4, 1], strides = [1, 1]} : vector<4x36xf32> to vector<4x1xf32>
    %394 = vector.shape_cast %393 : vector<4x1xf32> to vector<1x4x1xf32>
    %395 = vector.extract_strided_slice %378 {offsets = [0, 2, 0], sizes = [2, 1, 256], strides = [1, 1, 1]} : vector<2x4x256xf32> to vector<2x1x256xf32>
    %396 = vector.broadcast %394 : vector<1x4x1xf32> to vector<2x4x256xf32>
    %397 = vector.broadcast %395 : vector<2x1x256xf32> to vector<2x4x256xf32>
    %398 = arith.mulf %396, %397 : vector<2x4x256xf32>
    %399 = arith.addf %392, %398 : vector<2x4x256xf32>
    %400 = vector.extract_strided_slice %339 {offsets = [0, 7], sizes = [4, 1], strides = [1, 1]} : vector<4x36xf32> to vector<4x1xf32>
    %401 = vector.shape_cast %400 : vector<4x1xf32> to vector<1x4x1xf32>
    %402 = vector.extract_strided_slice %378 {offsets = [0, 3, 0], sizes = [2, 1, 256], strides = [1, 1, 1]} : vector<2x4x256xf32> to vector<2x1x256xf32>
    %403 = vector.broadcast %401 : vector<1x4x1xf32> to vector<2x4x256xf32>
    %404 = vector.broadcast %402 : vector<2x1x256xf32> to vector<2x4x256xf32>
    %405 = arith.mulf %403, %404 : vector<2x4x256xf32>
    %406 = arith.addf %399, %405 : vector<2x4x256xf32>
    %c15_i32_47 = arith.constant 15 : i32
    %407 = tpu.dynamic_rotate %337 by %c15_i32_47 dim 2 : vector<2x4x256xf32>, i32 -> vector<2x4x256xf32>
    %cst_48 = arith.constant 0.000000e+00 : f32
    %408 = vector.shape_cast %15 : vector<1x1x256xi1> to vector<1x1x256xi1>
    %409 = vector.broadcast %408 : vector<1x1x256xi1> to vector<2x4x256xi1>
    %410 = vector.broadcast %cst_48 : f32 to vector<2x4x256xf32>
    %411 = arith.select %409, %407, %410 : vector<2x4x256xi1>, vector<2x4x256xf32>
    %412 = vector.extract_strided_slice %339 {offsets = [0, 8], sizes = [4, 1], strides = [1, 1]} : vector<4x36xf32> to vector<4x1xf32>
    %413 = vector.shape_cast %412 : vector<4x1xf32> to vector<1x4x1xf32>
    %414 = vector.extract_strided_slice %411 {offsets = [0, 0, 0], sizes = [2, 1, 256], strides = [1, 1, 1]} : vector<2x4x256xf32> to vector<2x1x256xf32>
    %415 = vector.broadcast %413 : vector<1x4x1xf32> to vector<2x4x256xf32>
    %416 = vector.broadcast %414 : vector<2x1x256xf32> to vector<2x4x256xf32>
    %417 = arith.mulf %415, %416 : vector<2x4x256xf32>
    %418 = arith.addf %406, %417 : vector<2x4x256xf32>
    %419 = vector.extract_strided_slice %339 {offsets = [0, 9], sizes = [4, 1], strides = [1, 1]} : vector<4x36xf32> to vector<4x1xf32>
    %420 = vector.shape_cast %419 : vector<4x1xf32> to vector<1x4x1xf32>
    %421 = vector.extract_strided_slice %411 {offsets = [0, 1, 0], sizes = [2, 1, 256], strides = [1, 1, 1]} : vector<2x4x256xf32> to vector<2x1x256xf32>
    %422 = vector.broadcast %420 : vector<1x4x1xf32> to vector<2x4x256xf32>
    %423 = vector.broadcast %421 : vector<2x1x256xf32> to vector<2x4x256xf32>
    %424 = arith.mulf %422, %423 : vector<2x4x256xf32>
    %425 = arith.addf %418, %424 : vector<2x4x256xf32>
    %426 = vector.extract_strided_slice %339 {offsets = [0, 10], sizes = [4, 1], strides = [1, 1]} : vector<4x36xf32> to vector<4x1xf32>
    %427 = vector.shape_cast %426 : vector<4x1xf32> to vector<1x4x1xf32>
    %428 = vector.extract_strided_slice %411 {offsets = [0, 2, 0], sizes = [2, 1, 256], strides = [1, 1, 1]} : vector<2x4x256xf32> to vector<2x1x256xf32>
    %429 = vector.broadcast %427 : vector<1x4x1xf32> to vector<2x4x256xf32>
    %430 = vector.broadcast %428 : vector<2x1x256xf32> to vector<2x4x256xf32>
    %431 = arith.mulf %429, %430 : vector<2x4x256xf32>
    %432 = arith.addf %425, %431 : vector<2x4x256xf32>
    %433 = vector.extract_strided_slice %339 {offsets = [0, 11], sizes = [4, 1], strides = [1, 1]} : vector<4x36xf32> to vector<4x1xf32>
    %434 = vector.shape_cast %433 : vector<4x1xf32> to vector<1x4x1xf32>
    %435 = vector.extract_strided_slice %411 {offsets = [0, 3, 0], sizes = [2, 1, 256], strides = [1, 1, 1]} : vector<2x4x256xf32> to vector<2x1x256xf32>
    %436 = vector.broadcast %434 : vector<1x4x1xf32> to vector<2x4x256xf32>
    %437 = vector.broadcast %435 : vector<2x1x256xf32> to vector<2x4x256xf32>
    %438 = arith.mulf %436, %437 : vector<2x4x256xf32>
    %439 = arith.addf %432, %438 : vector<2x4x256xf32>
    %c1_i32_49 = arith.constant 1 : i32
    %440 = tpu.dynamic_rotate %337 by %c1_i32_49 dim 2 : vector<2x4x256xf32>, i32 -> vector<2x4x256xf32>
    %cst_50 = arith.constant 0.000000e+00 : f32
    %441 = vector.shape_cast %20 : vector<1x1x256xi1> to vector<1x1x256xi1>
    %442 = vector.broadcast %441 : vector<1x1x256xi1> to vector<2x4x256xi1>
    %443 = vector.broadcast %cst_50 : f32 to vector<2x4x256xf32>
    %444 = arith.select %442, %440, %443 : vector<2x4x256xi1>, vector<2x4x256xf32>
    %445 = vector.extract_strided_slice %339 {offsets = [0, 12], sizes = [4, 1], strides = [1, 1]} : vector<4x36xf32> to vector<4x1xf32>
    %446 = vector.shape_cast %445 : vector<4x1xf32> to vector<1x4x1xf32>
    %447 = vector.extract_strided_slice %444 {offsets = [0, 0, 0], sizes = [2, 1, 256], strides = [1, 1, 1]} : vector<2x4x256xf32> to vector<2x1x256xf32>
    %448 = vector.broadcast %446 : vector<1x4x1xf32> to vector<2x4x256xf32>
    %449 = vector.broadcast %447 : vector<2x1x256xf32> to vector<2x4x256xf32>
    %450 = arith.mulf %448, %449 : vector<2x4x256xf32>
    %451 = arith.addf %439, %450 : vector<2x4x256xf32>
    %452 = vector.extract_strided_slice %339 {offsets = [0, 13], sizes = [4, 1], strides = [1, 1]} : vector<4x36xf32> to vector<4x1xf32>
    %453 = vector.shape_cast %452 : vector<4x1xf32> to vector<1x4x1xf32>
    %454 = vector.extract_strided_slice %444 {offsets = [0, 1, 0], sizes = [2, 1, 256], strides = [1, 1, 1]} : vector<2x4x256xf32> to vector<2x1x256xf32>
    %455 = vector.broadcast %453 : vector<1x4x1xf32> to vector<2x4x256xf32>
    %456 = vector.broadcast %454 : vector<2x1x256xf32> to vector<2x4x256xf32>
    %457 = arith.mulf %455, %456 : vector<2x4x256xf32>
    %458 = arith.addf %451, %457 : vector<2x4x256xf32>
    %459 = vector.extract_strided_slice %339 {offsets = [0, 14], sizes = [4, 1], strides = [1, 1]} : vector<4x36xf32> to vector<4x1xf32>
    %460 = vector.shape_cast %459 : vector<4x1xf32> to vector<1x4x1xf32>
    %461 = vector.extract_strided_slice %444 {offsets = [0, 2, 0], sizes = [2, 1, 256], strides = [1, 1, 1]} : vector<2x4x256xf32> to vector<2x1x256xf32>
    %462 = vector.broadcast %460 : vector<1x4x1xf32> to vector<2x4x256xf32>
    %463 = vector.broadcast %461 : vector<2x1x256xf32> to vector<2x4x256xf32>
    %464 = arith.mulf %462, %463 : vector<2x4x256xf32>
    %465 = arith.addf %458, %464 : vector<2x4x256xf32>
    %466 = vector.extract_strided_slice %339 {offsets = [0, 15], sizes = [4, 1], strides = [1, 1]} : vector<4x36xf32> to vector<4x1xf32>
    %467 = vector.shape_cast %466 : vector<4x1xf32> to vector<1x4x1xf32>
    %468 = vector.extract_strided_slice %444 {offsets = [0, 3, 0], sizes = [2, 1, 256], strides = [1, 1, 1]} : vector<2x4x256xf32> to vector<2x1x256xf32>
    %469 = vector.broadcast %467 : vector<1x4x1xf32> to vector<2x4x256xf32>
    %470 = vector.broadcast %468 : vector<2x1x256xf32> to vector<2x4x256xf32>
    %471 = arith.mulf %469, %470 : vector<2x4x256xf32>
    %472 = arith.addf %465, %471 : vector<2x4x256xf32>
    %473 = vector.extract_strided_slice %339 {offsets = [0, 16], sizes = [4, 1], strides = [1, 1]} : vector<4x36xf32> to vector<4x1xf32>
    %474 = vector.shape_cast %473 : vector<4x1xf32> to vector<1x4x1xf32>
    %475 = vector.extract_strided_slice %337 {offsets = [0, 0, 0], sizes = [2, 1, 256], strides = [1, 1, 1]} : vector<2x4x256xf32> to vector<2x1x256xf32>
    %476 = vector.broadcast %474 : vector<1x4x1xf32> to vector<2x4x256xf32>
    %477 = vector.broadcast %475 : vector<2x1x256xf32> to vector<2x4x256xf32>
    %478 = arith.mulf %476, %477 : vector<2x4x256xf32>
    %479 = arith.addf %472, %478 : vector<2x4x256xf32>
    %480 = vector.extract_strided_slice %339 {offsets = [0, 17], sizes = [4, 1], strides = [1, 1]} : vector<4x36xf32> to vector<4x1xf32>
    %481 = vector.shape_cast %480 : vector<4x1xf32> to vector<1x4x1xf32>
    %482 = vector.extract_strided_slice %337 {offsets = [0, 1, 0], sizes = [2, 1, 256], strides = [1, 1, 1]} : vector<2x4x256xf32> to vector<2x1x256xf32>
    %483 = vector.broadcast %481 : vector<1x4x1xf32> to vector<2x4x256xf32>
    %484 = vector.broadcast %482 : vector<2x1x256xf32> to vector<2x4x256xf32>
    %485 = arith.mulf %483, %484 : vector<2x4x256xf32>
    %486 = arith.addf %479, %485 : vector<2x4x256xf32>
    %487 = vector.extract_strided_slice %339 {offsets = [0, 18], sizes = [4, 1], strides = [1, 1]} : vector<4x36xf32> to vector<4x1xf32>
    %488 = vector.shape_cast %487 : vector<4x1xf32> to vector<1x4x1xf32>
    %489 = vector.extract_strided_slice %337 {offsets = [0, 2, 0], sizes = [2, 1, 256], strides = [1, 1, 1]} : vector<2x4x256xf32> to vector<2x1x256xf32>
    %490 = vector.broadcast %488 : vector<1x4x1xf32> to vector<2x4x256xf32>
    %491 = vector.broadcast %489 : vector<2x1x256xf32> to vector<2x4x256xf32>
    %492 = arith.mulf %490, %491 : vector<2x4x256xf32>
    %493 = arith.addf %486, %492 : vector<2x4x256xf32>
    %494 = vector.extract_strided_slice %339 {offsets = [0, 19], sizes = [4, 1], strides = [1, 1]} : vector<4x36xf32> to vector<4x1xf32>
    %495 = vector.shape_cast %494 : vector<4x1xf32> to vector<1x4x1xf32>
    %496 = vector.extract_strided_slice %337 {offsets = [0, 3, 0], sizes = [2, 1, 256], strides = [1, 1, 1]} : vector<2x4x256xf32> to vector<2x1x256xf32>
    %497 = vector.broadcast %495 : vector<1x4x1xf32> to vector<2x4x256xf32>
    %498 = vector.broadcast %496 : vector<2x1x256xf32> to vector<2x4x256xf32>
    %499 = arith.mulf %497, %498 : vector<2x4x256xf32>
    %500 = arith.addf %493, %499 : vector<2x4x256xf32>
    %c255_i32_51 = arith.constant 255 : i32
    %501 = tpu.dynamic_rotate %337 by %c255_i32_51 dim 2 : vector<2x4x256xf32>, i32 -> vector<2x4x256xf32>
    %cst_52 = arith.constant 0.000000e+00 : f32
    %502 = vector.shape_cast %25 : vector<1x1x256xi1> to vector<1x1x256xi1>
    %503 = vector.broadcast %502 : vector<1x1x256xi1> to vector<2x4x256xi1>
    %504 = vector.broadcast %cst_52 : f32 to vector<2x4x256xf32>
    %505 = arith.select %503, %501, %504 : vector<2x4x256xi1>, vector<2x4x256xf32>
    %506 = vector.extract_strided_slice %339 {offsets = [0, 20], sizes = [4, 1], strides = [1, 1]} : vector<4x36xf32> to vector<4x1xf32>
    %507 = vector.shape_cast %506 : vector<4x1xf32> to vector<1x4x1xf32>
    %508 = vector.extract_strided_slice %505 {offsets = [0, 0, 0], sizes = [2, 1, 256], strides = [1, 1, 1]} : vector<2x4x256xf32> to vector<2x1x256xf32>
    %509 = vector.broadcast %507 : vector<1x4x1xf32> to vector<2x4x256xf32>
    %510 = vector.broadcast %508 : vector<2x1x256xf32> to vector<2x4x256xf32>
    %511 = arith.mulf %509, %510 : vector<2x4x256xf32>
    %512 = arith.addf %500, %511 : vector<2x4x256xf32>
    %513 = vector.extract_strided_slice %339 {offsets = [0, 21], sizes = [4, 1], strides = [1, 1]} : vector<4x36xf32> to vector<4x1xf32>
    %514 = vector.shape_cast %513 : vector<4x1xf32> to vector<1x4x1xf32>
    %515 = vector.extract_strided_slice %505 {offsets = [0, 1, 0], sizes = [2, 1, 256], strides = [1, 1, 1]} : vector<2x4x256xf32> to vector<2x1x256xf32>
    %516 = vector.broadcast %514 : vector<1x4x1xf32> to vector<2x4x256xf32>
    %517 = vector.broadcast %515 : vector<2x1x256xf32> to vector<2x4x256xf32>
    %518 = arith.mulf %516, %517 : vector<2x4x256xf32>
    %519 = arith.addf %512, %518 : vector<2x4x256xf32>
    %520 = vector.extract_strided_slice %339 {offsets = [0, 22], sizes = [4, 1], strides = [1, 1]} : vector<4x36xf32> to vector<4x1xf32>
    %521 = vector.shape_cast %520 : vector<4x1xf32> to vector<1x4x1xf32>
    %522 = vector.extract_strided_slice %505 {offsets = [0, 2, 0], sizes = [2, 1, 256], strides = [1, 1, 1]} : vector<2x4x256xf32> to vector<2x1x256xf32>
    %523 = vector.broadcast %521 : vector<1x4x1xf32> to vector<2x4x256xf32>
    %524 = vector.broadcast %522 : vector<2x1x256xf32> to vector<2x4x256xf32>
    %525 = arith.mulf %523, %524 : vector<2x4x256xf32>
    %526 = arith.addf %519, %525 : vector<2x4x256xf32>
    %527 = vector.extract_strided_slice %339 {offsets = [0, 23], sizes = [4, 1], strides = [1, 1]} : vector<4x36xf32> to vector<4x1xf32>
    %528 = vector.shape_cast %527 : vector<4x1xf32> to vector<1x4x1xf32>
    %529 = vector.extract_strided_slice %505 {offsets = [0, 3, 0], sizes = [2, 1, 256], strides = [1, 1, 1]} : vector<2x4x256xf32> to vector<2x1x256xf32>
    %530 = vector.broadcast %528 : vector<1x4x1xf32> to vector<2x4x256xf32>
    %531 = vector.broadcast %529 : vector<2x1x256xf32> to vector<2x4x256xf32>
    %532 = arith.mulf %530, %531 : vector<2x4x256xf32>
    %533 = arith.addf %526, %532 : vector<2x4x256xf32>
    %c241_i32_53 = arith.constant 241 : i32
    %534 = tpu.dynamic_rotate %337 by %c241_i32_53 dim 2 : vector<2x4x256xf32>, i32 -> vector<2x4x256xf32>
    %cst_54 = arith.constant 0.000000e+00 : f32
    %535 = vector.shape_cast %30 : vector<1x1x256xi1> to vector<1x1x256xi1>
    %536 = vector.broadcast %535 : vector<1x1x256xi1> to vector<2x4x256xi1>
    %537 = vector.broadcast %cst_54 : f32 to vector<2x4x256xf32>
    %538 = arith.select %536, %534, %537 : vector<2x4x256xi1>, vector<2x4x256xf32>
    %539 = vector.extract_strided_slice %339 {offsets = [0, 24], sizes = [4, 1], strides = [1, 1]} : vector<4x36xf32> to vector<4x1xf32>
    %540 = vector.shape_cast %539 : vector<4x1xf32> to vector<1x4x1xf32>
    %541 = vector.extract_strided_slice %538 {offsets = [0, 0, 0], sizes = [2, 1, 256], strides = [1, 1, 1]} : vector<2x4x256xf32> to vector<2x1x256xf32>
    %542 = vector.broadcast %540 : vector<1x4x1xf32> to vector<2x4x256xf32>
    %543 = vector.broadcast %541 : vector<2x1x256xf32> to vector<2x4x256xf32>
    %544 = arith.mulf %542, %543 : vector<2x4x256xf32>
    %545 = arith.addf %533, %544 : vector<2x4x256xf32>
    %546 = vector.extract_strided_slice %339 {offsets = [0, 25], sizes = [4, 1], strides = [1, 1]} : vector<4x36xf32> to vector<4x1xf32>
    %547 = vector.shape_cast %546 : vector<4x1xf32> to vector<1x4x1xf32>
    %548 = vector.extract_strided_slice %538 {offsets = [0, 1, 0], sizes = [2, 1, 256], strides = [1, 1, 1]} : vector<2x4x256xf32> to vector<2x1x256xf32>
    %549 = vector.broadcast %547 : vector<1x4x1xf32> to vector<2x4x256xf32>
    %550 = vector.broadcast %548 : vector<2x1x256xf32> to vector<2x4x256xf32>
    %551 = arith.mulf %549, %550 : vector<2x4x256xf32>
    %552 = arith.addf %545, %551 : vector<2x4x256xf32>
    %553 = vector.extract_strided_slice %339 {offsets = [0, 26], sizes = [4, 1], strides = [1, 1]} : vector<4x36xf32> to vector<4x1xf32>
    %554 = vector.shape_cast %553 : vector<4x1xf32> to vector<1x4x1xf32>
    %555 = vector.extract_strided_slice %538 {offsets = [0, 2, 0], sizes = [2, 1, 256], strides = [1, 1, 1]} : vector<2x4x256xf32> to vector<2x1x256xf32>
    %556 = vector.broadcast %554 : vector<1x4x1xf32> to vector<2x4x256xf32>
    %557 = vector.broadcast %555 : vector<2x1x256xf32> to vector<2x4x256xf32>
    %558 = arith.mulf %556, %557 : vector<2x4x256xf32>
    %559 = arith.addf %552, %558 : vector<2x4x256xf32>
    %560 = vector.extract_strided_slice %339 {offsets = [0, 27], sizes = [4, 1], strides = [1, 1]} : vector<4x36xf32> to vector<4x1xf32>
    %561 = vector.shape_cast %560 : vector<4x1xf32> to vector<1x4x1xf32>
    %562 = vector.extract_strided_slice %538 {offsets = [0, 3, 0], sizes = [2, 1, 256], strides = [1, 1, 1]} : vector<2x4x256xf32> to vector<2x1x256xf32>
    %563 = vector.broadcast %561 : vector<1x4x1xf32> to vector<2x4x256xf32>
    %564 = vector.broadcast %562 : vector<2x1x256xf32> to vector<2x4x256xf32>
    %565 = arith.mulf %563, %564 : vector<2x4x256xf32>
    %566 = arith.addf %559, %565 : vector<2x4x256xf32>
    %c240_i32_55 = arith.constant 240 : i32
    %567 = tpu.dynamic_rotate %337 by %c240_i32_55 dim 2 : vector<2x4x256xf32>, i32 -> vector<2x4x256xf32>
    %cst_56 = arith.constant 0.000000e+00 : f32
    %568 = vector.shape_cast %35 : vector<1x1x256xi1> to vector<1x1x256xi1>
    %569 = vector.broadcast %568 : vector<1x1x256xi1> to vector<2x4x256xi1>
    %570 = vector.broadcast %cst_56 : f32 to vector<2x4x256xf32>
    %571 = arith.select %569, %567, %570 : vector<2x4x256xi1>, vector<2x4x256xf32>
    %572 = vector.extract_strided_slice %339 {offsets = [0, 28], sizes = [4, 1], strides = [1, 1]} : vector<4x36xf32> to vector<4x1xf32>
    %573 = vector.shape_cast %572 : vector<4x1xf32> to vector<1x4x1xf32>
    %574 = vector.extract_strided_slice %571 {offsets = [0, 0, 0], sizes = [2, 1, 256], strides = [1, 1, 1]} : vector<2x4x256xf32> to vector<2x1x256xf32>
    %575 = vector.broadcast %573 : vector<1x4x1xf32> to vector<2x4x256xf32>
    %576 = vector.broadcast %574 : vector<2x1x256xf32> to vector<2x4x256xf32>
    %577 = arith.mulf %575, %576 : vector<2x4x256xf32>
    %578 = arith.addf %566, %577 : vector<2x4x256xf32>
    %579 = vector.extract_strided_slice %339 {offsets = [0, 29], sizes = [4, 1], strides = [1, 1]} : vector<4x36xf32> to vector<4x1xf32>
    %580 = vector.shape_cast %579 : vector<4x1xf32> to vector<1x4x1xf32>
    %581 = vector.extract_strided_slice %571 {offsets = [0, 1, 0], sizes = [2, 1, 256], strides = [1, 1, 1]} : vector<2x4x256xf32> to vector<2x1x256xf32>
    %582 = vector.broadcast %580 : vector<1x4x1xf32> to vector<2x4x256xf32>
    %583 = vector.broadcast %581 : vector<2x1x256xf32> to vector<2x4x256xf32>
    %584 = arith.mulf %582, %583 : vector<2x4x256xf32>
    %585 = arith.addf %578, %584 : vector<2x4x256xf32>
    %586 = vector.extract_strided_slice %339 {offsets = [0, 30], sizes = [4, 1], strides = [1, 1]} : vector<4x36xf32> to vector<4x1xf32>
    %587 = vector.shape_cast %586 : vector<4x1xf32> to vector<1x4x1xf32>
    %588 = vector.extract_strided_slice %571 {offsets = [0, 2, 0], sizes = [2, 1, 256], strides = [1, 1, 1]} : vector<2x4x256xf32> to vector<2x1x256xf32>
    %589 = vector.broadcast %587 : vector<1x4x1xf32> to vector<2x4x256xf32>
    %590 = vector.broadcast %588 : vector<2x1x256xf32> to vector<2x4x256xf32>
    %591 = arith.mulf %589, %590 : vector<2x4x256xf32>
    %592 = arith.addf %585, %591 : vector<2x4x256xf32>
    %593 = vector.extract_strided_slice %339 {offsets = [0, 31], sizes = [4, 1], strides = [1, 1]} : vector<4x36xf32> to vector<4x1xf32>
    %594 = vector.shape_cast %593 : vector<4x1xf32> to vector<1x4x1xf32>
    %595 = vector.extract_strided_slice %571 {offsets = [0, 3, 0], sizes = [2, 1, 256], strides = [1, 1, 1]} : vector<2x4x256xf32> to vector<2x1x256xf32>
    %596 = vector.broadcast %594 : vector<1x4x1xf32> to vector<2x4x256xf32>
    %597 = vector.broadcast %595 : vector<2x1x256xf32> to vector<2x4x256xf32>
    %598 = arith.mulf %596, %597 : vector<2x4x256xf32>
    %599 = arith.addf %592, %598 : vector<2x4x256xf32>
    %c239_i32_57 = arith.constant 239 : i32
    %600 = tpu.dynamic_rotate %337 by %c239_i32_57 dim 2 : vector<2x4x256xf32>, i32 -> vector<2x4x256xf32>
    %cst_58 = arith.constant 0.000000e+00 : f32
    %601 = vector.shape_cast %40 : vector<1x1x256xi1> to vector<1x1x256xi1>
    %602 = vector.broadcast %601 : vector<1x1x256xi1> to vector<2x4x256xi1>
    %603 = vector.broadcast %cst_58 : f32 to vector<2x4x256xf32>
    %604 = arith.select %602, %600, %603 : vector<2x4x256xi1>, vector<2x4x256xf32>
    %605 = vector.extract_strided_slice %339 {offsets = [0, 32], sizes = [4, 1], strides = [1, 1]} : vector<4x36xf32> to vector<4x1xf32>
    %606 = vector.shape_cast %605 : vector<4x1xf32> to vector<1x4x1xf32>
    %607 = vector.extract_strided_slice %604 {offsets = [0, 0, 0], sizes = [2, 1, 256], strides = [1, 1, 1]} : vector<2x4x256xf32> to vector<2x1x256xf32>
    %608 = vector.broadcast %606 : vector<1x4x1xf32> to vector<2x4x256xf32>
    %609 = vector.broadcast %607 : vector<2x1x256xf32> to vector<2x4x256xf32>
    %610 = arith.mulf %608, %609 : vector<2x4x256xf32>
    %611 = arith.addf %599, %610 : vector<2x4x256xf32>
    %612 = vector.extract_strided_slice %339 {offsets = [0, 33], sizes = [4, 1], strides = [1, 1]} : vector<4x36xf32> to vector<4x1xf32>
    %613 = vector.shape_cast %612 : vector<4x1xf32> to vector<1x4x1xf32>
    %614 = vector.extract_strided_slice %604 {offsets = [0, 1, 0], sizes = [2, 1, 256], strides = [1, 1, 1]} : vector<2x4x256xf32> to vector<2x1x256xf32>
    %615 = vector.broadcast %613 : vector<1x4x1xf32> to vector<2x4x256xf32>
    %616 = vector.broadcast %614 : vector<2x1x256xf32> to vector<2x4x256xf32>
    %617 = arith.mulf %615, %616 : vector<2x4x256xf32>
    %618 = arith.addf %611, %617 : vector<2x4x256xf32>
    %619 = vector.extract_strided_slice %339 {offsets = [0, 34], sizes = [4, 1], strides = [1, 1]} : vector<4x36xf32> to vector<4x1xf32>
    %620 = vector.shape_cast %619 : vector<4x1xf32> to vector<1x4x1xf32>
    %621 = vector.extract_strided_slice %604 {offsets = [0, 2, 0], sizes = [2, 1, 256], strides = [1, 1, 1]} : vector<2x4x256xf32> to vector<2x1x256xf32>
    %622 = vector.broadcast %620 : vector<1x4x1xf32> to vector<2x4x256xf32>
    %623 = vector.broadcast %621 : vector<2x1x256xf32> to vector<2x4x256xf32>
    %624 = arith.mulf %622, %623 : vector<2x4x256xf32>
    %625 = arith.addf %618, %624 : vector<2x4x256xf32>
    %626 = vector.extract_strided_slice %339 {offsets = [0, 35], sizes = [4, 1], strides = [1, 1]} : vector<4x36xf32> to vector<4x1xf32>
    %627 = vector.shape_cast %626 : vector<4x1xf32> to vector<1x4x1xf32>
    %628 = vector.extract_strided_slice %604 {offsets = [0, 3, 0], sizes = [2, 1, 256], strides = [1, 1, 1]} : vector<2x4x256xf32> to vector<2x1x256xf32>
    %629 = vector.broadcast %627 : vector<1x4x1xf32> to vector<2x4x256xf32>
    %630 = vector.broadcast %628 : vector<2x1x256xf32> to vector<2x4x256xf32>
    %631 = arith.mulf %629, %630 : vector<2x4x256xf32>
    %632 = arith.addf %625, %631 : vector<2x4x256xf32>
    %cst_59 = arith.constant 0.000000e+00 : f32
    %633 = vector.broadcast %cst_59 : f32 to vector<2x4x256xf32>
    %634 = arith.maximumf %632, %633 : vector<2x4x256xf32>
    %cst_60 = arith.constant dense<0.000000e+00> : vector<2x4xf32>
    %635 = vector.multi_reduction <add>, %634, %cst_60 [2] : vector<2x4x256xf32> to vector<2x4xf32>
    %636 = vector.shape_cast %635 : vector<2x4xf32> to vector<2x4x1xf32>
    %cst_61 = arith.constant 2.560000e+02 : f32
    %637 = vector.broadcast %cst_61 : f32 to vector<2x4x1xf32>
    %638 = arith.divf %636, %637 : vector<2x4x1xf32>
    %c0_62 = arith.constant 0 : index
    %c0_63 = arith.constant 0 : index
    %c0_64 = arith.constant 0 : index
    %639 = vector.load %arg3[%c0_62, %c0_63, %c0_64] : memref<2x4x4xf32, #tpu.memory_space<vmem>>, vector<1x4x4xf32>
    %640 = vector.shape_cast %639 : vector<1x4x4xf32> to vector<4x4xf32>
    %641 = vector.shape_cast %640 : vector<4x4xf32> to vector<1x4x4xf32>
    %642 = vector.broadcast %641 : vector<1x4x4xf32> to vector<2x4x4xf32>
    %643 = vector.broadcast %638 : vector<2x4x1xf32> to vector<2x4x4xf32>
    %644 = arith.mulf %642, %643 : vector<2x4x4xf32>
    %cst_65 = arith.constant dense<0.000000e+00> : vector<2x4xf32>
    %645 = vector.multi_reduction <add>, %644, %cst_65 [1] : vector<2x4x4xf32> to vector<2x4xf32>
    %646 = vector.shape_cast %645 : vector<2x4xf32> to vector<2x1x4xf32>
    %cst_66 = arith.constant 0.000000e+00 : f32
    %647 = vector.broadcast %cst_66 : f32 to vector<2x1x4xf32>
    %648 = arith.maximumf %646, %647 : vector<2x1x4xf32>
    %c0_67 = arith.constant 0 : index
    %c0_68 = arith.constant 0 : index
    %c0_69 = arith.constant 0 : index
    %649 = vector.load %arg4[%c0_67, %c0_68, %c0_69] : memref<2x4x4xf32, #tpu.memory_space<vmem>>, vector<1x4x4xf32>
    %650 = vector.shape_cast %649 : vector<1x4x4xf32> to vector<4x4xf32>
    %651 = vector.shape_cast %650 : vector<4x4xf32> to vector<1x4x4xf32>
    %652 = vector.broadcast %651 : vector<1x4x4xf32> to vector<2x4x4xf32>
    %653 = vector.broadcast %648 : vector<2x1x4xf32> to vector<2x4x4xf32>
    %654 = arith.mulf %652, %653 : vector<2x4x4xf32>
    %cst_70 = arith.constant dense<0.000000e+00> : vector<2x4xf32>
    %655 = vector.multi_reduction <add>, %654, %cst_70 [2] : vector<2x4x4xf32> to vector<2x4xf32>
    %656 = vector.shape_cast %655 : vector<2x4xf32> to vector<2x4x1xf32>
    %657 = arith.negf %656 : vector<2x4x1xf32>
    %658 = math.exp %657 : vector<2x4x1xf32>
    %cst_71 = arith.constant 1.000000e+00 : f32
    %659 = vector.broadcast %cst_71 : f32 to vector<2x4x1xf32>
    %660 = arith.addf %659, %658 : vector<2x4x1xf32>
    %661 = arith.divf %659, %660 : vector<2x4x1xf32>
    %662 = vector.broadcast %661 : vector<2x4x1xf32> to vector<2x4x256xf32>
    %663 = arith.mulf %634, %662 : vector<2x4x256xf32>
    %664 = arith.addf %663, %0 : vector<2x4x256xf32>
    %c2_72 = arith.constant 2 : index
    %c0_73 = arith.constant 0 : index
    %c0_74 = arith.constant 0 : index
    %665 = vector.load %arg2[%c2_72, %c0_73, %c0_74] : memref<5x4x36xf32, #tpu.memory_space<vmem>>, vector<1x4x36xf32>
    %666 = vector.shape_cast %665 : vector<1x4x36xf32> to vector<4x36xf32>
    %cst_75 = arith.constant 0.000000e+00 : f32
    %667 = vector.broadcast %cst_75 : f32 to vector<2x4x256xf32>
    %c17_i32_76 = arith.constant 17 : i32
    %668 = tpu.dynamic_rotate %664 by %c17_i32_76 dim 2 : vector<2x4x256xf32>, i32 -> vector<2x4x256xf32>
    %cst_77 = arith.constant 0.000000e+00 : f32
    %669 = vector.shape_cast %5 : vector<1x1x256xi1> to vector<1x1x256xi1>
    %670 = vector.broadcast %669 : vector<1x1x256xi1> to vector<2x4x256xi1>
    %671 = vector.broadcast %cst_77 : f32 to vector<2x4x256xf32>
    %672 = arith.select %670, %668, %671 : vector<2x4x256xi1>, vector<2x4x256xf32>
    %673 = vector.extract_strided_slice %666 {offsets = [0, 0], sizes = [4, 1], strides = [1, 1]} : vector<4x36xf32> to vector<4x1xf32>
    %674 = vector.shape_cast %673 : vector<4x1xf32> to vector<1x4x1xf32>
    %675 = vector.extract_strided_slice %672 {offsets = [0, 0, 0], sizes = [2, 1, 256], strides = [1, 1, 1]} : vector<2x4x256xf32> to vector<2x1x256xf32>
    %676 = vector.broadcast %674 : vector<1x4x1xf32> to vector<2x4x256xf32>
    %677 = vector.broadcast %675 : vector<2x1x256xf32> to vector<2x4x256xf32>
    %678 = arith.mulf %676, %677 : vector<2x4x256xf32>
    %679 = arith.addf %667, %678 : vector<2x4x256xf32>
    %680 = vector.extract_strided_slice %666 {offsets = [0, 1], sizes = [4, 1], strides = [1, 1]} : vector<4x36xf32> to vector<4x1xf32>
    %681 = vector.shape_cast %680 : vector<4x1xf32> to vector<1x4x1xf32>
    %682 = vector.extract_strided_slice %672 {offsets = [0, 1, 0], sizes = [2, 1, 256], strides = [1, 1, 1]} : vector<2x4x256xf32> to vector<2x1x256xf32>
    %683 = vector.broadcast %681 : vector<1x4x1xf32> to vector<2x4x256xf32>
    %684 = vector.broadcast %682 : vector<2x1x256xf32> to vector<2x4x256xf32>
    %685 = arith.mulf %683, %684 : vector<2x4x256xf32>
    %686 = arith.addf %679, %685 : vector<2x4x256xf32>
    %687 = vector.extract_strided_slice %666 {offsets = [0, 2], sizes = [4, 1], strides = [1, 1]} : vector<4x36xf32> to vector<4x1xf32>
    %688 = vector.shape_cast %687 : vector<4x1xf32> to vector<1x4x1xf32>
    %689 = vector.extract_strided_slice %672 {offsets = [0, 2, 0], sizes = [2, 1, 256], strides = [1, 1, 1]} : vector<2x4x256xf32> to vector<2x1x256xf32>
    %690 = vector.broadcast %688 : vector<1x4x1xf32> to vector<2x4x256xf32>
    %691 = vector.broadcast %689 : vector<2x1x256xf32> to vector<2x4x256xf32>
    %692 = arith.mulf %690, %691 : vector<2x4x256xf32>
    %693 = arith.addf %686, %692 : vector<2x4x256xf32>
    %694 = vector.extract_strided_slice %666 {offsets = [0, 3], sizes = [4, 1], strides = [1, 1]} : vector<4x36xf32> to vector<4x1xf32>
    %695 = vector.shape_cast %694 : vector<4x1xf32> to vector<1x4x1xf32>
    %696 = vector.extract_strided_slice %672 {offsets = [0, 3, 0], sizes = [2, 1, 256], strides = [1, 1, 1]} : vector<2x4x256xf32> to vector<2x1x256xf32>
    %697 = vector.broadcast %695 : vector<1x4x1xf32> to vector<2x4x256xf32>
    %698 = vector.broadcast %696 : vector<2x1x256xf32> to vector<2x4x256xf32>
    %699 = arith.mulf %697, %698 : vector<2x4x256xf32>
    %700 = arith.addf %693, %699 : vector<2x4x256xf32>
    %c16_i32_78 = arith.constant 16 : i32
    %701 = tpu.dynamic_rotate %664 by %c16_i32_78 dim 2 : vector<2x4x256xf32>, i32 -> vector<2x4x256xf32>
    %cst_79 = arith.constant 0.000000e+00 : f32
    %702 = vector.shape_cast %10 : vector<1x1x256xi1> to vector<1x1x256xi1>
    %703 = vector.broadcast %702 : vector<1x1x256xi1> to vector<2x4x256xi1>
    %704 = vector.broadcast %cst_79 : f32 to vector<2x4x256xf32>
    %705 = arith.select %703, %701, %704 : vector<2x4x256xi1>, vector<2x4x256xf32>
    %706 = vector.extract_strided_slice %666 {offsets = [0, 4], sizes = [4, 1], strides = [1, 1]} : vector<4x36xf32> to vector<4x1xf32>
    %707 = vector.shape_cast %706 : vector<4x1xf32> to vector<1x4x1xf32>
    %708 = vector.extract_strided_slice %705 {offsets = [0, 0, 0], sizes = [2, 1, 256], strides = [1, 1, 1]} : vector<2x4x256xf32> to vector<2x1x256xf32>
    %709 = vector.broadcast %707 : vector<1x4x1xf32> to vector<2x4x256xf32>
    %710 = vector.broadcast %708 : vector<2x1x256xf32> to vector<2x4x256xf32>
    %711 = arith.mulf %709, %710 : vector<2x4x256xf32>
    %712 = arith.addf %700, %711 : vector<2x4x256xf32>
    %713 = vector.extract_strided_slice %666 {offsets = [0, 5], sizes = [4, 1], strides = [1, 1]} : vector<4x36xf32> to vector<4x1xf32>
    %714 = vector.shape_cast %713 : vector<4x1xf32> to vector<1x4x1xf32>
    %715 = vector.extract_strided_slice %705 {offsets = [0, 1, 0], sizes = [2, 1, 256], strides = [1, 1, 1]} : vector<2x4x256xf32> to vector<2x1x256xf32>
    %716 = vector.broadcast %714 : vector<1x4x1xf32> to vector<2x4x256xf32>
    %717 = vector.broadcast %715 : vector<2x1x256xf32> to vector<2x4x256xf32>
    %718 = arith.mulf %716, %717 : vector<2x4x256xf32>
    %719 = arith.addf %712, %718 : vector<2x4x256xf32>
    %720 = vector.extract_strided_slice %666 {offsets = [0, 6], sizes = [4, 1], strides = [1, 1]} : vector<4x36xf32> to vector<4x1xf32>
    %721 = vector.shape_cast %720 : vector<4x1xf32> to vector<1x4x1xf32>
    %722 = vector.extract_strided_slice %705 {offsets = [0, 2, 0], sizes = [2, 1, 256], strides = [1, 1, 1]} : vector<2x4x256xf32> to vector<2x1x256xf32>
    %723 = vector.broadcast %721 : vector<1x4x1xf32> to vector<2x4x256xf32>
    %724 = vector.broadcast %722 : vector<2x1x256xf32> to vector<2x4x256xf32>
    %725 = arith.mulf %723, %724 : vector<2x4x256xf32>
    %726 = arith.addf %719, %725 : vector<2x4x256xf32>
    %727 = vector.extract_strided_slice %666 {offsets = [0, 7], sizes = [4, 1], strides = [1, 1]} : vector<4x36xf32> to vector<4x1xf32>
    %728 = vector.shape_cast %727 : vector<4x1xf32> to vector<1x4x1xf32>
    %729 = vector.extract_strided_slice %705 {offsets = [0, 3, 0], sizes = [2, 1, 256], strides = [1, 1, 1]} : vector<2x4x256xf32> to vector<2x1x256xf32>
    %730 = vector.broadcast %728 : vector<1x4x1xf32> to vector<2x4x256xf32>
    %731 = vector.broadcast %729 : vector<2x1x256xf32> to vector<2x4x256xf32>
    %732 = arith.mulf %730, %731 : vector<2x4x256xf32>
    %733 = arith.addf %726, %732 : vector<2x4x256xf32>
    %c15_i32_80 = arith.constant 15 : i32
    %734 = tpu.dynamic_rotate %664 by %c15_i32_80 dim 2 : vector<2x4x256xf32>, i32 -> vector<2x4x256xf32>
    %cst_81 = arith.constant 0.000000e+00 : f32
    %735 = vector.shape_cast %15 : vector<1x1x256xi1> to vector<1x1x256xi1>
    %736 = vector.broadcast %735 : vector<1x1x256xi1> to vector<2x4x256xi1>
    %737 = vector.broadcast %cst_81 : f32 to vector<2x4x256xf32>
    %738 = arith.select %736, %734, %737 : vector<2x4x256xi1>, vector<2x4x256xf32>
    %739 = vector.extract_strided_slice %666 {offsets = [0, 8], sizes = [4, 1], strides = [1, 1]} : vector<4x36xf32> to vector<4x1xf32>
    %740 = vector.shape_cast %739 : vector<4x1xf32> to vector<1x4x1xf32>
    %741 = vector.extract_strided_slice %738 {offsets = [0, 0, 0], sizes = [2, 1, 256], strides = [1, 1, 1]} : vector<2x4x256xf32> to vector<2x1x256xf32>
    %742 = vector.broadcast %740 : vector<1x4x1xf32> to vector<2x4x256xf32>
    %743 = vector.broadcast %741 : vector<2x1x256xf32> to vector<2x4x256xf32>
    %744 = arith.mulf %742, %743 : vector<2x4x256xf32>
    %745 = arith.addf %733, %744 : vector<2x4x256xf32>
    %746 = vector.extract_strided_slice %666 {offsets = [0, 9], sizes = [4, 1], strides = [1, 1]} : vector<4x36xf32> to vector<4x1xf32>
    %747 = vector.shape_cast %746 : vector<4x1xf32> to vector<1x4x1xf32>
    %748 = vector.extract_strided_slice %738 {offsets = [0, 1, 0], sizes = [2, 1, 256], strides = [1, 1, 1]} : vector<2x4x256xf32> to vector<2x1x256xf32>
    %749 = vector.broadcast %747 : vector<1x4x1xf32> to vector<2x4x256xf32>
    %750 = vector.broadcast %748 : vector<2x1x256xf32> to vector<2x4x256xf32>
    %751 = arith.mulf %749, %750 : vector<2x4x256xf32>
    %752 = arith.addf %745, %751 : vector<2x4x256xf32>
    %753 = vector.extract_strided_slice %666 {offsets = [0, 10], sizes = [4, 1], strides = [1, 1]} : vector<4x36xf32> to vector<4x1xf32>
    %754 = vector.shape_cast %753 : vector<4x1xf32> to vector<1x4x1xf32>
    %755 = vector.extract_strided_slice %738 {offsets = [0, 2, 0], sizes = [2, 1, 256], strides = [1, 1, 1]} : vector<2x4x256xf32> to vector<2x1x256xf32>
    %756 = vector.broadcast %754 : vector<1x4x1xf32> to vector<2x4x256xf32>
    %757 = vector.broadcast %755 : vector<2x1x256xf32> to vector<2x4x256xf32>
    %758 = arith.mulf %756, %757 : vector<2x4x256xf32>
    %759 = arith.addf %752, %758 : vector<2x4x256xf32>
    %760 = vector.extract_strided_slice %666 {offsets = [0, 11], sizes = [4, 1], strides = [1, 1]} : vector<4x36xf32> to vector<4x1xf32>
    %761 = vector.shape_cast %760 : vector<4x1xf32> to vector<1x4x1xf32>
    %762 = vector.extract_strided_slice %738 {offsets = [0, 3, 0], sizes = [2, 1, 256], strides = [1, 1, 1]} : vector<2x4x256xf32> to vector<2x1x256xf32>
    %763 = vector.broadcast %761 : vector<1x4x1xf32> to vector<2x4x256xf32>
    %764 = vector.broadcast %762 : vector<2x1x256xf32> to vector<2x4x256xf32>
    %765 = arith.mulf %763, %764 : vector<2x4x256xf32>
    %766 = arith.addf %759, %765 : vector<2x4x256xf32>
    %c1_i32_82 = arith.constant 1 : i32
    %767 = tpu.dynamic_rotate %664 by %c1_i32_82 dim 2 : vector<2x4x256xf32>, i32 -> vector<2x4x256xf32>
    %cst_83 = arith.constant 0.000000e+00 : f32
    %768 = vector.shape_cast %20 : vector<1x1x256xi1> to vector<1x1x256xi1>
    %769 = vector.broadcast %768 : vector<1x1x256xi1> to vector<2x4x256xi1>
    %770 = vector.broadcast %cst_83 : f32 to vector<2x4x256xf32>
    %771 = arith.select %769, %767, %770 : vector<2x4x256xi1>, vector<2x4x256xf32>
    %772 = vector.extract_strided_slice %666 {offsets = [0, 12], sizes = [4, 1], strides = [1, 1]} : vector<4x36xf32> to vector<4x1xf32>
    %773 = vector.shape_cast %772 : vector<4x1xf32> to vector<1x4x1xf32>
    %774 = vector.extract_strided_slice %771 {offsets = [0, 0, 0], sizes = [2, 1, 256], strides = [1, 1, 1]} : vector<2x4x256xf32> to vector<2x1x256xf32>
    %775 = vector.broadcast %773 : vector<1x4x1xf32> to vector<2x4x256xf32>
    %776 = vector.broadcast %774 : vector<2x1x256xf32> to vector<2x4x256xf32>
    %777 = arith.mulf %775, %776 : vector<2x4x256xf32>
    %778 = arith.addf %766, %777 : vector<2x4x256xf32>
    %779 = vector.extract_strided_slice %666 {offsets = [0, 13], sizes = [4, 1], strides = [1, 1]} : vector<4x36xf32> to vector<4x1xf32>
    %780 = vector.shape_cast %779 : vector<4x1xf32> to vector<1x4x1xf32>
    %781 = vector.extract_strided_slice %771 {offsets = [0, 1, 0], sizes = [2, 1, 256], strides = [1, 1, 1]} : vector<2x4x256xf32> to vector<2x1x256xf32>
    %782 = vector.broadcast %780 : vector<1x4x1xf32> to vector<2x4x256xf32>
    %783 = vector.broadcast %781 : vector<2x1x256xf32> to vector<2x4x256xf32>
    %784 = arith.mulf %782, %783 : vector<2x4x256xf32>
    %785 = arith.addf %778, %784 : vector<2x4x256xf32>
    %786 = vector.extract_strided_slice %666 {offsets = [0, 14], sizes = [4, 1], strides = [1, 1]} : vector<4x36xf32> to vector<4x1xf32>
    %787 = vector.shape_cast %786 : vector<4x1xf32> to vector<1x4x1xf32>
    %788 = vector.extract_strided_slice %771 {offsets = [0, 2, 0], sizes = [2, 1, 256], strides = [1, 1, 1]} : vector<2x4x256xf32> to vector<2x1x256xf32>
    %789 = vector.broadcast %787 : vector<1x4x1xf32> to vector<2x4x256xf32>
    %790 = vector.broadcast %788 : vector<2x1x256xf32> to vector<2x4x256xf32>
    %791 = arith.mulf %789, %790 : vector<2x4x256xf32>
    %792 = arith.addf %785, %791 : vector<2x4x256xf32>
    %793 = vector.extract_strided_slice %666 {offsets = [0, 15], sizes = [4, 1], strides = [1, 1]} : vector<4x36xf32> to vector<4x1xf32>
    %794 = vector.shape_cast %793 : vector<4x1xf32> to vector<1x4x1xf32>
    %795 = vector.extract_strided_slice %771 {offsets = [0, 3, 0], sizes = [2, 1, 256], strides = [1, 1, 1]} : vector<2x4x256xf32> to vector<2x1x256xf32>
    %796 = vector.broadcast %794 : vector<1x4x1xf32> to vector<2x4x256xf32>
    %797 = vector.broadcast %795 : vector<2x1x256xf32> to vector<2x4x256xf32>
    %798 = arith.mulf %796, %797 : vector<2x4x256xf32>
    %799 = arith.addf %792, %798 : vector<2x4x256xf32>
    %800 = vector.extract_strided_slice %666 {offsets = [0, 16], sizes = [4, 1], strides = [1, 1]} : vector<4x36xf32> to vector<4x1xf32>
    %801 = vector.shape_cast %800 : vector<4x1xf32> to vector<1x4x1xf32>
    %802 = vector.extract_strided_slice %664 {offsets = [0, 0, 0], sizes = [2, 1, 256], strides = [1, 1, 1]} : vector<2x4x256xf32> to vector<2x1x256xf32>
    %803 = vector.broadcast %801 : vector<1x4x1xf32> to vector<2x4x256xf32>
    %804 = vector.broadcast %802 : vector<2x1x256xf32> to vector<2x4x256xf32>
    %805 = arith.mulf %803, %804 : vector<2x4x256xf32>
    %806 = arith.addf %799, %805 : vector<2x4x256xf32>
    %807 = vector.extract_strided_slice %666 {offsets = [0, 17], sizes = [4, 1], strides = [1, 1]} : vector<4x36xf32> to vector<4x1xf32>
    %808 = vector.shape_cast %807 : vector<4x1xf32> to vector<1x4x1xf32>
    %809 = vector.extract_strided_slice %664 {offsets = [0, 1, 0], sizes = [2, 1, 256], strides = [1, 1, 1]} : vector<2x4x256xf32> to vector<2x1x256xf32>
    %810 = vector.broadcast %808 : vector<1x4x1xf32> to vector<2x4x256xf32>
    %811 = vector.broadcast %809 : vector<2x1x256xf32> to vector<2x4x256xf32>
    %812 = arith.mulf %810, %811 : vector<2x4x256xf32>
    %813 = arith.addf %806, %812 : vector<2x4x256xf32>
    %814 = vector.extract_strided_slice %666 {offsets = [0, 18], sizes = [4, 1], strides = [1, 1]} : vector<4x36xf32> to vector<4x1xf32>
    %815 = vector.shape_cast %814 : vector<4x1xf32> to vector<1x4x1xf32>
    %816 = vector.extract_strided_slice %664 {offsets = [0, 2, 0], sizes = [2, 1, 256], strides = [1, 1, 1]} : vector<2x4x256xf32> to vector<2x1x256xf32>
    %817 = vector.broadcast %815 : vector<1x4x1xf32> to vector<2x4x256xf32>
    %818 = vector.broadcast %816 : vector<2x1x256xf32> to vector<2x4x256xf32>
    %819 = arith.mulf %817, %818 : vector<2x4x256xf32>
    %820 = arith.addf %813, %819 : vector<2x4x256xf32>
    %821 = vector.extract_strided_slice %666 {offsets = [0, 19], sizes = [4, 1], strides = [1, 1]} : vector<4x36xf32> to vector<4x1xf32>
    %822 = vector.shape_cast %821 : vector<4x1xf32> to vector<1x4x1xf32>
    %823 = vector.extract_strided_slice %664 {offsets = [0, 3, 0], sizes = [2, 1, 256], strides = [1, 1, 1]} : vector<2x4x256xf32> to vector<2x1x256xf32>
    %824 = vector.broadcast %822 : vector<1x4x1xf32> to vector<2x4x256xf32>
    %825 = vector.broadcast %823 : vector<2x1x256xf32> to vector<2x4x256xf32>
    %826 = arith.mulf %824, %825 : vector<2x4x256xf32>
    %827 = arith.addf %820, %826 : vector<2x4x256xf32>
    %c255_i32_84 = arith.constant 255 : i32
    %828 = tpu.dynamic_rotate %664 by %c255_i32_84 dim 2 : vector<2x4x256xf32>, i32 -> vector<2x4x256xf32>
    %cst_85 = arith.constant 0.000000e+00 : f32
    %829 = vector.shape_cast %25 : vector<1x1x256xi1> to vector<1x1x256xi1>
    %830 = vector.broadcast %829 : vector<1x1x256xi1> to vector<2x4x256xi1>
    %831 = vector.broadcast %cst_85 : f32 to vector<2x4x256xf32>
    %832 = arith.select %830, %828, %831 : vector<2x4x256xi1>, vector<2x4x256xf32>
    %833 = vector.extract_strided_slice %666 {offsets = [0, 20], sizes = [4, 1], strides = [1, 1]} : vector<4x36xf32> to vector<4x1xf32>
    %834 = vector.shape_cast %833 : vector<4x1xf32> to vector<1x4x1xf32>
    %835 = vector.extract_strided_slice %832 {offsets = [0, 0, 0], sizes = [2, 1, 256], strides = [1, 1, 1]} : vector<2x4x256xf32> to vector<2x1x256xf32>
    %836 = vector.broadcast %834 : vector<1x4x1xf32> to vector<2x4x256xf32>
    %837 = vector.broadcast %835 : vector<2x1x256xf32> to vector<2x4x256xf32>
    %838 = arith.mulf %836, %837 : vector<2x4x256xf32>
    %839 = arith.addf %827, %838 : vector<2x4x256xf32>
    %840 = vector.extract_strided_slice %666 {offsets = [0, 21], sizes = [4, 1], strides = [1, 1]} : vector<4x36xf32> to vector<4x1xf32>
    %841 = vector.shape_cast %840 : vector<4x1xf32> to vector<1x4x1xf32>
    %842 = vector.extract_strided_slice %832 {offsets = [0, 1, 0], sizes = [2, 1, 256], strides = [1, 1, 1]} : vector<2x4x256xf32> to vector<2x1x256xf32>
    %843 = vector.broadcast %841 : vector<1x4x1xf32> to vector<2x4x256xf32>
    %844 = vector.broadcast %842 : vector<2x1x256xf32> to vector<2x4x256xf32>
    %845 = arith.mulf %843, %844 : vector<2x4x256xf32>
    %846 = arith.addf %839, %845 : vector<2x4x256xf32>
    %847 = vector.extract_strided_slice %666 {offsets = [0, 22], sizes = [4, 1], strides = [1, 1]} : vector<4x36xf32> to vector<4x1xf32>
    %848 = vector.shape_cast %847 : vector<4x1xf32> to vector<1x4x1xf32>
    %849 = vector.extract_strided_slice %832 {offsets = [0, 2, 0], sizes = [2, 1, 256], strides = [1, 1, 1]} : vector<2x4x256xf32> to vector<2x1x256xf32>
    %850 = vector.broadcast %848 : vector<1x4x1xf32> to vector<2x4x256xf32>
    %851 = vector.broadcast %849 : vector<2x1x256xf32> to vector<2x4x256xf32>
    %852 = arith.mulf %850, %851 : vector<2x4x256xf32>
    %853 = arith.addf %846, %852 : vector<2x4x256xf32>
    %854 = vector.extract_strided_slice %666 {offsets = [0, 23], sizes = [4, 1], strides = [1, 1]} : vector<4x36xf32> to vector<4x1xf32>
    %855 = vector.shape_cast %854 : vector<4x1xf32> to vector<1x4x1xf32>
    %856 = vector.extract_strided_slice %832 {offsets = [0, 3, 0], sizes = [2, 1, 256], strides = [1, 1, 1]} : vector<2x4x256xf32> to vector<2x1x256xf32>
    %857 = vector.broadcast %855 : vector<1x4x1xf32> to vector<2x4x256xf32>
    %858 = vector.broadcast %856 : vector<2x1x256xf32> to vector<2x4x256xf32>
    %859 = arith.mulf %857, %858 : vector<2x4x256xf32>
    %860 = arith.addf %853, %859 : vector<2x4x256xf32>
    %c241_i32_86 = arith.constant 241 : i32
    %861 = tpu.dynamic_rotate %664 by %c241_i32_86 dim 2 : vector<2x4x256xf32>, i32 -> vector<2x4x256xf32>
    %cst_87 = arith.constant 0.000000e+00 : f32
    %862 = vector.shape_cast %30 : vector<1x1x256xi1> to vector<1x1x256xi1>
    %863 = vector.broadcast %862 : vector<1x1x256xi1> to vector<2x4x256xi1>
    %864 = vector.broadcast %cst_87 : f32 to vector<2x4x256xf32>
    %865 = arith.select %863, %861, %864 : vector<2x4x256xi1>, vector<2x4x256xf32>
    %866 = vector.extract_strided_slice %666 {offsets = [0, 24], sizes = [4, 1], strides = [1, 1]} : vector<4x36xf32> to vector<4x1xf32>
    %867 = vector.shape_cast %866 : vector<4x1xf32> to vector<1x4x1xf32>
    %868 = vector.extract_strided_slice %865 {offsets = [0, 0, 0], sizes = [2, 1, 256], strides = [1, 1, 1]} : vector<2x4x256xf32> to vector<2x1x256xf32>
    %869 = vector.broadcast %867 : vector<1x4x1xf32> to vector<2x4x256xf32>
    %870 = vector.broadcast %868 : vector<2x1x256xf32> to vector<2x4x256xf32>
    %871 = arith.mulf %869, %870 : vector<2x4x256xf32>
    %872 = arith.addf %860, %871 : vector<2x4x256xf32>
    %873 = vector.extract_strided_slice %666 {offsets = [0, 25], sizes = [4, 1], strides = [1, 1]} : vector<4x36xf32> to vector<4x1xf32>
    %874 = vector.shape_cast %873 : vector<4x1xf32> to vector<1x4x1xf32>
    %875 = vector.extract_strided_slice %865 {offsets = [0, 1, 0], sizes = [2, 1, 256], strides = [1, 1, 1]} : vector<2x4x256xf32> to vector<2x1x256xf32>
    %876 = vector.broadcast %874 : vector<1x4x1xf32> to vector<2x4x256xf32>
    %877 = vector.broadcast %875 : vector<2x1x256xf32> to vector<2x4x256xf32>
    %878 = arith.mulf %876, %877 : vector<2x4x256xf32>
    %879 = arith.addf %872, %878 : vector<2x4x256xf32>
    %880 = vector.extract_strided_slice %666 {offsets = [0, 26], sizes = [4, 1], strides = [1, 1]} : vector<4x36xf32> to vector<4x1xf32>
    %881 = vector.shape_cast %880 : vector<4x1xf32> to vector<1x4x1xf32>
    %882 = vector.extract_strided_slice %865 {offsets = [0, 2, 0], sizes = [2, 1, 256], strides = [1, 1, 1]} : vector<2x4x256xf32> to vector<2x1x256xf32>
    %883 = vector.broadcast %881 : vector<1x4x1xf32> to vector<2x4x256xf32>
    %884 = vector.broadcast %882 : vector<2x1x256xf32> to vector<2x4x256xf32>
    %885 = arith.mulf %883, %884 : vector<2x4x256xf32>
    %886 = arith.addf %879, %885 : vector<2x4x256xf32>
    %887 = vector.extract_strided_slice %666 {offsets = [0, 27], sizes = [4, 1], strides = [1, 1]} : vector<4x36xf32> to vector<4x1xf32>
    %888 = vector.shape_cast %887 : vector<4x1xf32> to vector<1x4x1xf32>
    %889 = vector.extract_strided_slice %865 {offsets = [0, 3, 0], sizes = [2, 1, 256], strides = [1, 1, 1]} : vector<2x4x256xf32> to vector<2x1x256xf32>
    %890 = vector.broadcast %888 : vector<1x4x1xf32> to vector<2x4x256xf32>
    %891 = vector.broadcast %889 : vector<2x1x256xf32> to vector<2x4x256xf32>
    %892 = arith.mulf %890, %891 : vector<2x4x256xf32>
    %893 = arith.addf %886, %892 : vector<2x4x256xf32>
    %c240_i32_88 = arith.constant 240 : i32
    %894 = tpu.dynamic_rotate %664 by %c240_i32_88 dim 2 : vector<2x4x256xf32>, i32 -> vector<2x4x256xf32>
    %cst_89 = arith.constant 0.000000e+00 : f32
    %895 = vector.shape_cast %35 : vector<1x1x256xi1> to vector<1x1x256xi1>
    %896 = vector.broadcast %895 : vector<1x1x256xi1> to vector<2x4x256xi1>
    %897 = vector.broadcast %cst_89 : f32 to vector<2x4x256xf32>
    %898 = arith.select %896, %894, %897 : vector<2x4x256xi1>, vector<2x4x256xf32>
    %899 = vector.extract_strided_slice %666 {offsets = [0, 28], sizes = [4, 1], strides = [1, 1]} : vector<4x36xf32> to vector<4x1xf32>
    %900 = vector.shape_cast %899 : vector<4x1xf32> to vector<1x4x1xf32>
    %901 = vector.extract_strided_slice %898 {offsets = [0, 0, 0], sizes = [2, 1, 256], strides = [1, 1, 1]} : vector<2x4x256xf32> to vector<2x1x256xf32>
    %902 = vector.broadcast %900 : vector<1x4x1xf32> to vector<2x4x256xf32>
    %903 = vector.broadcast %901 : vector<2x1x256xf32> to vector<2x4x256xf32>
    %904 = arith.mulf %902, %903 : vector<2x4x256xf32>
    %905 = arith.addf %893, %904 : vector<2x4x256xf32>
    %906 = vector.extract_strided_slice %666 {offsets = [0, 29], sizes = [4, 1], strides = [1, 1]} : vector<4x36xf32> to vector<4x1xf32>
    %907 = vector.shape_cast %906 : vector<4x1xf32> to vector<1x4x1xf32>
    %908 = vector.extract_strided_slice %898 {offsets = [0, 1, 0], sizes = [2, 1, 256], strides = [1, 1, 1]} : vector<2x4x256xf32> to vector<2x1x256xf32>
    %909 = vector.broadcast %907 : vector<1x4x1xf32> to vector<2x4x256xf32>
    %910 = vector.broadcast %908 : vector<2x1x256xf32> to vector<2x4x256xf32>
    %911 = arith.mulf %909, %910 : vector<2x4x256xf32>
    %912 = arith.addf %905, %911 : vector<2x4x256xf32>
    %913 = vector.extract_strided_slice %666 {offsets = [0, 30], sizes = [4, 1], strides = [1, 1]} : vector<4x36xf32> to vector<4x1xf32>
    %914 = vector.shape_cast %913 : vector<4x1xf32> to vector<1x4x1xf32>
    %915 = vector.extract_strided_slice %898 {offsets = [0, 2, 0], sizes = [2, 1, 256], strides = [1, 1, 1]} : vector<2x4x256xf32> to vector<2x1x256xf32>
    %916 = vector.broadcast %914 : vector<1x4x1xf32> to vector<2x4x256xf32>
    %917 = vector.broadcast %915 : vector<2x1x256xf32> to vector<2x4x256xf32>
    %918 = arith.mulf %916, %917 : vector<2x4x256xf32>
    %919 = arith.addf %912, %918 : vector<2x4x256xf32>
    %920 = vector.extract_strided_slice %666 {offsets = [0, 31], sizes = [4, 1], strides = [1, 1]} : vector<4x36xf32> to vector<4x1xf32>
    %921 = vector.shape_cast %920 : vector<4x1xf32> to vector<1x4x1xf32>
    %922 = vector.extract_strided_slice %898 {offsets = [0, 3, 0], sizes = [2, 1, 256], strides = [1, 1, 1]} : vector<2x4x256xf32> to vector<2x1x256xf32>
    %923 = vector.broadcast %921 : vector<1x4x1xf32> to vector<2x4x256xf32>
    %924 = vector.broadcast %922 : vector<2x1x256xf32> to vector<2x4x256xf32>
    %925 = arith.mulf %923, %924 : vector<2x4x256xf32>
    %926 = arith.addf %919, %925 : vector<2x4x256xf32>
    %c239_i32_90 = arith.constant 239 : i32
    %927 = tpu.dynamic_rotate %664 by %c239_i32_90 dim 2 : vector<2x4x256xf32>, i32 -> vector<2x4x256xf32>
    %cst_91 = arith.constant 0.000000e+00 : f32
    %928 = vector.shape_cast %40 : vector<1x1x256xi1> to vector<1x1x256xi1>
    %929 = vector.broadcast %928 : vector<1x1x256xi1> to vector<2x4x256xi1>
    %930 = vector.broadcast %cst_91 : f32 to vector<2x4x256xf32>
    %931 = arith.select %929, %927, %930 : vector<2x4x256xi1>, vector<2x4x256xf32>
    %932 = vector.extract_strided_slice %666 {offsets = [0, 32], sizes = [4, 1], strides = [1, 1]} : vector<4x36xf32> to vector<4x1xf32>
    %933 = vector.shape_cast %932 : vector<4x1xf32> to vector<1x4x1xf32>
    %934 = vector.extract_strided_slice %931 {offsets = [0, 0, 0], sizes = [2, 1, 256], strides = [1, 1, 1]} : vector<2x4x256xf32> to vector<2x1x256xf32>
    %935 = vector.broadcast %933 : vector<1x4x1xf32> to vector<2x4x256xf32>
    %936 = vector.broadcast %934 : vector<2x1x256xf32> to vector<2x4x256xf32>
    %937 = arith.mulf %935, %936 : vector<2x4x256xf32>
    %938 = arith.addf %926, %937 : vector<2x4x256xf32>
    %939 = vector.extract_strided_slice %666 {offsets = [0, 33], sizes = [4, 1], strides = [1, 1]} : vector<4x36xf32> to vector<4x1xf32>
    %940 = vector.shape_cast %939 : vector<4x1xf32> to vector<1x4x1xf32>
    %941 = vector.extract_strided_slice %931 {offsets = [0, 1, 0], sizes = [2, 1, 256], strides = [1, 1, 1]} : vector<2x4x256xf32> to vector<2x1x256xf32>
    %942 = vector.broadcast %940 : vector<1x4x1xf32> to vector<2x4x256xf32>
    %943 = vector.broadcast %941 : vector<2x1x256xf32> to vector<2x4x256xf32>
    %944 = arith.mulf %942, %943 : vector<2x4x256xf32>
    %945 = arith.addf %938, %944 : vector<2x4x256xf32>
    %946 = vector.extract_strided_slice %666 {offsets = [0, 34], sizes = [4, 1], strides = [1, 1]} : vector<4x36xf32> to vector<4x1xf32>
    %947 = vector.shape_cast %946 : vector<4x1xf32> to vector<1x4x1xf32>
    %948 = vector.extract_strided_slice %931 {offsets = [0, 2, 0], sizes = [2, 1, 256], strides = [1, 1, 1]} : vector<2x4x256xf32> to vector<2x1x256xf32>
    %949 = vector.broadcast %947 : vector<1x4x1xf32> to vector<2x4x256xf32>
    %950 = vector.broadcast %948 : vector<2x1x256xf32> to vector<2x4x256xf32>
    %951 = arith.mulf %949, %950 : vector<2x4x256xf32>
    %952 = arith.addf %945, %951 : vector<2x4x256xf32>
    %953 = vector.extract_strided_slice %666 {offsets = [0, 35], sizes = [4, 1], strides = [1, 1]} : vector<4x36xf32> to vector<4x1xf32>
    %954 = vector.shape_cast %953 : vector<4x1xf32> to vector<1x4x1xf32>
    %955 = vector.extract_strided_slice %931 {offsets = [0, 3, 0], sizes = [2, 1, 256], strides = [1, 1, 1]} : vector<2x4x256xf32> to vector<2x1x256xf32>
    %956 = vector.broadcast %954 : vector<1x4x1xf32> to vector<2x4x256xf32>
    %957 = vector.broadcast %955 : vector<2x1x256xf32> to vector<2x4x256xf32>
    %958 = arith.mulf %956, %957 : vector<2x4x256xf32>
    %959 = arith.addf %952, %958 : vector<2x4x256xf32>
    %cst_92 = arith.constant 0.000000e+00 : f32
    %960 = vector.broadcast %cst_92 : f32 to vector<2x4x256xf32>
    %961 = arith.maximumf %959, %960 : vector<2x4x256xf32>
    %c3_93 = arith.constant 3 : index
    %c0_94 = arith.constant 0 : index
    %c0_95 = arith.constant 0 : index
    %962 = vector.load %arg2[%c3_93, %c0_94, %c0_95] : memref<5x4x36xf32, #tpu.memory_space<vmem>>, vector<1x4x36xf32>
    %963 = vector.shape_cast %962 : vector<1x4x36xf32> to vector<4x36xf32>
    %cst_96 = arith.constant 0.000000e+00 : f32
    %964 = vector.broadcast %cst_96 : f32 to vector<2x4x256xf32>
    %c17_i32_97 = arith.constant 17 : i32
    %965 = tpu.dynamic_rotate %961 by %c17_i32_97 dim 2 : vector<2x4x256xf32>, i32 -> vector<2x4x256xf32>
    %cst_98 = arith.constant 0.000000e+00 : f32
    %966 = vector.shape_cast %5 : vector<1x1x256xi1> to vector<1x1x256xi1>
    %967 = vector.broadcast %966 : vector<1x1x256xi1> to vector<2x4x256xi1>
    %968 = vector.broadcast %cst_98 : f32 to vector<2x4x256xf32>
    %969 = arith.select %967, %965, %968 : vector<2x4x256xi1>, vector<2x4x256xf32>
    %970 = vector.extract_strided_slice %963 {offsets = [0, 0], sizes = [4, 1], strides = [1, 1]} : vector<4x36xf32> to vector<4x1xf32>
    %971 = vector.shape_cast %970 : vector<4x1xf32> to vector<1x4x1xf32>
    %972 = vector.extract_strided_slice %969 {offsets = [0, 0, 0], sizes = [2, 1, 256], strides = [1, 1, 1]} : vector<2x4x256xf32> to vector<2x1x256xf32>
    %973 = vector.broadcast %971 : vector<1x4x1xf32> to vector<2x4x256xf32>
    %974 = vector.broadcast %972 : vector<2x1x256xf32> to vector<2x4x256xf32>
    %975 = arith.mulf %973, %974 : vector<2x4x256xf32>
    %976 = arith.addf %964, %975 : vector<2x4x256xf32>
    %977 = vector.extract_strided_slice %963 {offsets = [0, 1], sizes = [4, 1], strides = [1, 1]} : vector<4x36xf32> to vector<4x1xf32>
    %978 = vector.shape_cast %977 : vector<4x1xf32> to vector<1x4x1xf32>
    %979 = vector.extract_strided_slice %969 {offsets = [0, 1, 0], sizes = [2, 1, 256], strides = [1, 1, 1]} : vector<2x4x256xf32> to vector<2x1x256xf32>
    %980 = vector.broadcast %978 : vector<1x4x1xf32> to vector<2x4x256xf32>
    %981 = vector.broadcast %979 : vector<2x1x256xf32> to vector<2x4x256xf32>
    %982 = arith.mulf %980, %981 : vector<2x4x256xf32>
    %983 = arith.addf %976, %982 : vector<2x4x256xf32>
    %984 = vector.extract_strided_slice %963 {offsets = [0, 2], sizes = [4, 1], strides = [1, 1]} : vector<4x36xf32> to vector<4x1xf32>
    %985 = vector.shape_cast %984 : vector<4x1xf32> to vector<1x4x1xf32>
    %986 = vector.extract_strided_slice %969 {offsets = [0, 2, 0], sizes = [2, 1, 256], strides = [1, 1, 1]} : vector<2x4x256xf32> to vector<2x1x256xf32>
    %987 = vector.broadcast %985 : vector<1x4x1xf32> to vector<2x4x256xf32>
    %988 = vector.broadcast %986 : vector<2x1x256xf32> to vector<2x4x256xf32>
    %989 = arith.mulf %987, %988 : vector<2x4x256xf32>
    %990 = arith.addf %983, %989 : vector<2x4x256xf32>
    %991 = vector.extract_strided_slice %963 {offsets = [0, 3], sizes = [4, 1], strides = [1, 1]} : vector<4x36xf32> to vector<4x1xf32>
    %992 = vector.shape_cast %991 : vector<4x1xf32> to vector<1x4x1xf32>
    %993 = vector.extract_strided_slice %969 {offsets = [0, 3, 0], sizes = [2, 1, 256], strides = [1, 1, 1]} : vector<2x4x256xf32> to vector<2x1x256xf32>
    %994 = vector.broadcast %992 : vector<1x4x1xf32> to vector<2x4x256xf32>
    %995 = vector.broadcast %993 : vector<2x1x256xf32> to vector<2x4x256xf32>
    %996 = arith.mulf %994, %995 : vector<2x4x256xf32>
    %997 = arith.addf %990, %996 : vector<2x4x256xf32>
    %c16_i32_99 = arith.constant 16 : i32
    %998 = tpu.dynamic_rotate %961 by %c16_i32_99 dim 2 : vector<2x4x256xf32>, i32 -> vector<2x4x256xf32>
    %cst_100 = arith.constant 0.000000e+00 : f32
    %999 = vector.shape_cast %10 : vector<1x1x256xi1> to vector<1x1x256xi1>
    %1000 = vector.broadcast %999 : vector<1x1x256xi1> to vector<2x4x256xi1>
    %1001 = vector.broadcast %cst_100 : f32 to vector<2x4x256xf32>
    %1002 = arith.select %1000, %998, %1001 : vector<2x4x256xi1>, vector<2x4x256xf32>
    %1003 = vector.extract_strided_slice %963 {offsets = [0, 4], sizes = [4, 1], strides = [1, 1]} : vector<4x36xf32> to vector<4x1xf32>
    %1004 = vector.shape_cast %1003 : vector<4x1xf32> to vector<1x4x1xf32>
    %1005 = vector.extract_strided_slice %1002 {offsets = [0, 0, 0], sizes = [2, 1, 256], strides = [1, 1, 1]} : vector<2x4x256xf32> to vector<2x1x256xf32>
    %1006 = vector.broadcast %1004 : vector<1x4x1xf32> to vector<2x4x256xf32>
    %1007 = vector.broadcast %1005 : vector<2x1x256xf32> to vector<2x4x256xf32>
    %1008 = arith.mulf %1006, %1007 : vector<2x4x256xf32>
    %1009 = arith.addf %997, %1008 : vector<2x4x256xf32>
    %1010 = vector.extract_strided_slice %963 {offsets = [0, 5], sizes = [4, 1], strides = [1, 1]} : vector<4x36xf32> to vector<4x1xf32>
    %1011 = vector.shape_cast %1010 : vector<4x1xf32> to vector<1x4x1xf32>
    %1012 = vector.extract_strided_slice %1002 {offsets = [0, 1, 0], sizes = [2, 1, 256], strides = [1, 1, 1]} : vector<2x4x256xf32> to vector<2x1x256xf32>
    %1013 = vector.broadcast %1011 : vector<1x4x1xf32> to vector<2x4x256xf32>
    %1014 = vector.broadcast %1012 : vector<2x1x256xf32> to vector<2x4x256xf32>
    %1015 = arith.mulf %1013, %1014 : vector<2x4x256xf32>
    %1016 = arith.addf %1009, %1015 : vector<2x4x256xf32>
    %1017 = vector.extract_strided_slice %963 {offsets = [0, 6], sizes = [4, 1], strides = [1, 1]} : vector<4x36xf32> to vector<4x1xf32>
    %1018 = vector.shape_cast %1017 : vector<4x1xf32> to vector<1x4x1xf32>
    %1019 = vector.extract_strided_slice %1002 {offsets = [0, 2, 0], sizes = [2, 1, 256], strides = [1, 1, 1]} : vector<2x4x256xf32> to vector<2x1x256xf32>
    %1020 = vector.broadcast %1018 : vector<1x4x1xf32> to vector<2x4x256xf32>
    %1021 = vector.broadcast %1019 : vector<2x1x256xf32> to vector<2x4x256xf32>
    %1022 = arith.mulf %1020, %1021 : vector<2x4x256xf32>
    %1023 = arith.addf %1016, %1022 : vector<2x4x256xf32>
    %1024 = vector.extract_strided_slice %963 {offsets = [0, 7], sizes = [4, 1], strides = [1, 1]} : vector<4x36xf32> to vector<4x1xf32>
    %1025 = vector.shape_cast %1024 : vector<4x1xf32> to vector<1x4x1xf32>
    %1026 = vector.extract_strided_slice %1002 {offsets = [0, 3, 0], sizes = [2, 1, 256], strides = [1, 1, 1]} : vector<2x4x256xf32> to vector<2x1x256xf32>
    %1027 = vector.broadcast %1025 : vector<1x4x1xf32> to vector<2x4x256xf32>
    %1028 = vector.broadcast %1026 : vector<2x1x256xf32> to vector<2x4x256xf32>
    %1029 = arith.mulf %1027, %1028 : vector<2x4x256xf32>
    %1030 = arith.addf %1023, %1029 : vector<2x4x256xf32>
    %c15_i32_101 = arith.constant 15 : i32
    %1031 = tpu.dynamic_rotate %961 by %c15_i32_101 dim 2 : vector<2x4x256xf32>, i32 -> vector<2x4x256xf32>
    %cst_102 = arith.constant 0.000000e+00 : f32
    %1032 = vector.shape_cast %15 : vector<1x1x256xi1> to vector<1x1x256xi1>
    %1033 = vector.broadcast %1032 : vector<1x1x256xi1> to vector<2x4x256xi1>
    %1034 = vector.broadcast %cst_102 : f32 to vector<2x4x256xf32>
    %1035 = arith.select %1033, %1031, %1034 : vector<2x4x256xi1>, vector<2x4x256xf32>
    %1036 = vector.extract_strided_slice %963 {offsets = [0, 8], sizes = [4, 1], strides = [1, 1]} : vector<4x36xf32> to vector<4x1xf32>
    %1037 = vector.shape_cast %1036 : vector<4x1xf32> to vector<1x4x1xf32>
    %1038 = vector.extract_strided_slice %1035 {offsets = [0, 0, 0], sizes = [2, 1, 256], strides = [1, 1, 1]} : vector<2x4x256xf32> to vector<2x1x256xf32>
    %1039 = vector.broadcast %1037 : vector<1x4x1xf32> to vector<2x4x256xf32>
    %1040 = vector.broadcast %1038 : vector<2x1x256xf32> to vector<2x4x256xf32>
    %1041 = arith.mulf %1039, %1040 : vector<2x4x256xf32>
    %1042 = arith.addf %1030, %1041 : vector<2x4x256xf32>
    %1043 = vector.extract_strided_slice %963 {offsets = [0, 9], sizes = [4, 1], strides = [1, 1]} : vector<4x36xf32> to vector<4x1xf32>
    %1044 = vector.shape_cast %1043 : vector<4x1xf32> to vector<1x4x1xf32>
    %1045 = vector.extract_strided_slice %1035 {offsets = [0, 1, 0], sizes = [2, 1, 256], strides = [1, 1, 1]} : vector<2x4x256xf32> to vector<2x1x256xf32>
    %1046 = vector.broadcast %1044 : vector<1x4x1xf32> to vector<2x4x256xf32>
    %1047 = vector.broadcast %1045 : vector<2x1x256xf32> to vector<2x4x256xf32>
    %1048 = arith.mulf %1046, %1047 : vector<2x4x256xf32>
    %1049 = arith.addf %1042, %1048 : vector<2x4x256xf32>
    %1050 = vector.extract_strided_slice %963 {offsets = [0, 10], sizes = [4, 1], strides = [1, 1]} : vector<4x36xf32> to vector<4x1xf32>
    %1051 = vector.shape_cast %1050 : vector<4x1xf32> to vector<1x4x1xf32>
    %1052 = vector.extract_strided_slice %1035 {offsets = [0, 2, 0], sizes = [2, 1, 256], strides = [1, 1, 1]} : vector<2x4x256xf32> to vector<2x1x256xf32>
    %1053 = vector.broadcast %1051 : vector<1x4x1xf32> to vector<2x4x256xf32>
    %1054 = vector.broadcast %1052 : vector<2x1x256xf32> to vector<2x4x256xf32>
    %1055 = arith.mulf %1053, %1054 : vector<2x4x256xf32>
    %1056 = arith.addf %1049, %1055 : vector<2x4x256xf32>
    %1057 = vector.extract_strided_slice %963 {offsets = [0, 11], sizes = [4, 1], strides = [1, 1]} : vector<4x36xf32> to vector<4x1xf32>
    %1058 = vector.shape_cast %1057 : vector<4x1xf32> to vector<1x4x1xf32>
    %1059 = vector.extract_strided_slice %1035 {offsets = [0, 3, 0], sizes = [2, 1, 256], strides = [1, 1, 1]} : vector<2x4x256xf32> to vector<2x1x256xf32>
    %1060 = vector.broadcast %1058 : vector<1x4x1xf32> to vector<2x4x256xf32>
    %1061 = vector.broadcast %1059 : vector<2x1x256xf32> to vector<2x4x256xf32>
    %1062 = arith.mulf %1060, %1061 : vector<2x4x256xf32>
    %1063 = arith.addf %1056, %1062 : vector<2x4x256xf32>
    %c1_i32_103 = arith.constant 1 : i32
    %1064 = tpu.dynamic_rotate %961 by %c1_i32_103 dim 2 : vector<2x4x256xf32>, i32 -> vector<2x4x256xf32>
    %cst_104 = arith.constant 0.000000e+00 : f32
    %1065 = vector.shape_cast %20 : vector<1x1x256xi1> to vector<1x1x256xi1>
    %1066 = vector.broadcast %1065 : vector<1x1x256xi1> to vector<2x4x256xi1>
    %1067 = vector.broadcast %cst_104 : f32 to vector<2x4x256xf32>
    %1068 = arith.select %1066, %1064, %1067 : vector<2x4x256xi1>, vector<2x4x256xf32>
    %1069 = vector.extract_strided_slice %963 {offsets = [0, 12], sizes = [4, 1], strides = [1, 1]} : vector<4x36xf32> to vector<4x1xf32>
    %1070 = vector.shape_cast %1069 : vector<4x1xf32> to vector<1x4x1xf32>
    %1071 = vector.extract_strided_slice %1068 {offsets = [0, 0, 0], sizes = [2, 1, 256], strides = [1, 1, 1]} : vector<2x4x256xf32> to vector<2x1x256xf32>
    %1072 = vector.broadcast %1070 : vector<1x4x1xf32> to vector<2x4x256xf32>
    %1073 = vector.broadcast %1071 : vector<2x1x256xf32> to vector<2x4x256xf32>
    %1074 = arith.mulf %1072, %1073 : vector<2x4x256xf32>
    %1075 = arith.addf %1063, %1074 : vector<2x4x256xf32>
    %1076 = vector.extract_strided_slice %963 {offsets = [0, 13], sizes = [4, 1], strides = [1, 1]} : vector<4x36xf32> to vector<4x1xf32>
    %1077 = vector.shape_cast %1076 : vector<4x1xf32> to vector<1x4x1xf32>
    %1078 = vector.extract_strided_slice %1068 {offsets = [0, 1, 0], sizes = [2, 1, 256], strides = [1, 1, 1]} : vector<2x4x256xf32> to vector<2x1x256xf32>
    %1079 = vector.broadcast %1077 : vector<1x4x1xf32> to vector<2x4x256xf32>
    %1080 = vector.broadcast %1078 : vector<2x1x256xf32> to vector<2x4x256xf32>
    %1081 = arith.mulf %1079, %1080 : vector<2x4x256xf32>
    %1082 = arith.addf %1075, %1081 : vector<2x4x256xf32>
    %1083 = vector.extract_strided_slice %963 {offsets = [0, 14], sizes = [4, 1], strides = [1, 1]} : vector<4x36xf32> to vector<4x1xf32>
    %1084 = vector.shape_cast %1083 : vector<4x1xf32> to vector<1x4x1xf32>
    %1085 = vector.extract_strided_slice %1068 {offsets = [0, 2, 0], sizes = [2, 1, 256], strides = [1, 1, 1]} : vector<2x4x256xf32> to vector<2x1x256xf32>
    %1086 = vector.broadcast %1084 : vector<1x4x1xf32> to vector<2x4x256xf32>
    %1087 = vector.broadcast %1085 : vector<2x1x256xf32> to vector<2x4x256xf32>
    %1088 = arith.mulf %1086, %1087 : vector<2x4x256xf32>
    %1089 = arith.addf %1082, %1088 : vector<2x4x256xf32>
    %1090 = vector.extract_strided_slice %963 {offsets = [0, 15], sizes = [4, 1], strides = [1, 1]} : vector<4x36xf32> to vector<4x1xf32>
    %1091 = vector.shape_cast %1090 : vector<4x1xf32> to vector<1x4x1xf32>
    %1092 = vector.extract_strided_slice %1068 {offsets = [0, 3, 0], sizes = [2, 1, 256], strides = [1, 1, 1]} : vector<2x4x256xf32> to vector<2x1x256xf32>
    %1093 = vector.broadcast %1091 : vector<1x4x1xf32> to vector<2x4x256xf32>
    %1094 = vector.broadcast %1092 : vector<2x1x256xf32> to vector<2x4x256xf32>
    %1095 = arith.mulf %1093, %1094 : vector<2x4x256xf32>
    %1096 = arith.addf %1089, %1095 : vector<2x4x256xf32>
    %1097 = vector.extract_strided_slice %963 {offsets = [0, 16], sizes = [4, 1], strides = [1, 1]} : vector<4x36xf32> to vector<4x1xf32>
    %1098 = vector.shape_cast %1097 : vector<4x1xf32> to vector<1x4x1xf32>
    %1099 = vector.extract_strided_slice %961 {offsets = [0, 0, 0], sizes = [2, 1, 256], strides = [1, 1, 1]} : vector<2x4x256xf32> to vector<2x1x256xf32>
    %1100 = vector.broadcast %1098 : vector<1x4x1xf32> to vector<2x4x256xf32>
    %1101 = vector.broadcast %1099 : vector<2x1x256xf32> to vector<2x4x256xf32>
    %1102 = arith.mulf %1100, %1101 : vector<2x4x256xf32>
    %1103 = arith.addf %1096, %1102 : vector<2x4x256xf32>
    %1104 = vector.extract_strided_slice %963 {offsets = [0, 17], sizes = [4, 1], strides = [1, 1]} : vector<4x36xf32> to vector<4x1xf32>
    %1105 = vector.shape_cast %1104 : vector<4x1xf32> to vector<1x4x1xf32>
    %1106 = vector.extract_strided_slice %961 {offsets = [0, 1, 0], sizes = [2, 1, 256], strides = [1, 1, 1]} : vector<2x4x256xf32> to vector<2x1x256xf32>
    %1107 = vector.broadcast %1105 : vector<1x4x1xf32> to vector<2x4x256xf32>
    %1108 = vector.broadcast %1106 : vector<2x1x256xf32> to vector<2x4x256xf32>
    %1109 = arith.mulf %1107, %1108 : vector<2x4x256xf32>
    %1110 = arith.addf %1103, %1109 : vector<2x4x256xf32>
    %1111 = vector.extract_strided_slice %963 {offsets = [0, 18], sizes = [4, 1], strides = [1, 1]} : vector<4x36xf32> to vector<4x1xf32>
    %1112 = vector.shape_cast %1111 : vector<4x1xf32> to vector<1x4x1xf32>
    %1113 = vector.extract_strided_slice %961 {offsets = [0, 2, 0], sizes = [2, 1, 256], strides = [1, 1, 1]} : vector<2x4x256xf32> to vector<2x1x256xf32>
    %1114 = vector.broadcast %1112 : vector<1x4x1xf32> to vector<2x4x256xf32>
    %1115 = vector.broadcast %1113 : vector<2x1x256xf32> to vector<2x4x256xf32>
    %1116 = arith.mulf %1114, %1115 : vector<2x4x256xf32>
    %1117 = arith.addf %1110, %1116 : vector<2x4x256xf32>
    %1118 = vector.extract_strided_slice %963 {offsets = [0, 19], sizes = [4, 1], strides = [1, 1]} : vector<4x36xf32> to vector<4x1xf32>
    %1119 = vector.shape_cast %1118 : vector<4x1xf32> to vector<1x4x1xf32>
    %1120 = vector.extract_strided_slice %961 {offsets = [0, 3, 0], sizes = [2, 1, 256], strides = [1, 1, 1]} : vector<2x4x256xf32> to vector<2x1x256xf32>
    %1121 = vector.broadcast %1119 : vector<1x4x1xf32> to vector<2x4x256xf32>
    %1122 = vector.broadcast %1120 : vector<2x1x256xf32> to vector<2x4x256xf32>
    %1123 = arith.mulf %1121, %1122 : vector<2x4x256xf32>
    %1124 = arith.addf %1117, %1123 : vector<2x4x256xf32>
    %c255_i32_105 = arith.constant 255 : i32
    %1125 = tpu.dynamic_rotate %961 by %c255_i32_105 dim 2 : vector<2x4x256xf32>, i32 -> vector<2x4x256xf32>
    %cst_106 = arith.constant 0.000000e+00 : f32
    %1126 = vector.shape_cast %25 : vector<1x1x256xi1> to vector<1x1x256xi1>
    %1127 = vector.broadcast %1126 : vector<1x1x256xi1> to vector<2x4x256xi1>
    %1128 = vector.broadcast %cst_106 : f32 to vector<2x4x256xf32>
    %1129 = arith.select %1127, %1125, %1128 : vector<2x4x256xi1>, vector<2x4x256xf32>
    %1130 = vector.extract_strided_slice %963 {offsets = [0, 20], sizes = [4, 1], strides = [1, 1]} : vector<4x36xf32> to vector<4x1xf32>
    %1131 = vector.shape_cast %1130 : vector<4x1xf32> to vector<1x4x1xf32>
    %1132 = vector.extract_strided_slice %1129 {offsets = [0, 0, 0], sizes = [2, 1, 256], strides = [1, 1, 1]} : vector<2x4x256xf32> to vector<2x1x256xf32>
    %1133 = vector.broadcast %1131 : vector<1x4x1xf32> to vector<2x4x256xf32>
    %1134 = vector.broadcast %1132 : vector<2x1x256xf32> to vector<2x4x256xf32>
    %1135 = arith.mulf %1133, %1134 : vector<2x4x256xf32>
    %1136 = arith.addf %1124, %1135 : vector<2x4x256xf32>
    %1137 = vector.extract_strided_slice %963 {offsets = [0, 21], sizes = [4, 1], strides = [1, 1]} : vector<4x36xf32> to vector<4x1xf32>
    %1138 = vector.shape_cast %1137 : vector<4x1xf32> to vector<1x4x1xf32>
    %1139 = vector.extract_strided_slice %1129 {offsets = [0, 1, 0], sizes = [2, 1, 256], strides = [1, 1, 1]} : vector<2x4x256xf32> to vector<2x1x256xf32>
    %1140 = vector.broadcast %1138 : vector<1x4x1xf32> to vector<2x4x256xf32>
    %1141 = vector.broadcast %1139 : vector<2x1x256xf32> to vector<2x4x256xf32>
    %1142 = arith.mulf %1140, %1141 : vector<2x4x256xf32>
    %1143 = arith.addf %1136, %1142 : vector<2x4x256xf32>
    %1144 = vector.extract_strided_slice %963 {offsets = [0, 22], sizes = [4, 1], strides = [1, 1]} : vector<4x36xf32> to vector<4x1xf32>
    %1145 = vector.shape_cast %1144 : vector<4x1xf32> to vector<1x4x1xf32>
    %1146 = vector.extract_strided_slice %1129 {offsets = [0, 2, 0], sizes = [2, 1, 256], strides = [1, 1, 1]} : vector<2x4x256xf32> to vector<2x1x256xf32>
    %1147 = vector.broadcast %1145 : vector<1x4x1xf32> to vector<2x4x256xf32>
    %1148 = vector.broadcast %1146 : vector<2x1x256xf32> to vector<2x4x256xf32>
    %1149 = arith.mulf %1147, %1148 : vector<2x4x256xf32>
    %1150 = arith.addf %1143, %1149 : vector<2x4x256xf32>
    %1151 = vector.extract_strided_slice %963 {offsets = [0, 23], sizes = [4, 1], strides = [1, 1]} : vector<4x36xf32> to vector<4x1xf32>
    %1152 = vector.shape_cast %1151 : vector<4x1xf32> to vector<1x4x1xf32>
    %1153 = vector.extract_strided_slice %1129 {offsets = [0, 3, 0], sizes = [2, 1, 256], strides = [1, 1, 1]} : vector<2x4x256xf32> to vector<2x1x256xf32>
    %1154 = vector.broadcast %1152 : vector<1x4x1xf32> to vector<2x4x256xf32>
    %1155 = vector.broadcast %1153 : vector<2x1x256xf32> to vector<2x4x256xf32>
    %1156 = arith.mulf %1154, %1155 : vector<2x4x256xf32>
    %1157 = arith.addf %1150, %1156 : vector<2x4x256xf32>
    %c241_i32_107 = arith.constant 241 : i32
    %1158 = tpu.dynamic_rotate %961 by %c241_i32_107 dim 2 : vector<2x4x256xf32>, i32 -> vector<2x4x256xf32>
    %cst_108 = arith.constant 0.000000e+00 : f32
    %1159 = vector.shape_cast %30 : vector<1x1x256xi1> to vector<1x1x256xi1>
    %1160 = vector.broadcast %1159 : vector<1x1x256xi1> to vector<2x4x256xi1>
    %1161 = vector.broadcast %cst_108 : f32 to vector<2x4x256xf32>
    %1162 = arith.select %1160, %1158, %1161 : vector<2x4x256xi1>, vector<2x4x256xf32>
    %1163 = vector.extract_strided_slice %963 {offsets = [0, 24], sizes = [4, 1], strides = [1, 1]} : vector<4x36xf32> to vector<4x1xf32>
    %1164 = vector.shape_cast %1163 : vector<4x1xf32> to vector<1x4x1xf32>
    %1165 = vector.extract_strided_slice %1162 {offsets = [0, 0, 0], sizes = [2, 1, 256], strides = [1, 1, 1]} : vector<2x4x256xf32> to vector<2x1x256xf32>
    %1166 = vector.broadcast %1164 : vector<1x4x1xf32> to vector<2x4x256xf32>
    %1167 = vector.broadcast %1165 : vector<2x1x256xf32> to vector<2x4x256xf32>
    %1168 = arith.mulf %1166, %1167 : vector<2x4x256xf32>
    %1169 = arith.addf %1157, %1168 : vector<2x4x256xf32>
    %1170 = vector.extract_strided_slice %963 {offsets = [0, 25], sizes = [4, 1], strides = [1, 1]} : vector<4x36xf32> to vector<4x1xf32>
    %1171 = vector.shape_cast %1170 : vector<4x1xf32> to vector<1x4x1xf32>
    %1172 = vector.extract_strided_slice %1162 {offsets = [0, 1, 0], sizes = [2, 1, 256], strides = [1, 1, 1]} : vector<2x4x256xf32> to vector<2x1x256xf32>
    %1173 = vector.broadcast %1171 : vector<1x4x1xf32> to vector<2x4x256xf32>
    %1174 = vector.broadcast %1172 : vector<2x1x256xf32> to vector<2x4x256xf32>
    %1175 = arith.mulf %1173, %1174 : vector<2x4x256xf32>
    %1176 = arith.addf %1169, %1175 : vector<2x4x256xf32>
    %1177 = vector.extract_strided_slice %963 {offsets = [0, 26], sizes = [4, 1], strides = [1, 1]} : vector<4x36xf32> to vector<4x1xf32>
    %1178 = vector.shape_cast %1177 : vector<4x1xf32> to vector<1x4x1xf32>
    %1179 = vector.extract_strided_slice %1162 {offsets = [0, 2, 0], sizes = [2, 1, 256], strides = [1, 1, 1]} : vector<2x4x256xf32> to vector<2x1x256xf32>
    %1180 = vector.broadcast %1178 : vector<1x4x1xf32> to vector<2x4x256xf32>
    %1181 = vector.broadcast %1179 : vector<2x1x256xf32> to vector<2x4x256xf32>
    %1182 = arith.mulf %1180, %1181 : vector<2x4x256xf32>
    %1183 = arith.addf %1176, %1182 : vector<2x4x256xf32>
    %1184 = vector.extract_strided_slice %963 {offsets = [0, 27], sizes = [4, 1], strides = [1, 1]} : vector<4x36xf32> to vector<4x1xf32>
    %1185 = vector.shape_cast %1184 : vector<4x1xf32> to vector<1x4x1xf32>
    %1186 = vector.extract_strided_slice %1162 {offsets = [0, 3, 0], sizes = [2, 1, 256], strides = [1, 1, 1]} : vector<2x4x256xf32> to vector<2x1x256xf32>
    %1187 = vector.broadcast %1185 : vector<1x4x1xf32> to vector<2x4x256xf32>
    %1188 = vector.broadcast %1186 : vector<2x1x256xf32> to vector<2x4x256xf32>
    %1189 = arith.mulf %1187, %1188 : vector<2x4x256xf32>
    %1190 = arith.addf %1183, %1189 : vector<2x4x256xf32>
    %c240_i32_109 = arith.constant 240 : i32
    %1191 = tpu.dynamic_rotate %961 by %c240_i32_109 dim 2 : vector<2x4x256xf32>, i32 -> vector<2x4x256xf32>
    %cst_110 = arith.constant 0.000000e+00 : f32
    %1192 = vector.shape_cast %35 : vector<1x1x256xi1> to vector<1x1x256xi1>
    %1193 = vector.broadcast %1192 : vector<1x1x256xi1> to vector<2x4x256xi1>
    %1194 = vector.broadcast %cst_110 : f32 to vector<2x4x256xf32>
    %1195 = arith.select %1193, %1191, %1194 : vector<2x4x256xi1>, vector<2x4x256xf32>
    %1196 = vector.extract_strided_slice %963 {offsets = [0, 28], sizes = [4, 1], strides = [1, 1]} : vector<4x36xf32> to vector<4x1xf32>
    %1197 = vector.shape_cast %1196 : vector<4x1xf32> to vector<1x4x1xf32>
    %1198 = vector.extract_strided_slice %1195 {offsets = [0, 0, 0], sizes = [2, 1, 256], strides = [1, 1, 1]} : vector<2x4x256xf32> to vector<2x1x256xf32>
    %1199 = vector.broadcast %1197 : vector<1x4x1xf32> to vector<2x4x256xf32>
    %1200 = vector.broadcast %1198 : vector<2x1x256xf32> to vector<2x4x256xf32>
    %1201 = arith.mulf %1199, %1200 : vector<2x4x256xf32>
    %1202 = arith.addf %1190, %1201 : vector<2x4x256xf32>
    %1203 = vector.extract_strided_slice %963 {offsets = [0, 29], sizes = [4, 1], strides = [1, 1]} : vector<4x36xf32> to vector<4x1xf32>
    %1204 = vector.shape_cast %1203 : vector<4x1xf32> to vector<1x4x1xf32>
    %1205 = vector.extract_strided_slice %1195 {offsets = [0, 1, 0], sizes = [2, 1, 256], strides = [1, 1, 1]} : vector<2x4x256xf32> to vector<2x1x256xf32>
    %1206 = vector.broadcast %1204 : vector<1x4x1xf32> to vector<2x4x256xf32>
    %1207 = vector.broadcast %1205 : vector<2x1x256xf32> to vector<2x4x256xf32>
    %1208 = arith.mulf %1206, %1207 : vector<2x4x256xf32>
    %1209 = arith.addf %1202, %1208 : vector<2x4x256xf32>
    %1210 = vector.extract_strided_slice %963 {offsets = [0, 30], sizes = [4, 1], strides = [1, 1]} : vector<4x36xf32> to vector<4x1xf32>
    %1211 = vector.shape_cast %1210 : vector<4x1xf32> to vector<1x4x1xf32>
    %1212 = vector.extract_strided_slice %1195 {offsets = [0, 2, 0], sizes = [2, 1, 256], strides = [1, 1, 1]} : vector<2x4x256xf32> to vector<2x1x256xf32>
    %1213 = vector.broadcast %1211 : vector<1x4x1xf32> to vector<2x4x256xf32>
    %1214 = vector.broadcast %1212 : vector<2x1x256xf32> to vector<2x4x256xf32>
    %1215 = arith.mulf %1213, %1214 : vector<2x4x256xf32>
    %1216 = arith.addf %1209, %1215 : vector<2x4x256xf32>
    %1217 = vector.extract_strided_slice %963 {offsets = [0, 31], sizes = [4, 1], strides = [1, 1]} : vector<4x36xf32> to vector<4x1xf32>
    %1218 = vector.shape_cast %1217 : vector<4x1xf32> to vector<1x4x1xf32>
    %1219 = vector.extract_strided_slice %1195 {offsets = [0, 3, 0], sizes = [2, 1, 256], strides = [1, 1, 1]} : vector<2x4x256xf32> to vector<2x1x256xf32>
    %1220 = vector.broadcast %1218 : vector<1x4x1xf32> to vector<2x4x256xf32>
    %1221 = vector.broadcast %1219 : vector<2x1x256xf32> to vector<2x4x256xf32>
    %1222 = arith.mulf %1220, %1221 : vector<2x4x256xf32>
    %1223 = arith.addf %1216, %1222 : vector<2x4x256xf32>
    %c239_i32_111 = arith.constant 239 : i32
    %1224 = tpu.dynamic_rotate %961 by %c239_i32_111 dim 2 : vector<2x4x256xf32>, i32 -> vector<2x4x256xf32>
    %cst_112 = arith.constant 0.000000e+00 : f32
    %1225 = vector.shape_cast %40 : vector<1x1x256xi1> to vector<1x1x256xi1>
    %1226 = vector.broadcast %1225 : vector<1x1x256xi1> to vector<2x4x256xi1>
    %1227 = vector.broadcast %cst_112 : f32 to vector<2x4x256xf32>
    %1228 = arith.select %1226, %1224, %1227 : vector<2x4x256xi1>, vector<2x4x256xf32>
    %1229 = vector.extract_strided_slice %963 {offsets = [0, 32], sizes = [4, 1], strides = [1, 1]} : vector<4x36xf32> to vector<4x1xf32>
    %1230 = vector.shape_cast %1229 : vector<4x1xf32> to vector<1x4x1xf32>
    %1231 = vector.extract_strided_slice %1228 {offsets = [0, 0, 0], sizes = [2, 1, 256], strides = [1, 1, 1]} : vector<2x4x256xf32> to vector<2x1x256xf32>
    %1232 = vector.broadcast %1230 : vector<1x4x1xf32> to vector<2x4x256xf32>
    %1233 = vector.broadcast %1231 : vector<2x1x256xf32> to vector<2x4x256xf32>
    %1234 = arith.mulf %1232, %1233 : vector<2x4x256xf32>
    %1235 = arith.addf %1223, %1234 : vector<2x4x256xf32>
    %1236 = vector.extract_strided_slice %963 {offsets = [0, 33], sizes = [4, 1], strides = [1, 1]} : vector<4x36xf32> to vector<4x1xf32>
    %1237 = vector.shape_cast %1236 : vector<4x1xf32> to vector<1x4x1xf32>
    %1238 = vector.extract_strided_slice %1228 {offsets = [0, 1, 0], sizes = [2, 1, 256], strides = [1, 1, 1]} : vector<2x4x256xf32> to vector<2x1x256xf32>
    %1239 = vector.broadcast %1237 : vector<1x4x1xf32> to vector<2x4x256xf32>
    %1240 = vector.broadcast %1238 : vector<2x1x256xf32> to vector<2x4x256xf32>
    %1241 = arith.mulf %1239, %1240 : vector<2x4x256xf32>
    %1242 = arith.addf %1235, %1241 : vector<2x4x256xf32>
    %1243 = vector.extract_strided_slice %963 {offsets = [0, 34], sizes = [4, 1], strides = [1, 1]} : vector<4x36xf32> to vector<4x1xf32>
    %1244 = vector.shape_cast %1243 : vector<4x1xf32> to vector<1x4x1xf32>
    %1245 = vector.extract_strided_slice %1228 {offsets = [0, 2, 0], sizes = [2, 1, 256], strides = [1, 1, 1]} : vector<2x4x256xf32> to vector<2x1x256xf32>
    %1246 = vector.broadcast %1244 : vector<1x4x1xf32> to vector<2x4x256xf32>
    %1247 = vector.broadcast %1245 : vector<2x1x256xf32> to vector<2x4x256xf32>
    %1248 = arith.mulf %1246, %1247 : vector<2x4x256xf32>
    %1249 = arith.addf %1242, %1248 : vector<2x4x256xf32>
    %1250 = vector.extract_strided_slice %963 {offsets = [0, 35], sizes = [4, 1], strides = [1, 1]} : vector<4x36xf32> to vector<4x1xf32>
    %1251 = vector.shape_cast %1250 : vector<4x1xf32> to vector<1x4x1xf32>
    %1252 = vector.extract_strided_slice %1228 {offsets = [0, 3, 0], sizes = [2, 1, 256], strides = [1, 1, 1]} : vector<2x4x256xf32> to vector<2x1x256xf32>
    %1253 = vector.broadcast %1251 : vector<1x4x1xf32> to vector<2x4x256xf32>
    %1254 = vector.broadcast %1252 : vector<2x1x256xf32> to vector<2x4x256xf32>
    %1255 = arith.mulf %1253, %1254 : vector<2x4x256xf32>
    %1256 = arith.addf %1249, %1255 : vector<2x4x256xf32>
    %cst_113 = arith.constant 0.000000e+00 : f32
    %1257 = vector.broadcast %cst_113 : f32 to vector<2x4x256xf32>
    %1258 = arith.maximumf %1256, %1257 : vector<2x4x256xf32>
    %cst_114 = arith.constant dense<0.000000e+00> : vector<2x4xf32>
    %1259 = vector.multi_reduction <add>, %1258, %cst_114 [2] : vector<2x4x256xf32> to vector<2x4xf32>
    %1260 = vector.shape_cast %1259 : vector<2x4xf32> to vector<2x4x1xf32>
    %cst_115 = arith.constant 2.560000e+02 : f32
    %1261 = vector.broadcast %cst_115 : f32 to vector<2x4x1xf32>
    %1262 = arith.divf %1260, %1261 : vector<2x4x1xf32>
    %c1_116 = arith.constant 1 : index
    %c0_117 = arith.constant 0 : index
    %c0_118 = arith.constant 0 : index
    %1263 = vector.load %arg3[%c1_116, %c0_117, %c0_118] : memref<2x4x4xf32, #tpu.memory_space<vmem>>, vector<1x4x4xf32>
    %1264 = vector.shape_cast %1263 : vector<1x4x4xf32> to vector<4x4xf32>
    %1265 = vector.shape_cast %1264 : vector<4x4xf32> to vector<1x4x4xf32>
    %1266 = vector.broadcast %1265 : vector<1x4x4xf32> to vector<2x4x4xf32>
    %1267 = vector.broadcast %1262 : vector<2x4x1xf32> to vector<2x4x4xf32>
    %1268 = arith.mulf %1266, %1267 : vector<2x4x4xf32>
    %cst_119 = arith.constant dense<0.000000e+00> : vector<2x4xf32>
    %1269 = vector.multi_reduction <add>, %1268, %cst_119 [1] : vector<2x4x4xf32> to vector<2x4xf32>
    %1270 = vector.shape_cast %1269 : vector<2x4xf32> to vector<2x1x4xf32>
    %cst_120 = arith.constant 0.000000e+00 : f32
    %1271 = vector.broadcast %cst_120 : f32 to vector<2x1x4xf32>
    %1272 = arith.maximumf %1270, %1271 : vector<2x1x4xf32>
    %c1_121 = arith.constant 1 : index
    %c0_122 = arith.constant 0 : index
    %c0_123 = arith.constant 0 : index
    %1273 = vector.load %arg4[%c1_121, %c0_122, %c0_123] : memref<2x4x4xf32, #tpu.memory_space<vmem>>, vector<1x4x4xf32>
    %1274 = vector.shape_cast %1273 : vector<1x4x4xf32> to vector<4x4xf32>
    %1275 = vector.shape_cast %1274 : vector<4x4xf32> to vector<1x4x4xf32>
    %1276 = vector.broadcast %1275 : vector<1x4x4xf32> to vector<2x4x4xf32>
    %1277 = vector.broadcast %1272 : vector<2x1x4xf32> to vector<2x4x4xf32>
    %1278 = arith.mulf %1276, %1277 : vector<2x4x4xf32>
    %cst_124 = arith.constant dense<0.000000e+00> : vector<2x4xf32>
    %1279 = vector.multi_reduction <add>, %1278, %cst_124 [2] : vector<2x4x4xf32> to vector<2x4xf32>
    %1280 = vector.shape_cast %1279 : vector<2x4xf32> to vector<2x4x1xf32>
    %1281 = arith.negf %1280 : vector<2x4x1xf32>
    %1282 = math.exp %1281 : vector<2x4x1xf32>
    %cst_125 = arith.constant 1.000000e+00 : f32
    %1283 = vector.broadcast %cst_125 : f32 to vector<2x4x1xf32>
    %1284 = arith.addf %1283, %1282 : vector<2x4x1xf32>
    %1285 = arith.divf %1283, %1284 : vector<2x4x1xf32>
    %1286 = vector.broadcast %1285 : vector<2x4x1xf32> to vector<2x4x256xf32>
    %1287 = arith.mulf %1258, %1286 : vector<2x4x256xf32>
    %1288 = arith.addf %1287, %664 : vector<2x4x256xf32>
    %c4 = arith.constant 4 : index
    %c0_126 = arith.constant 0 : index
    %c0_127 = arith.constant 0 : index
    %1289 = vector.load %arg2[%c4, %c0_126, %c0_127] : memref<5x4x36xf32, #tpu.memory_space<vmem>>, vector<1x4x36xf32>
    %1290 = vector.shape_cast %1289 : vector<1x4x36xf32> to vector<4x36xf32>
    %cst_128 = arith.constant 0.000000e+00 : f32
    %1291 = vector.broadcast %cst_128 : f32 to vector<2x4x256xf32>
    %c17_i32_129 = arith.constant 17 : i32
    %1292 = tpu.dynamic_rotate %1288 by %c17_i32_129 dim 2 : vector<2x4x256xf32>, i32 -> vector<2x4x256xf32>
    %cst_130 = arith.constant 0.000000e+00 : f32
    %1293 = vector.shape_cast %5 : vector<1x1x256xi1> to vector<1x1x256xi1>
    %1294 = vector.broadcast %1293 : vector<1x1x256xi1> to vector<2x4x256xi1>
    %1295 = vector.broadcast %cst_130 : f32 to vector<2x4x256xf32>
    %1296 = arith.select %1294, %1292, %1295 : vector<2x4x256xi1>, vector<2x4x256xf32>
    %1297 = vector.extract_strided_slice %1290 {offsets = [0, 0], sizes = [4, 1], strides = [1, 1]} : vector<4x36xf32> to vector<4x1xf32>
    %1298 = vector.shape_cast %1297 : vector<4x1xf32> to vector<1x4x1xf32>
    %1299 = vector.extract_strided_slice %1296 {offsets = [0, 0, 0], sizes = [2, 1, 256], strides = [1, 1, 1]} : vector<2x4x256xf32> to vector<2x1x256xf32>
    %1300 = vector.broadcast %1298 : vector<1x4x1xf32> to vector<2x4x256xf32>
    %1301 = vector.broadcast %1299 : vector<2x1x256xf32> to vector<2x4x256xf32>
    %1302 = arith.mulf %1300, %1301 : vector<2x4x256xf32>
    %1303 = arith.addf %1291, %1302 : vector<2x4x256xf32>
    %1304 = vector.extract_strided_slice %1290 {offsets = [0, 1], sizes = [4, 1], strides = [1, 1]} : vector<4x36xf32> to vector<4x1xf32>
    %1305 = vector.shape_cast %1304 : vector<4x1xf32> to vector<1x4x1xf32>
    %1306 = vector.extract_strided_slice %1296 {offsets = [0, 1, 0], sizes = [2, 1, 256], strides = [1, 1, 1]} : vector<2x4x256xf32> to vector<2x1x256xf32>
    %1307 = vector.broadcast %1305 : vector<1x4x1xf32> to vector<2x4x256xf32>
    %1308 = vector.broadcast %1306 : vector<2x1x256xf32> to vector<2x4x256xf32>
    %1309 = arith.mulf %1307, %1308 : vector<2x4x256xf32>
    %1310 = arith.addf %1303, %1309 : vector<2x4x256xf32>
    %1311 = vector.extract_strided_slice %1290 {offsets = [0, 2], sizes = [4, 1], strides = [1, 1]} : vector<4x36xf32> to vector<4x1xf32>
    %1312 = vector.shape_cast %1311 : vector<4x1xf32> to vector<1x4x1xf32>
    %1313 = vector.extract_strided_slice %1296 {offsets = [0, 2, 0], sizes = [2, 1, 256], strides = [1, 1, 1]} : vector<2x4x256xf32> to vector<2x1x256xf32>
    %1314 = vector.broadcast %1312 : vector<1x4x1xf32> to vector<2x4x256xf32>
    %1315 = vector.broadcast %1313 : vector<2x1x256xf32> to vector<2x4x256xf32>
    %1316 = arith.mulf %1314, %1315 : vector<2x4x256xf32>
    %1317 = arith.addf %1310, %1316 : vector<2x4x256xf32>
    %1318 = vector.extract_strided_slice %1290 {offsets = [0, 3], sizes = [4, 1], strides = [1, 1]} : vector<4x36xf32> to vector<4x1xf32>
    %1319 = vector.shape_cast %1318 : vector<4x1xf32> to vector<1x4x1xf32>
    %1320 = vector.extract_strided_slice %1296 {offsets = [0, 3, 0], sizes = [2, 1, 256], strides = [1, 1, 1]} : vector<2x4x256xf32> to vector<2x1x256xf32>
    %1321 = vector.broadcast %1319 : vector<1x4x1xf32> to vector<2x4x256xf32>
    %1322 = vector.broadcast %1320 : vector<2x1x256xf32> to vector<2x4x256xf32>
    %1323 = arith.mulf %1321, %1322 : vector<2x4x256xf32>
    %1324 = arith.addf %1317, %1323 : vector<2x4x256xf32>
    %c16_i32_131 = arith.constant 16 : i32
    %1325 = tpu.dynamic_rotate %1288 by %c16_i32_131 dim 2 : vector<2x4x256xf32>, i32 -> vector<2x4x256xf32>
    %cst_132 = arith.constant 0.000000e+00 : f32
    %1326 = vector.shape_cast %10 : vector<1x1x256xi1> to vector<1x1x256xi1>
    %1327 = vector.broadcast %1326 : vector<1x1x256xi1> to vector<2x4x256xi1>
    %1328 = vector.broadcast %cst_132 : f32 to vector<2x4x256xf32>
    %1329 = arith.select %1327, %1325, %1328 : vector<2x4x256xi1>, vector<2x4x256xf32>
    %1330 = vector.extract_strided_slice %1290 {offsets = [0, 4], sizes = [4, 1], strides = [1, 1]} : vector<4x36xf32> to vector<4x1xf32>
    %1331 = vector.shape_cast %1330 : vector<4x1xf32> to vector<1x4x1xf32>
    %1332 = vector.extract_strided_slice %1329 {offsets = [0, 0, 0], sizes = [2, 1, 256], strides = [1, 1, 1]} : vector<2x4x256xf32> to vector<2x1x256xf32>
    %1333 = vector.broadcast %1331 : vector<1x4x1xf32> to vector<2x4x256xf32>
    %1334 = vector.broadcast %1332 : vector<2x1x256xf32> to vector<2x4x256xf32>
    %1335 = arith.mulf %1333, %1334 : vector<2x4x256xf32>
    %1336 = arith.addf %1324, %1335 : vector<2x4x256xf32>
    %1337 = vector.extract_strided_slice %1290 {offsets = [0, 5], sizes = [4, 1], strides = [1, 1]} : vector<4x36xf32> to vector<4x1xf32>
    %1338 = vector.shape_cast %1337 : vector<4x1xf32> to vector<1x4x1xf32>
    %1339 = vector.extract_strided_slice %1329 {offsets = [0, 1, 0], sizes = [2, 1, 256], strides = [1, 1, 1]} : vector<2x4x256xf32> to vector<2x1x256xf32>
    %1340 = vector.broadcast %1338 : vector<1x4x1xf32> to vector<2x4x256xf32>
    %1341 = vector.broadcast %1339 : vector<2x1x256xf32> to vector<2x4x256xf32>
    %1342 = arith.mulf %1340, %1341 : vector<2x4x256xf32>
    %1343 = arith.addf %1336, %1342 : vector<2x4x256xf32>
    %1344 = vector.extract_strided_slice %1290 {offsets = [0, 6], sizes = [4, 1], strides = [1, 1]} : vector<4x36xf32> to vector<4x1xf32>
    %1345 = vector.shape_cast %1344 : vector<4x1xf32> to vector<1x4x1xf32>
    %1346 = vector.extract_strided_slice %1329 {offsets = [0, 2, 0], sizes = [2, 1, 256], strides = [1, 1, 1]} : vector<2x4x256xf32> to vector<2x1x256xf32>
    %1347 = vector.broadcast %1345 : vector<1x4x1xf32> to vector<2x4x256xf32>
    %1348 = vector.broadcast %1346 : vector<2x1x256xf32> to vector<2x4x256xf32>
    %1349 = arith.mulf %1347, %1348 : vector<2x4x256xf32>
    %1350 = arith.addf %1343, %1349 : vector<2x4x256xf32>
    %1351 = vector.extract_strided_slice %1290 {offsets = [0, 7], sizes = [4, 1], strides = [1, 1]} : vector<4x36xf32> to vector<4x1xf32>
    %1352 = vector.shape_cast %1351 : vector<4x1xf32> to vector<1x4x1xf32>
    %1353 = vector.extract_strided_slice %1329 {offsets = [0, 3, 0], sizes = [2, 1, 256], strides = [1, 1, 1]} : vector<2x4x256xf32> to vector<2x1x256xf32>
    %1354 = vector.broadcast %1352 : vector<1x4x1xf32> to vector<2x4x256xf32>
    %1355 = vector.broadcast %1353 : vector<2x1x256xf32> to vector<2x4x256xf32>
    %1356 = arith.mulf %1354, %1355 : vector<2x4x256xf32>
    %1357 = arith.addf %1350, %1356 : vector<2x4x256xf32>
    %c15_i32_133 = arith.constant 15 : i32
    %1358 = tpu.dynamic_rotate %1288 by %c15_i32_133 dim 2 : vector<2x4x256xf32>, i32 -> vector<2x4x256xf32>
    %cst_134 = arith.constant 0.000000e+00 : f32
    %1359 = vector.shape_cast %15 : vector<1x1x256xi1> to vector<1x1x256xi1>
    %1360 = vector.broadcast %1359 : vector<1x1x256xi1> to vector<2x4x256xi1>
    %1361 = vector.broadcast %cst_134 : f32 to vector<2x4x256xf32>
    %1362 = arith.select %1360, %1358, %1361 : vector<2x4x256xi1>, vector<2x4x256xf32>
    %1363 = vector.extract_strided_slice %1290 {offsets = [0, 8], sizes = [4, 1], strides = [1, 1]} : vector<4x36xf32> to vector<4x1xf32>
    %1364 = vector.shape_cast %1363 : vector<4x1xf32> to vector<1x4x1xf32>
    %1365 = vector.extract_strided_slice %1362 {offsets = [0, 0, 0], sizes = [2, 1, 256], strides = [1, 1, 1]} : vector<2x4x256xf32> to vector<2x1x256xf32>
    %1366 = vector.broadcast %1364 : vector<1x4x1xf32> to vector<2x4x256xf32>
    %1367 = vector.broadcast %1365 : vector<2x1x256xf32> to vector<2x4x256xf32>
    %1368 = arith.mulf %1366, %1367 : vector<2x4x256xf32>
    %1369 = arith.addf %1357, %1368 : vector<2x4x256xf32>
    %1370 = vector.extract_strided_slice %1290 {offsets = [0, 9], sizes = [4, 1], strides = [1, 1]} : vector<4x36xf32> to vector<4x1xf32>
    %1371 = vector.shape_cast %1370 : vector<4x1xf32> to vector<1x4x1xf32>
    %1372 = vector.extract_strided_slice %1362 {offsets = [0, 1, 0], sizes = [2, 1, 256], strides = [1, 1, 1]} : vector<2x4x256xf32> to vector<2x1x256xf32>
    %1373 = vector.broadcast %1371 : vector<1x4x1xf32> to vector<2x4x256xf32>
    %1374 = vector.broadcast %1372 : vector<2x1x256xf32> to vector<2x4x256xf32>
    %1375 = arith.mulf %1373, %1374 : vector<2x4x256xf32>
    %1376 = arith.addf %1369, %1375 : vector<2x4x256xf32>
    %1377 = vector.extract_strided_slice %1290 {offsets = [0, 10], sizes = [4, 1], strides = [1, 1]} : vector<4x36xf32> to vector<4x1xf32>
    %1378 = vector.shape_cast %1377 : vector<4x1xf32> to vector<1x4x1xf32>
    %1379 = vector.extract_strided_slice %1362 {offsets = [0, 2, 0], sizes = [2, 1, 256], strides = [1, 1, 1]} : vector<2x4x256xf32> to vector<2x1x256xf32>
    %1380 = vector.broadcast %1378 : vector<1x4x1xf32> to vector<2x4x256xf32>
    %1381 = vector.broadcast %1379 : vector<2x1x256xf32> to vector<2x4x256xf32>
    %1382 = arith.mulf %1380, %1381 : vector<2x4x256xf32>
    %1383 = arith.addf %1376, %1382 : vector<2x4x256xf32>
    %1384 = vector.extract_strided_slice %1290 {offsets = [0, 11], sizes = [4, 1], strides = [1, 1]} : vector<4x36xf32> to vector<4x1xf32>
    %1385 = vector.shape_cast %1384 : vector<4x1xf32> to vector<1x4x1xf32>
    %1386 = vector.extract_strided_slice %1362 {offsets = [0, 3, 0], sizes = [2, 1, 256], strides = [1, 1, 1]} : vector<2x4x256xf32> to vector<2x1x256xf32>
    %1387 = vector.broadcast %1385 : vector<1x4x1xf32> to vector<2x4x256xf32>
    %1388 = vector.broadcast %1386 : vector<2x1x256xf32> to vector<2x4x256xf32>
    %1389 = arith.mulf %1387, %1388 : vector<2x4x256xf32>
    %1390 = arith.addf %1383, %1389 : vector<2x4x256xf32>
    %c1_i32_135 = arith.constant 1 : i32
    %1391 = tpu.dynamic_rotate %1288 by %c1_i32_135 dim 2 : vector<2x4x256xf32>, i32 -> vector<2x4x256xf32>
    %cst_136 = arith.constant 0.000000e+00 : f32
    %1392 = vector.shape_cast %20 : vector<1x1x256xi1> to vector<1x1x256xi1>
    %1393 = vector.broadcast %1392 : vector<1x1x256xi1> to vector<2x4x256xi1>
    %1394 = vector.broadcast %cst_136 : f32 to vector<2x4x256xf32>
    %1395 = arith.select %1393, %1391, %1394 : vector<2x4x256xi1>, vector<2x4x256xf32>
    %1396 = vector.extract_strided_slice %1290 {offsets = [0, 12], sizes = [4, 1], strides = [1, 1]} : vector<4x36xf32> to vector<4x1xf32>
    %1397 = vector.shape_cast %1396 : vector<4x1xf32> to vector<1x4x1xf32>
    %1398 = vector.extract_strided_slice %1395 {offsets = [0, 0, 0], sizes = [2, 1, 256], strides = [1, 1, 1]} : vector<2x4x256xf32> to vector<2x1x256xf32>
    %1399 = vector.broadcast %1397 : vector<1x4x1xf32> to vector<2x4x256xf32>
    %1400 = vector.broadcast %1398 : vector<2x1x256xf32> to vector<2x4x256xf32>
    %1401 = arith.mulf %1399, %1400 : vector<2x4x256xf32>
    %1402 = arith.addf %1390, %1401 : vector<2x4x256xf32>
    %1403 = vector.extract_strided_slice %1290 {offsets = [0, 13], sizes = [4, 1], strides = [1, 1]} : vector<4x36xf32> to vector<4x1xf32>
    %1404 = vector.shape_cast %1403 : vector<4x1xf32> to vector<1x4x1xf32>
    %1405 = vector.extract_strided_slice %1395 {offsets = [0, 1, 0], sizes = [2, 1, 256], strides = [1, 1, 1]} : vector<2x4x256xf32> to vector<2x1x256xf32>
    %1406 = vector.broadcast %1404 : vector<1x4x1xf32> to vector<2x4x256xf32>
    %1407 = vector.broadcast %1405 : vector<2x1x256xf32> to vector<2x4x256xf32>
    %1408 = arith.mulf %1406, %1407 : vector<2x4x256xf32>
    %1409 = arith.addf %1402, %1408 : vector<2x4x256xf32>
    %1410 = vector.extract_strided_slice %1290 {offsets = [0, 14], sizes = [4, 1], strides = [1, 1]} : vector<4x36xf32> to vector<4x1xf32>
    %1411 = vector.shape_cast %1410 : vector<4x1xf32> to vector<1x4x1xf32>
    %1412 = vector.extract_strided_slice %1395 {offsets = [0, 2, 0], sizes = [2, 1, 256], strides = [1, 1, 1]} : vector<2x4x256xf32> to vector<2x1x256xf32>
    %1413 = vector.broadcast %1411 : vector<1x4x1xf32> to vector<2x4x256xf32>
    %1414 = vector.broadcast %1412 : vector<2x1x256xf32> to vector<2x4x256xf32>
    %1415 = arith.mulf %1413, %1414 : vector<2x4x256xf32>
    %1416 = arith.addf %1409, %1415 : vector<2x4x256xf32>
    %1417 = vector.extract_strided_slice %1290 {offsets = [0, 15], sizes = [4, 1], strides = [1, 1]} : vector<4x36xf32> to vector<4x1xf32>
    %1418 = vector.shape_cast %1417 : vector<4x1xf32> to vector<1x4x1xf32>
    %1419 = vector.extract_strided_slice %1395 {offsets = [0, 3, 0], sizes = [2, 1, 256], strides = [1, 1, 1]} : vector<2x4x256xf32> to vector<2x1x256xf32>
    %1420 = vector.broadcast %1418 : vector<1x4x1xf32> to vector<2x4x256xf32>
    %1421 = vector.broadcast %1419 : vector<2x1x256xf32> to vector<2x4x256xf32>
    %1422 = arith.mulf %1420, %1421 : vector<2x4x256xf32>
    %1423 = arith.addf %1416, %1422 : vector<2x4x256xf32>
    %1424 = vector.extract_strided_slice %1290 {offsets = [0, 16], sizes = [4, 1], strides = [1, 1]} : vector<4x36xf32> to vector<4x1xf32>
    %1425 = vector.shape_cast %1424 : vector<4x1xf32> to vector<1x4x1xf32>
    %1426 = vector.extract_strided_slice %1288 {offsets = [0, 0, 0], sizes = [2, 1, 256], strides = [1, 1, 1]} : vector<2x4x256xf32> to vector<2x1x256xf32>
    %1427 = vector.broadcast %1425 : vector<1x4x1xf32> to vector<2x4x256xf32>
    %1428 = vector.broadcast %1426 : vector<2x1x256xf32> to vector<2x4x256xf32>
    %1429 = arith.mulf %1427, %1428 : vector<2x4x256xf32>
    %1430 = arith.addf %1423, %1429 : vector<2x4x256xf32>
    %1431 = vector.extract_strided_slice %1290 {offsets = [0, 17], sizes = [4, 1], strides = [1, 1]} : vector<4x36xf32> to vector<4x1xf32>
    %1432 = vector.shape_cast %1431 : vector<4x1xf32> to vector<1x4x1xf32>
    %1433 = vector.extract_strided_slice %1288 {offsets = [0, 1, 0], sizes = [2, 1, 256], strides = [1, 1, 1]} : vector<2x4x256xf32> to vector<2x1x256xf32>
    %1434 = vector.broadcast %1432 : vector<1x4x1xf32> to vector<2x4x256xf32>
    %1435 = vector.broadcast %1433 : vector<2x1x256xf32> to vector<2x4x256xf32>
    %1436 = arith.mulf %1434, %1435 : vector<2x4x256xf32>
    %1437 = arith.addf %1430, %1436 : vector<2x4x256xf32>
    %1438 = vector.extract_strided_slice %1290 {offsets = [0, 18], sizes = [4, 1], strides = [1, 1]} : vector<4x36xf32> to vector<4x1xf32>
    %1439 = vector.shape_cast %1438 : vector<4x1xf32> to vector<1x4x1xf32>
    %1440 = vector.extract_strided_slice %1288 {offsets = [0, 2, 0], sizes = [2, 1, 256], strides = [1, 1, 1]} : vector<2x4x256xf32> to vector<2x1x256xf32>
    %1441 = vector.broadcast %1439 : vector<1x4x1xf32> to vector<2x4x256xf32>
    %1442 = vector.broadcast %1440 : vector<2x1x256xf32> to vector<2x4x256xf32>
    %1443 = arith.mulf %1441, %1442 : vector<2x4x256xf32>
    %1444 = arith.addf %1437, %1443 : vector<2x4x256xf32>
    %1445 = vector.extract_strided_slice %1290 {offsets = [0, 19], sizes = [4, 1], strides = [1, 1]} : vector<4x36xf32> to vector<4x1xf32>
    %1446 = vector.shape_cast %1445 : vector<4x1xf32> to vector<1x4x1xf32>
    %1447 = vector.extract_strided_slice %1288 {offsets = [0, 3, 0], sizes = [2, 1, 256], strides = [1, 1, 1]} : vector<2x4x256xf32> to vector<2x1x256xf32>
    %1448 = vector.broadcast %1446 : vector<1x4x1xf32> to vector<2x4x256xf32>
    %1449 = vector.broadcast %1447 : vector<2x1x256xf32> to vector<2x4x256xf32>
    %1450 = arith.mulf %1448, %1449 : vector<2x4x256xf32>
    %1451 = arith.addf %1444, %1450 : vector<2x4x256xf32>
    %c255_i32_137 = arith.constant 255 : i32
    %1452 = tpu.dynamic_rotate %1288 by %c255_i32_137 dim 2 : vector<2x4x256xf32>, i32 -> vector<2x4x256xf32>
    %cst_138 = arith.constant 0.000000e+00 : f32
    %1453 = vector.shape_cast %25 : vector<1x1x256xi1> to vector<1x1x256xi1>
    %1454 = vector.broadcast %1453 : vector<1x1x256xi1> to vector<2x4x256xi1>
    %1455 = vector.broadcast %cst_138 : f32 to vector<2x4x256xf32>
    %1456 = arith.select %1454, %1452, %1455 : vector<2x4x256xi1>, vector<2x4x256xf32>
    %1457 = vector.extract_strided_slice %1290 {offsets = [0, 20], sizes = [4, 1], strides = [1, 1]} : vector<4x36xf32> to vector<4x1xf32>
    %1458 = vector.shape_cast %1457 : vector<4x1xf32> to vector<1x4x1xf32>
    %1459 = vector.extract_strided_slice %1456 {offsets = [0, 0, 0], sizes = [2, 1, 256], strides = [1, 1, 1]} : vector<2x4x256xf32> to vector<2x1x256xf32>
    %1460 = vector.broadcast %1458 : vector<1x4x1xf32> to vector<2x4x256xf32>
    %1461 = vector.broadcast %1459 : vector<2x1x256xf32> to vector<2x4x256xf32>
    %1462 = arith.mulf %1460, %1461 : vector<2x4x256xf32>
    %1463 = arith.addf %1451, %1462 : vector<2x4x256xf32>
    %1464 = vector.extract_strided_slice %1290 {offsets = [0, 21], sizes = [4, 1], strides = [1, 1]} : vector<4x36xf32> to vector<4x1xf32>
    %1465 = vector.shape_cast %1464 : vector<4x1xf32> to vector<1x4x1xf32>
    %1466 = vector.extract_strided_slice %1456 {offsets = [0, 1, 0], sizes = [2, 1, 256], strides = [1, 1, 1]} : vector<2x4x256xf32> to vector<2x1x256xf32>
    %1467 = vector.broadcast %1465 : vector<1x4x1xf32> to vector<2x4x256xf32>
    %1468 = vector.broadcast %1466 : vector<2x1x256xf32> to vector<2x4x256xf32>
    %1469 = arith.mulf %1467, %1468 : vector<2x4x256xf32>
    %1470 = arith.addf %1463, %1469 : vector<2x4x256xf32>
    %1471 = vector.extract_strided_slice %1290 {offsets = [0, 22], sizes = [4, 1], strides = [1, 1]} : vector<4x36xf32> to vector<4x1xf32>
    %1472 = vector.shape_cast %1471 : vector<4x1xf32> to vector<1x4x1xf32>
    %1473 = vector.extract_strided_slice %1456 {offsets = [0, 2, 0], sizes = [2, 1, 256], strides = [1, 1, 1]} : vector<2x4x256xf32> to vector<2x1x256xf32>
    %1474 = vector.broadcast %1472 : vector<1x4x1xf32> to vector<2x4x256xf32>
    %1475 = vector.broadcast %1473 : vector<2x1x256xf32> to vector<2x4x256xf32>
    %1476 = arith.mulf %1474, %1475 : vector<2x4x256xf32>
    %1477 = arith.addf %1470, %1476 : vector<2x4x256xf32>
    %1478 = vector.extract_strided_slice %1290 {offsets = [0, 23], sizes = [4, 1], strides = [1, 1]} : vector<4x36xf32> to vector<4x1xf32>
    %1479 = vector.shape_cast %1478 : vector<4x1xf32> to vector<1x4x1xf32>
    %1480 = vector.extract_strided_slice %1456 {offsets = [0, 3, 0], sizes = [2, 1, 256], strides = [1, 1, 1]} : vector<2x4x256xf32> to vector<2x1x256xf32>
    %1481 = vector.broadcast %1479 : vector<1x4x1xf32> to vector<2x4x256xf32>
    %1482 = vector.broadcast %1480 : vector<2x1x256xf32> to vector<2x4x256xf32>
    %1483 = arith.mulf %1481, %1482 : vector<2x4x256xf32>
    %1484 = arith.addf %1477, %1483 : vector<2x4x256xf32>
    %c241_i32_139 = arith.constant 241 : i32
    %1485 = tpu.dynamic_rotate %1288 by %c241_i32_139 dim 2 : vector<2x4x256xf32>, i32 -> vector<2x4x256xf32>
    %cst_140 = arith.constant 0.000000e+00 : f32
    %1486 = vector.shape_cast %30 : vector<1x1x256xi1> to vector<1x1x256xi1>
    %1487 = vector.broadcast %1486 : vector<1x1x256xi1> to vector<2x4x256xi1>
    %1488 = vector.broadcast %cst_140 : f32 to vector<2x4x256xf32>
    %1489 = arith.select %1487, %1485, %1488 : vector<2x4x256xi1>, vector<2x4x256xf32>
    %1490 = vector.extract_strided_slice %1290 {offsets = [0, 24], sizes = [4, 1], strides = [1, 1]} : vector<4x36xf32> to vector<4x1xf32>
    %1491 = vector.shape_cast %1490 : vector<4x1xf32> to vector<1x4x1xf32>
    %1492 = vector.extract_strided_slice %1489 {offsets = [0, 0, 0], sizes = [2, 1, 256], strides = [1, 1, 1]} : vector<2x4x256xf32> to vector<2x1x256xf32>
    %1493 = vector.broadcast %1491 : vector<1x4x1xf32> to vector<2x4x256xf32>
    %1494 = vector.broadcast %1492 : vector<2x1x256xf32> to vector<2x4x256xf32>
    %1495 = arith.mulf %1493, %1494 : vector<2x4x256xf32>
    %1496 = arith.addf %1484, %1495 : vector<2x4x256xf32>
    %1497 = vector.extract_strided_slice %1290 {offsets = [0, 25], sizes = [4, 1], strides = [1, 1]} : vector<4x36xf32> to vector<4x1xf32>
    %1498 = vector.shape_cast %1497 : vector<4x1xf32> to vector<1x4x1xf32>
    %1499 = vector.extract_strided_slice %1489 {offsets = [0, 1, 0], sizes = [2, 1, 256], strides = [1, 1, 1]} : vector<2x4x256xf32> to vector<2x1x256xf32>
    %1500 = vector.broadcast %1498 : vector<1x4x1xf32> to vector<2x4x256xf32>
    %1501 = vector.broadcast %1499 : vector<2x1x256xf32> to vector<2x4x256xf32>
    %1502 = arith.mulf %1500, %1501 : vector<2x4x256xf32>
    %1503 = arith.addf %1496, %1502 : vector<2x4x256xf32>
    %1504 = vector.extract_strided_slice %1290 {offsets = [0, 26], sizes = [4, 1], strides = [1, 1]} : vector<4x36xf32> to vector<4x1xf32>
    %1505 = vector.shape_cast %1504 : vector<4x1xf32> to vector<1x4x1xf32>
    %1506 = vector.extract_strided_slice %1489 {offsets = [0, 2, 0], sizes = [2, 1, 256], strides = [1, 1, 1]} : vector<2x4x256xf32> to vector<2x1x256xf32>
    %1507 = vector.broadcast %1505 : vector<1x4x1xf32> to vector<2x4x256xf32>
    %1508 = vector.broadcast %1506 : vector<2x1x256xf32> to vector<2x4x256xf32>
    %1509 = arith.mulf %1507, %1508 : vector<2x4x256xf32>
    %1510 = arith.addf %1503, %1509 : vector<2x4x256xf32>
    %1511 = vector.extract_strided_slice %1290 {offsets = [0, 27], sizes = [4, 1], strides = [1, 1]} : vector<4x36xf32> to vector<4x1xf32>
    %1512 = vector.shape_cast %1511 : vector<4x1xf32> to vector<1x4x1xf32>
    %1513 = vector.extract_strided_slice %1489 {offsets = [0, 3, 0], sizes = [2, 1, 256], strides = [1, 1, 1]} : vector<2x4x256xf32> to vector<2x1x256xf32>
    %1514 = vector.broadcast %1512 : vector<1x4x1xf32> to vector<2x4x256xf32>
    %1515 = vector.broadcast %1513 : vector<2x1x256xf32> to vector<2x4x256xf32>
    %1516 = arith.mulf %1514, %1515 : vector<2x4x256xf32>
    %1517 = arith.addf %1510, %1516 : vector<2x4x256xf32>
    %c240_i32_141 = arith.constant 240 : i32
    %1518 = tpu.dynamic_rotate %1288 by %c240_i32_141 dim 2 : vector<2x4x256xf32>, i32 -> vector<2x4x256xf32>
    %cst_142 = arith.constant 0.000000e+00 : f32
    %1519 = vector.shape_cast %35 : vector<1x1x256xi1> to vector<1x1x256xi1>
    %1520 = vector.broadcast %1519 : vector<1x1x256xi1> to vector<2x4x256xi1>
    %1521 = vector.broadcast %cst_142 : f32 to vector<2x4x256xf32>
    %1522 = arith.select %1520, %1518, %1521 : vector<2x4x256xi1>, vector<2x4x256xf32>
    %1523 = vector.extract_strided_slice %1290 {offsets = [0, 28], sizes = [4, 1], strides = [1, 1]} : vector<4x36xf32> to vector<4x1xf32>
    %1524 = vector.shape_cast %1523 : vector<4x1xf32> to vector<1x4x1xf32>
    %1525 = vector.extract_strided_slice %1522 {offsets = [0, 0, 0], sizes = [2, 1, 256], strides = [1, 1, 1]} : vector<2x4x256xf32> to vector<2x1x256xf32>
    %1526 = vector.broadcast %1524 : vector<1x4x1xf32> to vector<2x4x256xf32>
    %1527 = vector.broadcast %1525 : vector<2x1x256xf32> to vector<2x4x256xf32>
    %1528 = arith.mulf %1526, %1527 : vector<2x4x256xf32>
    %1529 = arith.addf %1517, %1528 : vector<2x4x256xf32>
    %1530 = vector.extract_strided_slice %1290 {offsets = [0, 29], sizes = [4, 1], strides = [1, 1]} : vector<4x36xf32> to vector<4x1xf32>
    %1531 = vector.shape_cast %1530 : vector<4x1xf32> to vector<1x4x1xf32>
    %1532 = vector.extract_strided_slice %1522 {offsets = [0, 1, 0], sizes = [2, 1, 256], strides = [1, 1, 1]} : vector<2x4x256xf32> to vector<2x1x256xf32>
    %1533 = vector.broadcast %1531 : vector<1x4x1xf32> to vector<2x4x256xf32>
    %1534 = vector.broadcast %1532 : vector<2x1x256xf32> to vector<2x4x256xf32>
    %1535 = arith.mulf %1533, %1534 : vector<2x4x256xf32>
    %1536 = arith.addf %1529, %1535 : vector<2x4x256xf32>
    %1537 = vector.extract_strided_slice %1290 {offsets = [0, 30], sizes = [4, 1], strides = [1, 1]} : vector<4x36xf32> to vector<4x1xf32>
    %1538 = vector.shape_cast %1537 : vector<4x1xf32> to vector<1x4x1xf32>
    %1539 = vector.extract_strided_slice %1522 {offsets = [0, 2, 0], sizes = [2, 1, 256], strides = [1, 1, 1]} : vector<2x4x256xf32> to vector<2x1x256xf32>
    %1540 = vector.broadcast %1538 : vector<1x4x1xf32> to vector<2x4x256xf32>
    %1541 = vector.broadcast %1539 : vector<2x1x256xf32> to vector<2x4x256xf32>
    %1542 = arith.mulf %1540, %1541 : vector<2x4x256xf32>
    %1543 = arith.addf %1536, %1542 : vector<2x4x256xf32>
    %1544 = vector.extract_strided_slice %1290 {offsets = [0, 31], sizes = [4, 1], strides = [1, 1]} : vector<4x36xf32> to vector<4x1xf32>
    %1545 = vector.shape_cast %1544 : vector<4x1xf32> to vector<1x4x1xf32>
    %1546 = vector.extract_strided_slice %1522 {offsets = [0, 3, 0], sizes = [2, 1, 256], strides = [1, 1, 1]} : vector<2x4x256xf32> to vector<2x1x256xf32>
    %1547 = vector.broadcast %1545 : vector<1x4x1xf32> to vector<2x4x256xf32>
    %1548 = vector.broadcast %1546 : vector<2x1x256xf32> to vector<2x4x256xf32>
    %1549 = arith.mulf %1547, %1548 : vector<2x4x256xf32>
    %1550 = arith.addf %1543, %1549 : vector<2x4x256xf32>
    %c239_i32_143 = arith.constant 239 : i32
    %1551 = tpu.dynamic_rotate %1288 by %c239_i32_143 dim 2 : vector<2x4x256xf32>, i32 -> vector<2x4x256xf32>
    %cst_144 = arith.constant 0.000000e+00 : f32
    %1552 = vector.shape_cast %40 : vector<1x1x256xi1> to vector<1x1x256xi1>
    %1553 = vector.broadcast %1552 : vector<1x1x256xi1> to vector<2x4x256xi1>
    %1554 = vector.broadcast %cst_144 : f32 to vector<2x4x256xf32>
    %1555 = arith.select %1553, %1551, %1554 : vector<2x4x256xi1>, vector<2x4x256xf32>
    %1556 = vector.extract_strided_slice %1290 {offsets = [0, 32], sizes = [4, 1], strides = [1, 1]} : vector<4x36xf32> to vector<4x1xf32>
    %1557 = vector.shape_cast %1556 : vector<4x1xf32> to vector<1x4x1xf32>
    %1558 = vector.extract_strided_slice %1555 {offsets = [0, 0, 0], sizes = [2, 1, 256], strides = [1, 1, 1]} : vector<2x4x256xf32> to vector<2x1x256xf32>
    %1559 = vector.broadcast %1557 : vector<1x4x1xf32> to vector<2x4x256xf32>
    %1560 = vector.broadcast %1558 : vector<2x1x256xf32> to vector<2x4x256xf32>
    %1561 = arith.mulf %1559, %1560 : vector<2x4x256xf32>
    %1562 = arith.addf %1550, %1561 : vector<2x4x256xf32>
    %1563 = vector.extract_strided_slice %1290 {offsets = [0, 33], sizes = [4, 1], strides = [1, 1]} : vector<4x36xf32> to vector<4x1xf32>
    %1564 = vector.shape_cast %1563 : vector<4x1xf32> to vector<1x4x1xf32>
    %1565 = vector.extract_strided_slice %1555 {offsets = [0, 1, 0], sizes = [2, 1, 256], strides = [1, 1, 1]} : vector<2x4x256xf32> to vector<2x1x256xf32>
    %1566 = vector.broadcast %1564 : vector<1x4x1xf32> to vector<2x4x256xf32>
    %1567 = vector.broadcast %1565 : vector<2x1x256xf32> to vector<2x4x256xf32>
    %1568 = arith.mulf %1566, %1567 : vector<2x4x256xf32>
    %1569 = arith.addf %1562, %1568 : vector<2x4x256xf32>
    %1570 = vector.extract_strided_slice %1290 {offsets = [0, 34], sizes = [4, 1], strides = [1, 1]} : vector<4x36xf32> to vector<4x1xf32>
    %1571 = vector.shape_cast %1570 : vector<4x1xf32> to vector<1x4x1xf32>
    %1572 = vector.extract_strided_slice %1555 {offsets = [0, 2, 0], sizes = [2, 1, 256], strides = [1, 1, 1]} : vector<2x4x256xf32> to vector<2x1x256xf32>
    %1573 = vector.broadcast %1571 : vector<1x4x1xf32> to vector<2x4x256xf32>
    %1574 = vector.broadcast %1572 : vector<2x1x256xf32> to vector<2x4x256xf32>
    %1575 = arith.mulf %1573, %1574 : vector<2x4x256xf32>
    %1576 = arith.addf %1569, %1575 : vector<2x4x256xf32>
    %1577 = vector.extract_strided_slice %1290 {offsets = [0, 35], sizes = [4, 1], strides = [1, 1]} : vector<4x36xf32> to vector<4x1xf32>
    %1578 = vector.shape_cast %1577 : vector<4x1xf32> to vector<1x4x1xf32>
    %1579 = vector.extract_strided_slice %1555 {offsets = [0, 3, 0], sizes = [2, 1, 256], strides = [1, 1, 1]} : vector<2x4x256xf32> to vector<2x1x256xf32>
    %1580 = vector.broadcast %1578 : vector<1x4x1xf32> to vector<2x4x256xf32>
    %1581 = vector.broadcast %1579 : vector<2x1x256xf32> to vector<2x4x256xf32>
    %1582 = arith.mulf %1580, %1581 : vector<2x4x256xf32>
    %1583 = arith.addf %1576, %1582 : vector<2x4x256xf32>
    %1584 = arith.addf %1583, %0 : vector<2x4x256xf32>
    %cst_145 = arith.constant 0.000000e+00 : f32
    %1585 = vector.broadcast %cst_145 : f32 to vector<2x4x256xf32>
    %1586 = arith.maximumf %1584, %1585 : vector<2x4x256xf32>
    %c0_146 = arith.constant 0 : index
    %c0_147 = arith.constant 0 : index
    %c0_148 = arith.constant 0 : index
    %1587 = vector.load %arg6[%c0_146, %c0_147, %c0_148] : memref<2x4x256xf32, #tpu.memory_space<vmem>>, vector<2x4x256xf32>
    tpu.vector_store %arg6[%c0_146, %c0_147, %c0_148], %1586 {strides = array<i32>} : memref<2x4x256xf32, #tpu.memory_space<vmem>>, vector<2x4x256xf32>,
    return
  }
  func.func @transform_0(%arg0: i32) -> (i32, i32, i32) {
    %c0_i32 = arith.constant 0 : i32
    %c0_i32_0 = arith.constant 0 : i32
    %c0_i32_1 = arith.constant 0 : i32
    return %arg0, %c0_i32, %c0_i32_0 : i32, i32, i32
  }
  func.func @transform_1(%arg0: i32) -> (i32, i32, i32) {
    %c0_i32 = arith.constant 0 : i32
    %c0_i32_0 = arith.constant 0 : i32
    %c0_i32_1 = arith.constant 0 : i32
    %c0_i32_2 = arith.constant 0 : i32
    return %c0_i32, %c0_i32_0, %c0_i32_1 : i32, i32, i32
  }
  func.func @transform_2(%arg0: i32) -> (i32, i32, i32) {
    %c0_i32 = arith.constant 0 : i32
    %c0_i32_0 = arith.constant 0 : i32
    %c0_i32_1 = arith.constant 0 : i32
    %c0_i32_2 = arith.constant 0 : i32
    return %c0_i32, %c0_i32_0, %c0_i32_1 : i32, i32, i32
  }
  func.func @transform_3(%arg0: i32) -> (i32, i32, i32) {
    %c0_i32 = arith.constant 0 : i32
    %c0_i32_0 = arith.constant 0 : i32
    %c0_i32_1 = arith.constant 0 : i32
    %c0_i32_2 = arith.constant 0 : i32
    return %c0_i32, %c0_i32_0, %c0_i32_1 : i32, i32, i32
  }
  func.func @transform_4(%arg0: i32) -> (i32, i32, i32) {
    %c0_i32 = arith.constant 0 : i32
    %c0_i32_0 = arith.constant 0 : i32
    %c0_i32_1 = arith.constant 0 : i32
    %c0_i32_2 = arith.constant 0 : i32
    return %c0_i32, %c0_i32_0, %c0_i32_1 : i32, i32, i32
  }
  func.func @transform_5(%arg0: i32) -> (i32, i32, i32) {
    %c0_i32 = arith.constant 0 : i32
    %c0_i32_0 = arith.constant 0 : i32
    %c0_i32_1 = arith.constant 0 : i32
    return %arg0, %c0_i32, %c0_i32_0 : i32, i32, i32
  }
}

</mosaic_0001>

<bundles_post_ra>
// kernel: tpu_custom_call.1
= control target key start
LH: loop header
LB: loop body
LE: loop exit
PB: predicated region body
PF: predicated region fallthrough
CT: control target
= control target key end

     0   :  { %10 = vsyncpa [#allocation3], 0  ;;  %s10915_s0 = inlined_call_operand.hbm [shape: f32[2,4,256], index: 0, kind: input, shape index: {}]   ;;  %s10916_s1 = inlined_call_operand.hbm [shape: f32[5,4,36], index: 1, kind: input, shape index: {}]   ;;  %s10917_s2 = inlined_call_operand.hbm [shape: f32[2,4,4], index: 2, kind: input, shape index: {}]   ;;  %s10918_s3 = inlined_call_operand.vmem [shape: f32[2,4,4], index: 3, kind: input, shape index: {}]   ;;  %s10919_s4 = inlined_call_operand.hbm [shape: f32[9,1,256], index: 4, kind: input, shape index: {}]   ;;  %s10920_s5 = inlined_call_operand.hbm [shape: f32[2,4,256], index: 5, kind: output, shape index: {}]  }
   0x1   :  { %11 = vsyncpa [#allocation6], 0 }
   0x2   :  { %12 = vsyncpa [#allocation9], 0 }
   0x3   :  { %13 = vsyncpa [#allocation4], 0  ;;  %s6541_s18 = smov [#allocation5]   ;;  %s6423_s22 = scalar_lea.hbm %s10916_s1, 320 }
   0x4   :  { %s31_s19 = sshll.u32 %s6541_s18, 4  ;;  %p6424_p0 = scmp.ne.s32.totalorder %s10916_s1, %s6423_s22  ;;  %s32_s19 = int_to_ptr.vmem [resolvable:$true] %s31_s19 }
   0x5   :  { %p6427_p1 = scmp.lt.u32.totalorder %s6423_s22, %s10916_s1 }
   0x7   :  { %p6429_p2 = pnand %p6427_p1, %p6424_p0 }
   0x9   :  { %6432 = shalt.err (!%p6429_p2)
}
   0xa   :  { %s6433_s27 = scalar_lea.vmem %s32_s19, 320  ;;  %p6438_p4 = scmp.lt.s32.totalorder %s32_s19, %s32_s19 }
   0xb   :  { %p6434_p3 = scmp.ne.s32.totalorder %s32_s19, %s6433_s27  ;;  %p6439_p5 = scmp.lt.s32.totalorder %s6433_s27, %s6433_s27 }
   0xd   :  { %p6440_p6 = por %p6439_p5, %p6438_p4 }
   0xf   :  { %p6441_p7 = pnand %p6440_p6, %p6434_p3 }
  0x11   :  { %6444 = shalt.err (!%p6441_p7)
}
  0x12   :  { %s6542_s28 = smov 64   ;;  %s6543_s29 = smov 4  }
  0x13   :  { %37 = dma.hbm_to_vmem [thread:$0]  %s10916_s1, 320, %s32_s19, [#allocation6], %s6542_s28, %s6542_s28, %s6543_s29  }
  0x14   :  { %s6544_s7 = smov [#allocation2]   ;;  %s6445_s11 = scalar_lea.hbm %s10915_s0, 256 }
  0x15   :  { %s19_s8 = sshll.u32 %s6544_s7, 4  ;;  %p6446_p8 = scmp.ne.s32.totalorder %s10915_s0, %s6445_s11  ;;  %s20_s8 = int_to_ptr.vmem [resolvable:$true] %s19_s8 }
  0x16   :  { %p6449_p9 = scmp.lt.u32.totalorder %s6445_s11, %s10915_s0 }
  0x18   :  { %p6451_p10 = pnand %p6449_p9, %p6446_p8 }
  0x1a   :  { %6454 = shalt.err (!%p6451_p10)
}
  0x1b   :  { %s6455_s16 = scalar_lea.vmem %s20_s8, 256  ;;  %p6460_p12 = scmp.lt.s32.totalorder %s20_s8, %s20_s8 }
  0x1c   :  { %p6456_p11 = scmp.ne.s32.totalorder %s20_s8, %s6455_s16  ;;  %p6461_p13 = scmp.lt.s32.totalorder %s6455_s16, %s6455_s16 }
  0x1e   :  { %p6462_p0 = por %p6461_p13, %p6460_p12 }
  0x20   :  { %p6463_p1 = pnand %p6462_p0, %p6456_p11 }
  0x22   :  { %6466 = shalt.err (!%p6463_p1)
}
  0x23   :  { %s6545_s1 = smov 128   ;;  %s6546_s17 = smov 8  }
  0x24   :  { %25 = dma.hbm_to_vmem [thread:$0]  %s10915_s0, 256, %s20_s8, [#allocation3], %s6545_s1, %s6545_s1, %s6546_s17  }
  0x25   :  { %s6547_s20 = smov [#allocation7]   ;;  %s6548_s22 = smov [#allocation8]  }
  0x26   :  { %s43_s21 = sshll.u32 %s6547_s20, 4  ;;  %s57_s23 = sshll.u32 %s6548_s22, 4  ;;  %s44_s21 = int_to_ptr.vmem [resolvable:$true] %s43_s21  ;;  %s6656_s23 = int_to_ptr.vmem [resolvable:$true] %s57_s23 }
  0x27   :  { %s6467_s26 = scalar_lea.hbm %s10917_s2, 128 }
  0x28   :  { %p6468_p2 = scmp.ne.s32.totalorder %s10917_s2, %s6467_s26  ;;  %p6471_p3 = scmp.lt.u32.totalorder %s6467_s26, %s10917_s2 }
  0x2a   :  { %p6473_p4 = pnand %p6471_p3, %p6468_p2 }
  0x2c   :  { %6476 = shalt.err (!%p6473_p4)
}
  0x2d   :  { %s6477_s0 = scalar_lea.vmem %s44_s21, 128  ;;  %p6482_p6 = scmp.lt.s32.totalorder %s44_s21, %s44_s21 }
  0x2e   :  { %p6478_p5 = scmp.ne.s32.totalorder %s44_s21, %s6477_s0  ;;  %p6483_p7 = scmp.lt.s32.totalorder %s6477_s0, %s6477_s0 }
  0x30   :  { %p6484_p8 = por %p6483_p7, %p6482_p6 }
  0x32   :  { %p6485_p9 = pnand %p6484_p8, %p6478_p5 }
  0x34   :  { %6488 = shalt.err (!%p6485_p9)
}
  0x35   :  { %49 = dma.hbm_to_vmem [thread:$0]  %s10917_s2, 128, %s44_s21, [#allocation6], %s6542_s28, %s6542_s28, %s6543_s29  }
  0x36   :  { %s6489_s12 = scalar_lea.hbm %s10919_s4, 288 }
  0x37   :  { %p6490_p10 = scmp.ne.s32.totalorder %s10919_s4, %s6489_s12  ;;  %p6493_p11 = scmp.lt.u32.totalorder %s6489_s12, %s10919_s4 }
  0x39   :  { %p6495_p12 = pnand %p6493_p11, %p6490_p10 }
  0x3b   :  { %6498 = shalt.err (!%p6495_p12)
}
  0x3c   :  { %s6499_s18 = scalar_lea.vmem %s6656_s23, 288  ;;  %p6504_p0 = scmp.lt.s32.totalorder %s6656_s23, %s6656_s23 }
  0x3d   :  { %p6500_p13 = scmp.ne.s32.totalorder %s6656_s23, %s6499_s18  ;;  %p6505_p1 = scmp.lt.s32.totalorder %s6499_s18, %s6499_s18 }
  0x3f   :  { %p6506_p2 = por %p6505_p1, %p6504_p0 }
  0x41   :  { %p6507_p3 = pnand %p6506_p2, %p6500_p13 }
  0x43   :  { %6510 = shalt.err (!%p6507_p3)
}
  0x44   :  { %s6549_s2 = smov 32   ;;  %s6550_s28 = smov 2  }
  0x45   :  { %63 = dma.hbm_to_vmem [thread:$0]  %s10919_s4, 288, %s6656_s23, [#allocation9], %s6549_s2, %s6549_s2, %s6550_s28  }
  0x46   :  { %6533 = dma.done.wait [#allocation3], 256  }
  0x47   :  { %6534 = vsyncadd [#allocation3], 4294967040 }
  0x48   :  { %6535 = dma.done.wait [#allocation6], 448  }
  0x49   :  { %6536 = vsyncadd [#allocation6], 4294966848 }
  0x4a   :  { %6537 = dma.done.wait [#allocation9], 288  }
  0x4b   :  { %6538 = vsyncadd [#allocation9], 4294967008  ;;  %v10921_v0 = vmov 1   ;;  %v10977_v1 = vmov 0   ;;  %v6692_v2 = vld [vmem:[#allocation5] sm:$0xf]  ;;  %v116_v47 = vlaneseq }
  0x4c   :  { %6218 = vset.pattern.permute.xlu1 %v10921_v0  ;;  %6217 = vset.pattern.permute.xlu0 %v10977_v1  ;;  %v6694_v3 = vld [vmem:[#allocation2] sm:$0xff]  ;;  %s6553_s20 = smov 17   ;;  %v6703_v5 = vld [vmem:[#allocation2 + $0x8] sm:$0xff]  ;;  %v10989_v7 = vmov 2   ;;  %v10991_v8 = vmov 3   ;;  %v10933_v9 = vmov 4  }
  0x4d   :  { %168 = vperm.xlu1 %6218, %v6692_v2   ;;  %108 = vrot.lane.b32.xlu0 %v6694_v3, %s6553_s20  ;;  %v6701_v4 = vcombine.high %v6694_v3, %v6694_v3  ;;  %v6711_v6 = vcombine.high %v6703_v5, %v6703_v5  ;;  %s6557_s4 = smov 16   ;;  %v10985_v10 = vmov 6   ;;  %v10987_v11 = vmov 5   ;;  %s6562_s21 = smov 15   ;;  %v6827_v41 = vld [vmem:[#allocation5 + $0x4] sm:$0xf] }
  0x4e   :  { %v10929_v12 = vmov 7   ;;  %v10981_v13 = vmov 9   ;;  %v10923_v14 = vmov 10   ;;  %v10983_v15 = vmov 8   ;;  %s6567_s22 = smov 1   ;;  %s6573_s23 = smov 127  }
  0x4f   :  { %11158 = vst [vmem:[#allocation15_spill] sm:$0xff] %v6701_v4  ;;  %11159 = vst [vmem:[#allocation16_spill] sm:$0xff] %v6711_v6  ;;  %v10973_v16 = vmov 13   ;;  %v10979_v17 = vmov 11   ;;  %v10969_v18 = vmov 14   ;;  %v10967_v19 = vmov 17  }
  0x50   :  { %v10975_v20 = vmov 12   ;;  %v10963_v21 = vmov 20   ;;  %v10971_v22 = vmov 15   ;;  %v10959_v23 = vmov 23   ;;  %s6575_s24 = smov 113   ;;  %s6581_s25 = smov 112  }
  0x51   :  { %110 = vrot.lane.b32.xlu0 %v6703_v5, %s6553_s20  ;;  %112 = vrot.lane.b32.xlu1 %v6701_v4, %s6553_s20  ;;  %v10953_v24 = vmov 26   ;;  %v10965_v25 = vmov 16   ;;  %v10961_v26 = vmov 18   ;;  %v10949_v27 = vmov 29   ;;  %s6586_s26 = smov 111  }
  0x52   :  { %6219 = vset.pattern.permute.xlu1 %v10989_v7  ;;  %v10957_v28 = vmov 19   ;;  %v10955_v29 = vmov 21   ;;  %v10945_v30 = vmov 30   ;;  %v10951_v31 = vmov 22   ;;  %v78_v51 = vld [vmem:[#allocation8] sm:$0x3] }
  0x53   :  { %v10941_v32 = vmov 33   ;;  %v10937_v33 = vmov 34   ;;  %v10947_v34 = vmov 24   ;;  %v10943_v35 = vmov 25   ;;  %v81_v55 = vld [vmem:[#allocation8 + $0x2] sm:$0x3] }
  0x54   :  { %v10939_v36 = vmov 27   ;;  %v10935_v39 = vmov 28   ;;  %v10931_v43 = vmov 31   ;;  %v10927_v50 = vmov 32   ;;  %v84_v60 = vld [vmem:[#allocation8 + $0x4] sm:$0x3] }
  0x55   :  { %140 = vperm.xlu0 %6217, %v6692_v2   ;;  %114 = vrot.lane.b32.xlu1 %v6711_v6, %s6553_s20  ;;  %v6853_v52 = vshrl.u32 %v116_v47, 7  ;;  %vm79_vm0 = vcmp.gt.f32.partialorder %v78_v51, 0.5  ;;  %v10925_v58 = vmov 35   ;;  %vm82_vm1 = vcmp.gt.f32.partialorder %v81_v55, 0.5  ;;  %v87_v51 = vld [vmem:[#allocation8 + $0x6] sm:$0x3] }
  0x56   :  { %v123_v59 = vsel %vm79_vm0, 1, %v10977_v1  ;;  %v6868_v61 = vand.u32 127, %v116_v47  ;;  %vm85_vm2 = vcmp.gt.f32.partialorder %v84_v60, 0.5  ;;  %vm88_vm4 = vcmp.gt.f32.partialorder %v87_v51, 0.5 }
  0x57   :  { %v6862_v56 = vsub.s32 0, %v6853_v52  ;;  %v6871_v62 = vsub.s32 1, %v6853_v52  ;;  %v681_v55 = vsub.s32 4, %v6853_v52 }
  0x58   :  { %vm11011_vm3 = vcmp.lt.s32.totalorder %v6868_v61, 17  ;;  %vm11010_vm7 = vcmp.lt.s32.totalorder %v6868_v61, 16  ;;  %vm11008_vm10 = vcmp.lt.s32.totalorder %v6868_v61, 15  ;;  %vm11007_vm13 = vcmp.lt.s32.totalorder %v6868_v61, 1 }
  0x59   :  { %6220 = vset.pattern.permute.xlu0 %v10991_v8  ;;  %196 = vperm.xlu1 %6219, %v6692_v2   ;;  %v127_v63 = vrot.slane %v123_v59, %v6862_v56  ;;  %v131_v47 = vrot.slane %v123_v59, %v6871_v62 }
  0x5a   :  { %224 = vperm.xlu0 %6220, %v6692_v2  }
  0x5b   :  { %vm6889_vm5 = vcmp.eq.s32.totalorder %v127_v63, 1  ;;  %vm6918_vm6 = vcmp.eq.s32.totalorder %v131_v47, 1 }
  0x5d   :  { %6221 = vset.pattern.permute.xlu1 %v10933_v9 }
  0x5e   :  { %280 = vperm.xlu1 %6221, %v6692_v2   ;;  %251 = vrot.lane.b32.xlu0 %v6694_v3, %s6557_s4 }
  0x5f   :  { %6223 = vset.pattern.permute.xlu0 %v10985_v10 }
  0x62   :  { %6222 = vset.pattern.permute.xlu1 %v10987_v11  ;;  %255 = vrot.lane.b32.xlu0 %v6701_v4, %s6557_s4 }
  0x63   :  { %308 = vperm.xlu1 %6222, %v6692_v2  }
  0x66   :  { %336 = vperm.xlu0 %6223, %v6692_v2  }
  0x67   :  { %253 = vrot.lane.b32.xlu1 %v6703_v5, %s6557_s4 }
  0x68   :  { %6224 = vset.pattern.permute.xlu1 %v10929_v12 }
  0x6a   :  { %6226 = vset.pattern.permute.xlu0 %v10981_v13 }
  0x6b   :  { %257 = vrot.lane.b32.xlu1 %v6711_v6, %s6557_s4  ;;  %448 = vperm.xlu0 %6226, %v6692_v2  }
  0x6f   :  { %364 = vperm.xlu1 %6224, %v6692_v2   ;;  %395 = vrot.lane.b32.xlu0 %v6701_v4, %s6562_s21 }
  0x70   :  { %6227 = vset.pattern.permute.xlu0 %v10923_v14 }
  0x73   :  { %6225 = vset.pattern.permute.xlu1 %v10983_v15  ;;  %476 = vperm.xlu0 %6227, %v6692_v2  }
  0x74   :  { %420 = vperm.xlu1 %6225, %v6692_v2  }
  0x77   :  { %6230 = vset.pattern.permute.xlu0 %v10973_v16  ;;  %v734_v16 = vrot.slane %v6703_v5, %v6871_v62 }
  0x78   :  { %391 = vrot.lane.b32.xlu1 %v6694_v3, %s6562_s21  ;;  %588 = vperm.xlu0 %6230, %v6692_v2  }
  0x79   :  { %6228 = vset.pattern.permute.xlu1 %v10979_v17 }
  0x7c   :  { %393 = vrot.lane.b32.xlu1 %v6703_v5, %s6562_s21  ;;  %535 = vrot.lane.b32.xlu0 %v6701_v4, %s6567_s22 }
  0x7d   :  { %6231 = vset.pattern.permute.xlu0 %v10969_v18 }
  0x80   :  { %397 = vrot.lane.b32.xlu1 %v6711_v6, %s6562_s21  ;;  %616 = vperm.xlu0 %6231, %v6692_v2  }
  0x84   :  { %504 = vperm.xlu1 %6228, %v6692_v2   ;;  %6234 = vset.pattern.permute.xlu0 %v10967_v19 }
  0x85   :  { %720 = vperm.xlu0 %6234, %v6692_v2  }
  0x88   :  { %6229 = vset.pattern.permute.xlu1 %v10975_v20 }
  0x89   :  { %560 = vperm.xlu1 %6229, %v6692_v2   ;;  %6237 = vset.pattern.permute.xlu0 %v10963_v21 }
  0x8a   :  { %892 = vperm.xlu0 %6237, %v6692_v2  }
  0x8d   :  { %531 = vrot.lane.b32.xlu1 %v6694_v3, %s6567_s22 }
  0x8e   :  { %6232 = vset.pattern.permute.xlu1 %v10971_v22  ;;  %865 = vrot.lane.b32.xlu0 %v6703_v5, %s6573_s23 }
  0x8f   :  { %6240 = vset.pattern.permute.xlu0 %v10959_v23 }
  0x91   :  { %533 = vrot.lane.b32.xlu1 %v6703_v5, %s6567_s22 }
  0x92   :  { %869 = vrot.lane.b32.xlu0 %v6711_v6, %s6573_s23 }
  0x95   :  { %537 = vrot.lane.b32.xlu1 %v6711_v6, %s6567_s22 }
  0x96   :  { %976 = vperm.xlu0 %6240, %v6692_v2  }
  0x99   :  { %644 = vperm.xlu1 %6232, %v6692_v2  }
  0x9a   :  { %1003 = vrot.lane.b32.xlu0 %v6694_v3, %s6575_s24 }
  0x9b   :  { %6243 = vset.pattern.permute.xlu0 %v10953_v24 }
  0x9d   :  { %6233 = vset.pattern.permute.xlu1 %v10965_v25 }
  0x9e   :  { %672 = vperm.xlu1 %6233, %v6692_v2   ;;  %1007 = vrot.lane.b32.xlu0 %v6701_v4, %s6575_s24 }
  0xa2   :  { %6235 = vset.pattern.permute.xlu1 %v10961_v26  ;;  %1088 = vperm.xlu0 %6243, %v6692_v2  }
  0xa3   :  { %768 = vperm.xlu1 %6235, %v6692_v2  }
  0xa6   :  { %6246 = vset.pattern.permute.xlu0 %v10949_v27 }
  0xa7   :  { %6236 = vset.pattern.permute.xlu1 %v10957_v28  ;;  %1200 = vperm.xlu0 %6246, %v6692_v2   ;;  %v726_v28 = vrot.slane %v6694_v3, %v6871_v62 }
  0xa8   :  { %816 = vperm.xlu1 %6236, %v6692_v2  }
  0xa9   :  { %v7001_v26 = vrot.slane %v726_v28, %v6871_v62 }
  0xab   :  { %1147 = vrot.lane.b32.xlu0 %v6701_v4, %s6581_s25 }
  0xac   :  { %6238 = vset.pattern.permute.xlu1 %v10955_v29  ;;  %6247 = vset.pattern.permute.xlu0 %v10945_v30  ;;  %v686_v30 = vrot.slane %v6703_v5, %v6862_v56 }
  0xad   :  { %920 = vperm.xlu1 %6238, %v6692_v2  }
  0xae   :  { %v6970_v21 = vrot.slane %v686_v30, %v6862_v56 }
  0xaf   :  { %1228 = vperm.xlu0 %6247, %v6692_v2  }
  0xb1   :  { %863 = vrot.lane.b32.xlu1 %v6694_v3, %s6573_s23 }
  0xb2   :  { %6239 = vset.pattern.permute.xlu1 %v10951_v31 }
  0xb3   :  { %6250 = vset.pattern.permute.xlu0 %v10941_v32  ;;  %v678_v32 = vrot.slane %v6694_v3, %v6862_v56 }
  0xb4   :  { %1340 = vperm.xlu0 %6250, %v6692_v2  }
  0xb5   :  { %867 = vrot.lane.b32.xlu1 %v6701_v4, %s6573_s23  ;;  %v6965_v23 = vrot.slane %v678_v32, %v6862_v56 }
  0xb8   :  { %1287 = vrot.lane.b32.xlu0 %v6701_v4, %s6586_s26 }
  0xb9   :  { %948 = vperm.xlu1 %6239, %v6692_v2   ;;  %6251 = vset.pattern.permute.xlu0 %v10937_v33  ;;  %v729_v33 = vsub.s32 5, %v6853_v52 }
  0xbb   :  { %v6998_v20 = vrot.slane %v6703_v5, %v729_v33 }
  0xbc   :  { %1368 = vperm.xlu0 %6251, %v6692_v2  }
  0xbd   :  { %6241 = vset.pattern.permute.xlu1 %v10947_v34  ;;  %v6927_v34 = vrot.slane %v6703_v5, %v681_v55 }
  0xbe   :  { %1032 = vperm.xlu1 %6241, %v6692_v2  }
  0xbf   :  { %v109_v45 = vpop.permute.xlu0 %108  ;;  %11166 = vst [vmem:[#allocation19_spill] sm:$0xff] %v6927_v34 }
  0xc0   :  { %6254 = vset.pattern.permute.xlu0 %v10921_v0 }
  0xc1   :  { %1475 = vperm.xlu0 %6254, %v6827_v41  }
  0xc2   :  { %6242 = vset.pattern.permute.xlu1 %v10943_v35  ;;  %v6914_v35 = vrot.slane %v6694_v3, %v681_v55 }
  0xc3   :  { %1060 = vperm.xlu1 %6242, %v6692_v2   ;;  %v111_v49 = vpop.permute.xlu0 %110 }
  0xc5   :  { %6257 = vset.pattern.permute.xlu0 %v10933_v9  ;;  %v6898_v9 = vsel %vm85_vm2, 1, %v10977_v1 }
  0xc6   :  { %1575 = vperm.xlu0 %6257, %v6827_v41  }
  0xc7   :  { %1005 = vrot.lane.b32.xlu1 %v6703_v5, %s6575_s24 }
  0xc8   :  { %6244 = vset.pattern.permute.xlu1 %v10939_v36  ;;  %v6909_v36 = vsel %vm88_vm4, 1, %v10977_v1 }
  0xca   :  { %6260 = vset.pattern.permute.xlu0 %v10929_v12  ;;  %v11160_v12 = vmov 0 }
  0xcb   :  { %1009 = vrot.lane.b32.xlu1 %v6711_v6, %s6575_s24  ;;  %1659 = vperm.xlu0 %6260, %v6827_v41   ;;  %v11161_v12 = vsel %vm6889_vm5, 4294967295, %v11160_v12 }
  0xcc   :  { %v6820_v37 = vpop.permute.xlu1 %168  ;;  %11162 = vst [vmem:[#allocation17_spill] sm:$0xff] %v11161_v12 }
  0xcf   :  { %1116 = vperm.xlu1 %6244, %v6692_v2   ;;  %6263 = vset.pattern.permute.xlu0 %v10923_v14  ;;  %v264_v14 = vsel %vm82_vm1, 1, %v10977_v1  ;;  %vm11006_vm1 = vcmp.lt.s32.totalorder %v6868_v61, 127 }
  0xd0   :  { %v6823_v38 = vpop.permute.xlu1 %112  ;;  %v268_v60 = vrot.slane %v264_v14, %v6862_v56  ;;  %v272_v51 = vrot.slane %v264_v14, %v6871_v62 }
  0xd1   :  { %v119_v27 = vsel %vm11011_vm3, %v109_v45, %v6823_v38  ;;  %v121_v47 = vsel %vm11011_vm3, %v6823_v38, %v109_v45  ;;  %v6952_v38 = vrot.slane %v6694_v3, %v729_v33  ;;  %v11170_v45 = vmov 0 }
  0xd2   :  { %vm6954_vm8 = vcmp.eq.s32.totalorder %v268_v60, 1  ;;  %vm6958_vm9 = vcmp.eq.s32.totalorder %v272_v51, 1  ;;  %v6974_v60 = vsel %vm6889_vm5, %v121_v47, 0.0  ;;  %v6978_v51 = vsel %vm6918_vm6, %v119_v27, 0.0 }
  0xd3   :  { %6245 = vset.pattern.permute.xlu1 %v10935_v39  ;;  %v11171_v45 = vsel %vm6958_vm9, 4294967295, %v11170_v45  ;;  %v146_v47 = vrot.slane %v6974_v60, %v6862_v56  ;;  %v150_v17 = vrot.slane %v6978_v51, %v6862_v56  ;;  %v174_v13 = vrot.slane %v6974_v60, %v6871_v62 }
  0xd4   :  { %1172 = vperm.xlu1 %6245, %v6692_v2   ;;  %v115_v40 = vpop.permute.xlu1 %114  ;;  %v6857_v54 = vpop.permute.xlu0 %140  ;;  %11172 = vst [vmem:[#allocation21_spill] sm:$0xff] %v11171_v45  ;;  %v11175_v45 = vmov 0 }
  0xd5   :  { %v120_v59 = vsel %vm11011_vm3, %v111_v49, %v115_v40  ;;  %v122_v39 = vsel %vm11011_vm3, %v115_v40, %v111_v49  ;;  %v11163_v40 = vmov 0 }
  0xd6   :  { %v11164_v40 = vsel %vm6918_vm6, 4294967295, %v11163_v40  ;;  %v6937_v31 = vsel %vm6889_vm5, %v122_v39, 0.0  ;;  %v6941_v24 = vsel %vm6918_vm6, %v120_v59, 0.0  ;;  %v11167_v39 = vmov 0 }
  0xd7   :  { %11165 = vst [vmem:[#allocation18_spill] sm:$0xff] %v11164_v40  ;;  %v11168_v39 = vsel %vm6954_vm8, 4294967295, %v11167_v39  ;;  %v154_v25 = vrot.slane %v6937_v31, %v6862_v56  ;;  %v158_v32 = vrot.slane %v6941_v24, %v6862_v56  ;;  %v182_v30 = vrot.slane %v6937_v31, %v6871_v62 }
  0xd8   :  { %1143 = vrot.lane.b32.xlu1 %v6694_v3, %s6581_s25  ;;  %v6832_v42 = vpop.permute.xlu1 %196  ;;  %11169 = vst [vmem:[#allocation20_spill] sm:$0xff] %v11168_v39  ;;  %v186_v19 = vrot.slane %v6941_v24, %v6871_v62  ;;  %v178_v59 = vrot.slane %v6978_v51, %v6871_v62 }
  0xd9   :  { %6248 = vset.pattern.permute.xlu1 %v10931_v43  ;;  %v6876_v0 = vpop.permute.xlu0 %224  ;;  %v6894_v43 = vsub.s32 3, %v6853_v52  ;;  %v162_v29 = vmul.f32 %v158_v32, %v6857_v54  ;;  %v189_v15 = vmul.f32 %v182_v30, %v6820_v37 }
  0xda   :  { %v190_v10 = vmul.f32 %v186_v19, %v6820_v37 }
  0xdb   :  { %v234_v32 = vrot.slane %v6978_v51, %v6894_v43 }
  0xdc   :  { %1145 = vrot.lane.b32.xlu1 %v6703_v5, %s6581_s25 }
  0xdd   :  { %v6839_v44 = vpop.permute.xlu1 %280  ;;  %v252_v14 = vpop.permute.xlu0 %251 }
  0xe0   :  { %1149 = vrot.lane.b32.xlu1 %v6711_v6, %s6581_s25 }
  0xe1   :  { %v256_v18 = vpop.permute.xlu0 %255 }
  0xe2   :  { %v6845_v46 = vpop.permute.xlu1 %308  ;;  %v262_v8 = vsel %vm11010_vm7, %v256_v18, %v252_v14 }
  0xe4   :  { %1256 = vperm.xlu1 %6248, %v6692_v2  }
  0xe6   :  { %v6849_v48 = vpop.permute.xlu1 %253 }
  0xe8   :  { %6249 = vset.pattern.permute.xlu1 %v10927_v50  ;;  %v6885_v50 = vsub.s32 2, %v6853_v52 }
  0xe9   :  { %1312 = vperm.xlu1 %6249, %v6692_v2  }
  0xea   :  { %v6855_v53 = vpop.permute.xlu1 %257  ;;  %v202_v33 = vrot.slane %v6974_v60, %v6885_v50  ;;  %v206_v28 = vrot.slane %v6978_v51, %v6885_v50  ;;  %v210_v19 = vrot.slane %v6937_v31, %v6885_v50  ;;  %v214_v30 = vrot.slane %v6941_v24, %v6885_v50 }
  0xeb   :  { %v261_v27 = vsel %vm11010_vm7, %v6849_v48, %v6855_v53  ;;  %v263_v11 = vsel %vm11010_vm7, %v6855_v53, %v6849_v48  ;;  %v187_v48 = vmul.f32 %v174_v13, %v6820_v37  ;;  %v188_v53 = vmul.f32 %v178_v59, %v6820_v37 }
  0xec   :  { %v160_v51 = vmul.f32 %v150_v17, %v6857_v54  ;;  %v7053_v4 = vsel %vm6954_vm8, %v263_v11, 0.0  ;;  %v238_v13 = vrot.slane %v6937_v31, %v6894_v43  ;;  %v242_v17 = vrot.slane %v6941_v24, %v6894_v43 }
  0xed   :  { %1283 = vrot.lane.b32.xlu1 %v6694_v3, %s6586_s26  ;;  %v215_v59 = vmul.f32 %v202_v33, %v6832_v42  ;;  %v218_v11 = vmul.f32 %v214_v30, %v6832_v42  ;;  %v7073_v31 = vsel %vm6954_vm8, %v262_v8, 0.0  ;;  %v7087_v33 = vrot.slane %v734_v16, %v6871_v62 }
  0xee   :  { %v6864_v57 = vpop.permute.xlu1 %364  ;;  %6252 = vset.pattern.permute.xlu1 %v10925_v58  ;;  %v244_v30 = vmul.f32 %v234_v32, %v6876_v0  ;;  %v11178_v16 = vrot.slane %v6898_v9, %v6871_v62 }
  0xf0   :  { %vm7103_vm12 = vcmp.eq.s32.totalorder %v11178_v16, 1 }
  0xf1   :  { %1285 = vrot.lane.b32.xlu1 %v6703_v5, %s6586_s26 }
  0xf3   :  { %v6879_v58 = vpop.permute.xlu1 %420 }
  0xf5   :  { %1289 = vrot.lane.b32.xlu1 %v6711_v6, %s6586_s26  ;;  %v7057_v6 = vsel %vm6958_vm9, %v261_v27, 0.0  ;;  %v11173_v27 = vmov 3  }
  0xf6   :  { %v326_v16 = vrot.slane %v7057_v6, %v6871_v62 }
  0xf7   :  { %v6905_v63 = vpop.permute.xlu1 %391 }
  0xf9   :  { %1396 = vperm.xlu1 %6252, %v6692_v2   ;;  %v7038_v2 = vpop.permute.xlu0 %336 }
  0xfb   :  { %v6945_v55 = vpop.permute.xlu1 %393 }
  0xfd   :  { %6253 = vset.pattern.permute.xlu1 %v10977_v1  ;;  %v161_v1 = vmul.f32 %v154_v25, %v6857_v54  ;;  %v230_v25 = vrot.slane %v6974_v60, %v6894_v43  ;;  %v159_v60 = vmul.f32 %v146_v47, %v6857_v54  ;;  %v194_v54 = vadd.f32 %v190_v10, %v162_v29  ;;  %v7067_v47 = vpop.permute.xlu0 %448 }
  0xfe   :  { %1447 = vperm.xlu1 %6253, %v6827_v41   ;;  %v294_v10 = vrot.slane %v7053_v4, %v6862_v56 }
  0xff   :  { %v6993_v22 = vpop.permute.xlu1 %397  ;;  %v193_v37 = vadd.f32 %v189_v15, %v161_v1  ;;  %v298_v15 = vrot.slane %v7057_v6, %v6862_v56  ;;  %v191_v29 = vadd.f32 %v187_v48, %v159_v60  ;;  %v11179_v48 = vmov 0 }
 0x100   :  { %v11180_v48 = vsel %vm7103_vm12, 4294967295, %v11179_v48 }
 0x101   :  { %11181 = vst [vmem:[#allocation23_spill] sm:$0xff] %v11180_v48 }
 0x102   :  { %6255 = vset.pattern.permute.xlu1 %v10989_v7  ;;  %v260_v7 = vsel %vm11010_vm7, %v252_v14, %v256_v18  ;;  %v216_v18 = vmul.f32 %v206_v28, %v6832_v42  ;;  %v217_v14 = vmul.f32 %v210_v19, %v6832_v42  ;;  %v192_v42 = vadd.f32 %v188_v53, %v160_v51 }
 0x103   :  { %v7040_v49 = vpop.permute.xlu1 %504  ;;  %1503 = vperm.xlu1 %6255, %v6827_v41   ;;  %v7077_v1 = vsel %vm6958_vm9, %v260_v7, 0.0  ;;  %v222_v28 = vadd.f32 %v218_v11, %v194_v54  ;;  %v243_v19 = vmul.f32 %v230_v25, %v6876_v0  ;;  %v219_v53 = vadd.f32 %v215_v59, %v191_v29  ;;  %v396_v59 = vpop.permute.xlu0 %395 }
 0x104   :  { %v221_v7 = vadd.f32 %v217_v14, %v193_v37  ;;  %v220_v60 = vadd.f32 %v216_v18, %v192_v42  ;;  %v286_v25 = vrot.slane %v7073_v31, %v6862_v56  ;;  %v290_v32 = vrot.slane %v7077_v1, %v6862_v56 }
 0x105   :  { %v245_v51 = vmul.f32 %v238_v13, %v6876_v0  ;;  %v246_v37 = vmul.f32 %v242_v17, %v6876_v0  ;;  %v301_v54 = vmul.f32 %v294_v10, %v6839_v44  ;;  %v11182_v11 = vmov 5  }
 0x106   :  { %v322_v42 = vrot.slane %v7053_v4, %v6871_v62  ;;  %v248_v8 = vadd.f32 %v244_v30, %v220_v60  ;;  %v299_v18 = vmul.f32 %v286_v25, %v6839_v44  ;;  %v300_v0 = vmul.f32 %v290_v32, %v6839_v44 }
 0x107   :  { %6256 = vset.pattern.permute.xlu1 %v11173_v27  ;;  %v11174_v27 = vrot.slane %v6898_v9, %v6862_v56  ;;  %v302_v9 = vmul.f32 %v298_v15, %v6839_v44  ;;  %v249_v10 = vadd.f32 %v245_v51, %v221_v7  ;;  %v250_v15 = vadd.f32 %v246_v37, %v222_v28 }
 0x108   :  { %v7083_v24 = vpop.permute.xlu1 %560  ;;  %1531 = vperm.xlu1 %6256, %v6827_v41   ;;  %v401_v7 = vsel %vm11008_vm10, %v6945_v55, %v6993_v22  ;;  %v403_v28 = vsel %vm11008_vm10, %v6993_v22, %v6945_v55  ;;  %v318_v44 = vrot.slane %v7077_v1, %v6871_v62  ;;  %v350_v30 = vrot.slane %v7053_v4, %v6885_v50 }
 0x109   :  { %vm7096_vm11 = vcmp.eq.s32.totalorder %v11174_v27, 1  ;;  %v11183_v27 = vsub.s32 6, %v6853_v52  ;;  %v306_v39 = vadd.f32 %v302_v9, %v250_v15  ;;  %v11185_v60 = vmov 6   ;;  %v7171_v9 = vpop.permute.xlu0 %476 }
 0x10a   :  { %v11176_v45 = vsel %vm7096_vm11, 4294967295, %v11175_v45  ;;  %v342_v25 = vrot.slane %v7073_v31, %v6885_v50  ;;  %v346_v22 = vrot.slane %v7077_v1, %v6885_v50  ;;  %v329_v55 = vmul.f32 %v322_v42, %v6845_v46 }
 0x10b   :  { %11177 = vst [vmem:[#allocation22_spill] sm:$0xff] %v11176_v45  ;;  %v7123_v29 = vrot.slane %v6694_v3, %v11183_v27  ;;  %v11184_v13 = vmov %v11183_v27  ;;  %v247_v27 = vadd.f32 %v243_v19, %v219_v53  ;;  %v314_v19 = vrot.slane %v7073_v31, %v6871_v62 }
 0x10c   :  { %v7115_v14 = vpop.permute.xlu1 %531  ;;  %6258 = vset.pattern.permute.xlu1 %v11182_v11  ;;  %v7130_v17 = vrot.slane %v6703_v5, %v11184_v13  ;;  %v305_v11 = vadd.f32 %v301_v54, %v249_v10  ;;  %v354_v53 = vrot.slane %v7057_v6, %v6885_v50  ;;  %v330_v32 = vmul.f32 %v326_v16, %v6845_v46 }
 0x10d   :  { %1603 = vperm.xlu1 %6258, %v6827_v41   ;;  %v400_v37 = vsel %vm11008_vm10, %v6905_v63, %v396_v59  ;;  %v402_v54 = vsel %vm11008_vm10, %v396_v59, %v6905_v63  ;;  %v7175_v13 = vsel %vm7096_vm11, %v403_v28, 0.0  ;;  %v7179_v10 = vsel %vm7103_vm12, %v401_v7, 0.0  ;;  %v7207_v28 = vpop.permute.xlu0 %588 }
 0x10e   :  { %v303_v15 = vadd.f32 %v299_v18, %v247_v27  ;;  %v304_v42 = vadd.f32 %v300_v0, %v248_v8  ;;  %v333_v16 = vadd.f32 %v329_v55, %v305_v11  ;;  %v357_v12 = vmul.f32 %v350_v30, %v7038_v2 }
 0x10f   :  { %v358_v34 = vmul.f32 %v354_v53, %v7038_v2  ;;  %v378_v63 = vrot.slane %v7053_v4, %v6894_v43  ;;  %v382_v59 = vrot.slane %v7057_v6, %v6894_v43  ;;  %v7190_v7 = vsel %vm7096_vm11, %v402_v54, 0.0 }
 0x110   :  { %v7147_v51 = vpop.permute.xlu1 %533  ;;  %v434_v8 = vrot.slane %v7175_v13, %v6862_v56  ;;  %v438_v11 = vrot.slane %v7179_v10, %v6862_v56  ;;  %v11186_v4 = vmov 8   ;;  %v370_v6 = vrot.slane %v7073_v31, %v6894_v43 }
 0x111   :  { %6259 = vset.pattern.permute.xlu1 %v11185_v60  ;;  %v334_v60 = vadd.f32 %v330_v32, %v306_v39  ;;  %v7194_v39 = vsel %vm7103_vm12, %v400_v37, 0.0  ;;  %v374_v18 = vrot.slane %v7077_v1, %v6894_v43  ;;  %v327_v0 = vmul.f32 %v314_v19, %v6845_v46 }
 0x112   :  { %1631 = vperm.xlu1 %6259, %v6827_v41   ;;  %v328_v27 = vmul.f32 %v318_v44, %v6845_v46  ;;  %v355_v30 = vmul.f32 %v342_v25, %v7038_v2  ;;  %v356_v53 = vmul.f32 %v346_v22, %v7038_v2  ;;  %v361_v55 = vadd.f32 %v357_v12, %v333_v16 }
 0x113   :  { %v362_v32 = vadd.f32 %v358_v34, %v334_v60  ;;  %v11187_v31 = vrot.slane %v6909_v36, %v6862_v56  ;;  %v11188_v37 = vmov 0  ;;  %v11191_v46 = vrot.slane %v6909_v36, %v6871_v62 }
 0x114   :  { %v538_v40 = vpop.permute.xlu1 %537  ;;  %v11192_v1 = vmov 0  ;;  %v331_v44 = vadd.f32 %v327_v0, %v303_v15  ;;  %v332_v2 = vadd.f32 %v328_v27, %v304_v42  ;;  %v426_v12 = vrot.slane %v7190_v7, %v6862_v56 }
 0x115   :  { %vm7215_vm14 = vcmp.eq.s32.totalorder %v11187_v31, 1  ;;  %vm7222_vm15 = vcmp.eq.s32.totalorder %v11191_v46, 1  ;;  %v430_v34 = vrot.slane %v7194_v39, %v6862_v56  ;;  %v385_v60 = vmul.f32 %v378_v63, %v6864_v57  ;;  %v536_v46 = vpop.permute.xlu0 %535 }
 0x116   :  { %6261 = vset.pattern.permute.xlu1 %v11186_v4  ;;  %v11189_v37 = vsel %vm7215_vm14, 4294967295, %v11188_v37  ;;  %v11193_v1 = vsel %vm7222_vm15, 4294967295, %v11192_v1  ;;  %v386_v25 = vmul.f32 %v382_v59, %v6864_v57  ;;  %v441_v36 = vmul.f32 %v434_v8, %v6879_v58 }
 0x117   :  { %1703 = vperm.xlu1 %6261, %v6827_v41   ;;  %11190 = vst [vmem:[#allocation24_spill] sm:$0xff] %v11189_v37  ;;  %11194 = vst [vmem:[#allocation25_spill] sm:$0xff] %v11193_v1  ;;  %v442_v22 = vmul.f32 %v438_v11, %v6879_v58  ;;  %v383_v54 = vmul.f32 %v370_v6, %v6864_v57  ;;  %v384_v16 = vmul.f32 %v374_v18, %v6864_v57  ;;  %v11196_v63 = vmov 9  }
 0x118   :  { %v7226_v19 = vpop.permute.xlu1 %644  ;;  %v11195_v15 = vrot.slane %v6694_v3, %v6885_v50  ;;  %v389_v59 = vadd.f32 %v385_v60, %v361_v55  ;;  %v390_v27 = vadd.f32 %v386_v25, %v362_v32  ;;  %v462_v8 = vrot.slane %v7175_v13, %v6871_v62 }
 0x119   :  { %v466_v11 = vrot.slane %v7179_v10, %v6871_v62  ;;  %v359_v57 = vadd.f32 %v355_v30, %v331_v44  ;;  %v360_v6 = vadd.f32 %v356_v53, %v332_v2  ;;  %v439_v18 = vmul.f32 %v426_v12, %v6879_v58 }
 0x11a   :  { %v7242_v42 = vrot.slane %v11195_v15, %v6885_v50  ;;  %v440_v31 = vmul.f32 %v430_v34, %v6879_v58  ;;  %v445_v0 = vadd.f32 %v441_v36, %v389_v59  ;;  %v446_v55 = vadd.f32 %v442_v22, %v390_v27 }
 0x11b   :  { %6262 = vset.pattern.permute.xlu1 %v11196_v63  ;;  %v541_v32 = vsel %vm11007_vm13, %v7147_v51, %v538_v40  ;;  %v543_v60 = vsel %vm11007_vm13, %v538_v40, %v7147_v51  ;;  %v387_v30 = vadd.f32 %v383_v54, %v359_v57  ;;  %v388_v53 = vadd.f32 %v384_v16, %v360_v6 }
 0x11c   :  { %1731 = vperm.xlu1 %6262, %v6827_v41   ;;  %v90_v41 = vld [vmem:[#allocation8 + $0xa] sm:$0x3]  ;;  %v490_v44 = vrot.slane %v7175_v13, %v6885_v50  ;;  %v494_v58 = vrot.slane %v7179_v10, %v6885_v50  ;;  %v454_v2 = vrot.slane %v7190_v7, %v6871_v62  ;;  %v458_v12 = vrot.slane %v7194_v39, %v6871_v62 }
 0x11d   :  { %v7254_v15 = vpop.permute.xlu1 %672  ;;  %v469_v34 = vmul.f32 %v462_v8, %v7067_v47  ;;  %v470_v25 = vmul.f32 %v466_v11, %v7067_v47  ;;  %v11197_v40 = vmov 11   ;;  %v540_v51 = vsel %vm11007_vm13, %v7115_v14, %v536_v46 }
 0x11e   :  { %v542_v36 = vsel %vm11007_vm13, %v536_v46, %v7115_v14  ;;  %v7281_v22 = vsel %vm7215_vm14, %v543_v60, 0.0  ;;  %v7285_v54 = vsel %vm7222_vm15, %v541_v32, 0.0  ;;  %vm91_vm0 = vcmp.gt.f32.partialorder %v90_v41, 0.5  ;;  %v7295_v60 = vpop.permute.xlu0 %616 }
 0x11f   :  { %v443_v16 = vadd.f32 %v439_v18, %v387_v30  ;;  %v444_v59 = vadd.f32 %v440_v31, %v388_v53  ;;  %v473_v27 = vadd.f32 %v469_v34, %v445_v0  ;;  %v474_v8 = vadd.f32 %v470_v25, %v446_v55 }
 0x120   :  { %6264 = vset.pattern.permute.xlu1 %v11197_v40  ;;  %v497_v57 = vmul.f32 %v490_v44, %v7171_v9  ;;  %v498_v6 = vmul.f32 %v494_v58, %v7171_v9  ;;  %v518_v14 = vrot.slane %v7175_v13, %v6894_v43  ;;  %v522_v46 = vrot.slane %v7179_v10, %v6894_v43 }
 0x121   :  { %v7299_v18 = vsel %vm7215_vm14, %v542_v36, 0.0  ;;  %v7303_v0 = vsel %vm7222_vm15, %v540_v51, 0.0  ;;  %v574_v31 = vrot.slane %v7281_v22, %v6862_v56  ;;  %v578_v55 = vrot.slane %v7285_v54, %v6862_v56 }
 0x122   :  { %v7287_v11 = vpop.permute.xlu1 %768  ;;  %v467_v13 = vmul.f32 %v454_v2, %v7067_v47  ;;  %v468_v10 = vmul.f32 %v458_v12, %v7067_v47  ;;  %v482_v32 = vrot.slane %v7190_v7, %v6885_v50  ;;  %v486_v30 = vrot.slane %v7194_v39, %v6885_v50  ;;  %v7323_v12 = vpop.permute.xlu0 %720 }
 0x123   :  { %v510_v53 = vrot.slane %v7190_v7, %v6894_v43  ;;  %v514_v44 = vrot.slane %v7194_v39, %v6894_v43  ;;  %v501_v58 = vadd.f32 %v497_v57, %v473_v27  ;;  %v502_v34 = vadd.f32 %v498_v6, %v474_v8 }
 0x124   :  { %v471_v25 = vadd.f32 %v467_v13, %v443_v16  ;;  %v472_v51 = vadd.f32 %v468_v10, %v444_v59  ;;  %v566_v2 = vrot.slane %v7299_v18, %v6862_v56  ;;  %v570_v47 = vrot.slane %v7303_v0, %v6862_v56 }
 0x125   :  { %v525_v40 = vmul.f32 %v518_v14, %v7040_v49  ;;  %v526_v7 = vmul.f32 %v522_v46, %v7040_v49  ;;  %v581_v39 = vmul.f32 %v574_v31, %v7083_v24  ;;  %v582_v27 = vmul.f32 %v578_v55, %v7083_v24 }
 0x126   :  { %v495_v16 = vmul.f32 %v482_v32, %v7171_v9  ;;  %v496_v59 = vmul.f32 %v486_v30, %v7171_v9  ;;  %v523_v8 = vmul.f32 %v510_v53, %v7040_v49  ;;  %v524_v57 = vmul.f32 %v514_v44, %v7040_v49 }
 0x127   :  { %v7325_v36 = vpop.permute.xlu1 %816  ;;  %v529_v6 = vadd.f32 %v525_v40, %v501_v58  ;;  %v530_v13 = vadd.f32 %v526_v7, %v502_v34  ;;  %v602_v10 = vrot.slane %v7281_v22, %v6871_v62  ;;  %v606_v14 = vrot.slane %v7285_v54, %v6871_v62 }
 0x128   :  { %v499_v46 = vadd.f32 %v495_v16, %v471_v25  ;;  %v500_v31 = vadd.f32 %v496_v59, %v472_v51  ;;  %v579_v55 = vmul.f32 %v566_v2, %v7083_v24  ;;  %v580_v32 = vmul.f32 %v570_v47, %v7083_v24  ;;  %v7350_v51 = vpop.permute.xlu0 %892 }
 0x129   :  { %v585_v4 = vadd.f32 %v581_v39, %v529_v6  ;;  %v586_v9 = vadd.f32 %v582_v27, %v530_v13  ;;  %v11198_v30 = vmov 0   ;;  %v825_v49 = vsub.s32 7, %v6853_v52 }
 0x12a   :  { %v876_v53 = vsel %vm91_vm0, 1, %v11198_v30  ;;  %v527_v44 = vadd.f32 %v523_v8, %v499_v46  ;;  %v528_v58 = vadd.f32 %v524_v57, %v500_v31  ;;  %v594_v34 = vrot.slane %v7299_v18, %v6871_v62 }
 0x12b   :  { %v598_v25 = vrot.slane %v7303_v0, %v6871_v62  ;;  %v609_v24 = vmul.f32 %v602_v10, %v7207_v28  ;;  %v610_v2 = vmul.f32 %v606_v14, %v7207_v28  ;;  %v630_v41 = vrot.slane %v7281_v22, %v6885_v50 }
 0x12c   :  { %v7344_v40 = vpop.permute.xlu1 %920  ;;  %v634_v47 = vrot.slane %v7285_v54, %v6885_v50  ;;  %v583_v7 = vadd.f32 %v579_v55, %v527_v44  ;;  %v584_v39 = vadd.f32 %v580_v32, %v528_v58  ;;  %v11199_v27 = vrot.slane %v6703_v5, %v6885_v50 }
 0x12d   :  { %v806_v59 = vrot.slane %v7130_v17, %v6885_v50  ;;  %v613_v8 = vadd.f32 %v609_v24, %v585_v4  ;;  %v614_v57 = vadd.f32 %v610_v2, %v586_v9  ;;  %v880_v6 = vrot.slane %v876_v53, %v6862_v56 }
 0x12e   :  { %v7362_v16 = vrot.slane %v11199_v27, %v6885_v50  ;;  %v884_v13 = vrot.slane %v876_v53, %v6871_v62  ;;  %v607_v14 = vmul.f32 %v594_v34, %v7207_v28  ;;  %v608_v46 = vmul.f32 %v598_v25, %v7207_v28  ;;  %v866_v25 = vpop.permute.xlu0 %865 }
 0x12f   :  { %v622_v31 = vrot.slane %v7299_v18, %v6885_v50  ;;  %v626_v55 = vrot.slane %v7303_v0, %v6885_v50  ;;  %v637_v4 = vmul.f32 %v630_v41, %v7295_v60  ;;  %v638_v32 = vmul.f32 %v634_v47, %v7295_v60 }
 0x130   :  { %v864_v10 = vpop.permute.xlu1 %863  ;;  %v658_v9 = vrot.slane %v7281_v22, %v6894_v43  ;;  %v662_v53 = vrot.slane %v7285_v54, %v6894_v43  ;;  %v650_v28 = vrot.slane %v7299_v18, %v6894_v43  ;;  %v654_v44 = vrot.slane %v7303_v0, %v6894_v43 }
 0x131   :  { %v611_v58 = vadd.f32 %v607_v14, %v583_v7  ;;  %v612_v34 = vadd.f32 %v608_v46, %v584_v39  ;;  %v641_v24 = vadd.f32 %v637_v4, %v613_v8  ;;  %v642_v2 = vadd.f32 %v638_v32, %v614_v57  ;;  %v93_v39 = vld [vmem:[#allocation8 + $0xc] sm:$0x3] }
 0x132   :  { %v822_v41 = vrot.slane %v6694_v3, %v6894_v43  ;;  %v7390_v22 = vrot.slane %v6694_v3, %v825_v49  ;;  %v635_v47 = vmul.f32 %v622_v31, %v7295_v60  ;;  %v636_v18 = vmul.f32 %v626_v55, %v7295_v60 }
 0x133   :  { %v663_v0 = vmul.f32 %v650_v28, %v7226_v19  ;;  %v664_v7 = vmul.f32 %v654_v44, %v7226_v19  ;;  %v665_v27 = vmul.f32 %v658_v9, %v7226_v19  ;;  %v666_v8 = vmul.f32 %v662_v53, %v7226_v19  ;;  %v870_v28 = vpop.permute.xlu0 %869 }
 0x134   :  { %v868_v54 = vpop.permute.xlu1 %867  ;;  %vm7398_vm2 = vcmp.eq.s32.totalorder %v880_v6, 1  ;;  %v11200_v57 = vmov 0  ;;  %v830_v3 = vrot.slane %v6703_v5, %v6894_v43  ;;  %v639_v14 = vadd.f32 %v635_v47, %v611_v58 }
 0x135   :  { %v11201_v57 = vsel %vm7398_vm2, 4294967295, %v11200_v57  ;;  %v640_v46 = vadd.f32 %v636_v18, %v612_v34  ;;  %v711_v60 = vmul.f32 %v6965_v23, %v7254_v15  ;;  %v11203_v31 = vrot.slane %v6914_v35, %v6862_v56 }
 0x136   :  { %11202 = vst [vmem:[#allocation26_spill] sm:$0xff] %v11201_v57  ;;  %v669_v4 = vadd.f32 %v665_v27, %v641_v24  ;;  %v670_v32 = vadd.f32 %v666_v8, %v642_v2  ;;  %vm7410_vm4 = vcmp.eq.s32.totalorder %v884_v13, 1  ;;  %v11204_v19 = vmov 0  ;;  %v11209_v24 = vld [vmem:[#allocation19_spill] sm:$0xff] }
 0x137   :  { %v712_v55 = vmul.f32 %v11203_v31, %v7254_v15  ;;  %v11205_v19 = vsel %vm7410_vm4, 4294967295, %v11204_v19  ;;  %vm94_vm0 = vcmp.gt.f32.partialorder %v93_v39, 0.5  ;;  %v667_v5 = vadd.f32 %v663_v0, %v639_v14  ;;  %v96_v0 = vld [vmem:[#allocation8 + $0xe] sm:$0x3]  ;;  %v6415_v27 = vld [vmem:[#allocation2 + $0x8] sm:$0xff] }
 0x138   :  { %11206 = vst [vmem:[#allocation27_spill] sm:$0xff] %v11205_v19  ;;  %v7414_v6 = vpop.permute.xlu1 %948  ;;  %v668_v9 = vadd.f32 %v664_v7, %v640_v46  ;;  %v759_v53 = vmul.f32 %v7001_v26, %v7323_v12  ;;  %v11207_v23 = vrot.slane %v6952_v38, %v6871_v62  ;;  %v761_v13 = vmul.f32 %v7087_v33, %v7323_v12 }
 0x139   :  { %v11208_v44 = vrot.slane %v6998_v20, %v6871_v62  ;;  %v713_v34 = vmul.f32 %v6970_v21, %v7254_v15  ;;  %v11210_v26 = vrot.slane %v11209_v24, %v6862_v56  ;;  %v715_v47 = vadd.f32 %v711_v60, %v667_v5 }
 0x13a   :  { %v760_v35 = vmul.f32 %v11207_v23, %v7323_v12  ;;  %v716_v38 = vadd.f32 %v712_v55, %v668_v9  ;;  %v872_v18 = vsel %vm11006_vm1, %v864_v10, %v868_v54  ;;  %v874_v33 = vsel %vm11006_vm1, %v868_v54, %v864_v10  ;;  %v7448_v54 = vpop.permute.xlu0 %976 }
 0x13b   :  { %v762_v58 = vmul.f32 %v11208_v44, %v7323_v12  ;;  %v714_v2 = vmul.f32 %v11210_v26, %v7254_v15  ;;  %v717_v7 = vadd.f32 %v713_v34, %v669_v4  ;;  %v873_v12 = vsel %vm11006_vm1, %v866_v25, %v870_v28 }
 0x13c   :  { %v875_v21 = vsel %vm11006_vm1, %v870_v28, %v866_v25  ;;  %v834_v15 = vrot.slane %v6415_v27, %v825_v49  ;;  %v842_v8 = vrot.slane %v822_v41, %v6894_v43  ;;  %v846_v14 = vrot.slane %v7390_v22, %v6894_v43 }
 0x13d   :  { %v718_v20 = vadd.f32 %v714_v2, %v670_v32  ;;  %v850_v10 = vrot.slane %v830_v3, %v6894_v43  ;;  %v7450_v46 = vpop.permute.xlu1 %1032  ;;  %v7454_v60 = vsel %vm7398_vm2, %v872_v18, 0.0  ;;  %v7458_v25 = vsel %vm7410_vm4, %v874_v33, 0.0 }
 0x13e   :  { %v1016_v52 = vsel %vm94_vm0, 1, %v11198_v30  ;;  %vm97_vm1 = vcmp.gt.f32.partialorder %v96_v0, 0.5  ;;  %v763_v49 = vadd.f32 %v759_v53, %v715_v47  ;;  %v764_v41 = vadd.f32 %v760_v35, %v716_v38  ;;  %v1004_v17 = vpop.permute.xlu0 %1003 }
 0x13f   :  { %v7464_v22 = vsel %vm7398_vm2, %v873_v12, 0.0  ;;  %v7468_v3 = vsel %vm7410_vm4, %v875_v21, 0.0  ;;  %v765_v31 = vadd.f32 %v761_v13, %v717_v7  ;;  %v766_v55 = vadd.f32 %v762_v58, %v718_v20 }
 0x140   :  { %v807_v4 = vmul.f32 %v7242_v42, %v7287_v11  ;;  %v11211_v39 = vrot.slane %v7123_v29, %v6885_v50  ;;  %vm11009_vm0 = vcmp.lt.s32.totalorder %v6868_v61, 113  ;;  %v854_v5 = vrot.slane %v834_v15, %v6894_v43 }
 0x141   :  { %v898_v9 = vrot.slane %v7454_v60, %v6862_v56  ;;  %v902_v53 = vrot.slane %v7458_v25, %v6862_v56  ;;  %v1020_v23 = vrot.slane %v1016_v52, %v6862_v56  ;;  %v809_v42 = vmul.f32 %v7362_v16, %v7287_v11 }
 0x142   :  { %v808_v32 = vmul.f32 %v11211_v39, %v7287_v11  ;;  %v810_v29 = vmul.f32 %v806_v59, %v7287_v11  ;;  %v1024_v35 = vrot.slane %v1016_v52, %v6871_v62  ;;  %v7490_v28 = vpop.permute.xlu1 %1060  ;;  %v7494_v13 = vsel %vm97_vm1, 1, %v11198_v30 }
 0x143   :  { %v906_v44 = vrot.slane %v7464_v22, %v6862_v56  ;;  %v910_v58 = vrot.slane %v7468_v3, %v6862_v56  ;;  %v855_v16 = vmul.f32 %v842_v8, %v7325_v36  ;;  %v856_v34 = vmul.f32 %v846_v14, %v7325_v36 }
 0x144   :  { %v811_v11 = vadd.f32 %v807_v4, %v763_v49  ;;  %v812_v59 = vadd.f32 %v808_v32, %v764_v41  ;;  %v813_v24 = vadd.f32 %v809_v42, %v765_v31  ;;  %v814_v26 = vadd.f32 %v810_v29, %v766_v55  ;;  %v1008_v4 = vpop.permute.xlu0 %1007 }
 0x145   :  { %v857_v2 = vmul.f32 %v850_v10, %v7325_v36  ;;  %v858_v47 = vmul.f32 %v854_v5, %v7325_v36  ;;  %v911_v38 = vmul.f32 %v898_v9, %v7350_v51  ;;  %v912_v18 = vmul.f32 %v902_v53, %v7350_v51 }
 0x146   :  { %vm7506_vm1 = vcmp.eq.s32.totalorder %v1020_v23, 1  ;;  %v11212_v33 = vmov 0  ;;  %vm7510_vm13 = vcmp.eq.s32.totalorder %v1024_v35, 1  ;;  %v11215_v0 = vmov 0  ;;  %v1006_v7 = vpop.permute.xlu1 %1005 }
 0x147   :  { %v11213_v33 = vsel %vm7506_vm1, 4294967295, %v11212_v33  ;;  %v11216_v0 = vsel %vm7510_vm13, 4294967295, %v11215_v0  ;;  %v1160_v20 = vrot.slane %v7494_v13, %v6862_v56  ;;  %v1164_v12 = vrot.slane %v7494_v13, %v6871_v62 }
 0x148   :  { %11214 = vst [vmem:[#allocation19_spill] sm:$0xff] %v11213_v33  ;;  %11217 = vst [vmem:[#allocation28_spill] sm:$0xff] %v11216_v0  ;;  %v859_v36 = vadd.f32 %v855_v16, %v811_v11  ;;  %v860_v21 = vadd.f32 %v856_v34, %v812_v59  ;;  %v926_v27 = vrot.slane %v7454_v60, %v6871_v62  ;;  %vm11012_vm10 = vcmp.lt.s32.totalorder %v6868_v61, 112 }
 0x149   :  { %v930_v15 = vrot.slane %v7458_v25, %v6871_v62  ;;  %v913_v8 = vmul.f32 %v906_v44, %v7350_v51  ;;  %v914_v14 = vmul.f32 %v910_v58, %v7350_v51  ;;  %v934_v10 = vrot.slane %v7464_v22, %v6871_v62 }
 0x14a   :  { %v938_v52 = vrot.slane %v7468_v3, %v6871_v62  ;;  %v861_v49 = vadd.f32 %v857_v2, %v813_v24  ;;  %v862_v41 = vadd.f32 %v858_v47, %v814_v26  ;;  %v915_v31 = vadd.f32 %v911_v38, %v859_v36  ;;  %v1010_v9 = vpop.permute.xlu1 %1009  ;;  %v7557_v2 = vpop.permute.xlu0 %1088  ;;  %v99_v38 = vld [vmem:[#allocation8 + $0x10] sm:$0x3] }
 0x14b   :  { %v916_v55 = vadd.f32 %v912_v18, %v860_v21  ;;  %v962_v39 = vrot.slane %v7464_v22, %v6885_v50  ;;  %v966_v32 = vrot.slane %v7468_v3, %v6885_v50  ;;  %v990_v51 = vrot.slane %v7464_v22, %v6894_v43 }
 0x14c   :  { %v994_v5 = vrot.slane %v7468_v3, %v6894_v43  ;;  %v939_v53 = vmul.f32 %v926_v27, %v7344_v40  ;;  %v940_v23 = vmul.f32 %v930_v15, %v7344_v40  ;;  %v954_v42 = vrot.slane %v7454_v60, %v6885_v50 }
 0x14d   :  { %v958_v29 = vrot.slane %v7458_v25, %v6885_v50  ;;  %v1012_v35 = vsel %vm11009_vm0, %v1004_v17, %v1008_v4  ;;  %v1014_v22 = vsel %vm11009_vm0, %v1008_v4, %v1004_v17  ;;  %v1013_v3 = vsel %vm11009_vm0, %v1006_v7, %v1010_v9 }
 0x14e   :  { %v1015_v44 = vsel %vm11009_vm0, %v1010_v9, %v1006_v7  ;;  %v917_v58 = vadd.f32 %v913_v8, %v861_v49  ;;  %v918_v16 = vadd.f32 %v914_v14, %v862_v41  ;;  %v943_v34 = vadd.f32 %v939_v53, %v915_v31  ;;  %v7559_v47 = vpop.permute.xlu1 %1116  ;;  %v7589_v41 = vpop.permute.xlu0 %1200 }
 0x14f   :  { %v944_v11 = vadd.f32 %v940_v23, %v916_v55  ;;  %v941_v59 = vmul.f32 %v934_v10, %v7344_v40  ;;  %v942_v24 = vmul.f32 %v938_v52, %v7344_v40  ;;  %v982_v26 = vrot.slane %v7454_v60, %v6894_v43 }
 0x150   :  { %v986_v17 = vrot.slane %v7458_v25, %v6894_v43  ;;  %v967_v18 = vmul.f32 %v954_v42, %v7414_v6  ;;  %v968_v7 = vmul.f32 %v958_v29, %v7414_v6  ;;  %v7565_v36 = vsel %vm7506_vm1, %v1013_v3, 0.0 }
 0x151   :  { %v7569_v40 = vsel %vm7510_vm13, %v1015_v44, 0.0  ;;  %v969_v60 = vmul.f32 %v962_v39, %v7414_v6  ;;  %v970_v25 = vmul.f32 %v966_v32, %v7414_v6  ;;  %v7575_v21 = vsel %vm7506_vm1, %v1012_v35, 0.0 }
 0x152   :  { %v7579_v27 = vsel %vm7510_vm13, %v1014_v22, 0.0  ;;  %v971_v15 = vadd.f32 %v967_v18, %v943_v34  ;;  %v972_v8 = vadd.f32 %v968_v7, %v944_v11  ;;  %vm7581_vm0 = vcmp.eq.s32.totalorder %v1160_v20, 1 }
 0x153   :  { %v11218_v14 = vmov 0  ;;  %vm100_vm7 = vcmp.gt.f32.partialorder %v99_v38, 0.5  ;;  %v945_v10 = vadd.f32 %v941_v59, %v917_v58  ;;  %v946_v52 = vadd.f32 %v942_v24, %v918_v16  ;;  %v7597_v39 = vpop.permute.xlu1 %1172 }
 0x154   :  { %v11219_v14 = vsel %vm7581_vm0, 4294967295, %v11218_v14  ;;  %v1046_v6 = vrot.slane %v7565_v36, %v6862_v56  ;;  %v1050_v49 = vrot.slane %v7569_v40, %v6862_v56  ;;  %v995_v31 = vmul.f32 %v982_v26, %v7448_v54  ;;  %v1148_v26 = vpop.permute.xlu0 %1147 }
 0x155   :  { %11220 = vst [vmem:[#allocation29_spill] sm:$0xff] %v11219_v14  ;;  %v996_v55 = vmul.f32 %v986_v17, %v7448_v54  ;;  %v1038_v20 = vrot.slane %v7575_v21, %v6862_v56  ;;  %v1042_v4 = vrot.slane %v7579_v27, %v6862_v56  ;;  %v997_v32 = vmul.f32 %v990_v51, %v7448_v54 }
 0x156   :  { %v998_v9 = vmul.f32 %v994_v5, %v7448_v54  ;;  %v973_v53 = vadd.f32 %v969_v60, %v945_v10  ;;  %v974_v23 = vadd.f32 %v970_v25, %v946_v52  ;;  %v999_v42 = vadd.f32 %v995_v31, %v971_v15 }
 0x157   :  { %v1000_v29 = vadd.f32 %v996_v55, %v972_v8  ;;  %vm7604_vm3 = vcmp.eq.s32.totalorder %v1164_v12, 1  ;;  %v11221_v35 = vmov 0  ;;  %v7610_v22 = vsel %vm100_vm7, 1, %v11198_v30  ;;  %v1144_v16 = vpop.permute.xlu1 %1143 }
 0x158   :  { %v11222_v35 = vsel %vm7604_vm3, 4294967295, %v11221_v35  ;;  %v1066_v51 = vrot.slane %v7575_v21, %v6871_v62  ;;  %v1070_v54 = vrot.slane %v7579_v27, %v6871_v62  ;;  %v1053_v5 = vmul.f32 %v1046_v6, %v7450_v46 }
 0x159   :  { %11223 = vst [vmem:[#allocation30_spill] sm:$0xff] %v11222_v35  ;;  %v1054_v3 = vmul.f32 %v1050_v49, %v7450_v46  ;;  %v1094_v13 = vrot.slane %v7575_v21, %v6885_v50  ;;  %v1098_v12 = vrot.slane %v7579_v27, %v6885_v50  ;;  %v1051_v44 = vmul.f32 %v1038_v20, %v7450_v46 }
 0x15a   :  { %v1052_v58 = vmul.f32 %v1042_v4, %v7450_v46  ;;  %v1001_v34 = vadd.f32 %v997_v32, %v973_v53  ;;  %v1002_v11 = vadd.f32 %v998_v9, %v974_v23  ;;  %v1074_v59 = vrot.slane %v7565_v36, %v6871_v62 }
 0x15b   :  { %v1078_v24 = vrot.slane %v7569_v40, %v6871_v62  ;;  %v1055_v17 = vadd.f32 %v1051_v44, %v999_v42  ;;  %v1152_v18 = vsel %vm11012_vm10, %v1144_v16, %v1148_v26  ;;  %v1154_v7 = vsel %vm11012_vm10, %v1148_v26, %v1144_v16  ;;  %v1146_v52 = vpop.permute.xlu1 %1145 }
 0x15c   :  { %v1056_v38 = vadd.f32 %v1052_v58, %v1000_v29  ;;  %v1079_v46 = vmul.f32 %v1066_v51, %v7490_v28  ;;  %v1080_v60 = vmul.f32 %v1070_v54, %v7490_v28  ;;  %v1057_v25 = vadd.f32 %v1053_v5, %v1001_v34 }
 0x15d   :  { %v1058_v15 = vadd.f32 %v1054_v3, %v1002_v11  ;;  %v1102_v8 = vrot.slane %v7565_v36, %v6885_v50  ;;  %v1106_v10 = vrot.slane %v7569_v40, %v6885_v50  ;;  %v1300_v6 = vrot.slane %v7610_v22, %v6862_v56  ;;  %v1229_v11 = vpop.permute.xlu0 %1228 }
 0x15e   :  { %v1304_v49 = vrot.slane %v7610_v22, %v6871_v62  ;;  %v1081_v31 = vmul.f32 %v1074_v59, %v7490_v28  ;;  %v1082_v55 = vmul.f32 %v1078_v24, %v7490_v28  ;;  %v7646_v20 = vsel %vm7581_vm0, %v1152_v18, 0.0 }
 0x15f   :  { %v7650_v4 = vsel %vm7604_vm3, %v1154_v7, 0.0  ;;  %v1122_v32 = vrot.slane %v7575_v21, %v6894_v43  ;;  %v1126_v9 = vrot.slane %v7579_v27, %v6894_v43  ;;  %v1107_v53 = vmul.f32 %v1094_v13, %v7557_v2  ;;  %v1150_v5 = vpop.permute.xlu1 %1149 }
 0x160   :  { %v1108_v23 = vmul.f32 %v1098_v12, %v7557_v2  ;;  %v1083_v42 = vadd.f32 %v1079_v46, %v1055_v17  ;;  %v1084_v28 = vadd.f32 %v1080_v60, %v1056_v38  ;;  %v1085_v29 = vadd.f32 %v1081_v31, %v1057_v25 }
 0x161   :  { %v1086_v22 = vadd.f32 %v1082_v55, %v1058_v15  ;;  %v1130_v51 = vrot.slane %v7565_v36, %v6894_v43  ;;  %v1134_v54 = vrot.slane %v7569_v40, %v6894_v43  ;;  %v1178_v21 = vrot.slane %v7646_v20, %v6862_v56 }
 0x162   :  { %v1182_v27 = vrot.slane %v7650_v4, %v6862_v56  ;;  %v1109_v3 = vmul.f32 %v1102_v8, %v7557_v2  ;;  %v1110_v13 = vmul.f32 %v1106_v10, %v7557_v2  ;;  %v1153_v12 = vsel %vm11012_vm10, %v1146_v52, %v1150_v5 }
 0x163   :  { %v1155_v36 = vsel %vm11012_vm10, %v1150_v5, %v1146_v52  ;;  %v1135_v44 = vmul.f32 %v1122_v32, %v7559_v47  ;;  %v1136_v40 = vmul.f32 %v1126_v9, %v7559_v47  ;;  %v7676_v58 = vsel %vm7581_vm0, %v1153_v12, 0.0  ;;  %v1257_v7 = vpop.permute.xlu1 %1256 }
 0x164   :  { %v7680_v16 = vsel %vm7604_vm3, %v1155_v36, 0.0  ;;  %v1113_v2 = vadd.f32 %v1109_v3, %v1085_v29  ;;  %v1114_v34 = vadd.f32 %v1110_v13, %v1086_v22  ;;  %v1186_v59 = vrot.slane %v7676_v58, %v6862_v56 }
 0x165   :  { %v1190_v24 = vrot.slane %v7680_v16, %v6862_v56  ;;  %v1111_v26 = vadd.f32 %v1107_v53, %v1083_v42  ;;  %v1112_v17 = vadd.f32 %v1108_v23, %v1084_v28  ;;  %v1191_v38 = vmul.f32 %v1178_v21, %v7597_v39  ;;  %v7701_v53 = vpop.permute.xlu0 %1340 }
 0x166   :  { %v1192_v18 = vmul.f32 %v1182_v27, %v7597_v39  ;;  %v1137_v46 = vmul.f32 %v1130_v51, %v7559_v47  ;;  %v1138_v60 = vmul.f32 %v1134_v54, %v7559_v47  ;;  %v1193_v25 = vmul.f32 %v1186_v59, %v7597_v39 }
 0x167   :  { %v1194_v15 = vmul.f32 %v1190_v24, %v7597_v39  ;;  %v1139_v8 = vadd.f32 %v1135_v44, %v1111_v26  ;;  %v1140_v10 = vadd.f32 %v1136_v40, %v1112_v17  ;;  %v1206_v52 = vrot.slane %v7646_v20, %v6871_v62 }
 0x168   :  { %v1210_v31 = vrot.slane %v7650_v4, %v6871_v62  ;;  %v1141_v55 = vadd.f32 %v1137_v46, %v1113_v2  ;;  %v1142_v32 = vadd.f32 %v1138_v60, %v1114_v34  ;;  %v1214_v9 = vrot.slane %v7676_v58, %v6871_v62  ;;  %v7707_v51 = vpop.permute.xlu1 %1312 }
 0x169   :  { %v1218_v47 = vrot.slane %v7680_v16, %v6871_v62  ;;  %v1195_v23 = vadd.f32 %v1191_v38, %v1139_v8  ;;  %v1196_v39 = vadd.f32 %v1192_v18, %v1140_v10  ;;  %v1234_v42 = vrot.slane %v7646_v20, %v6885_v50 }
 0x16a   :  { %v1238_v28 = vrot.slane %v7650_v4, %v6885_v50  ;;  %v1197_v29 = vadd.f32 %v1193_v25, %v1141_v55  ;;  %v1198_v22 = vadd.f32 %v1194_v15, %v1142_v32  ;;  %vm7709_vm10 = vcmp.eq.s32.totalorder %v1300_v6, 1 }
 0x16b   :  { %v11224_v54 = vmov 0  ;;  %vm7713_vm7 = vcmp.eq.s32.totalorder %v1304_v49, 1  ;;  %v11227_v21 = vmov 0  ;;  %v1219_v27 = vmul.f32 %v1206_v52, %v7589_v41 }
 0x16c   :  { %v11225_v54 = vsel %vm7709_vm10, 4294967295, %v11224_v54  ;;  %v11228_v21 = vsel %vm7713_vm7, 4294967295, %v11227_v21  ;;  %v1220_v5 = vmul.f32 %v1210_v31, %v7589_v41  ;;  %v1262_v3 = vrot.slane %v7646_v20, %v6894_v43  ;;  %v1284_v17 = vpop.permute.xlu1 %1283 }
 0x16d   :  { %11226 = vst [vmem:[#allocation31_spill] sm:$0xff] %v11225_v54  ;;  %11229 = vst [vmem:[#allocation32_spill] sm:$0xff] %v11228_v21  ;;  %v1242_v13 = vrot.slane %v7676_v58, %v6885_v50  ;;  %v1266_v6 = vrot.slane %v7650_v4, %v6894_v43  ;;  %v1221_v12 = vmul.f32 %v1214_v9, %v7589_v41  ;;  %v1288_v4 = vpop.permute.xlu0 %1287  ;;  %vm11230_vm3 = vcmp.lt.s32.totalorder %v6868_v61, 111 }
 0x16e   :  { %v1222_v49 = vmul.f32 %v1218_v47, %v7589_v41  ;;  %v1246_v36 = vrot.slane %v7680_v16, %v6885_v50  ;;  %v1223_v44 = vadd.f32 %v1219_v27, %v1195_v23  ;;  %v1224_v40 = vadd.f32 %v1220_v5, %v1196_v39  ;;  %vm11231_vm0 = vmmov %vm11230_vm3 }
 0x16f   :  { %v1247_v2 = vmul.f32 %v1234_v42, %v1229_v11  ;;  %v1248_v34 = vmul.f32 %v1238_v28, %v1229_v11  ;;  %v1225_v59 = vadd.f32 %v1221_v12, %v1197_v29  ;;  %v1270_v20 = vrot.slane %v7676_v58, %v6894_v43 }
 0x170   :  { %v1226_v24 = vadd.f32 %v1222_v49, %v1198_v22  ;;  %v1274_v26 = vrot.slane %v7680_v16, %v6894_v43  ;;  %v1249_v38 = vmul.f32 %v1242_v13, %v1229_v11  ;;  %v1275_v18 = vmul.f32 %v1262_v3, %v1257_v7  ;;  %v1286_v9 = vpop.permute.xlu1 %1285 }
 0x171   :  { %v1292_v41 = vsel %vm11230_vm3, %v1284_v17, %v1288_v4  ;;  %v1294_v46 = vsel %vm11231_vm0, %v1288_v4, %v1284_v17  ;;  %v1250_v60 = vmul.f32 %v1246_v36, %v1229_v11  ;;  %v1276_v25 = vmul.f32 %v1266_v6, %v1257_v7  ;;  %v1369_v12 = vpop.permute.xlu0 %1368  ;;  %vm11232_vm3 = vmmov %vm11231_vm0 }
 0x172   :  { %v1307_v15 = vsel %vm7709_vm10, %v1292_v41, 0.0  ;;  %v1308_v58 = vsel %vm7713_vm7, %v1294_v46, 0.0  ;;  %v1251_v8 = vadd.f32 %v1247_v2, %v1223_v44  ;;  %v1252_v52 = vadd.f32 %v1248_v34, %v1224_v40 }
 0x173   :  { %v1318_v16 = vrot.slane %v1307_v15, %v6862_v56  ;;  %v1322_v10 = vrot.slane %v1308_v58, %v6862_v56  ;;  %v1253_v31 = vadd.f32 %v1249_v38, %v1225_v59  ;;  %v1254_v55 = vadd.f32 %v1250_v60, %v1226_v24 }
 0x174   :  { %v1346_v32 = vrot.slane %v1307_v15, %v6871_v62  ;;  %v1279_v47 = vadd.f32 %v1275_v18, %v1251_v8  ;;  %v1277_v39 = vmul.f32 %v1270_v20, %v1257_v7  ;;  %v1278_v42 = vmul.f32 %v1274_v26, %v1257_v7  ;;  %v1290_v49 = vpop.permute.xlu1 %1289 }
 0x175   :  { %v1331_v11 = vmul.f32 %v1318_v16, %v7707_v51  ;;  %v1332_v23 = vmul.f32 %v1322_v10, %v7707_v51  ;;  %v1280_v28 = vadd.f32 %v1276_v25, %v1252_v52  ;;  %v1350_v29 = vrot.slane %v1308_v58, %v6871_v62 }
 0x176   :  { %v1374_v27 = vrot.slane %v1307_v15, %v6885_v50  ;;  %v1281_v5 = vadd.f32 %v1277_v39, %v1253_v31  ;;  %v1282_v3 = vadd.f32 %v1278_v42, %v1254_v55  ;;  %v1359_v6 = vmul.f32 %v1346_v32, %v7701_v53 }
 0x177   :  { %v1335_v22 = vadd.f32 %v1331_v11, %v1279_v47  ;;  %v1336_v13 = vadd.f32 %v1332_v23, %v1280_v28  ;;  %v1378_v36 = vrot.slane %v1308_v58, %v6885_v50  ;;  %v1402_v44 = vrot.slane %v1307_v15, %v6894_v43 }
 0x178   :  { %v1293_v7 = vsel %vm11232_vm3, %v1286_v9, %v1290_v49  ;;  %v1295_v40 = vsel %vm11231_vm0, %v1290_v49, %v1286_v9  ;;  %v1360_v2 = vmul.f32 %v1350_v29, %v7701_v53  ;;  %v1406_v20 = vrot.slane %v1308_v58, %v6894_v43  ;;  %v1397_v60 = vpop.permute.xlu1 %1396 }
 0x179   :  { %v1363_v34 = vadd.f32 %v1359_v6, %v1335_v22  ;;  %v1309_v59 = vsel %vm7709_vm10, %v1293_v7, 0.0  ;;  %v1310_v24 = vsel %vm7713_vm7, %v1295_v40, 0.0  ;;  %v1387_v26 = vmul.f32 %v1374_v27, %v1369_v12  ;;  %v7803_v7 = vld [vmem:[#allocation5 + $0x4] sm:$0xf] }
 0x17a   :  { %v1326_v4 = vrot.slane %v1309_v59, %v6862_v56  ;;  %v1330_v17 = vrot.slane %v1310_v24, %v6862_v56  ;;  %v1364_v38 = vadd.f32 %v1360_v2, %v1336_v13  ;;  %v1354_v18 = vrot.slane %v1309_v59, %v6871_v62 }
 0x17b   :  { %v1358_v41 = vrot.slane %v1310_v24, %v6871_v62  ;;  %v1382_v46 = vrot.slane %v1309_v59, %v6885_v50  ;;  %v1388_v25 = vmul.f32 %v1378_v36, %v1369_v12  ;;  %v1386_v58 = vrot.slane %v1310_v24, %v6885_v50 }
 0x17c   :  { %v1333_v15 = vmul.f32 %v1326_v4, %v7707_v51  ;;  %v1334_v8 = vmul.f32 %v1330_v17, %v7707_v51  ;;  %v1391_v16 = vadd.f32 %v1387_v26, %v1363_v34  ;;  %v1361_v10 = vmul.f32 %v1354_v18, %v7701_v53 }
 0x17d   :  { %v1362_v52 = vmul.f32 %v1358_v41, %v7701_v53  ;;  %v1410_v31 = vrot.slane %v1309_v59, %v6894_v43  ;;  %v1415_v9 = vmul.f32 %v1402_v44, %v1397_v60  ;;  %v1416_v47 = vmul.f32 %v1406_v20, %v1397_v60 }
 0x17e   :  { %v1337_v55 = vadd.f32 %v1333_v15, %v1281_v5  ;;  %v1338_v32 = vadd.f32 %v1334_v8, %v1282_v3  ;;  %v1392_v11 = vadd.f32 %v1388_v25, %v1364_v38  ;;  %v1389_v23 = vmul.f32 %v1382_v46, %v1369_v12 }
 0x17f   :  { %v1414_v39 = vrot.slane %v1310_v24, %v6894_v43  ;;  %v1390_v51 = vmul.f32 %v1386_v58, %v1369_v12  ;;  %v1419_v29 = vadd.f32 %v1415_v9, %v1391_v16  ;;  %v1417_v22 = vmul.f32 %v1410_v31, %v1397_v60 }
 0x180   :  { %v1365_v42 = vadd.f32 %v1361_v10, %v1337_v55  ;;  %v1366_v28 = vadd.f32 %v1362_v52, %v1338_v32  ;;  %v1420_v6 = vadd.f32 %v1416_v47, %v1392_v11  ;;  %v11233_v40 = vmov 12  }
 0x181   :  { %v7773_v49 = vmax.f32 %v1419_v29, 0.0  ;;  %v1418_v53 = vmul.f32 %v1414_v39, %v1397_v60  ;;  %v11234_v2 = vmov 13   ;;  %v11235_v34 = vmov 15   ;;  %v7854_v60 = vpop.permute.xlu1 %1447  ;;  %v1476_v39 = vpop.permute.xlu0 %1475 }
 0x182   :  { %v1393_v27 = vadd.f32 %v1389_v23, %v1365_v42  ;;  %v1394_v13 = vadd.f32 %v1390_v51, %v1366_v28  ;;  %v7777_v3 = vmax.f32 %v1420_v6, 0.0  ;;  %v11236_v59 = vmov 14   ;;  %v7892_v42 = vld [vmem:[#allocation5 + $0x8] sm:$0xf] }
 0x183   :  { %1429 = vrot.lane.b32.xlu1 %v7773_v49, %s6553_s20  ;;  %v11237_v24 = vmov 17   ;;  %v11238_v20 = vmov 16   ;;  %v11239_v26 = vmov 20   ;;  %v11240_v4 = vmov 18  }
 0x184   :  { %v1421_v36 = vadd.f32 %v1417_v22, %v1393_v27  ;;  %v1422_v5 = vadd.f32 %v1418_v53, %v1394_v13  ;;  %v11241_v17 = vmov 23   ;;  %v11242_v38 = vmov 19  }
 0x185   :  { %v11243_v18 = vmov 21   ;;  %v11244_v41 = vmov 26   ;;  %v11245_v46 = vmov 22   ;;  %v11246_v25 = vmov 29   ;;  %v7860_v8 = vpop.permute.xlu1 %1503  ;;  %v7903_v22 = vpop.permute.xlu0 %1575 }
 0x186   :  { %v7779_v44 = vmax.f32 %v1421_v36, 0.0  ;;  %v7785_v12 = vmax.f32 %v1422_v5, 0.0  ;;  %v11247_v15 = vmov 24   ;;  %v11248_v58 = vmov 30  }
 0x187   :  { %1433 = vrot.lane.b32.xlu1 %v7777_v3, %s6553_s20  ;;  %v11249_v16 = vmov 25   ;;  %v11250_v52 = vmov 33   ;;  %v11251_v31 = vmov 27   ;;  %v11252_v32 = vmov 34  }
 0x188   :  { %1431 = vrot.lane.b32.xlu0 %v7779_v44, %s6553_s20  ;;  %v11253_v47 = vmov 28   ;;  %v11254_v23 = vmov 4   ;;  %v11255_v28 = vmov 31   ;;  %v11256_v29 = vmov 7  }
 0x189   :  { %v7868_v10 = vpop.permute.xlu1 %1531  ;;  %v7909_v13 = vpop.permute.xlu0 %1659  ;;  %v11257_v53 = vmov 32   ;;  %vm11259_vm3 = vcmp.lt.s32.totalorder %v6868_v61, 17 }
 0x18a   :  { %vm11260_vm0 = vmmov %vm11259_vm3 }
 0x18b   :  { %1558 = vrot.lane.b32.xlu1 %v7773_v49, %s6557_s4  ;;  %vm11261_vm7 = vmmov %vm11260_vm0 }
 0x18c   :  { %1435 = vrot.lane.b32.xlu0 %v7785_v12, %s6553_s20  ;;  %vm11262_vm10 = vmmov %vm11260_vm0 }
 0x18d   :  { %v7876_v55 = vpop.permute.xlu1 %1603 }
 0x18f   :  { %1562 = vrot.lane.b32.xlu1 %v7777_v3, %s6557_s4 }
 0x190   :  { %1560 = vrot.lane.b32.xlu0 %v7779_v44, %s6557_s4 }
 0x191   :  { %v7884_v9 = vpop.permute.xlu1 %1631 }
 0x193   :  { %1688 = vrot.lane.b32.xlu1 %v7779_v44, %s6562_s21 }
 0x194   :  { %1564 = vrot.lane.b32.xlu0 %v7785_v12, %s6557_s4 }
 0x196   :  { %v7889_v11 = vpop.permute.xlu1 %1703 }
 0x197   :  { %1692 = vrot.lane.b32.xlu1 %v7785_v12, %s6562_s21 }
 0x198   :  { %1686 = vrot.lane.b32.xlu0 %v7773_v49, %s6562_s21 }
 0x19b   :  { %1787 = vperm.xlu1 %6264, %v7803_v7   ;;  %v7898_v51 = vpop.permute.xlu1 %1731 }
 0x19c   :  { %1690 = vrot.lane.b32.xlu0 %v7777_v3, %s6562_s21 }
 0x19f   :  { %6265 = vset.pattern.permute.xlu1 %v11233_v40 }
 0x1a0   :  { %1759 = vperm.xlu0 %6263, %v7803_v7   ;;  %1831 = vperm.xlu1 %6265, %v7803_v7  }
 0x1a4   :  { %6266 = vset.pattern.permute.xlu0 %v11234_v2  ;;  %1814 = vrot.lane.b32.xlu1 %v7773_v49, %s6567_s22 }
 0x1a5   :  { %1859 = vperm.xlu0 %6266, %v7803_v7   ;;  %6268 = vset.pattern.permute.xlu1 %v11235_v34 }
 0x1a8   :  { %1816 = vrot.lane.b32.xlu1 %v7779_v44, %s6567_s22 }
 0x1a9   :  { %1818 = vrot.lane.b32.xlu0 %v7777_v3, %s6567_s22 }
 0x1aa   :  { %6267 = vset.pattern.permute.xlu0 %v11236_v59 }
 0x1ac   :  { %1820 = vrot.lane.b32.xlu1 %v7785_v12, %s6567_s22 }
 0x1ad   :  { %1887 = vperm.xlu0 %6267, %v7803_v7  }
 0x1b0   :  { %1915 = vperm.xlu1 %6268, %v7803_v7  }
 0x1b1   :  { %6270 = vset.pattern.permute.xlu0 %v11237_v24 }
 0x1b2   :  { %1971 = vperm.xlu0 %6270, %v7803_v7  }
 0x1b4   :  { %6269 = vset.pattern.permute.xlu1 %v11238_v20 }
 0x1b5   :  { %1943 = vperm.xlu1 %6269, %v7803_v7  }
 0x1b6   :  { %6273 = vset.pattern.permute.xlu0 %v11239_v26 }
 0x1b7   :  { %2071 = vperm.xlu0 %6273, %v7803_v7  }
 0x1b9   :  { %6271 = vset.pattern.permute.xlu1 %v11240_v4 }
 0x1ba   :  { %1999 = vperm.xlu1 %6271, %v7803_v7  }
 0x1bb   :  { %2056 = vrot.lane.b32.xlu0 %v7779_v44, %s6573_s23 }
 0x1bc   :  { %6276 = vset.pattern.permute.xlu0 %v11241_v17 }
 0x1be   :  { %6272 = vset.pattern.permute.xlu1 %v11242_v38 }
 0x1bf   :  { %2060 = vrot.lane.b32.xlu0 %v7785_v12, %s6573_s23  ;;  %2027 = vperm.xlu1 %6272, %v7803_v7  }
 0x1c3   :  { %2155 = vperm.xlu0 %6276, %v7803_v7   ;;  %6274 = vset.pattern.permute.xlu1 %v11243_v18 }
 0x1c4   :  { %2099 = vperm.xlu1 %6274, %v7803_v7  }
 0x1c7   :  { %2182 = vrot.lane.b32.xlu0 %v7773_v49, %s6575_s24 }
 0x1c8   :  { %6279 = vset.pattern.permute.xlu0 %v11244_v41  ;;  %2054 = vrot.lane.b32.xlu1 %v7773_v49, %s6573_s23 }
 0x1c9   :  { %6275 = vset.pattern.permute.xlu1 %v11245_v46 }
 0x1cb   :  { %2186 = vrot.lane.b32.xlu0 %v7777_v3, %s6575_s24 }
 0x1cc   :  { %2058 = vrot.lane.b32.xlu1 %v7777_v3, %s6573_s23 }
 0x1cf   :  { %2255 = vperm.xlu0 %6279, %v7803_v7  }
 0x1d0   :  { %2127 = vperm.xlu1 %6275, %v7803_v7  }
 0x1d3   :  { %6282 = vset.pattern.permute.xlu0 %v11246_v25 }
 0x1d4   :  { %2355 = vperm.xlu0 %6282, %v7803_v7   ;;  %6277 = vset.pattern.permute.xlu1 %v11247_v15 }
 0x1d5   :  { %2199 = vperm.xlu1 %6277, %v7803_v7  }
 0x1d8   :  { %2314 = vrot.lane.b32.xlu0 %v7777_v3, %s6581_s25 }
 0x1d9   :  { %6283 = vset.pattern.permute.xlu0 %v11248_v58  ;;  %6278 = vset.pattern.permute.xlu1 %v11249_v16 }
 0x1da   :  { %2227 = vperm.xlu1 %6278, %v7803_v7  }
 0x1dc   :  { %2383 = vperm.xlu0 %6283, %v7803_v7  }
 0x1de   :  { %2184 = vrot.lane.b32.xlu1 %v7779_v44, %s6575_s24 }
 0x1df   :  { %6280 = vset.pattern.permute.xlu1 %v11251_v31 }
 0x1e0   :  { %6286 = vset.pattern.permute.xlu0 %v11250_v52 }
 0x1e1   :  { %2483 = vperm.xlu0 %6286, %v7803_v7  }
 0x1e2   :  { %2188 = vrot.lane.b32.xlu1 %v7785_v12, %s6575_s24 }
 0x1e5   :  { %2442 = vrot.lane.b32.xlu0 %v7777_v3, %s6586_s26 }
 0x1e6   :  { %6287 = vset.pattern.permute.xlu0 %v11252_v32  ;;  %2283 = vperm.xlu1 %6280, %v7803_v7  }
 0x1e9   :  { %2511 = vperm.xlu0 %6287, %v7803_v7  }
 0x1ea   :  { %6281 = vset.pattern.permute.xlu1 %v11253_v47 }
 0x1eb   :  { %2327 = vperm.xlu1 %6281, %v7803_v7  }
 0x1ed   :  { %6292 = vset.pattern.permute.xlu0 %v11254_v23 }
 0x1ee   :  { %2781 = vperm.xlu0 %6292, %v7892_v42  }
 0x1ef   :  { %2310 = vrot.lane.b32.xlu1 %v7773_v49, %s6581_s25 }
 0x1f0   :  { %6284 = vset.pattern.permute.xlu1 %v11255_v28 }
 0x1f2   :  { %6295 = vset.pattern.permute.xlu0 %v11256_v29  ;;  %v11258_v29 = vmov 35  }
 0x1f3   :  { %2312 = vrot.lane.b32.xlu1 %v7779_v44, %s6581_s25  ;;  %2865 = vperm.xlu0 %6295, %v7892_v42  }
 0x1f5   :  { %v1430_v27 = vpop.permute.xlu1 %1429 }
 0x1f7   :  { %2316 = vrot.lane.b32.xlu1 %v7785_v12, %s6581_s25  ;;  %6297 = vset.pattern.permute.xlu0 %v11196_v63 }
 0x1f9   :  { %v1434_v6 = vpop.permute.xlu1 %1433 }
 0x1fa   :  { %v1432_v36 = vpop.permute.xlu0 %1431  ;;  %v1437_v52 = vsel %vm11259_vm3, %v1430_v27, %v1434_v6 }
 0x1fb   :  { %2411 = vperm.xlu1 %6284, %v7803_v7   ;;  %v7935_v41 = vsel %vm6918_vm6, %v1437_v52, 0.0 }
 0x1fc   :  { %v1457_v52 = vrot.slane %v7935_v41, %v6862_v56  ;;  %v1513_v16 = vrot.slane %v7935_v41, %v6885_v50 }
 0x1fd   :  { %v1559_v5 = vpop.permute.xlu1 %1558 }
 0x1fe   :  { %v1436_v23 = vpop.permute.xlu0 %1435  ;;  %v1523_v59 = vmul.f32 %v1513_v16, %v7860_v8 }
 0x1ff   :  { %6285 = vset.pattern.permute.xlu1 %v11257_v53  ;;  %v1439_v53 = vsel %vm11260_vm0, %v1434_v6, %v1430_v27  ;;  %v1438_v58 = vsel %vm11261_vm7, %v1432_v36, %v1436_v23 }
 0x200   :  { %2455 = vperm.xlu1 %6285, %v7803_v7   ;;  %v7931_v25 = vsel %vm6889_vm5, %v1439_v53, 0.0  ;;  %v7946_v6 = vsel %vm6918_vm6, %v1438_v58, 0.0 }
 0x201   :  { %v1563_v63 = vpop.permute.xlu1 %1562  ;;  %v1453_v53 = vrot.slane %v7931_v25, %v6862_v56  ;;  %v1465_v58 = vrot.slane %v7946_v6, %v6862_v56  ;;  %v1493_v28 = vrot.slane %v7946_v6, %v6871_v62  ;;  %v1509_v17 = vrot.slane %v7931_v25, %v6885_v50 }
 0x202   :  { %v1561_v32 = vpop.permute.xlu0 %1560 }
 0x203   :  { %v1466_v15 = vmul.f32 %v1453_v53, %v7854_v60  ;;  %v1469_v4 = vmul.f32 %v1465_v58, %v7854_v60  ;;  %v1497_v40 = vmul.f32 %v1493_v28, %v1476_v39 }
 0x204   :  { %2438 = vrot.lane.b32.xlu1 %v7773_v49, %s6586_s26 }
 0x205   :  { %6288 = vset.pattern.permute.xlu1 %v11258_v29  ;;  %v1440_v29 = vsel %vm11262_vm10, %v1436_v23, %v1432_v36  ;;  %v7937_v31 = vpop.permute.xlu1 %1688  ;;  %v1481_v36 = vrot.slane %v7931_v25, %v6871_v62  ;;  %vm11265_vm10 = vcmp.lt.s32.totalorder %v6868_v61, 16  ;;  %v1501_v21 = vadd.f32 %v1497_v40, %v1469_v4 }
 0x206   :  { %v7942_v27 = vsel %vm6889_vm5, %v1440_v29, 0.0  ;;  %v1565_v23 = vpop.permute.xlu0 %1564  ;;  %v1566_v20 = vsel %vm11265_vm10, %v1559_v5, %v1563_v63  ;;  %vm11266_vm7 = vmmov %vm11265_vm10  ;;  %vm11274_vm10 = vcmp.lt.s32.totalorder %v6868_v61, 15 }
 0x207   :  { %v1461_v29 = vrot.slane %v7942_v27, %v6862_v56  ;;  %v1489_v47 = vrot.slane %v7942_v27, %v6871_v62  ;;  %v1494_v46 = vmul.f32 %v1481_v36, %v1476_v39  ;;  %v1568_v34 = vsel %vm11266_vm7, %v1563_v63, %v1559_v5  ;;  %vm11267_vm3 = vmmov %vm11266_vm7 }
 0x208   :  { %2440 = vrot.lane.b32.xlu1 %v7779_v44, %s6586_s26  ;;  %v1567_v53 = vsel %vm11267_vm3, %v1561_v32, %v1565_v23  ;;  %vm11268_vm0 = vmmov %vm11267_vm3  ;;  %v11269_v36 = vmov 2   ;;  %v1517_v63 = vrot.slane %v7942_v27, %v6885_v50 }
 0x209   :  { %v7970_v26 = vpop.permute.xlu1 %1692  ;;  %v1468_v38 = vmul.f32 %v1461_v29, %v7854_v60  ;;  %v1496_v24 = vmul.f32 %v1489_v47, %v1476_v39  ;;  %v1521_v47 = vrot.slane %v7946_v6, %v6885_v50  ;;  %v1498_v5 = vadd.f32 %v1494_v46, %v1466_v15  ;;  %vm11275_vm7 = vmmov %vm11274_vm10 }
 0x20a   :  { %v7980_v2 = vpop.permute.xlu0 %1686  ;;  %v8012_v58 = vsel %vm6958_vm9, %v1567_v53, 0.0  ;;  %v11272_v53 = vmov 3   ;;  %vm11276_vm3 = vmmov %vm11275_vm7 }
 0x20b   :  { %v1593_v4 = vrot.slane %v8012_v58, %v6862_v56 }
 0x20c   :  { %2444 = vrot.lane.b32.xlu1 %v7785_v12, %s6586_s26 }
 0x20e   :  { %v1691_v15 = vpop.permute.xlu0 %1690 }
 0x210   :  { %2539 = vperm.xlu1 %6288, %v7803_v7   ;;  %v1485_v7 = vrot.slane %v7935_v41, %v6871_v62 }
 0x212   :  { %v1495_v18 = vmul.f32 %v1485_v7, %v1476_v39  ;;  %v1541_v7 = vrot.slane %v7935_v41, %v6894_v43 }
 0x214   :  { %6289 = vset.pattern.permute.xlu1 %v11198_v30  ;;  %v1467_v30 = vmul.f32 %v1457_v52, %v7854_v60  ;;  %v1569_v52 = vsel %vm11268_vm0, %v1565_v23, %v1561_v32  ;;  %v1537_v60 = vrot.slane %v7931_v25, %v6894_v43  ;;  %v8000_v32 = vsel %vm6954_vm8, %v1568_v34, 0.0  ;;  %vm11277_vm0 = vmmov %vm11276_vm3 }
 0x215   :  { %2653 = vperm.xlu1 %6289, %v7892_v42   ;;  %v8004_v25 = vsel %vm6958_vm9, %v1566_v20, 0.0  ;;  %v8008_v23 = vsel %vm6954_vm8, %v1569_v52, 0.0  ;;  %v1500_v34 = vadd.f32 %v1496_v24, %v1468_v38  ;;  %v1545_v20 = vrot.slane %v7942_v27, %v6894_v43 }
 0x216   :  { %v1499_v41 = vadd.f32 %v1495_v18, %v1467_v30  ;;  %v1549_v30 = vrot.slane %v7946_v6, %v6894_v43  ;;  %v1581_v18 = vrot.slane %v8000_v32, %v6862_v56  ;;  %v1585_v46 = vrot.slane %v8004_v25, %v6862_v56 }
 0x217   :  { %v1525_v24 = vmul.f32 %v1521_v47, %v7860_v8  ;;  %v1589_v40 = vrot.slane %v8008_v23, %v6862_v56  ;;  %v1550_v6 = vmul.f32 %v1537_v60, %v7868_v10  ;;  %v1551_v52 = vmul.f32 %v1541_v7, %v7868_v10 }
 0x218   :  { %v1527_v27 = vadd.f32 %v1523_v59, %v1499_v41  ;;  %v1553_v47 = vmul.f32 %v1549_v30, %v7868_v10  ;;  %v1594_v39 = vmul.f32 %v1581_v18, %v7903_v22  ;;  %v1613_v59 = vrot.slane %v8004_v25, %v6871_v62 }
 0x219   :  { %6290 = vset.pattern.permute.xlu1 %v11269_v36  ;;  %v1522_v36 = vmul.f32 %v1509_v17, %v7860_v8  ;;  %v1524_v17 = vmul.f32 %v1517_v63, %v7860_v8  ;;  %v1529_v63 = vadd.f32 %v1525_v24, %v1501_v21  ;;  %v1552_v8 = vmul.f32 %v1545_v20, %v7868_v10 }
 0x21a   :  { %v7991_v29 = vpop.permute.xlu1 %1787  ;;  %2709 = vperm.xlu1 %6290, %v7892_v42   ;;  %v1597_v21 = vmul.f32 %v1593_v4, %v7903_v22  ;;  %v11273_v7 = vmov 5   ;;  %v1637_v41 = vrot.slane %v8000_v32, %v6885_v50  ;;  %v1617_v18 = vrot.slane %v8008_v23, %v6871_v62 }
 0x21b   :  { %v1526_v16 = vadd.f32 %v1522_v36, %v1498_v5  ;;  %v1528_v28 = vadd.f32 %v1524_v17, %v1500_v34  ;;  %v1596_v36 = vmul.f32 %v1589_v40, %v7903_v22  ;;  %v1555_v5 = vadd.f32 %v1551_v52, %v1527_v27 }
 0x21c   :  { %v1641_v34 = vrot.slane %v8004_v25, %v6885_v50  ;;  %v1557_v30 = vadd.f32 %v1553_v47, %v1529_v63  ;;  %v1623_v40 = vmul.f32 %v1613_v59, %v7876_v55  ;;  %v1645_v52 = vrot.slane %v8008_v23, %v6885_v50 }
 0x21d   :  { %v1554_v10 = vadd.f32 %v1550_v6, %v1526_v16  ;;  %v1556_v20 = vadd.f32 %v1552_v8, %v1528_v28  ;;  %v1650_v6 = vmul.f32 %v1637_v41, %v7884_v9  ;;  %v1649_v63 = vrot.slane %v8012_v58, %v6885_v50 }
 0x21e   :  { %6291 = vset.pattern.permute.xlu1 %v11272_v53  ;;  %v1595_v53 = vmul.f32 %v1585_v46, %v7903_v22  ;;  %v1621_v22 = vrot.slane %v8012_v58, %v6871_v62  ;;  %v1601_v16 = vadd.f32 %v1597_v21, %v1557_v30  ;;  %v1651_v28 = vmul.f32 %v1641_v34, %v7884_v9 }
 0x21f   :  { %v8031_v38 = vpop.permute.xlu1 %1831  ;;  %2737 = vperm.xlu1 %6291, %v7892_v42   ;;  %v8040_v54 = vpop.permute.xlu0 %1759  ;;  %v1609_v42 = vrot.slane %v8000_v32, %v6871_v62  ;;  %v1598_v46 = vadd.f32 %v1594_v39, %v1554_v10  ;;  %v1600_v4 = vadd.f32 %v1596_v36, %v1556_v20  ;;  %v1624_v39 = vmul.f32 %v1617_v18, %v7876_v55 }
 0x220   :  { %v1599_v17 = vadd.f32 %v1595_v53, %v1555_v5  ;;  %v1625_v53 = vmul.f32 %v1621_v22, %v7876_v55  ;;  %v1695_v47 = vsel %vm11274_vm10, %v7937_v31, %v7970_v26  ;;  %v1694_v21 = vsel %vm11276_vm3, %v7980_v2, %v1691_v15 }
 0x221   :  { %v1622_v24 = vmul.f32 %v1609_v42, %v7876_v55  ;;  %v1697_v42 = vsel %vm11275_vm7, %v7970_v26, %v7937_v31  ;;  %v1696_v55 = vsel %vm11277_vm0, %v1691_v15, %v7980_v2  ;;  %v1665_v10 = vrot.slane %v8000_v32, %v6894_v43 }
 0x222   :  { %v1627_v36 = vadd.f32 %v1623_v40, %v1599_v17  ;;  %v1669_v5 = vrot.slane %v8004_v25, %v6894_v43  ;;  %v1628_v41 = vadd.f32 %v1624_v39, %v1600_v4  ;;  %v1629_v34 = vadd.f32 %v1625_v53, %v1601_v16 }
 0x223   :  { %v8048_v60 = vpop.permute.xlu1 %1814  ;;  %6293 = vset.pattern.permute.xlu1 %v11273_v7  ;;  %v1626_v59 = vadd.f32 %v1622_v24, %v1598_v46  ;;  %v1652_v26 = vmul.f32 %v1645_v52, %v7884_v9  ;;  %v1653_v31 = vmul.f32 %v1649_v63, %v7884_v9  ;;  %v8093_v30 = vsel %vm7096_vm11, %v1697_v42, 0.0 }
 0x224   :  { %v8067_v8 = vpop.permute.xlu0 %1859  ;;  %v8097_v2 = vsel %vm7103_vm12, %v1695_v47, 0.0  ;;  %v1673_v32 = vrot.slane %v8008_v23, %v6894_v43  ;;  %v1677_v25 = vrot.slane %v8012_v58, %v6894_v43  ;;  %v8105_v15 = vsel %vm7096_vm11, %v1696_v55, 0.0 }
 0x225   :  { %v8109_v9 = vsel %vm7103_vm12, %v1694_v21, 0.0  ;;  %v1654_v18 = vadd.f32 %v1650_v6, %v1626_v59  ;;  %v1655_v22 = vadd.f32 %v1651_v28, %v1627_v36  ;;  %v1656_v17 = vadd.f32 %v1652_v26, %v1628_v41 }
 0x226   :  { %v1657_v24 = vadd.f32 %v1653_v31, %v1629_v34  ;;  %v1717_v40 = vrot.slane %v8093_v30, %v6862_v56  ;;  %v1721_v23 = vrot.slane %v8097_v2, %v6862_v56  ;;  %v1678_v4 = vmul.f32 %v1665_v10, %v7909_v13 }
 0x227   :  { %v1817_v27 = vpop.permute.xlu1 %1816  ;;  %v1679_v16 = vmul.f32 %v1669_v5, %v7909_v13  ;;  %v1709_v52 = vrot.slane %v8105_v15, %v6862_v56  ;;  %v1713_v6 = vrot.slane %v8109_v9, %v6862_v56  ;;  %v1680_v28 = vmul.f32 %v1673_v32, %v7909_v13 }
 0x228   :  { %v1819_v46 = vpop.permute.xlu0 %1818  ;;  %v1681_v63 = vmul.f32 %v1677_v25, %v7909_v13  ;;  %v1745_v39 = vrot.slane %v8093_v30, %v6871_v62  ;;  %v1749_v53 = vrot.slane %v8097_v2, %v6871_v62  ;;  %v1682_v47 = vadd.f32 %v1678_v4, %v1654_v18 }
 0x229   :  { %v1683_v42 = vadd.f32 %v1679_v16, %v1655_v22  ;;  %v1684_v59 = vadd.f32 %v1680_v28, %v1656_v17  ;;  %v1724_v21 = vmul.f32 %v1717_v40, %v7889_v11  ;;  %v1725_v55 = vmul.f32 %v1721_v23, %v7889_v11 }
 0x22a   :  { %v1685_v36 = vadd.f32 %v1681_v63, %v1657_v24  ;;  %v1773_v10 = vrot.slane %v8093_v30, %v6885_v50  ;;  %v1777_v13 = vrot.slane %v8097_v2, %v6885_v50  ;;  %v1722_v5 = vmul.f32 %v1709_v52, %v7889_v11 }
 0x22b   :  { %v1821_v20 = vpop.permute.xlu1 %1820  ;;  %v1723_v41 = vmul.f32 %v1713_v6, %v7889_v11  ;;  %v1752_v31 = vmul.f32 %v1745_v39, %v7898_v51  ;;  %v1753_v32 = vmul.f32 %v1749_v53, %v7898_v51  ;;  %vm11278_vm10 = vcmp.lt.s32.totalorder %v6868_v61, 1 }
 0x22c   :  { %v8137_v34 = vpop.permute.xlu0 %1887  ;;  %v1823_v25 = vsel %vm11278_vm10, %v1817_v27, %v1821_v20  ;;  %vm11279_vm7 = vmmov %vm11278_vm10  ;;  %v1737_v22 = vrot.slane %v8105_v15, %v6871_v62  ;;  %v1741_v11 = vrot.slane %v8109_v9, %v6871_v62  ;;  %v1728_v40 = vadd.f32 %v1724_v21, %v1684_v59 }
 0x22d   :  { %v1825_v18 = vsel %vm11279_vm7, %v1821_v20, %v1817_v27  ;;  %vm11280_vm3 = vmmov %vm11279_vm7  ;;  %v1729_v23 = vadd.f32 %v1725_v55, %v1685_v36  ;;  %v1765_v4 = vrot.slane %v8105_v15, %v6885_v50  ;;  %v1769_v27 = vrot.slane %v8109_v9, %v6885_v50 }
 0x22e   :  { %v1822_v17 = vsel %vm11280_vm3, %v8048_v60, %v1819_v46  ;;  %vm11281_vm0 = vmmov %vm11280_vm3  ;;  %v1726_v20 = vadd.f32 %v1722_v5, %v1682_v47  ;;  %v1727_v16 = vadd.f32 %v1723_v41, %v1683_v42  ;;  %v8163_v52 = vsel %vm7215_vm14, %v1825_v18, 0.0 }
 0x22f   :  { %v8115_v58 = vpop.permute.xlu1 %1915  ;;  %v1824_v24 = vsel %vm11281_vm0, %v1819_v46, %v8048_v60  ;;  %v8167_v6 = vsel %vm7222_vm15, %v1823_v25, 0.0  ;;  %v1780_v60 = vmul.f32 %v1773_v10, %v8040_v54  ;;  %v1781_v46 = vmul.f32 %v1777_v13, %v8040_v54 }
 0x230   :  { %v8173_v28 = vsel %vm7215_vm14, %v1824_v24, 0.0  ;;  %v8177_v63 = vsel %vm7222_vm15, %v1822_v17, 0.0  ;;  %v1750_v53 = vmul.f32 %v1737_v22, %v7898_v51  ;;  %v1751_v47 = vmul.f32 %v1741_v11, %v7898_v51 }
 0x231   :  { %v1778_v42 = vmul.f32 %v1765_v4, %v8040_v54  ;;  %v1779_v59 = vmul.f32 %v1769_v27, %v8040_v54  ;;  %v8185_v36 = vpop.permute.xlu0 %1971  ;;  %v1756_v21 = vadd.f32 %v1752_v31, %v1728_v40  ;;  %v1757_v55 = vadd.f32 %v1753_v32, %v1729_v23 }
 0x232   :  { %v1845_v10 = vrot.slane %v8163_v52, %v6862_v56  ;;  %v1849_v13 = vrot.slane %v8167_v6, %v6862_v56  ;;  %v1754_v5 = vadd.f32 %v1750_v53, %v1726_v20  ;;  %v1755_v41 = vadd.f32 %v1751_v47, %v1727_v16 }
 0x233   :  { %v1837_v25 = vrot.slane %v8173_v28, %v6862_v56  ;;  %v1841_v51 = vrot.slane %v8177_v63, %v6862_v56  ;;  %v1801_v54 = vrot.slane %v8093_v30, %v6894_v43  ;;  %v1805_v31 = vrot.slane %v8097_v2, %v6894_v43 }
 0x234   :  { %v8139_v26 = vpop.permute.xlu1 %1943  ;;  %v1784_v32 = vadd.f32 %v1780_v60, %v1756_v21  ;;  %v1785_v18 = vadd.f32 %v1781_v46, %v1757_v55  ;;  %v1793_v22 = vrot.slane %v8105_v15, %v6894_v43  ;;  %v1797_v11 = vrot.slane %v8109_v9, %v6894_v43 }
 0x235   :  { %v1782_v17 = vadd.f32 %v1778_v42, %v1754_v5  ;;  %v1783_v24 = vadd.f32 %v1779_v59, %v1755_v41  ;;  %v1808_v23 = vmul.f32 %v1801_v54, %v7991_v29  ;;  %v1809_v4 = vmul.f32 %v1805_v31, %v7991_v29 }
 0x236   :  { %v1852_v30 = vmul.f32 %v1845_v10, %v8031_v38  ;;  %v1853_v2 = vmul.f32 %v1849_v13, %v8031_v38  ;;  %v1806_v27 = vmul.f32 %v1793_v22, %v7991_v29  ;;  %v1807_v20 = vmul.f32 %v1797_v11, %v7991_v29  ;;  %v8213_v16 = vpop.permute.xlu0 %2071 }
 0x237   :  { %v1850_v15 = vmul.f32 %v1837_v25, %v8031_v38  ;;  %v1851_v9 = vmul.f32 %v1841_v51, %v8031_v38  ;;  %v1812_v60 = vadd.f32 %v1808_v23, %v1784_v32  ;;  %v1813_v46 = vadd.f32 %v1809_v4, %v1785_v18 }
 0x238   :  { %v1873_v53 = vrot.slane %v8163_v52, %v6871_v62  ;;  %v1877_v47 = vrot.slane %v8167_v6, %v6871_v62  ;;  %v1810_v42 = vadd.f32 %v1806_v27, %v1782_v17  ;;  %v1811_v59 = vadd.f32 %v1807_v20, %v1783_v24 }
 0x239   :  { %v8179_v39 = vpop.permute.xlu1 %1999  ;;  %v1865_v21 = vrot.slane %v8173_v28, %v6871_v62  ;;  %v1869_v29 = vrot.slane %v8177_v63, %v6871_v62  ;;  %v1856_v55 = vadd.f32 %v1852_v30, %v1812_v60  ;;  %v1857_v38 = vadd.f32 %v1853_v2, %v1813_v46 }
 0x23a   :  { %v1854_v13 = vadd.f32 %v1850_v15, %v1810_v42  ;;  %v1855_v5 = vadd.f32 %v1851_v9, %v1811_v59  ;;  %v1880_v41 = vmul.f32 %v1873_v53, %v8067_v8  ;;  %v1881_v25 = vmul.f32 %v1877_v47, %v8067_v8  ;;  %v8237_v11 = vpop.permute.xlu0 %2056 }
 0x23b   :  { %v1901_v51 = vrot.slane %v8163_v52, %v6885_v50  ;;  %v1905_v54 = vrot.slane %v8167_v6, %v6885_v50  ;;  %v1878_v31 = vmul.f32 %v1865_v21, %v8067_v8  ;;  %v1879_v32 = vmul.f32 %v1869_v29, %v8067_v8 }
 0x23c   :  { %v1893_v18 = vrot.slane %v8173_v28, %v6885_v50  ;;  %v1897_v22 = vrot.slane %v8177_v63, %v6885_v50  ;;  %v1884_v17 = vadd.f32 %v1880_v41, %v1856_v55  ;;  %v1885_v24 = vadd.f32 %v1881_v25, %v1857_v38 }
 0x23d   :  { %v1882_v4 = vadd.f32 %v1878_v31, %v1854_v13  ;;  %v1883_v30 = vadd.f32 %v1879_v32, %v1855_v5  ;;  %v1929_v2 = vrot.slane %v8163_v52, %v6894_v43  ;;  %v1933_v27 = vrot.slane %v8167_v6, %v6894_v43 }
 0x23e   :  { %v8203_v40 = vpop.permute.xlu1 %2027  ;;  %v1908_v8 = vmul.f32 %v1901_v51, %v8137_v34  ;;  %v1909_v20 = vmul.f32 %v1905_v54, %v8137_v34  ;;  %v1906_v15 = vmul.f32 %v1893_v18, %v8137_v34  ;;  %v1907_v9 = vmul.f32 %v1897_v22, %v8137_v34  ;;  %v2061_v29 = vpop.permute.xlu0 %2060 }
 0x23f   :  { %v1981_v53 = vrot.slane %v7777_v3, %v6871_v62  ;;  %v1977_v47 = vrot.slane %v7773_v49, %v6871_v62  ;;  %v1921_v6 = vrot.slane %v8173_v28, %v6894_v43  ;;  %v1925_v42 = vrot.slane %v8177_v63, %v6894_v43 }
 0x240   :  { %v1912_v60 = vadd.f32 %v1908_v8, %v1884_v17  ;;  %v1913_v46 = vadd.f32 %v1909_v20, %v1885_v24  ;;  %v1910_v59 = vadd.f32 %v1906_v15, %v1882_v4  ;;  %v1911_v21 = vadd.f32 %v1907_v9, %v1883_v30 }
 0x241   :  { %v1936_v34 = vmul.f32 %v1929_v2, %v8115_v58  ;;  %v1937_v55 = vmul.f32 %v1933_v27, %v8115_v58  ;;  %v1949_v38 = vrot.slane %v7773_v49, %v6862_v56  ;;  %v1953_v13 = vrot.slane %v7777_v3, %v6862_v56 }
 0x242   :  { %v1934_v5 = vmul.f32 %v1921_v6, %v8115_v58  ;;  %v1935_v28 = vmul.f32 %v1925_v42, %v8115_v58  ;;  %v2005_v63 = vrot.slane %v7773_v49, %v6885_v50  ;;  %v2009_v41 = vrot.slane %v7777_v3, %v6885_v50  ;;  %v8289_v9 = vpop.permute.xlu0 %2155 }
 0x243   :  { %v8223_v10 = vpop.permute.xlu1 %2099  ;;  %v1940_v25 = vadd.f32 %v1936_v34, %v1912_v60  ;;  %v1941_v51 = vadd.f32 %v1937_v55, %v1913_v46  ;;  %v1957_v54 = vrot.slane %v7779_v44, %v6862_v56  ;;  %v1961_v31 = vrot.slane %v7785_v12, %v6862_v56 }
 0x244   :  { %v1938_v18 = vadd.f32 %v1934_v5, %v1910_v59  ;;  %v1939_v22 = vadd.f32 %v1935_v28, %v1911_v21  ;;  %v1962_v58 = vmul.f32 %v1949_v38, %v8139_v26  ;;  %v1963_v17 = vmul.f32 %v1953_v13, %v8139_v26 }
 0x245   :  { %v1964_v24 = vmul.f32 %v1957_v54, %v8139_v26  ;;  %v1965_v4 = vmul.f32 %v1961_v31, %v8139_v26  ;;  %v2033_v30 = vrot.slane %v7773_v49, %v6894_v43  ;;  %v2037_v2 = vrot.slane %v7777_v3, %v6894_v43 }
 0x246   :  { %v1985_v27 = vrot.slane %v7779_v44, %v6871_v62  ;;  %v1989_v8 = vrot.slane %v7785_v12, %v6871_v62  ;;  %v2013_v20 = vrot.slane %v7779_v44, %v6885_v50  ;;  %v2017_v15 = vrot.slane %v7785_v12, %v6885_v50 }
 0x247   :  { %v2055_v23 = vpop.permute.xlu1 %2054  ;;  %v1968_v26 = vadd.f32 %v1964_v24, %v1940_v25  ;;  %v1969_v60 = vadd.f32 %v1965_v4, %v1941_v51  ;;  %vm11282_vm10 = vcmp.lt.s32.totalorder %v6868_v61, 127  ;;  %v1966_v46 = vadd.f32 %v1962_v58, %v1938_v18 }
 0x248   :  { %vm11283_vm7 = vmmov %vm11282_vm10  ;;  %v1967_v6 = vadd.f32 %v1963_v17, %v1939_v22  ;;  %v2041_v42 = vrot.slane %v7779_v44, %v6894_v43  ;;  %v2045_v59 = vrot.slane %v7785_v12, %v6894_v43  ;;  %v1990_v34 = vmul.f32 %v1977_v47, %v8185_v36 }
 0x249   :  { %v1991_v55 = vmul.f32 %v1981_v53, %v8185_v36  ;;  %v1992_v38 = vmul.f32 %v1985_v27, %v8185_v36  ;;  %v1993_v13 = vmul.f32 %v1989_v8, %v8185_v36  ;;  %vm11284_vm3 = vmmov %vm11283_vm7  ;;  %v2018_v36 = vmul.f32 %v2005_v63, %v8179_v39 }
 0x24a   :  { %vm11285_vm0 = vmmov %vm11284_vm3  ;;  %v2019_v5 = vmul.f32 %v2009_v41, %v8179_v39  ;;  %v1994_v28 = vadd.f32 %v1990_v34, %v1966_v46  ;;  %v2020_v51 = vmul.f32 %v2013_v20, %v8179_v39  ;;  %v2046_v22 = vmul.f32 %v2033_v30, %v8203_v40 }
 0x24b   :  { %v2059_v52 = vpop.permute.xlu1 %2058  ;;  %v2065_v44 = vsel %vm11285_vm0, %v2061_v29, %v8237_v11  ;;  %v1996_v53 = vadd.f32 %v1992_v38, %v1968_v26  ;;  %v1995_v25 = vadd.f32 %v1991_v55, %v1967_v6  ;;  %v2048_v24 = vmul.f32 %v2041_v42, %v8203_v40 }
 0x24c   :  { %v2062_v49 = vsel %vm11282_vm10, %v2055_v23, %v2059_v52  ;;  %v2064_v3 = vsel %vm11283_vm7, %v2059_v52, %v2055_v23  ;;  %v2063_v23 = vsel %vm11284_vm3, %v8237_v11, %v2061_v29  ;;  %v1997_v52 = vadd.f32 %v1993_v13, %v1969_v60  ;;  %v2183_v29 = vpop.permute.xlu0 %2182 }
 0x24d   :  { %v8313_v12 = vsel %vm7398_vm2, %v2062_v49, 0.0  ;;  %v8317_v47 = vsel %vm7410_vm4, %v2064_v3, 0.0  ;;  %v2021_v11 = vmul.f32 %v2017_v15, %v8179_v39  ;;  %v8325_v54 = vsel %vm7398_vm2, %v2063_v23, 0.0 }
 0x24e   :  { %v8329_v31 = vsel %vm7410_vm4, %v2065_v44, 0.0  ;;  %v2077_v63 = vrot.slane %v8313_v12, %v6862_v56  ;;  %v2081_v41 = vrot.slane %v8317_v47, %v6862_v56  ;;  %v2047_v39 = vmul.f32 %v2037_v2, %v8203_v40 }
 0x24f   :  { %v8271_v32 = vpop.permute.xlu1 %2127  ;;  %v2024_v58 = vadd.f32 %v2020_v51, %v1996_v53  ;;  %v2025_v17 = vadd.f32 %v2021_v11, %v1997_v52  ;;  %v2049_v4 = vmul.f32 %v2045_v59, %v8203_v40  ;;  %v2022_v27 = vadd.f32 %v2018_v36, %v1994_v28 }
 0x250   :  { %v2023_v8 = vadd.f32 %v2019_v5, %v1995_v25  ;;  %v2085_v20 = vrot.slane %v8325_v54, %v6862_v56  ;;  %v2089_v15 = vrot.slane %v8329_v31, %v6862_v56  ;;  %v2090_v26 = vmul.f32 %v2077_v63, %v8213_v16  ;;  %v2187_v3 = vpop.permute.xlu0 %2186 }
 0x251   :  { %v2091_v30 = vmul.f32 %v2081_v41, %v8213_v16  ;;  %v2050_v2 = vadd.f32 %v2046_v22, %v2022_v27  ;;  %v2052_v46 = vadd.f32 %v2048_v24, %v2024_v58  ;;  %v2053_v6 = vadd.f32 %v2049_v4, %v2025_v17 }
 0x252   :  { %v2051_v49 = vadd.f32 %v2047_v39, %v2023_v8  ;;  %v2105_v40 = vrot.slane %v8313_v12, %v6871_v62  ;;  %v2109_v42 = vrot.slane %v8317_v47, %v6871_v62  ;;  %v2092_v59 = vmul.f32 %v2085_v20, %v8213_v16 }
 0x253   :  { %v2093_v34 = vmul.f32 %v2089_v15, %v8213_v16  ;;  %v2113_v55 = vrot.slane %v8325_v54, %v6871_v62  ;;  %v2117_v38 = vrot.slane %v8329_v31, %v6871_v62  ;;  %v2141_v13 = vrot.slane %v8325_v54, %v6885_v50 }
 0x254   :  { %v8299_v21 = vpop.permute.xlu1 %2199  ;;  %v2145_v23 = vrot.slane %v8329_v31, %v6885_v50  ;;  %v2094_v44 = vadd.f32 %v2090_v26, %v2050_v2  ;;  %v2095_v53 = vadd.f32 %v2091_v30, %v2051_v49  ;;  %v2169_v36 = vrot.slane %v8325_v54, %v6894_v43  ;;  %v8377_v39 = vpop.permute.xlu0 %2255 }
 0x255   :  { %v2173_v16 = vrot.slane %v8329_v31, %v6894_v43  ;;  %vm11286_vm10 = vcmp.lt.s32.totalorder %v6868_v61, 113  ;;  %v2118_v25 = vmul.f32 %v2105_v40, %v8223_v10  ;;  %v2119_v51 = vmul.f32 %v2109_v42, %v8223_v10 }
 0x256   :  { %vm11287_vm7 = vmmov %vm11286_vm10  ;;  %v2133_v11 = vrot.slane %v8313_v12, %v6885_v50  ;;  %v2137_v63 = vrot.slane %v8317_v47, %v6885_v50  ;;  %v2096_v54 = vadd.f32 %v2092_v59, %v2052_v46  ;;  %v2097_v41 = vadd.f32 %v2093_v34, %v2053_v6 }
 0x257   :  { %v2120_v31 = vmul.f32 %v2113_v55, %v8223_v10  ;;  %v2121_v22 = vmul.f32 %v2117_v38, %v8223_v10  ;;  %v2122_v58 = vadd.f32 %v2118_v25, %v2094_v44  ;;  %v2123_v17 = vadd.f32 %v2119_v51, %v2095_v53  ;;  %vm11288_vm3 = vmmov %vm11287_vm7 }
 0x258   :  { %v2190_v8 = vsel %vm11288_vm3, %v2183_v29, %v2187_v3  ;;  %vm11289_vm0 = vmmov %vm11288_vm3  ;;  %v2148_v20 = vmul.f32 %v2141_v13, %v8271_v32  ;;  %v2149_v15 = vmul.f32 %v2145_v23, %v8271_v32  ;;  %v2161_v26 = vrot.slane %v8313_v12, %v6894_v43  ;;  %v8413_v59 = vpop.permute.xlu0 %2355 }
 0x259   :  { %v8335_v18 = vpop.permute.xlu1 %2227  ;;  %v2192_v10 = vsel %vm11289_vm0, %v2187_v3, %v2183_v29  ;;  %v2165_v30 = vrot.slane %v8317_v47, %v6894_v43  ;;  %v2147_v2 = vmul.f32 %v2137_v63, %v8271_v32  ;;  %v2124_v49 = vadd.f32 %v2120_v31, %v2096_v54 }
 0x25a   :  { %v2125_v46 = vadd.f32 %v2121_v22, %v2097_v41  ;;  %v8407_v3 = vsel %vm7506_vm1, %v2190_v8, 0.0  ;;  %v8411_v12 = vsel %vm7510_vm13, %v2192_v10, 0.0  ;;  %v2176_v55 = vmul.f32 %v2169_v36, %v8289_v9 }
 0x25b   :  { %v2151_v40 = vadd.f32 %v2147_v2, %v2123_v17  ;;  %v2152_v42 = vadd.f32 %v2148_v20, %v2124_v49  ;;  %v2177_v38 = vmul.f32 %v2173_v16, %v8289_v9  ;;  %v2174_v13 = vmul.f32 %v2161_v26, %v8289_v9 }
 0x25c   :  { %v2175_v23 = vmul.f32 %v2165_v30, %v8289_v9  ;;  %v2205_v44 = vrot.slane %v8407_v3, %v6862_v56  ;;  %v2209_v53 = vrot.slane %v8411_v12, %v6862_v56  ;;  %v2237_v36 = vrot.slane %v8411_v12, %v6871_v62  ;;  %v2315_v17 = vpop.permute.xlu0 %2314 }
 0x25d   :  { %v2185_v60 = vpop.permute.xlu1 %2184  ;;  %v2180_v51 = vadd.f32 %v2176_v55, %v2152_v42  ;;  %v2261_v41 = vrot.slane %v8407_v3, %v6885_v50  ;;  %v2265_v31 = vrot.slane %v8411_v12, %v6885_v50  ;;  %vm11292_vm3 = vnez %v11219_v14 }
 0x25e   :  { %v2179_v25 = vadd.f32 %v2175_v23, %v2151_v40  ;;  %v2218_v22 = vmul.f32 %v2205_v44, %v8299_v21  ;;  %v2247_v10 = vmul.f32 %v2237_v36, %v8335_v18  ;;  %v2293_v40 = vrot.slane %v8411_v12, %v6894_v43 }
 0x25f   :  { %vm11293_vm0 = vnez %v11222_v35 }
 0x261   :  { %v2189_v52 = vpop.permute.xlu1 %2188 }
 0x262   :  { %v2191_v5 = vsel %vm11286_vm10, %v2185_v60, %v2189_v52  ;;  %v2193_v28 = vsel %vm11287_vm7, %v2189_v52, %v2185_v60  ;;  %v2146_v60 = vmul.f32 %v2133_v11, %v8271_v32  ;;  %v2153_v32 = vadd.f32 %v2149_v15, %v2125_v46 }
 0x263   :  { %v8381_v24 = vsel %vm7506_vm1, %v2191_v5, 0.0  ;;  %v8385_v4 = vsel %vm7510_vm13, %v2193_v28, 0.0  ;;  %v2233_v28 = vrot.slane %v8407_v3, %v6871_v62  ;;  %vm11290_vm10 = vcmp.lt.s32.totalorder %v6868_v61, 112 }
 0x264   :  { %v2213_v6 = vrot.slane %v8381_v24, %v6862_v56  ;;  %v2217_v29 = vrot.slane %v8385_v4, %v6862_v56  ;;  %v2150_v47 = vadd.f32 %v2146_v60, %v2122_v58  ;;  %v2181_v9 = vadd.f32 %v2177_v38, %v2153_v32  ;;  %vm11291_vm7 = vmmov %vm11290_vm10 }
 0x265   :  { %v8387_v27 = vpop.permute.xlu1 %2283  ;;  %v2241_v11 = vrot.slane %v8381_v24, %v6871_v62  ;;  %v2245_v63 = vrot.slane %v8385_v4, %v6871_v62  ;;  %v2219_v58 = vmul.f32 %v2209_v53, %v8299_v21  ;;  %v2246_v8 = vmul.f32 %v2233_v28, %v8335_v18  ;;  %v2384_v28 = vpop.permute.xlu0 %2383 }
 0x266   :  { %v2220_v52 = vmul.f32 %v2213_v6, %v8299_v21  ;;  %v2221_v5 = vmul.f32 %v2217_v29, %v8299_v21  ;;  %v2178_v16 = vadd.f32 %v2174_v13, %v2150_v47  ;;  %v2269_v21 = vrot.slane %v8381_v24, %v6885_v50 }
 0x267   :  { %v2223_v30 = vadd.f32 %v2219_v58, %v2179_v25  ;;  %v2248_v49 = vmul.f32 %v2241_v11, %v8335_v18  ;;  %v2249_v46 = vmul.f32 %v2245_v63, %v8335_v18  ;;  %v2273_v6 = vrot.slane %v8385_v4, %v6885_v50 }
 0x268   :  { %v2224_v20 = vadd.f32 %v2220_v52, %v2180_v51  ;;  %v2225_v15 = vadd.f32 %v2221_v5, %v2181_v9  ;;  %v2222_v26 = vadd.f32 %v2218_v22, %v2178_v16  ;;  %v2289_v47 = vrot.slane %v8407_v3, %v6894_v43 }
 0x269   :  { %v2274_v38 = vmul.f32 %v2261_v41, %v8377_v39  ;;  %v2275_v13 = vmul.f32 %v2265_v31, %v8377_v39  ;;  %v2251_v44 = vadd.f32 %v2247_v10, %v2223_v30  ;;  %v2276_v3 = vmul.f32 %v2269_v21, %v8377_v39 }
 0x26a   :  { %v8415_v34 = vpop.permute.xlu1 %2327  ;;  %v2252_v42 = vadd.f32 %v2248_v49, %v2224_v20  ;;  %v2253_v32 = vadd.f32 %v2249_v46, %v2225_v15  ;;  %v2250_v23 = vadd.f32 %v2246_v8, %v2222_v26  ;;  %v2277_v12 = vmul.f32 %v2273_v6, %v8377_v39  ;;  %v8505_v46 = vpop.permute.xlu0 %2483 }
 0x26b   :  { %v2297_v53 = vrot.slane %v8381_v24, %v6894_v43  ;;  %v2301_v52 = vrot.slane %v8385_v4, %v6894_v43  ;;  %v2302_v11 = vmul.f32 %v2289_v47, %v8387_v27  ;;  %v2303_v63 = vmul.f32 %v2293_v40, %v8387_v27 }
 0x26c   :  { %v2280_v51 = vadd.f32 %v2276_v3, %v2252_v42  ;;  %v2281_v9 = vadd.f32 %v2277_v12, %v2253_v32  ;;  %v2278_v31 = vadd.f32 %v2274_v38, %v2250_v23  ;;  %v2279_v22 = vadd.f32 %v2275_v13, %v2251_v44 }
 0x26d   :  { %v2304_v58 = vmul.f32 %v2297_v53, %v8387_v27 }
 0x26e   :  { %v2311_v54 = vpop.permute.xlu1 %2310  ;;  %v2307_v21 = vadd.f32 %v2303_v63, %v2279_v22 }
 0x26f   :  { %v2318_v60 = vsel %vm11290_vm10, %v2311_v54, %v2315_v17  ;;  %v2320_v2 = vsel %vm11291_vm7, %v2315_v17, %v2311_v54  ;;  %vm11294_vm10 = vmmov %vm11291_vm7  ;;  %v2305_v17 = vmul.f32 %v2301_v52, %v8387_v27  ;;  %v2308_v30 = vadd.f32 %v2304_v58, %v2280_v51 }
 0x270   :  { %v8459_v55 = vsel %vm11292_vm3, %v2318_v60, 0.0  ;;  %v8463_v18 = vsel %vm11293_vm0, %v2320_v2, 0.0  ;;  %v2306_v27 = vadd.f32 %v2302_v11, %v2278_v31 }
 0x271   :  { %v2333_v36 = vrot.slane %v8459_v55, %v6862_v56  ;;  %v2337_v16 = vrot.slane %v8463_v18, %v6862_v56  ;;  %v2309_v60 = vadd.f32 %v2305_v17, %v2281_v9  ;;  %v2361_v6 = vrot.slane %v8459_v55, %v6871_v62  ;;  %v2443_v9 = vpop.permute.xlu0 %2442 }
 0x272   :  { %v2313_v29 = vpop.permute.xlu1 %2312  ;;  %v2393_v47 = vrot.slane %v8463_v18, %v6885_v50 }
 0x273   :  { %v2346_v10 = vmul.f32 %v2333_v36, %v8415_v34  ;;  %v2347_v20 = vmul.f32 %v2337_v16, %v8415_v34  ;;  %v2374_v53 = vmul.f32 %v2361_v6, %v8413_v59  ;;  %v2421_v36 = vrot.slane %v8463_v18, %v6894_v43 }
 0x275   :  { %v2350_v32 = vadd.f32 %v2346_v10, %v2306_v27  ;;  %v2351_v38 = vadd.f32 %v2347_v20, %v2307_v21  ;;  %v11297_v10 = vld [vmem:[#allocation31_spill] sm:$0xff] }
 0x276   :  { %v2317_v5 = vpop.permute.xlu1 %2316 }
 0x277   :  { %v2319_v25 = vsel %vm11294_vm10, %v2313_v29, %v2317_v5  ;;  %v2321_v39 = vsel %vm11291_vm7, %v2317_v5, %v2313_v29  ;;  %v2365_v29 = vrot.slane %v8463_v18, %v6871_v62  ;;  %v2417_v5 = vrot.slane %v8459_v55, %v6894_v43 }
 0x278   :  { %v8483_v24 = vsel %vm11292_vm3, %v2319_v25, 0.0  ;;  %v8487_v4 = vsel %vm11293_vm0, %v2321_v39, 0.0  ;;  %v2403_v25 = vmul.f32 %v2393_v47, %v2384_v28  ;;  %v2378_v11 = vadd.f32 %v2374_v53, %v2350_v32 }
 0x279   :  { %v2341_v54 = vrot.slane %v8483_v24, %v6862_v56  ;;  %v2345_v41 = vrot.slane %v8487_v4, %v6862_v56  ;;  %v2369_v2 = vrot.slane %v8483_v24, %v6871_v62  ;;  %v2373_v49 = vrot.slane %v8487_v4, %v6871_v62 }
 0x27a   :  { %v2412_v8 = vpop.permute.xlu1 %2411  ;;  %v2397_v3 = vrot.slane %v8483_v24, %v6885_v50  ;;  %v2401_v12 = vrot.slane %v8487_v4, %v6885_v50  ;;  %v2375_v52 = vmul.f32 %v2365_v29, %v8413_v59  ;;  %vm11295_vm10 = vcmp.lt.s32.totalorder %v6868_v61, 111 }
 0x27b   :  { %v2348_v15 = vmul.f32 %v2341_v54, %v8415_v34  ;;  %v2349_v26 = vmul.f32 %v2345_v41, %v8415_v34  ;;  %v2389_v34 = vrot.slane %v8459_v55, %v6885_v50  ;;  %v2376_v23 = vmul.f32 %v2369_v2, %v8413_v59  ;;  %vm11296_vm7 = vmmov %vm11295_vm10 }
 0x27c   :  { %v2377_v44 = vmul.f32 %v2373_v49, %v8413_v59  ;;  %v2379_v63 = vadd.f32 %v2375_v52, %v2351_v38  ;;  %v2425_v54 = vrot.slane %v8483_v24, %v6894_v43  ;;  %v2429_v41 = vrot.slane %v8487_v4, %v6894_v43 }
 0x27d   :  { %v2352_v40 = vadd.f32 %v2348_v15, %v2308_v30  ;;  %v2353_v42 = vadd.f32 %v2349_v26, %v2309_v60  ;;  %v2402_v16 = vmul.f32 %v2389_v34, %v2384_v28  ;;  %v2404_v31 = vmul.f32 %v2397_v3, %v2384_v28  ;;  %v11299_v15 = vld [vmem:[#allocation32_spill] sm:$0xff] }
 0x27e   :  { %v2405_v22 = vmul.f32 %v2401_v12, %v2384_v28  ;;  %v2430_v58 = vmul.f32 %v2417_v5, %v2412_v8  ;;  %v2431_v17 = vmul.f32 %v2421_v36, %v2412_v8  ;;  %vm11298_vm0 = vnez %v11297_v10  ;;  %v2512_v5 = vpop.permute.xlu0 %2511 }
 0x27f   :  { %v8515_v13 = vpop.permute.xlu1 %2455  ;;  %v2380_v39 = vadd.f32 %v2376_v23, %v2352_v40  ;;  %v2381_v51 = vadd.f32 %v2377_v44, %v2353_v42  ;;  %vm11300_vm3 = vnez %v11299_v15  ;;  %v2406_v60 = vadd.f32 %v2402_v16, %v2378_v11 }
 0x280   :  { %v2407_v2 = vadd.f32 %v2403_v25, %v2379_v63  ;;  %v2432_v27 = vmul.f32 %v2425_v54, %v2412_v8  ;;  %v2433_v21 = vmul.f32 %v2429_v41, %v2412_v8 }
 0x281   :  { %v2408_v26 = vadd.f32 %v2404_v31, %v2380_v39  ;;  %v2409_v30 = vadd.f32 %v2405_v22, %v2381_v51  ;;  %v2434_v34 = vadd.f32 %v2430_v58, %v2406_v60 }
 0x282   :  { %v2435_v47 = vadd.f32 %v2431_v17, %v2407_v2 }
 0x283   :  { %v2439_v59 = vpop.permute.xlu1 %2438  ;;  %v2436_v32 = vadd.f32 %v2432_v27, %v2408_v26  ;;  %v2437_v38 = vadd.f32 %v2433_v21, %v2409_v30 }
 0x284   :  { %v2446_v55 = vsel %vm11295_vm10, %v2439_v59, %v2443_v9  ;;  %v2448_v18 = vsel %vm11296_vm7, %v2443_v9, %v2439_v59  ;;  %vm11301_vm10 = vmmov %vm11296_vm7 }
 0x285   :  { %v2450_v20 = vsel %vm11298_vm0, %v2446_v55, 0.0  ;;  %v2451_v24 = vsel %vm11300_vm3, %v2448_v18, 0.0 }
 0x286   :  { %v2461_v4 = vrot.slane %v2450_v20, %v6862_v56  ;;  %v2465_v28 = vrot.slane %v2451_v24, %v6862_v56  ;;  %v2489_v40 = vrot.slane %v2450_v20, %v6871_v62  ;;  %v2493_v42 = vrot.slane %v2451_v24, %v6871_v62 }
 0x287   :  { %v2441_v49 = vpop.permute.xlu1 %2440  ;;  %v2517_v3 = vrot.slane %v2450_v20, %v6885_v50  ;;  %v2521_v12 = vrot.slane %v2451_v24, %v6885_v50  ;;  %v2545_v8 = vrot.slane %v2450_v20, %v6894_v43  ;;  %v2549_v52 = vrot.slane %v2451_v24, %v6894_v43 }
 0x288   :  { %v2474_v6 = vmul.f32 %v2461_v4, %v8515_v13  ;;  %v2475_v29 = vmul.f32 %v2465_v28, %v8515_v13  ;;  %v2502_v25 = vmul.f32 %v2489_v40, %v8505_v46  ;;  %v2503_v39 = vmul.f32 %v2493_v42, %v8505_v46 }
 0x289   :  { %v2530_v59 = vmul.f32 %v2517_v3, %v2512_v5  ;;  %v2531_v31 = vmul.f32 %v2521_v12, %v2512_v5 }
 0x28a   :  { %v2478_v23 = vadd.f32 %v2474_v6, %v2434_v34  ;;  %v2479_v44 = vadd.f32 %v2475_v29, %v2435_v47 }
 0x28b   :  { %v2445_v53 = vpop.permute.xlu1 %2444 }
 0x28c   :  { %v2447_v36 = vsel %vm11301_vm10, %v2441_v49, %v2445_v53  ;;  %v2449_v16 = vsel %vm11296_vm7, %v2445_v53, %v2441_v49  ;;  %v2506_v55 = vadd.f32 %v2502_v25, %v2478_v23  ;;  %v2507_v18 = vadd.f32 %v2503_v39, %v2479_v44 }
 0x28d   :  { %v2452_v51 = vsel %vm11298_vm0, %v2447_v36, 0.0  ;;  %v2453_v9 = vsel %vm11300_vm3, %v2449_v16, 0.0  ;;  %vm11075_vm10 = vcmask 1043456   ;;  %vm11074_vm7 = vcmask 27648  }
 0x28e   :  { %v2469_v11 = vrot.slane %v2452_v51, %v6862_v56  ;;  %v2473_v63 = vrot.slane %v2453_v9, %v6862_v56  ;;  %v2497_v54 = vrot.slane %v2452_v51, %v6871_v62  ;;  %v2501_v41 = vrot.slane %v2453_v9, %v6871_v62 }
 0x28f   :  { %v2540_v22 = vpop.permute.xlu1 %2539  ;;  %v2525_v20 = vrot.slane %v2452_v51, %v6885_v50  ;;  %v2529_v24 = vrot.slane %v2453_v9, %v6885_v50  ;;  %v2553_v26 = vrot.slane %v2452_v51, %v6894_v43  ;;  %v2557_v30 = vrot.slane %v2453_v9, %v6894_v43  ;;  %v8597_v9 = vld [vmem:[#allocation5 + $0x8] sm:$0xf] }
 0x290   :  { %v2476_v58 = vmul.f32 %v2469_v11, %v8515_v13  ;;  %v2477_v17 = vmul.f32 %v2473_v63, %v8515_v13  ;;  %v2558_v4 = vmul.f32 %v2545_v8, %v2540_v22  ;;  %v2559_v28 = vmul.f32 %v2549_v52, %v2540_v22 }
 0x291   :  { %v2504_v49 = vmul.f32 %v2497_v54, %v8505_v46  ;;  %v2505_v27 = vmul.f32 %v2501_v41, %v8505_v46  ;;  %v2534_v21 = vadd.f32 %v2530_v59, %v2506_v55  ;;  %v2535_v6 = vadd.f32 %v2531_v31, %v2507_v18 }
 0x292   :  { %v2480_v60 = vadd.f32 %v2476_v58, %v2436_v32  ;;  %v2481_v2 = vadd.f32 %v2477_v17, %v2437_v38  ;;  %v2532_v29 = vmul.f32 %v2525_v20, %v2512_v5  ;;  %v2533_v13 = vmul.f32 %v2529_v24, %v2512_v5 }
 0x293   :  { %v8573_v40 = vadd.f32 %v2558_v4, %v2534_v21  ;;  %v8575_v42 = vadd.f32 %v2559_v28, %v2535_v6  ;;  %v2560_v23 = vmul.f32 %v2553_v26, %v2540_v22  ;;  %v2561_v44 = vmul.f32 %v2557_v30, %v2540_v22  ;;  %v8631_v28 = vpop.permute.xlu0 %2781 }
 0x294   :  { %v2508_v34 = vadd.f32 %v2504_v49, %v2480_v60  ;;  %v2509_v47 = vadd.f32 %v2505_v27, %v2481_v2  ;;  %v11302_v11 = vmov 6   ;;  %v11303_v63 = vmov 8   ;;  %v8627_v30 = vpop.permute.xlu1 %2653  ;;  %v2584_v49 = vld [vmem:[#allocation7] sm:$0xf] }
 0x295   :  { %v11036_v38 = vmax.f32 %v8573_v40, 0.0  ;;  %v11033_v12 = vmax.f32 %v8575_v42, 0.0  ;;  %v11304_v54 = vmov 11   ;;  %v11305_v41 = vmov 10  }
 0x296   :  { %v2536_v3 = vadd.f32 %v2532_v29, %v2508_v34  ;;  %v2537_v32 = vadd.f32 %v2533_v13, %v2509_v47  ;;  %v11306_v59 = vmov 14   ;;  %v11307_v31 = vmov 12  }
 0x297   :  { %v2571_v8 = vsel %vm11075_vm10, %v11036_v38, 0.0  ;;  %v2572_v52 = vsel %vm11075_vm10, %v11033_v12, 0.0  ;;  %v11308_v22 = vmov 17   ;;  %v11309_v55 = vmov 13   ;;  %v8635_v2 = vpop.permute.xlu0 %2865 }
 0x298   :  { %v8579_v46 = vadd.f32 %v2560_v23, %v2536_v3  ;;  %v8581_v53 = vadd.f32 %v2561_v44, %v2537_v32  ;;  %v2573_v5 = vadd.f32 %v2572_v52, %v2571_v8  ;;  %v11310_v18 = vmov 15  }
 0x299   :  { %v11311_v58 = vmov 16   ;;  %v11312_v17 = vmov 18   ;;  %v11313_v20 = vmov 19   ;;  %v11314_v24 = vmov 21   ;;  %v8629_v4 = vpop.permute.xlu1 %2709 }
 0x29a   :  { %v11035_v36 = vmax.f32 %v8579_v46, 0.0  ;;  %v11034_v16 = vmax.f32 %v8581_v53, 0.0  ;;  %2574 = vadd.xlane.f32.xlu1 %v2573_v5  ;;  %v11315_v26 = vmov 22  }
 0x29c   :  { %v2576_v25 = vsel %vm11075_vm10, %v11035_v36, 0.0  ;;  %v2577_v39 = vsel %vm11075_vm10, %v11034_v16, 0.0 }
 0x29d   :  { %v2578_v51 = vadd.f32 %v2577_v39, %v2576_v25 }
 0x29e   :  { %v8633_v60 = vpop.permute.xlu1 %2737 }
 0x29f   :  { %2579 = vadd.xlane.f32.xlu0 %v2578_v51 }
 0x2ab   :  { %2809 = vperm.xlu1 %6293, %v8597_v9  }
 0x2af   :  { %6294 = vset.pattern.permute.xlu1 %v11302_v11 }
 0x2b0   :  { %2837 = vperm.xlu1 %6294, %v8597_v9  }
 0x2b4   :  { %6296 = vset.pattern.permute.xlu1 %v11303_v63 }
 0x2b5   :  { %2937 = vperm.xlu0 %6297, %v8597_v9   ;;  %2909 = vperm.xlu1 %6296, %v8597_v9  }
 0x2b9   :  { %6299 = vset.pattern.permute.xlu0 %v11304_v54  ;;  %6298 = vset.pattern.permute.xlu1 %v11305_v41 }
 0x2ba   :  { %2993 = vperm.xlu0 %6299, %v8597_v9   ;;  %2965 = vperm.xlu1 %6298, %v8597_v9  }
 0x2be   :  { %6302 = vset.pattern.permute.xlu0 %v11306_v59  ;;  %6300 = vset.pattern.permute.xlu1 %v11307_v31 }
 0x2bf   :  { %3093 = vperm.xlu0 %6302, %v8597_v9   ;;  %3037 = vperm.xlu1 %6300, %v8597_v9  }
 0x2c3   :  { %6305 = vset.pattern.permute.xlu0 %v11308_v22  ;;  %6301 = vset.pattern.permute.xlu1 %v11309_v55 }
 0x2c4   :  { %3065 = vperm.xlu1 %6301, %v8597_v9  }
 0x2c8   :  { %6303 = vset.pattern.permute.xlu1 %v11310_v18 }
 0x2c9   :  { %3121 = vperm.xlu1 %6303, %v8597_v9  }
 0x2cd   :  { %6304 = vset.pattern.permute.xlu1 %v11311_v58 }
 0x2ce   :  { %3149 = vperm.xlu1 %6304, %v8597_v9  }
 0x2d2   :  { %6306 = vset.pattern.permute.xlu1 %v11312_v17 }
 0x2d3   :  { %3205 = vperm.xlu1 %6306, %v8597_v9  }
 0x2d7   :  { %6307 = vset.pattern.permute.xlu1 %v11313_v20 }
 0x2d8   :  { %3233 = vperm.xlu1 %6307, %v8597_v9  }
 0x2dc   :  { %6309 = vset.pattern.permute.xlu1 %v11314_v24 }
 0x2dd   :  { %3305 = vperm.xlu1 %6309, %v8597_v9  }
 0x2e1   :  { %6310 = vset.pattern.permute.xlu1 %v11315_v26 }
 0x327   :  { %v2575_v27 = vpop.xlane.xlu1 %2574 }
 0x328   :  { %v2582_v21 = vmul.f32 0.00390625, %v2575_v27  ;;  %v2604_v27 = vld [vmem:[%s10918_s3] sm:$0xf] }
 0x32a   :  { %v2585_v6 = vmul.f32 %v2584_v49, %v2582_v21 }
 0x32c   :  { %v2580_v29 = vpop.xlane.xlu0 %2579  ;;  %v2588_v34 = vsel %vm11074_vm7, %v2585_v6, 0.0 }
 0x32d   :  { %v2583_v13 = vmul.f32 0.00390625, %v2580_v29  ;;  %v2589_v47 = vrot.slane %v2588_v34, 4 }
 0x32f   :  { %v2586_v23 = vmul.f32 %v2584_v49, %v2583_v13  ;;  %v2590_v44 = vadd.f32 %v2589_v47, %v2588_v34 }
 0x331   :  { %v2595_v3 = vsel %vm11074_vm7, %v2586_v23, 0.0  ;;  %v2591_v8 = vrot.slane %v2590_v44, 2  ;;  %v11316_v23 = vmov 24  }
 0x332   :  { %v2596_v32 = vrot.slane %v2595_v3, 4 }
 0x333   :  { %v2592_v5 = vadd.f32 %v2591_v8, %v2590_v44  ;;  %v11317_v44 = vmov 20   ;;  %v11322_v8 = vmov 28  }
 0x334   :  { %v2597_v52 = vadd.f32 %v2596_v32, %v2595_v3  ;;  %v11320_v3 = vmov 27   ;;  %v11321_v32 = vmov 26  }
 0x335   :  { %v2593_v39 = vrot.slane %v2592_v5, 1 }
 0x336   :  { %v2598_v25 = vrot.slane %v2597_v52, 2 }
 0x337   :  { %v2594_v12 = vadd.f32 %v2593_v39, %v2592_v5  ;;  %v11324_v5 = vmov 31   ;;  %v11326_v39 = vmov 32  }
 0x338   :  { %v2599_v51 = vadd.f32 %v2598_v25, %v2597_v52  ;;  %v11323_v52 = vmov 29   ;;  %v11325_v25 = vmov 30  }
 0x339   :  { %v2602_v29 = vmax.f32 %v2594_v12, 0.0  ;;  %v11318_v12 = vmov 25  }
 0x33a   :  { %v2600_v21 = vrot.slane %v2599_v51, 1 }
 0x33b   :  { %v2605_v16 = vmul.f32 %v2604_v27, %v2602_v29  ;;  %v8674_v29 = vld [vmem:[#allocation5 + $0xc] sm:$0xf] }
 0x33c   :  { %v2601_v6 = vadd.f32 %v2600_v21, %v2599_v51  ;;  %v11327_v51 = vmov 33   ;;  %v11329_v21 = vmov 34  }
 0x33d   :  { %v2607_v13 = vsel %vm11074_vm7, %v2605_v16, 0.0  ;;  %v11319_v16 = vmov 23  }
 0x33e   :  { %v2603_v49 = vmax.f32 %v2601_v6, 0.0  ;;  %2608 = vadd.xlane.f32.xlu0 %v2607_v13  ;;  %v11330_v6 = vmov 0   ;;  %v11332_v13 = vmov 2  }
 0x340   :  { %v2606_v34 = vmul.f32 %v2604_v27, %v2603_v49  ;;  %v11328_v27 = vmov 35   ;;  %v11331_v49 = vmov 1  }
 0x342   :  { %v2610_v47 = vsel %vm11074_vm7, %v2606_v34, 0.0  ;;  %v8681_v34 = vpop.permute.xlu1 %2809  ;;  %vm11372_vm7 = vcmp.lt.s32.totalorder %v6868_v61, 17 }
 0x343   :  { %2611 = vadd.xlane.f32.xlu1 %v2610_v47  ;;  %vm11373_vm10 = vmmov %vm11372_vm7 }
 0x346   :  { %v8683_v47 = vpop.permute.xlu1 %2837 }
 0x34a   :  { %v8685_v36 = vpop.permute.xlu1 %2909 }
 0x34e   :  { %v8687_v38 = vpop.permute.xlu1 %2965 }
 0x354   :  { %3333 = vperm.xlu1 %6310, %v8597_v9   ;;  %3177 = vperm.xlu0 %6305, %v8597_v9  }
 0x358   :  { %6312 = vset.pattern.permute.xlu1 %v11316_v23  ;;  %6308 = vset.pattern.permute.xlu0 %v11317_v44 }
 0x359   :  { %3405 = vperm.xlu1 %6312, %v8597_v9   ;;  %3277 = vperm.xlu0 %6308, %v8597_v9  }
 0x35d   :  { %6313 = vset.pattern.permute.xlu1 %v11318_v12  ;;  %6311 = vset.pattern.permute.xlu0 %v11319_v16 }
 0x35e   :  { %3433 = vperm.xlu1 %6313, %v8597_v9   ;;  %3361 = vperm.xlu0 %6311, %v8597_v9  }
 0x362   :  { %6315 = vset.pattern.permute.xlu1 %v11320_v3  ;;  %6314 = vset.pattern.permute.xlu0 %v11321_v32 }
 0x363   :  { %3489 = vperm.xlu1 %6315, %v8597_v9   ;;  %3461 = vperm.xlu0 %6314, %v8597_v9  }
 0x367   :  { %6316 = vset.pattern.permute.xlu1 %v11322_v8  ;;  %6317 = vset.pattern.permute.xlu0 %v11323_v52 }
 0x368   :  { %3533 = vperm.xlu1 %6316, %v8597_v9   ;;  %3561 = vperm.xlu0 %6317, %v8597_v9  }
 0x36c   :  { %6319 = vset.pattern.permute.xlu1 %v11324_v5  ;;  %6318 = vset.pattern.permute.xlu0 %v11325_v25 }
 0x36d   :  { %3617 = vperm.xlu1 %6319, %v8597_v9   ;;  %3589 = vperm.xlu0 %6318, %v8597_v9  }
 0x371   :  { %6320 = vset.pattern.permute.xlu1 %v11326_v39  ;;  %6321 = vset.pattern.permute.xlu0 %v11327_v51 }
 0x372   :  { %3661 = vperm.xlu1 %6320, %v8597_v9   ;;  %3689 = vperm.xlu0 %6321, %v8597_v9  }
 0x376   :  { %6324 = vset.pattern.permute.xlu1 %v11328_v27  ;;  %6322 = vset.pattern.permute.xlu0 %v11329_v21  ;;  %v8689_v21 = vpop.permute.xlu1 %3037 }
 0x377   :  { %3745 = vperm.xlu1 %6324, %v8597_v9   ;;  %3717 = vperm.xlu0 %6322, %v8597_v9  }
 0x37a   :  { %v8691_v51 = vpop.permute.xlu1 %3065 }
 0x37b   :  { %6325 = vset.pattern.permute.xlu1 %v11330_v6  ;;  %6323 = vset.pattern.permute.xlu0 %v11331_v49  ;;  %11333 = vst [vmem:[#allocation33_spill] sm:$0xff] %v8691_v51  ;;  %v8697_v49 = vpop.permute.xlu0 %2937 }
 0x37c   :  { %3796 = vperm.xlu1 %6325, %v8674_v29   ;;  %2681 = vperm.xlu0 %6323, %v8597_v9  }
 0x37e   :  { %v8693_v6 = vpop.permute.xlu1 %3121 }
 0x37f   :  { %11334 = vst [vmem:[#allocation34_spill] sm:$0xff] %v8693_v6 }
 0x380   :  { %6326 = vset.pattern.permute.xlu1 %v11332_v13  ;;  %v8701_v13 = vpop.permute.xlu0 %2993 }
 0x382   :  { %v8695_v27 = vpop.permute.xlu1 %3149 }
 0x384   :  { %v8705_v39 = vpop.permute.xlu0 %3093 }
 0x385   :  { %11337 = vst [vmem:[#allocation37_spill] sm:$0xff] %v8705_v39  ;;  %v6418_v39 = vld [vmem:[#allocation2] sm:$0xff] }
 0x386   :  { %v8699_v9 = vpop.permute.xlu1 %3205 }
 0x387   :  { %11335 = vst [vmem:[#allocation35_spill] sm:$0xff] %v8699_v9  ;;  %v11339_v9 = vmax.f32 %v8573_v40, 0.0  ;;  %v11345_v40 = vld [vmem:[#allocation16_spill] sm:$0xff] }
 0x38a   :  { %v8703_v25 = vpop.permute.xlu1 %3233 }
 0x38b   :  { %11336 = vst [vmem:[#allocation36_spill] sm:$0xff] %v8703_v25 }
 0x38e   :  { %v8707_v15 = vpop.permute.xlu1 %3305 }
 0x38f   :  { %11338 = vst [vmem:[#allocation38_spill] sm:$0xff] %v8707_v15 }
 0x3cb   :  { %v2609_v10 = vpop.xlane.xlu0 %2608 }
 0x3cc   :  { %v6157_v35 = vmul.f32 -1.442695, %v2609_v10  ;;  %v11341_v10 = vmax.f32 %v8579_v46, 0.0  ;;  %v11347_v46 = vld [vmem:[#allocation15_spill] sm:$0xff] }
 0x3ce   :  { %6399 = vpow2.f32 %v6157_v35 }
 0x3d0   :  { %v2612_v14 = vpop.xlane.xlu1 %2611 }
 0x3d1   :  { %v6158_v0 = vmul.f32 -1.442695, %v2612_v14  ;;  %v11342_v14 = vmax.f32 %v8581_v53, 0.0 }
 0x3d3   :  { %6401 = vpow2.f32 %v6158_v0 }
 0x3d8   :  { %v6400_v33 = vpop.eup %6399 }
 0x3d9   :  { %v2619_v19 = vadd.f32 1.0, %v6400_v33  ;;  %v6419_v33 = vld [vmem:[#allocation2 + $0x8] sm:$0xff] }
 0x3db   :  { %6403 = vrcp.f32 %v2619_v19 }
 0x3dd   :  { %v6402_v57 = vpop.eup %6401 }
 0x3de   :  { %v2620_v5 = vadd.f32 1.0, %v6402_v57  ;;  %v11343_v57 = vmax.f32 %v8575_v42, 0.0  ;;  %v11349_v42 = vmov 4  }
 0x3e0   :  { %6405 = vrcp.f32 %v2620_v5 }
 0x3e5   :  { %v6404_v6 = vpop.eup %6403 }
 0x3e6   :  { %v2625_v25 = vmul.f32 %v6404_v6, %v11339_v9  ;;  %v2626_v19 = vmul.f32 %v6404_v6, %v11343_v57  ;;  %v8789_v6 = vpop.permute.xlu1 %3333 }
 0x3e7   :  { %11352 = vst [vmem:[#allocation43_spill] sm:$0xff] %v8789_v6 }
 0x3e8   :  { %v8711_v51 = vadd.f32 %v6418_v39, %v2625_v25  ;;  %v8731_v53 = vadd.f32 %v2626_v19, %v11347_v46  ;;  %v11351_v25 = vmov 7   ;;  %v8787_v39 = vpop.permute.xlu0 %3177 }
 0x3ea   :  { %v6406_v8 = vpop.eup %6405  ;;  %11340 = vst [vmem:[#allocation39_spill] sm:$0xff] %v8711_v51  ;;  %2635 = vrot.lane.b32.xlu0 %v8711_v51, %s6553_s20  ;;  %11348 = vst [vmem:[#allocation42_spill] sm:$0xff] %v8731_v53 }
 0x3eb   :  { %v2627_v35 = vmul.f32 %v6406_v8, %v11341_v10  ;;  %v2628_v0 = vmul.f32 %v6406_v8, %v11342_v14  ;;  %v11350_v8 = vmov 3  }
 0x3ec   :  { %v8795_v10 = vpop.permute.xlu0 %3277 }
 0x3ed   :  { %v8721_v5 = vadd.f32 %v6419_v33, %v2627_v35  ;;  %v8724_v9 = vadd.f32 %v2628_v0, %v11345_v40  ;;  %11353 = vst [vmem:[#allocation44_spill] sm:$0xff] %v8795_v10  ;;  %v8799_v35 = vpop.permute.xlu1 %3405 }
 0x3ee   :  { %11354 = vst [vmem:[#allocation45_spill] sm:$0xff] %v8799_v35 }
 0x3ef   :  { %11344 = vst [vmem:[#allocation40_spill] sm:$0xff] %v8721_v5  ;;  %11346 = vst [vmem:[#allocation41_spill] sm:$0xff] %v8724_v9  ;;  %2637 = vrot.lane.b32.xlu1 %v8721_v5, %s6553_s20  ;;  %2641 = vrot.lane.b32.xlu0 %v8724_v9, %s6553_s20 }
 0x3f0   :  { %v8804_v14 = vpop.permute.xlu0 %3361 }
 0x3f1   :  { %11355 = vst [vmem:[#allocation46_spill] sm:$0xff] %v8804_v14  ;;  %v8809_v0 = vpop.permute.xlu1 %3433 }
 0x3f2   :  { %11356 = vst [vmem:[#allocation47_spill] sm:$0xff] %v8809_v0 }
 0x3f3   :  { %2639 = vrot.lane.b32.xlu1 %v8731_v53, %s6553_s20  ;;  %2764 = vrot.lane.b32.xlu0 %v8711_v51, %s6557_s4 }
 0x3f4   :  { %v8814_v57 = vpop.permute.xlu0 %3461 }
 0x3f5   :  { %11357 = vst [vmem:[#allocation48_spill] sm:$0xff] %v8814_v57  ;;  %v8820_v19 = vpop.permute.xlu1 %3489 }
 0x3f6   :  { %11358 = vst [vmem:[#allocation49_spill] sm:$0xff] %v8820_v19 }
 0x3f7   :  { %2766 = vrot.lane.b32.xlu1 %v8721_v5, %s6557_s4  ;;  %2768 = vrot.lane.b32.xlu0 %v8731_v53, %s6557_s4 }
 0x3f8   :  { %v8822_v33 = vpop.permute.xlu0 %3561 }
 0x3f9   :  { %11359 = vst [vmem:[#allocation50_spill] sm:$0xff] %v8822_v33  ;;  %v8828_v40 = vpop.permute.xlu1 %3533 }
 0x3fa   :  { %11360 = vst [vmem:[#allocation51_spill] sm:$0xff] %v8828_v40 }
 0x3fb   :  { %2770 = vrot.lane.b32.xlu1 %v8724_v9, %s6557_s4  ;;  %2896 = vrot.lane.b32.xlu0 %v8731_v53, %s6562_s21 }
 0x3fc   :  { %v8833_v46 = vpop.permute.xlu0 %3589 }
 0x3fd   :  { %11361 = vst [vmem:[#allocation52_spill] sm:$0xff] %v8833_v46 }
 0x3ff   :  { %2892 = vrot.lane.b32.xlu1 %v8711_v51, %s6562_s21  ;;  %3020 = vrot.lane.b32.xlu0 %v8711_v51, %s6567_s22 }
 0x403   :  { %2894 = vrot.lane.b32.xlu1 %v8721_v5, %s6562_s21  ;;  %3024 = vrot.lane.b32.xlu0 %v8731_v53, %s6567_s22 }
 0x407   :  { %2898 = vrot.lane.b32.xlu1 %v8724_v9, %s6562_s21  ;;  %3824 = vperm.xlu0 %6323, %v8674_v29  }
 0x40b   :  { %3022 = vrot.lane.b32.xlu1 %v8721_v5, %s6567_s22  ;;  %3262 = vrot.lane.b32.xlu0 %v8721_v5, %s6573_s23 }
 0x40c   :  { %6328 = vset.pattern.permute.xlu0 %v11349_v42 }
 0x40f   :  { %3852 = vperm.xlu1 %6326, %v8674_v29   ;;  %3266 = vrot.lane.b32.xlu0 %v8724_v9, %s6573_s23 }
 0x413   :  { %6327 = vset.pattern.permute.xlu1 %v11350_v8  ;;  %3388 = vrot.lane.b32.xlu0 %v8711_v51, %s6575_s24 }
 0x414   :  { %3880 = vperm.xlu1 %6327, %v8674_v29  }
 0x417   :  { %3392 = vrot.lane.b32.xlu0 %v8731_v53, %s6575_s24 }
 0x418   :  { %3026 = vrot.lane.b32.xlu1 %v8724_v9, %s6567_s22 }
 0x419   :  { %6329 = vset.pattern.permute.xlu1 %v11273_v7 }
 0x41b   :  { %3924 = vperm.xlu0 %6328, %v8674_v29  }
 0x41c   :  { %3260 = vrot.lane.b32.xlu1 %v8711_v51, %s6573_s23 }
 0x41f   :  { %3520 = vrot.lane.b32.xlu0 %v8731_v53, %s6581_s25 }
 0x420   :  { %3264 = vrot.lane.b32.xlu1 %v8731_v53, %s6573_s23  ;;  %6331 = vset.pattern.permute.xlu0 %v11351_v25 }
 0x423   :  { %3648 = vrot.lane.b32.xlu0 %v8731_v53, %s6586_s26 }
 0x424   :  { %3390 = vrot.lane.b32.xlu1 %v8721_v5, %s6575_s24 }
 0x427   :  { %4008 = vperm.xlu0 %6331, %v8674_v29  }
 0x428   :  { %3952 = vperm.xlu1 %6329, %v8674_v29  }
 0x42b   :  { %6334 = vset.pattern.permute.xlu0 %v11305_v41 }
 0x42c   :  { %6330 = vset.pattern.permute.xlu1 %v11302_v11  ;;  %4108 = vperm.xlu0 %6334, %v8674_v29   ;;  %v3159_v11 = vrot.slane %v8731_v53, %v6862_v56 }
 0x42d   :  { %3980 = vperm.xlu1 %6330, %v8674_v29  }
 0x430   :  { %6337 = vset.pattern.permute.xlu0 %v11309_v55 }
 0x431   :  { %3394 = vrot.lane.b32.xlu1 %v8724_v9, %s6575_s24  ;;  %4208 = vperm.xlu0 %6337, %v8674_v29  }
 0x432   :  { %6332 = vset.pattern.permute.xlu1 %v11303_v63 }
 0x435   :  { %3516 = vrot.lane.b32.xlu1 %v8711_v51, %s6581_s25  ;;  %6338 = vset.pattern.permute.xlu0 %v11306_v59  ;;  %v11364_v59 = vmov 9  }
 0x436   :  { %4236 = vperm.xlu0 %6338, %v8674_v29  }
 0x439   :  { %3518 = vrot.lane.b32.xlu1 %v8721_v5, %s6581_s25 }
 0x43a   :  { %6341 = vset.pattern.permute.xlu0 %v11308_v22  ;;  %v8837_v22 = vpop.permute.xlu1 %3617 }
 0x43b   :  { %4320 = vperm.xlu0 %6341, %v8674_v29   ;;  %11362 = vst [vmem:[#allocation53_spill] sm:$0xff] %v8837_v22 }
 0x43d   :  { %3522 = vrot.lane.b32.xlu1 %v8724_v9, %s6581_s25 }
 0x43f   :  { %6344 = vset.pattern.permute.xlu0 %v11317_v44  ;;  %v8841_v44 = vpop.permute.xlu0 %3689 }
 0x440   :  { %4420 = vperm.xlu0 %6344, %v8674_v29   ;;  %11363 = vst [vmem:[#allocation54_spill] sm:$0xff] %v8841_v44  ;;  %v3195_v44 = vrot.slane %v8724_v9, %v6871_v62 }
 0x441   :  { %3644 = vrot.lane.b32.xlu1 %v8711_v51, %s6586_s26 }
 0x442   :  { %v8926_v15 = vmul.f32 %v3195_v44, %v8787_v39 }
 0x443   :  { %v8850_v55 = vpop.permute.xlu0 %3717 }
 0x444   :  { %6347 = vset.pattern.permute.xlu0 %v11319_v16  ;;  %v8846_v16 = vpop.permute.xlu1 %3661  ;;  %11366 = vst [vmem:[#allocation56_spill] sm:$0xff] %v8850_v55  ;;  %11377 = vst [vmem:[#allocation63_spill] sm:$0xff] %v8926_v15 }
 0x445   :  { %3646 = vrot.lane.b32.xlu1 %v8721_v5, %s6586_s26  ;;  %4504 = vperm.xlu0 %6347, %v8674_v29   ;;  %11365 = vst [vmem:[#allocation55_spill] sm:$0xff] %v8846_v16 }
 0x447   :  { %v8856_v41 = vpop.permute.xlu0 %2681 }
 0x449   :  { %4052 = vperm.xlu1 %6332, %v8674_v29   ;;  %6350 = vset.pattern.permute.xlu0 %v11321_v32  ;;  %v8853_v32 = vpop.permute.xlu1 %3745 }
 0x44a   :  { %4604 = vperm.xlu0 %6350, %v8674_v29   ;;  %11367 = vst [vmem:[#allocation57_spill] sm:$0xff] %v8853_v32 }
 0x44d   :  { %3650 = vrot.lane.b32.xlu1 %v8724_v9, %s6586_s26  ;;  %v8860_v63 = vpop.permute.xlu1 %3796 }
 0x44e   :  { %6333 = vset.pattern.permute.xlu1 %v11364_v59  ;;  %6353 = vset.pattern.permute.xlu0 %v11323_v52  ;;  %11368 = vst [vmem:[#allocation58_spill] sm:$0xff] %v8860_v63  ;;  %v3183_v52 = vrot.slane %v8711_v51, %v6871_v62  ;;  %v3187_v59 = vrot.slane %v8731_v53, %v6871_v62 }
 0x44f   :  { %v3191_v63 = vrot.slane %v8721_v5, %v6871_v62 }
 0x450   :  { %v8882_v32 = vmul.f32 %v3187_v59, %v8787_v39  ;;  %v3163_v59 = vrot.slane %v8721_v5, %v6862_v56 }
 0x451   :  { %4080 = vperm.xlu1 %6333, %v8674_v29   ;;  %v8919_v0 = vmul.f32 %v3191_v63, %v8787_v39 }
 0x452   :  { %11370 = vst [vmem:[#allocation60_spill] sm:$0xff] %v8882_v32  ;;  %v8931_v32 = vmul.f32 %v3163_v59, %v8695_v27 }
 0x453   :  { %11376 = vst [vmem:[#allocation62_spill] sm:$0xff] %v8919_v0 }
 0x454   :  { %11378 = vst [vmem:[#allocation64_spill] sm:$0xff] %v8931_v32 }
 0x455   :  { %6335 = vset.pattern.permute.xlu1 %v11304_v54  ;;  %v3155_v54 = vrot.slane %v8711_v51, %v6862_v56 }
 0x456   :  { %4136 = vperm.xlu1 %6335, %v8674_v29  }
 0x45a   :  { %6336 = vset.pattern.permute.xlu1 %v11307_v31  ;;  %v8873_v31 = vmul.f32 %v3183_v52, %v8787_v39  ;;  %v8888_v52 = vmul.f32 %v3159_v11, %v8695_v27 }
 0x45b   :  { %4180 = vperm.xlu1 %6336, %v8674_v29  }
 0x45c   :  { %v2636_v25 = vpop.permute.xlu0 %2635  ;;  %11369 = vst [vmem:[#allocation59_spill] sm:$0xff] %v8873_v31  ;;  %11371 = vst [vmem:[#allocation61_spill] sm:$0xff] %v8888_v52 }
 0x45f   :  { %6339 = vset.pattern.permute.xlu1 %v11310_v18  ;;  %v8885_v18 = vmul.f32 %v3155_v54, %v8695_v27 }
 0x460   :  { %4264 = vperm.xlu1 %6339, %v8674_v29  }
 0x461   :  { %v2638_v42 = vpop.permute.xlu1 %2637  ;;  %v2642_v55 = vpop.permute.xlu0 %2641 }
 0x462   :  { %v2644_v7 = vsel %vm11372_vm7, %v2638_v42, %v2642_v55  ;;  %v2646_v8 = vsel %vm11373_vm10, %v2642_v55, %v2638_v42  ;;  %vm11379_vm10 = vmmov %vm11372_vm7 }
 0x463   :  { %v2649_v22 = vsel %vm6889_vm5, %v2646_v8, 0.0  ;;  %v2650_v46 = vsel %vm6918_vm6, %v2644_v7, 0.0 }
 0x464   :  { %6340 = vset.pattern.permute.xlu1 %v11311_v58  ;;  %v2667_v40 = vrot.slane %v2649_v22, %v6862_v56  ;;  %v2671_v55 = vrot.slane %v2650_v46, %v6862_v56  ;;  %v2695_v42 = vrot.slane %v2649_v22, %v6871_v62  ;;  %v2699_v19 = vrot.slane %v2650_v46, %v6871_v62 }
 0x465   :  { %4292 = vperm.xlu1 %6340, %v8674_v29   ;;  %v2723_v7 = vrot.slane %v2649_v22, %v6885_v50  ;;  %v2727_v8 = vrot.slane %v2650_v46, %v6885_v50  ;;  %v2765_v58 = vpop.permute.xlu0 %2764  ;;  %v2640_v57 = vpop.permute.xlu1 %2639  ;;  %v2751_v35 = vrot.slane %v2649_v22, %v6894_v43  ;;  %v2755_v14 = vrot.slane %v2650_v46, %v6894_v43 }
 0x466   :  { %v2674_v10 = vmul.f32 %v2667_v40, %v8627_v30  ;;  %v2675_v11 = vmul.f32 %v2671_v55, %v8627_v30  ;;  %v2702_v63 = vmul.f32 %v2695_v42, %v8856_v41  ;;  %v2703_v33 = vmul.f32 %v2699_v19, %v8856_v41 }
 0x467   :  { %v2643_v22 = vsel %vm11379_vm10, %v2636_v25, %v2640_v57  ;;  %v2645_v46 = vsel %vm11372_vm7, %v2640_v57, %v2636_v25  ;;  %v2730_v44 = vmul.f32 %v2723_v7, %v8629_v4  ;;  %v2731_v40 = vmul.f32 %v2727_v8, %v8629_v4 }
 0x468   :  { %v2647_v39 = vsel %vm6889_vm5, %v2645_v46, 0.0  ;;  %v2648_v59 = vsel %vm6918_vm6, %v2643_v22, 0.0  ;;  %v8948_v19 = vmul.f32 %v2751_v35, %v8633_v60  ;;  %v8951_v55 = vmul.f32 %v2755_v14, %v8633_v60 }
 0x469   :  { %6342 = vset.pattern.permute.xlu1 %v11312_v17  ;;  %v2659_v25 = vrot.slane %v2647_v39, %v6862_v56  ;;  %v2663_v57 = vrot.slane %v2648_v59, %v6862_v56  ;;  %v2687_v42 = vrot.slane %v2647_v39, %v6871_v62  ;;  %v2691_v7 = vrot.slane %v2648_v59, %v6871_v62  ;;  %v2769_v46 = vpop.permute.xlu0 %2768  ;;  %v2767_v6 = vpop.permute.xlu1 %2766 }
 0x46a   :  { %4348 = vperm.xlu1 %6342, %v8674_v29   ;;  %v2715_v8 = vrot.slane %v2647_v39, %v6885_v50  ;;  %v2719_v22 = vrot.slane %v2648_v59, %v6885_v50  ;;  %v2706_v17 = vadd.f32 %v2702_v63, %v2674_v10  ;;  %v2707_v35 = vadd.f32 %v2703_v33, %v2675_v11 }
 0x46b   :  { %v2672_v54 = vmul.f32 %v2659_v25, %v8627_v30  ;;  %v2673_v14 = vmul.f32 %v2663_v57, %v8627_v30  ;;  %v2700_v16 = vmul.f32 %v2687_v42, %v8856_v41  ;;  %v2701_v15 = vmul.f32 %v2691_v7, %v8856_v41 }
 0x46c   :  { %v2728_v0 = vmul.f32 %v2715_v8, %v8629_v4  ;;  %v2729_v32 = vmul.f32 %v2719_v22, %v8629_v4  ;;  %v2743_v31 = vrot.slane %v2647_v39, %v6894_v43  ;;  %v2747_v52 = vrot.slane %v2648_v59, %v6894_v43 }
 0x46d   :  { %vm11380_vm10 = vcmp.lt.s32.totalorder %v6868_v61, 16  ;;  %v2704_v33 = vadd.f32 %v2700_v16, %v2672_v54  ;;  %v2705_v41 = vadd.f32 %v2701_v15, %v2673_v14  ;;  %v2771_v16 = vpop.permute.xlu1 %2770  ;;  %v2734_v54 = vadd.f32 %v2730_v44, %v2706_v17 }
 0x46e   :  { %6343 = vset.pattern.permute.xlu1 %v11313_v20  ;;  %v2772_v10 = vsel %vm11380_vm10, %v2765_v58, %v2769_v46  ;;  %vm11381_vm7 = vmmov %vm11380_vm10  ;;  %v2756_v39 = vmul.f32 %v2743_v31, %v8633_v60  ;;  %v2757_v59 = vmul.f32 %v2747_v52, %v8633_v60  ;;  %v2735_v22 = vadd.f32 %v2731_v40, %v2707_v35  ;;  %v2897_v40 = vpop.permute.xlu0 %2896 }
 0x46f   :  { %v2774_v30 = vsel %vm11381_vm7, %v2769_v46, %v2765_v58  ;;  %4376 = vperm.xlu1 %6343, %v8674_v29   ;;  %v2777_v25 = vsel %vm6958_vm9, %v2772_v10, 0.0  ;;  %v2732_v7 = vadd.f32 %v2728_v0, %v2704_v33  ;;  %v2733_v58 = vadd.f32 %v2729_v32, %v2705_v41  ;;  %vm11384_vm10 = vmmov %vm11381_vm7 }
 0x470   :  { %v2776_v63 = vsel %vm6954_vm8, %v2774_v30, 0.0  ;;  %v2791_v42 = vrot.slane %v2777_v25, %v6862_v56  ;;  %v2819_v15 = vrot.slane %v2777_v25, %v6871_v62  ;;  %v2847_v14 = vrot.slane %v2777_v25, %v6885_v50 }
 0x471   :  { %v2787_v57 = vrot.slane %v2776_v63, %v6862_v56  ;;  %v2815_v8 = vrot.slane %v2776_v63, %v6871_v62  ;;  %v2843_v46 = vrot.slane %v2776_v63, %v6885_v50  ;;  %v2760_v31 = vadd.f32 %v2756_v39, %v2732_v7 }
 0x472   :  { %v2761_v60 = vadd.f32 %v2757_v59, %v2733_v58  ;;  %v2801_v0 = vmul.f32 %v2791_v42, %v8631_v28  ;;  %v2829_v10 = vmul.f32 %v2819_v15, %v8681_v34  ;;  %v2857_v44 = vmul.f32 %v2847_v14, %v8683_v47 }
 0x473   :  { %6345 = vset.pattern.permute.xlu1 %v11314_v24  ;;  %v2800_v52 = vmul.f32 %v2787_v57, %v8631_v28  ;;  %v2828_v32 = vmul.f32 %v2815_v8, %v8681_v34  ;;  %v2856_v17 = vmul.f32 %v2843_v46, %v8683_v47  ;;  %v2773_v33 = vsel %vm11384_vm10, %v2767_v6, %v2771_v16  ;;  %v2893_v46 = vpop.permute.xlu1 %2892 }
 0x474   :  { %4448 = vperm.xlu1 %6345, %v8674_v29   ;;  %v2805_v30 = vadd.f32 %v2801_v0, %v2761_v60  ;;  %v2775_v41 = vsel %vm11381_vm7, %v2771_v16, %v2767_v6  ;;  %v2871_v39 = vrot.slane %v2776_v63, %v6894_v43  ;;  %v2875_v59 = vrot.slane %v2777_v25, %v6894_v43 }
 0x475   :  { %v2804_v35 = vadd.f32 %v2800_v52, %v2760_v31  ;;  %v2778_v57 = vsel %vm6954_vm8, %v2775_v41, 0.0  ;;  %v2779_v42 = vsel %vm6958_vm9, %v2773_v33, 0.0  ;;  %v2762_v14 = vadd.f32 %v8948_v19, %v2734_v54 }
 0x476   :  { %v2833_v58 = vadd.f32 %v2829_v10, %v2805_v30  ;;  %v2795_v8 = vrot.slane %v2778_v57, %v6862_v56  ;;  %v2799_v15 = vrot.slane %v2779_v42, %v6862_v56  ;;  %v2823_v6 = vrot.slane %v2778_v57, %v6871_v62  ;;  %v3021_v30 = vpop.permute.xlu0 %3020 }
 0x477   :  { %v2832_v7 = vadd.f32 %v2828_v32, %v2804_v35  ;;  %v2827_v63 = vrot.slane %v2779_v42, %v6871_v62  ;;  %v2851_v25 = vrot.slane %v2778_v57, %v6885_v50  ;;  %v2855_v16 = vrot.slane %v2779_v42, %v6885_v50 }
 0x478   :  { %6346 = vset.pattern.permute.xlu1 %v11315_v26  ;;  %v2763_v31 = vadd.f32 %v8951_v55, %v2735_v22  ;;  %v2802_v60 = vmul.f32 %v2795_v8, %v8631_v28  ;;  %v2803_v52 = vmul.f32 %v2799_v15, %v8631_v28  ;;  %v2861_v32 = vadd.f32 %v2857_v44, %v2833_v58 }
 0x479   :  { %4476 = vperm.xlu1 %6346, %v8674_v29   ;;  %v2860_v0 = vadd.f32 %v2856_v17, %v2832_v7  ;;  %v2884_v10 = vmul.f32 %v2871_v39, %v8635_v2  ;;  %v2885_v35 = vmul.f32 %v2875_v59, %v8635_v2  ;;  %v2830_v26 = vmul.f32 %v2823_v6, %v8681_v34  ;;  %v2895_v39 = vpop.permute.xlu1 %2894 }
 0x47a   :  { %v2806_v33 = vadd.f32 %v2802_v60, %v2762_v14  ;;  %v2807_v41 = vadd.f32 %v2803_v52, %v2763_v31  ;;  %v2831_v24 = vmul.f32 %v2827_v63, %v8681_v34  ;;  %v2858_v19 = vmul.f32 %v2851_v25, %v8683_v47  ;;  %v3025_v25 = vpop.permute.xlu0 %3024 }
 0x47b   :  { %v2859_v55 = vmul.f32 %v2855_v16, %v8683_v47  ;;  %vm11385_vm10 = vcmp.lt.s32.totalorder %v6868_v61, 15  ;;  %v2879_v22 = vrot.slane %v2778_v57, %v6894_v43  ;;  %v2883_v17 = vrot.slane %v2779_v42, %v6894_v43 }
 0x47c   :  { %v2900_v28 = vsel %vm11385_vm10, %v2893_v46, %v2897_v40  ;;  %vm11386_vm7 = vmmov %vm11385_vm10  ;;  %v2888_v47 = vadd.f32 %v2884_v10, %v2860_v0  ;;  %v2889_v59 = vadd.f32 %v2885_v35, %v2861_v32  ;;  %v2834_v58 = vadd.f32 %v2830_v26, %v2806_v33 }
 0x47d   :  { %v2902_v54 = vsel %vm11386_vm7, %v2897_v40, %v2893_v46  ;;  %6348 = vset.pattern.permute.xlu1 %v11316_v23  ;;  %v2905_v34 = vsel %vm7103_vm12, %v2900_v28, 0.0  ;;  %v2835_v8 = vadd.f32 %v2831_v24, %v2807_v41  ;;  %v2886_v16 = vmul.f32 %v2879_v22, %v8635_v2  ;;  %v2899_v33 = vpop.permute.xlu1 %2898 }
 0x47e   :  { %v2904_v44 = vsel %vm7096_vm11, %v2902_v54, 0.0  ;;  %4548 = vperm.xlu1 %6348, %v8674_v29   ;;  %v2919_v40 = vrot.slane %v2905_v34, %v6862_v56  ;;  %v2947_v42 = vrot.slane %v2905_v34, %v6871_v62  ;;  %v2975_v63 = vrot.slane %v2905_v34, %v6885_v50 }
 0x47f   :  { %v2915_v7 = vrot.slane %v2904_v44, %v6862_v56  ;;  %v2943_v57 = vrot.slane %v2904_v44, %v6871_v62  ;;  %v2971_v6 = vrot.slane %v2904_v44, %v6885_v50  ;;  %v2887_v14 = vmul.f32 %v2883_v17, %v8635_v2 }
 0x480   :  { %v2929_v46 = vmul.f32 %v2919_v40, %v8685_v36  ;;  %v2957_v24 = vmul.f32 %v2947_v42, %v8697_v49  ;;  %v2985_v0 = vmul.f32 %v2975_v63, %v8687_v38  ;;  %v2999_v32 = vrot.slane %v2904_v44, %v6894_v43 }
 0x481   :  { %v2928_v15 = vmul.f32 %v2915_v7, %v8685_v36  ;;  %v2956_v26 = vmul.f32 %v2943_v57, %v8697_v49  ;;  %v2984_v52 = vmul.f32 %v2971_v6, %v8687_v38  ;;  %v3003_v10 = vrot.slane %v2905_v34, %v6894_v43 }
 0x482   :  { %6349 = vset.pattern.permute.xlu1 %v11318_v12  ;;  %v2933_v60 = vadd.f32 %v2929_v46, %v2889_v59  ;;  %vm11387_vm10 = vcmp.lt.s32.totalorder %v6868_v61, 1  ;;  %v3012_v17 = vmul.f32 %v2999_v32, %v8701_v13  ;;  %v2862_v42 = vadd.f32 %v2858_v19, %v2834_v58 }
 0x483   :  { %v2932_v31 = vadd.f32 %v2928_v15, %v2888_v47  ;;  %4576 = vperm.xlu1 %6349, %v8674_v29   ;;  %v3028_v2 = vsel %vm11387_vm10, %v3021_v30, %v3025_v25  ;;  %vm11388_vm7 = vmmov %vm11387_vm10  ;;  %v3013_v44 = vmul.f32 %v3003_v10, %v8701_v13  ;;  %v2863_v15 = vadd.f32 %v2859_v55, %v2835_v8  ;;  %v9077_v55 = vpop.permute.xlu1 %3022 }
 0x484   :  { %v3030_v35 = vsel %vm11388_vm7, %v3025_v25, %v3021_v30  ;;  %v2961_v28 = vadd.f32 %v2957_v24, %v2933_v60  ;;  %v3033_v22 = vsel %vm7222_vm15, %v3028_v2, 0.0  ;;  %vm11391_vm10 = vcmp.lt.s32.totalorder %v6868_v61, 15 }
 0x485   :  { %v2960_v41 = vadd.f32 %v2956_v26, %v2932_v31  ;;  %v3032_v54 = vsel %vm7215_vm14, %v3030_v35, 0.0  ;;  %v3047_v47 = vrot.slane %v3033_v22, %v6862_v56  ;;  %v3075_v40 = vrot.slane %v3033_v22, %v6871_v62  ;;  %v11389_v31 = vld [vmem:[#allocation33_spill] sm:$0xff]  ;;  %vm11392_vm7 = vmmov %vm11391_vm10 }
 0x486   :  { %v3043_v34 = vrot.slane %v3032_v54, %v6862_v56  ;;  %v2989_v7 = vadd.f32 %v2985_v0, %v2961_v28  ;;  %v3071_v30 = vrot.slane %v3032_v54, %v6871_v62  ;;  %v9065_v57 = vpop.permute.xlu0 %3824  ;;  %v3099_v46 = vrot.slane %v3032_v54, %v6885_v50  ;;  %v11390_v0 = vld [vmem:[#allocation37_spill] sm:$0xff] }
 0x487   :  { %v2988_v59 = vadd.f32 %v2984_v52, %v2960_v41  ;;  %6351 = vset.pattern.permute.xlu1 %v11320_v3  ;;  %v3103_v6 = vrot.slane %v3033_v22, %v6885_v50  ;;  %v3057_v24 = vmul.f32 %v3047_v47, %v8689_v21  ;;  %v3085_v52 = vmul.f32 %v3075_v40, %v11389_v31 }
 0x488   :  { %4632 = vperm.xlu1 %6351, %v8674_v29   ;;  %v3017_v25 = vadd.f32 %v3013_v44, %v2989_v7  ;;  %v3056_v26 = vmul.f32 %v3043_v34, %v8689_v21  ;;  %v3084_v60 = vmul.f32 %v3071_v30, %v11389_v31  ;;  %v3112_v32 = vmul.f32 %v3099_v46, %v11390_v0 }
 0x489   :  { %v3016_v63 = vadd.f32 %v3012_v17, %v2988_v59  ;;  %v3113_v19 = vmul.f32 %v3103_v6, %v11390_v0  ;;  %v2901_v10 = vsel %vm11391_vm10, %v2895_v39, %v2899_v33  ;;  %v2903_v2 = vsel %vm11392_vm7, %v2899_v33, %v2895_v39 }
 0x48a   :  { %v3061_v8 = vadd.f32 %v3057_v24, %v3017_v25  ;;  %v3263_v35 = vpop.permute.xlu0 %3262  ;;  %v3127_v41 = vrot.slane %v3032_v54, %v6894_v43  ;;  %v3131_v28 = vrot.slane %v3033_v22, %v6894_v43  ;;  %v2906_v17 = vsel %vm7096_vm11, %v2903_v2, 0.0 }
 0x48b   :  { %v3060_v58 = vadd.f32 %v3056_v26, %v3016_v63  ;;  %v2907_v44 = vsel %vm7103_vm12, %v2901_v10, 0.0  ;;  %v11393_v34 = vmov 28   ;;  %v2923_v7 = vrot.slane %v2906_v17, %v6862_v56 }
 0x48c   :  { %6352 = vset.pattern.permute.xlu1 %v11393_v34  ;;  %v3089_v59 = vadd.f32 %v3085_v52, %v3061_v8  ;;  %v2927_v30 = vrot.slane %v2907_v44, %v6862_v56  ;;  %v2890_v39 = vadd.f32 %v2886_v16, %v2862_v42  ;;  %v2891_v33 = vadd.f32 %v2887_v14, %v2863_v15  ;;  %v11395_v16 = vld [vmem:[#allocation35_spill] sm:$0xff]  ;;  %v11398_v52 = vld [vmem:[#allocation34_spill] sm:$0xff] }
 0x48d   :  { %v3088_v47 = vadd.f32 %v3084_v60, %v3060_v58  ;;  %4676 = vperm.xlu1 %6352, %v8674_v29   ;;  %v2951_v54 = vrot.slane %v2906_v17, %v6871_v62  ;;  %v2955_v22 = vrot.slane %v2907_v44, %v6871_v62  ;;  %v2930_v63 = vmul.f32 %v2923_v7, %v8685_v36 }
 0x48e   :  { %v9095_v40 = vpop.permute.xlu1 %3852  ;;  %v3117_v6 = vadd.f32 %v3113_v19, %v3089_v59  ;;  %v2931_v25 = vmul.f32 %v2927_v30, %v8685_v36  ;;  %v3267_v26 = vpop.permute.xlu0 %3266  ;;  %v11394_v24 = vrot.slane %v8724_v9, %v6862_v56  ;;  %v11396_v14 = vrot.slane %v8721_v5, %v6885_v50 }
 0x48f   :  { %v3116_v46 = vadd.f32 %v3112_v32, %v3088_v47  ;;  %v11397_v15 = vrot.slane %v8724_v9, %v6885_v50  ;;  %v3239_v36 = vrot.slane %v8711_v51, %v6894_v43  ;;  %v3140_v32 = vmul.f32 %v3127_v41, %v11398_v52 }
 0x490   :  { %v9103_v29 = vmul.f32 %v11394_v24, %v8695_v27  ;;  %v9109_v42 = vmul.f32 %v11396_v14, %v11395_v16  ;;  %v3141_v27 = vmul.f32 %v3131_v28, %v11398_v52  ;;  %v2934_v19 = vadd.f32 %v2930_v63, %v2890_v39 }
 0x491   :  { %v9115_v60 = vmul.f32 %v11397_v15, %v11395_v16  ;;  %v2935_v58 = vadd.f32 %v2931_v25, %v2891_v33  ;;  %v11399_v8 = vmov 31   ;;  %v2958_v10 = vmul.f32 %v2951_v54, %v8697_v49 }
 0x492   :  { %6355 = vset.pattern.permute.xlu1 %v11399_v8  ;;  %v2959_v2 = vmul.f32 %v2955_v22, %v8697_v49  ;;  %v2979_v47 = vrot.slane %v2906_v17, %v6885_v50  ;;  %v2983_v59 = vrot.slane %v2907_v44, %v6885_v50  ;;  %v3144_v7 = vadd.f32 %v3140_v32, %v3116_v46  ;;  %v3389_v28 = vpop.permute.xlu0 %3388  ;;  %v11403_v22 = vld [vmem:[#allocation36_spill] sm:$0xff] }
 0x493   :  { %v3145_v30 = vadd.f32 %v3141_v27, %v3117_v6  ;;  %vm11400_vm10 = vcmp.lt.s32.totalorder %v6868_v61, 127  ;;  %v9130_v39 = vpop.permute.xlu1 %3880  ;;  %v2962_v33 = vadd.f32 %v2958_v10, %v2934_v19  ;;  %v3007_v54 = vrot.slane %v2906_v17, %v6894_v43 }
 0x494   :  { %v3269_v24 = vsel %vm11400_vm10, %v3263_v35, %v3267_v26  ;;  %vm11401_vm7 = vmmov %vm11400_vm10  ;;  %11402 = vst [vmem:[#allocation33_spill] sm:$0xff] %v9130_v39  ;;  %v2963_v63 = vadd.f32 %v2959_v2, %v2935_v58  ;;  %v3011_v49 = vrot.slane %v2907_v44, %v6894_v43  ;;  %v11404_v46 = vrot.slane %v8721_v5, %v6894_v43 }
 0x495   :  { %v3271_v41 = vsel %vm11401_vm7, %v3267_v26, %v3263_v35  ;;  %v11405_v25 = vrot.slane %v8724_v9, %v6894_v43  ;;  %v11406_v26 = vrot.slane %v8711_v51, %v6885_v50  ;;  %v11407_v17 = vrot.slane %v8731_v53, %v6885_v50 }
 0x496   :  { %v9138_v6 = vmul.f32 %v11404_v46, %v11403_v22  ;;  %v2986_v15 = vmul.f32 %v2979_v47, %v8687_v38  ;;  %v2987_v32 = vmul.f32 %v2983_v59, %v8687_v38  ;;  %v3274_v19 = vsel %vm7398_vm2, %v3269_v24, 0.0  ;;  %v11410_v46 = vld [vmem:[#allocation61_spill] sm:$0xff] }
 0x497   :  { %v9144_v35 = vmul.f32 %v11405_v25, %v11403_v22  ;;  %v9150_v14 = vmul.f32 %v11406_v26, %v11395_v16  ;;  %v9156_v44 = vmul.f32 %v11407_v17, %v11395_v16  ;;  %v9164_v10 = vsel %vm7410_vm4, %v3271_v41, 0.0  ;;  %v3393_v26 = vpop.permute.xlu0 %3392  ;;  %v3027_v8 = vpop.permute.xlu1 %3026 }
 0x498   :  { %v3172_v2 = vadd.f32 %v8885_v18, %v3144_v7  ;;  %v3173_v25 = vadd.f32 %v11410_v46, %v3145_v30  ;;  %v3243_v16 = vrot.slane %v8731_v53, %v6894_v43  ;;  %v9171_v47 = vmul.f32 %v3239_v36, %v11403_v22 }
 0x499   :  { %v2990_v38 = vadd.f32 %v2986_v15, %v2962_v33  ;;  %v2991_v59 = vadd.f32 %v2987_v32, %v2963_v63  ;;  %v3014_v24 = vmul.f32 %v3007_v54, %v8701_v13  ;;  %v3015_v17 = vmul.f32 %v3011_v49, %v8701_v13  ;;  %v11413_v63 = vld [vmem:[#allocation59_spill] sm:$0xff]  ;;  %v11414_v49 = vld [vmem:[#allocation60_spill] sm:$0xff] }
 0x49a   :  { %v3291_v41 = vrot.slane %v3274_v19, %v6862_v56  ;;  %v3295_v18 = vrot.slane %v9164_v10, %v6862_v56  ;;  %v3319_v7 = vrot.slane %v3274_v19, %v6871_v62  ;;  %v3323_v30 = vrot.slane %v9164_v10, %v6871_v62 }
 0x49b   :  { %v3347_v46 = vrot.slane %v3274_v19, %v6885_v50  ;;  %v3351_v36 = vrot.slane %v9164_v10, %v6885_v50  ;;  %vm11411_vm10 = vcmp.lt.s32.totalorder %v6868_v61, 113  ;;  %v3200_v54 = vadd.f32 %v11413_v63, %v3172_v2  ;;  %v3261_v34 = vpop.permute.xlu1 %3260 }
 0x49c   :  { %v3396_v33 = vsel %vm11411_vm10, %v3389_v28, %v3393_v26  ;;  %vm11412_vm7 = vmmov %vm11411_vm10  ;;  %v3201_v15 = vadd.f32 %v11414_v49, %v3173_v25  ;;  %v3375_v32 = vrot.slane %v3274_v19, %v6894_v43  ;;  %v3253_v9 = vmul.f32 %v3243_v16, %v11403_v22  ;;  %v11420_v25 = vld [vmem:[#allocation38_spill] sm:$0xff] }
 0x49d   :  { %v3398_v13 = vsel %vm11412_vm7, %v3393_v26, %v3389_v28  ;;  %v3018_v5 = vadd.f32 %v3014_v24, %v2990_v38  ;;  %v3019_v53 = vadd.f32 %v3015_v17, %v2991_v59  ;;  %v9194_v3 = vsel %vm7506_vm1, %v3396_v33, 0.0  ;;  %v11417_v28 = vld [vmem:[#allocation44_spill] sm:$0xff]  ;;  %v11421_v59 = vld [vmem:[#allocation43_spill] sm:$0xff] }
 0x49e   :  { %v9198_v23 = vsel %vm7510_vm13, %v3398_v13, 0.0  ;;  %v9201_v26 = vmul.f32 %v3291_v41, %v11417_v28  ;;  %v9204_v2 = vmul.f32 %v3295_v18, %v11417_v28  ;;  %vm11418_vm10 = vcmp.lt.s32.totalorder %v6868_v61, 1  ;;  %v11422_v18 = vld [vmem:[#allocation46_spill] sm:$0xff] }
 0x49f   :  { %v3029_v22 = vsel %vm11418_vm10, %v9077_v55, %v3027_v8  ;;  %vm11419_vm7 = vmmov %vm11418_vm10  ;;  %v9213_v16 = vmul.f32 %v3319_v7, %v11420_v25  ;;  %v9216_v38 = vmul.f32 %v3323_v30, %v11420_v25  ;;  %v9219_v24 = vmul.f32 %v3347_v46, %v11421_v59  ;;  %v3265_v7 = vpop.permute.xlu1 %3264 }
 0x4a0   :  { %v3031_v19 = vsel %vm11419_vm7, %v3027_v8, %v9077_v55  ;;  %v9222_v17 = vmul.f32 %v3351_v36, %v11421_v59  ;;  %v9227_v33 = vmul.f32 %v3375_v32, %v11422_v18  ;;  %v3035_v13 = vsel %vm7222_vm15, %v3029_v22, 0.0 }
 0x4a1   :  { %v3034_v36 = vsel %vm7215_vm14, %v3031_v19, 0.0  ;;  %v3055_v49 = vrot.slane %v3035_v13, %v6862_v56  ;;  %v3083_v41 = vrot.slane %v3035_v13, %v6871_v62  ;;  %v3111_v30 = vrot.slane %v3035_v13, %v6885_v50 }
 0x4a2   :  { %v3051_v63 = vrot.slane %v3034_v36, %v6862_v56  ;;  %v3079_v32 = vrot.slane %v3034_v36, %v6871_v62  ;;  %v3107_v8 = vrot.slane %v3034_v36, %v6885_v50  ;;  %v3135_v46 = vrot.slane %v3034_v36, %v6894_v43 }
 0x4a3   :  { %v3139_v55 = vrot.slane %v3035_v13, %v6894_v43  ;;  %v3059_v1 = vmul.f32 %v3055_v49, %v8689_v21  ;;  %v3391_v37 = vpop.permute.xlu1 %3390  ;;  %v3087_v45 = vmul.f32 %v3083_v41, %v11389_v31  ;;  %v3228_v39 = vadd.f32 %v9150_v14, %v3200_v54 }
 0x4a4   :  { %v3058_v20 = vmul.f32 %v3051_v63, %v8689_v21  ;;  %v3086_v48 = vmul.f32 %v3079_v32, %v11389_v31  ;;  %v3229_v36 = vadd.f32 %v9156_v44, %v3201_v15  ;;  %v3114_v19 = vmul.f32 %v3107_v8, %v11390_v0 }
 0x4a5   :  { %v3063_v4 = vadd.f32 %v3059_v1, %v3019_v53  ;;  %v3115_v11 = vmul.f32 %v3111_v30, %v11390_v0  ;;  %v3142_v22 = vmul.f32 %v3135_v46, %v11398_v52  ;;  %v3143_v63 = vmul.f32 %v3139_v55, %v11398_v52 }
 0x4a6   :  { %v3062_v13 = vadd.f32 %v3058_v20, %v3018_v5  ;;  %vm11423_vm10 = vcmp.lt.s32.totalorder %v6868_v61, 127 }
 0x4a7   :  { %v3268_v21 = vsel %vm11423_vm10, %v3261_v34, %v3265_v7  ;;  %vm11424_vm7 = vmmov %vm11423_vm10  ;;  %v3091_v14 = vadd.f32 %v3087_v45, %v3063_v4  ;;  %v9271_v5 = vpop.permute.xlu1 %3952  ;;  %v3256_v45 = vadd.f32 %v9171_v47, %v3228_v39  ;;  %v3495_v47 = vrot.slane %v9194_v3, %v6894_v43 }
 0x4a8   :  { %v3270_v31 = vsel %vm11424_vm7, %v3265_v7, %v3261_v34  ;;  %v3090_v41 = vadd.f32 %v3086_v48, %v3062_v13  ;;  %v3272_v20 = vsel %vm7398_vm2, %v3268_v21, 0.0  ;;  %v3257_v48 = vadd.f32 %v3253_v9, %v3229_v36 }
 0x4a9   :  { %v3273_v1 = vsel %vm7410_vm4, %v3270_v31, 0.0  ;;  %v3283_v53 = vrot.slane %v3272_v20, %v6862_v56  ;;  %v3311_v52 = vrot.slane %v3272_v20, %v6871_v62  ;;  %v3119_v34 = vadd.f32 %v3115_v11, %v3091_v14 }
 0x4aa   :  { %v3287_v0 = vrot.slane %v3273_v1, %v6862_v56  ;;  %v3315_v44 = vrot.slane %v3273_v1, %v6871_v62  ;;  %v3118_v54 = vadd.f32 %v3114_v19, %v3090_v41  ;;  %v3339_v55 = vrot.slane %v3272_v20, %v6885_v50  ;;  %v11426_v41 = vld [vmem:[#allocation45_spill] sm:$0xff] }
 0x4ab   :  { %v3296_v4 = vmul.f32 %v3283_v53, %v11417_v28  ;;  %v3343_v8 = vrot.slane %v3273_v1, %v6885_v50  ;;  %v3147_v30 = vadd.f32 %v3143_v63, %v3119_v34  ;;  %v3324_v46 = vmul.f32 %v3311_v52, %v11420_v25 }
 0x4ac   :  { %v3297_v15 = vmul.f32 %v3287_v0, %v11417_v28  ;;  %v3146_v7 = vadd.f32 %v3142_v22, %v3118_v54  ;;  %v3325_v49 = vmul.f32 %v3315_v44, %v11420_v25  ;;  %v3367_v11 = vrot.slane %v3272_v20, %v6894_v43  ;;  %v9286_v39 = vpop.permute.xlu1 %3980  ;;  %v11425_v22 = vld [vmem:[#allocation64_spill] sm:$0xff]  ;;  %v11429_v0 = vld [vmem:[#allocation62_spill] sm:$0xff]  ;;  %v11430_v44 = vld [vmem:[#allocation63_spill] sm:$0xff] }
 0x4ad   :  { %v3300_v32 = vadd.f32 %v3296_v4, %v3256_v45  ;;  %v3371_v9 = vrot.slane %v3273_v1, %v6894_v43  ;;  %v3499_v28 = vrot.slane %v9198_v23, %v6894_v43  ;;  %v3175_v13 = vadd.f32 %v9103_v29, %v3147_v30 }
 0x4ae   :  { %v3301_v19 = vadd.f32 %v3297_v15, %v3257_v48  ;;  %v3174_v36 = vadd.f32 %v11425_v22, %v3146_v7  ;;  %v3352_v21 = vmul.f32 %v3339_v55, %v11421_v59  ;;  %v3353_v31 = vmul.f32 %v3343_v8, %v11421_v59  ;;  %v9332_v22 = vpop.permute.xlu0 %3924 }
 0x4af   :  { %v3328_v63 = vadd.f32 %v3324_v46, %v3300_v32  ;;  %v11427_v14 = vrot.slane %v9194_v3, %v6862_v56  ;;  %v11428_v1 = vrot.slane %v9198_v23, %v6862_v56  ;;  %v3203_v29 = vadd.f32 %v11430_v44, %v3175_v13  ;;  %v11433_v32 = vld [vmem:[#allocation47_spill] sm:$0xff] }
 0x4b0   :  { %v3329_v25 = vadd.f32 %v3325_v49, %v3301_v19  ;;  %v3202_v52 = vadd.f32 %v11429_v0, %v3174_v36  ;;  %v3380_v45 = vmul.f32 %v3367_v11, %v11422_v18  ;;  %v3381_v59 = vmul.f32 %v3371_v9, %v11422_v18  ;;  %v3395_v48 = vpop.permute.xlu1 %3394 }
 0x4b1   :  { %v3424_v20 = vmul.f32 %v11427_v14, %v11426_v41  ;;  %v3425_v53 = vmul.f32 %v11428_v1, %v11426_v41  ;;  %v3356_v54 = vadd.f32 %v3352_v21, %v3328_v63  ;;  %v3231_v15 = vadd.f32 %v9115_v60, %v3203_v29 }
 0x4b2   :  { %v3357_v34 = vadd.f32 %v3353_v31, %v3329_v25  ;;  %v3230_v4 = vadd.f32 %v9109_v42, %v3202_v52  ;;  %vm11431_vm10 = vcmp.lt.s32.totalorder %v6868_v61, 113  ;;  %v11434_v42 = vrot.slane %v9194_v3, %v6871_v62 }
 0x4b3   :  { %v3397_v55 = vsel %vm11431_vm10, %v3391_v37, %v3395_v48  ;;  %vm11432_vm7 = vmmov %vm11431_vm10  ;;  %v3384_v7 = vadd.f32 %v3380_v45, %v3356_v54  ;;  %v11435_v19 = vrot.slane %v9198_v23, %v6871_v62  ;;  %v3259_v9 = vadd.f32 %v9144_v35, %v3231_v15  ;;  %v11440_v54 = vld [vmem:[#allocation49_spill] sm:$0xff] }
 0x4b4   :  { %v3399_v8 = vsel %vm11432_vm7, %v3395_v48, %v3391_v37  ;;  %v3385_v30 = vadd.f32 %v3381_v59, %v3357_v34  ;;  %v9316_v46 = vsel %vm7506_vm1, %v3397_v55, 0.0  ;;  %v3452_v60 = vmul.f32 %v11434_v42, %v11433_v32  ;;  %v3517_v21 = vpop.permute.xlu1 %3516 }
 0x4b5   :  { %v9320_v49 = vsel %vm7510_vm13, %v3399_v8, 0.0  ;;  %v3453_v37 = vmul.f32 %v11435_v19, %v11433_v32  ;;  %v3258_v11 = vadd.f32 %v9138_v6, %v3230_v4  ;;  %v3428_v36 = vadd.f32 %v3424_v20, %v3384_v7  ;;  %v3521_v8 = vpop.permute.xlu0 %3520 }
 0x4b6   :  { %v3429_v13 = vadd.f32 %v3425_v53, %v3385_v30  ;;  %v3419_v63 = vrot.slane %v9316_v46, %v6862_v56  ;;  %v3423_v25 = vrot.slane %v9320_v49, %v6862_v56  ;;  %v3303_v14 = vadd.f32 %v9204_v2, %v3259_v9  ;;  %v11437_v53 = vld [vmem:[#allocation48_spill] sm:$0xff] }
 0x4b7   :  { %v3302_v31 = vadd.f32 %v9201_v26, %v3258_v11  ;;  %v3447_v6 = vrot.slane %v9316_v46, %v6871_v62  ;;  %v3451_v35 = vrot.slane %v9320_v49, %v6871_v62  ;;  %v11436_v20 = vrot.slane %v9164_v10, %v6894_v43 }
 0x4b8   :  { %v11438_v0 = vrot.slane %v9194_v3, %v6885_v50  ;;  %v3456_v44 = vadd.f32 %v3452_v60, %v3428_v36  ;;  %v3457_v26 = vadd.f32 %v3453_v37, %v3429_v13  ;;  %v11439_v2 = vrot.slane %v9198_v23, %v6885_v50  ;;  %v3519_v4 = vpop.permute.xlu1 %3518  ;;  %v11443_v60 = vld [vmem:[#allocation29_spill] sm:$0xff]  ;;  %v11445_v37 = vld [vmem:[#allocation30_spill] sm:$0xff] }
 0x4b9   :  { %v3383_v1 = vmul.f32 %v11436_v20, %v11422_v18  ;;  %v3508_v34 = vmul.f32 %v3495_v47, %v11440_v54  ;;  %v3330_v45 = vadd.f32 %v9213_v16, %v3302_v31  ;;  %v3331_v59 = vadd.f32 %v9216_v38, %v3303_v14 }
 0x4ba   :  { %v3480_v52 = vmul.f32 %v11438_v0, %v11437_v53  ;;  %v3481_v29 = vmul.f32 %v11439_v2, %v11437_v53  ;;  %v3509_v10 = vmul.f32 %v3499_v28, %v11440_v54  ;;  %v3426_v18 = vmul.f32 %v3419_v63, %v11426_v41 }
 0x4bb   :  { %v3427_v3 = vmul.f32 %v3423_v25, %v11426_v41  ;;  %v3358_v15 = vadd.f32 %v9219_v24, %v3330_v45  ;;  %v3359_v55 = vadd.f32 %v9222_v17, %v3331_v59  ;;  %v3454_v23 = vmul.f32 %v3447_v6, %v11433_v32  ;;  %v11447_v6 = vld [vmem:[#allocation51_spill] sm:$0xff]  ;;  %v11448_v45 = vld [vmem:[#allocation50_spill] sm:$0xff] }
 0x4bc   :  { %v3484_v48 = vadd.f32 %v3480_v52, %v3456_v44  ;;  %v3455_v47 = vmul.f32 %v3451_v35, %v11433_v32  ;;  %v3475_v16 = vrot.slane %v9316_v46, %v6885_v50  ;;  %v3479_v38 = vrot.slane %v9320_v49, %v6885_v50  ;;  %v3523_v11 = vpop.permute.xlu1 %3522 }
 0x4bd   :  { %v3503_v28 = vrot.slane %v9316_v46, %v6894_v43  ;;  %v3485_v41 = vadd.f32 %v3481_v29, %v3457_v26  ;;  %v3386_v7 = vadd.f32 %v9227_v33, %v3358_v15  ;;  %v3387_v24 = vadd.f32 %v3383_v1, %v3359_v55  ;;  %v11450_v15 = vld [vmem:[#allocation52_spill] sm:$0xff] }
 0x4be   :  { %vm11441_vm10 = vcmp.lt.s32.totalorder %v6868_v61, 112  ;;  %v3507_v32 = vrot.slane %v9320_v49, %v6894_v43  ;;  %v3512_v42 = vadd.f32 %v3508_v34, %v3484_v48  ;;  %vm11444_vm13 = vnez %v11443_v60 }
 0x4bf   :  { %v3524_v17 = vsel %vm11441_vm10, %v3517_v21, %v3521_v8  ;;  %vm11442_vm7 = vmmov %vm11441_vm10  ;;  %vm11446_vm1 = vnez %v11445_v37  ;;  %v3430_v9 = vadd.f32 %v3426_v18, %v3386_v7  ;;  %v3431_v33 = vadd.f32 %v3427_v3, %v3387_v24 }
 0x4c0   :  { %v3526_v30 = vsel %vm11442_vm7, %v3521_v8, %v3517_v21  ;;  %v3528_v19 = vsel %vm11444_vm13, %v3524_v17, 0.0  ;;  %v3513_v63 = vadd.f32 %v3509_v10, %v3485_v41  ;;  %v3482_v1 = vmul.f32 %v3475_v16, %v11437_v53  ;;  %v3645_v52 = vpop.permute.xlu1 %3644  ;;  %vm11449_vm10 = vmmov %vm11442_vm7 }
 0x4c1   :  { %v3529_v46 = vsel %vm11446_vm1, %v3526_v30, 0.0  ;;  %v3539_v36 = vrot.slane %v3528_v19, %v6862_v56  ;;  %v3567_v25 = vrot.slane %v3528_v19, %v6871_v62  ;;  %v3595_v49 = vrot.slane %v3528_v19, %v6885_v50 }
 0x4c2   :  { %v3543_v13 = vrot.slane %v3529_v46, %v6862_v56  ;;  %v3571_v21 = vrot.slane %v3529_v46, %v6871_v62  ;;  %v3458_v31 = vadd.f32 %v3454_v23, %v3430_v9  ;;  %v3459_v14 = vadd.f32 %v3455_v47, %v3431_v33  ;;  %v11451_v33 = vld [vmem:[#allocation53_spill] sm:$0xff] }
 0x4c3   :  { %v3552_v35 = vmul.f32 %v3539_v36, %v11447_v6  ;;  %v3483_v0 = vmul.f32 %v3479_v38, %v11437_v53  ;;  %v3510_v44 = vmul.f32 %v3503_v28, %v11440_v54  ;;  %v3599_v29 = vrot.slane %v3529_v46, %v6885_v50 }
 0x4c4   :  { %v3553_v20 = vmul.f32 %v3543_v13, %v11447_v6  ;;  %v3486_v34 = vadd.f32 %v3482_v1, %v3458_v31  ;;  %v3580_v59 = vmul.f32 %v3567_v25, %v11448_v45  ;;  %v3525_v10 = vsel %vm11449_vm10, %v3519_v4, %v3523_v11  ;;  %v3647_v38 = vpop.permute.xlu1 %3646  ;;  %v3649_v13 = vpop.permute.xlu0 %3648 }
 0x4c5   :  { %v3556_v26 = vadd.f32 %v3552_v35, %v3512_v42  ;;  %v3527_v18 = vsel %vm11442_vm7, %v3523_v11, %v3519_v4  ;;  %v3487_v3 = vadd.f32 %v3483_v0, %v3459_v14  ;;  %v3511_v48 = vmul.f32 %v3507_v32, %v11440_v54 }
 0x4c6   :  { %v3557_v2 = vadd.f32 %v3553_v20, %v3513_v63  ;;  %v3581_v53 = vmul.f32 %v3571_v21, %v11448_v45  ;;  %v3608_v55 = vmul.f32 %v3595_v49, %v11450_v15  ;;  %v3623_v47 = vrot.slane %v3528_v19, %v6894_v43 }
 0x4c7   :  { %v3584_v23 = vadd.f32 %v3580_v59, %v3556_v26  ;;  %v3530_v8 = vsel %vm11444_vm13, %v3525_v10, 0.0  ;;  %v3531_v16 = vsel %vm11446_vm1, %v3527_v18, 0.0  ;;  %v3609_v4 = vmul.f32 %v3599_v29, %v11450_v15 }
 0x4c8   :  { %v3585_v28 = vadd.f32 %v3581_v53, %v3557_v2  ;;  %v3547_v41 = vrot.slane %v3530_v8, %v6862_v56  ;;  %v3551_v54 = vrot.slane %v3531_v16, %v6862_v56  ;;  %v3514_v7 = vadd.f32 %v3510_v44, %v3486_v34  ;;  %v9418_v49 = vpop.permute.xlu1 %4052 }
 0x4c9   :  { %v3627_v24 = vrot.slane %v3529_v46, %v6894_v43  ;;  %v3575_v17 = vrot.slane %v3530_v8, %v6871_v62  ;;  %v3579_v30 = vrot.slane %v3531_v16, %v6871_v62  ;;  %v3515_v32 = vadd.f32 %v3511_v48, %v3487_v3 }
 0x4ca   :  { %v3554_v42 = vmul.f32 %v3547_v41, %v11447_v6  ;;  %v3555_v19 = vmul.f32 %v3551_v54, %v11447_v6  ;;  %v3603_v11 = vrot.slane %v3530_v8, %v6885_v50  ;;  %v3612_v9 = vadd.f32 %v3608_v55, %v3584_v23 }
 0x4cb   :  { %v3636_v36 = vmul.f32 %v3623_v47, %v11451_v33  ;;  %v3613_v63 = vadd.f32 %v3609_v4, %v3585_v28  ;;  %v3582_v46 = vmul.f32 %v3575_v17, %v11448_v45  ;;  %v3583_v31 = vmul.f32 %v3579_v30, %v11448_v45  ;;  %v11456_v47 = vld [vmem:[#allocation55_spill] sm:$0xff] }
 0x4cc   :  { %v3558_v25 = vadd.f32 %v3554_v42, %v3514_v7  ;;  %v3559_v21 = vadd.f32 %v3555_v19, %v3515_v32  ;;  %v3607_v14 = vrot.slane %v3531_v16, %v6885_v50  ;;  %vm11452_vm10 = vcmp.lt.s32.totalorder %v6868_v61, 111  ;;  %v3651_v41 = vpop.permute.xlu1 %3650 }
 0x4cd   :  { %v3652_v6 = vsel %vm11452_vm10, %v3645_v52, %v3649_v13  ;;  %vm11453_vm7 = vmmov %vm11452_vm10  ;;  %v3637_v20 = vmul.f32 %v3627_v24, %v11451_v33  ;;  %v3610_v0 = vmul.f32 %v3603_v11, %v11450_v15  ;;  %v3631_v44 = vrot.slane %v3530_v8, %v6894_v43 }
 0x4ce   :  { %v3654_v35 = vsel %vm11453_vm7, %v3649_v13, %v3645_v52  ;;  %v3586_v1 = vadd.f32 %v3582_v46, %v3558_v25  ;;  %v3587_v26 = vadd.f32 %v3583_v31, %v3559_v21  ;;  %v3635_v2 = vrot.slane %v3531_v16, %v6894_v43  ;;  %vm11458_vm10 = vmmov %vm11453_vm7 }
 0x4cf   :  { %v3656_v34 = vsel %vm11298_vm0, %v3652_v6, 0.0  ;;  %v3657_v59 = vsel %vm11300_vm3, %v3654_v35, 0.0  ;;  %v3640_v10 = vadd.f32 %v3636_v36, %v3612_v9  ;;  %v3641_v18 = vadd.f32 %v3637_v20, %v3613_v63 }
 0x4d0   :  { %v3667_v52 = vrot.slane %v3656_v34, %v6862_v56  ;;  %v3671_v3 = vrot.slane %v3657_v59, %v6862_v56  ;;  %v3611_v48 = vmul.f32 %v3607_v14, %v11450_v15  ;;  %v3614_v53 = vadd.f32 %v3610_v0, %v3586_v1  ;;  %v11457_v15 = vld [vmem:[#allocation54_spill] sm:$0xff]  ;;  %v11460_v14 = vld [vmem:[#allocation57_spill] sm:$0xff] }
 0x4d1   :  { %v3695_v55 = vrot.slane %v3656_v34, %v6871_v62  ;;  %v3699_v23 = vrot.slane %v3657_v59, %v6871_v62  ;;  %v3723_v28 = vrot.slane %v3656_v34, %v6885_v50  ;;  %v3727_v4 = vrot.slane %v3657_v59, %v6885_v50 }
 0x4d2   :  { %v3680_v8 = vmul.f32 %v3667_v52, %v11456_v47  ;;  %v3681_v16 = vmul.f32 %v3671_v3, %v11456_v47  ;;  %v3615_v54 = vadd.f32 %v3611_v48, %v3587_v26  ;;  %v3638_v7 = vmul.f32 %v3631_v44, %v11451_v33 }
 0x4d3   :  { %v3639_v24 = vmul.f32 %v3635_v2, %v11451_v33  ;;  %v3708_v17 = vmul.f32 %v3695_v55, %v11457_v15  ;;  %v3709_v42 = vmul.f32 %v3699_v23, %v11457_v15  ;;  %v3751_v19 = vrot.slane %v3656_v34, %v6894_v43  ;;  %v11459_v33 = vld [vmem:[#allocation56_spill] sm:$0xff] }
 0x4d4   :  { %v3684_v30 = vadd.f32 %v3680_v8, %v3640_v10  ;;  %v3685_v32 = vadd.f32 %v3681_v16, %v3641_v18  ;;  %v3642_v11 = vadd.f32 %v3638_v7, %v3614_v53  ;;  %v3755_v9 = vrot.slane %v3657_v59, %v6894_v43 }
 0x4d5   :  { %v3653_v36 = vsel %vm11458_vm10, %v3647_v38, %v3651_v41  ;;  %v3655_v13 = vsel %vm11453_vm7, %v3651_v41, %v3647_v38  ;;  %v3736_v21 = vmul.f32 %v3723_v28, %v11459_v33  ;;  %v3737_v46 = vmul.f32 %v3727_v4, %v11459_v33 }
 0x4d6   :  { %v3712_v63 = vadd.f32 %v3708_v17, %v3684_v30  ;;  %v3713_v25 = vadd.f32 %v3709_v42, %v3685_v32  ;;  %v3643_v31 = vadd.f32 %v3639_v24, %v3615_v54  ;;  %v3764_v6 = vmul.f32 %v3751_v19, %v11460_v14 }
 0x4d7   :  { %v3658_v35 = vsel %vm11298_vm0, %v3653_v36, 0.0  ;;  %v3659_v20 = vsel %vm11300_vm3, %v3655_v13, 0.0  ;;  %v3765_v26 = vmul.f32 %v3755_v9, %v11460_v14  ;;  %v6420_v36 = vld [vmem:[#allocation5 + $0xc] sm:$0xf]  ;;  %v11461_v13 = vmov 32  }
 0x4d8   :  { %v3740_v1 = vadd.f32 %v3736_v21, %v3712_v63  ;;  %v3741_v0 = vadd.f32 %v3737_v46, %v3713_v25  ;;  %v3675_v44 = vrot.slane %v3658_v35, %v6862_v56  ;;  %v3679_v38 = vrot.slane %v3659_v20, %v6862_v56  ;;  %v9517_v25 = vpop.permute.xlu1 %4080 }
 0x4d9   :  { %v3703_v2 = vrot.slane %v3658_v35, %v6871_v62  ;;  %v3707_v34 = vrot.slane %v3659_v20, %v6871_v62  ;;  %v3731_v59 = vrot.slane %v3658_v35, %v6885_v50  ;;  %v3735_v3 = vrot.slane %v3659_v20, %v6885_v50 }
 0x4da   :  { %v3768_v10 = vadd.f32 %v3764_v6, %v3740_v1  ;;  %v3682_v18 = vmul.f32 %v3675_v44, %v11456_v47  ;;  %v3683_v52 = vmul.f32 %v3679_v38, %v11456_v47  ;;  %v3769_v48 = vadd.f32 %v3765_v26, %v3741_v0  ;;  %v9564_v0 = vpop.permute.xlu0 %4008 }
 0x4db   :  { %v3710_v53 = vmul.f32 %v3703_v2, %v11457_v15  ;;  %v3711_v16 = vmul.f32 %v3707_v34, %v11457_v15  ;;  %v3738_v28 = vmul.f32 %v3731_v59, %v11459_v33  ;;  %v3759_v4 = vrot.slane %v3658_v35, %v6894_v43 }
 0x4dc   :  { %v9470_v55 = vmax.f32 %v3768_v10, 0.0  ;;  %v3686_v23 = vadd.f32 %v3682_v18, %v3642_v11  ;;  %v3687_v8 = vadd.f32 %v3683_v52, %v3643_v31  ;;  %v3739_v7 = vmul.f32 %v3735_v3, %v11459_v33  ;;  %v9522_v21 = vpop.permute.xlu1 %4136 }
 0x4dd   :  { %v3763_v47 = vrot.slane %v3659_v20, %v6894_v43  ;;  %v9479_v24 = vmax.f32 %v3769_v48, 0.0  ;;  %v3766_v32 = vmul.f32 %v3759_v4, %v11460_v14  ;;  %v11462_v63 = vmov 30  }
 0x4de   :  { %v3714_v41 = vadd.f32 %v3710_v53, %v3686_v23  ;;  %v3715_v54 = vadd.f32 %v3711_v16, %v3687_v8  ;;  %3778 = vrot.lane.b32.xlu1 %v9470_v55, %s6553_s20  ;;  %v11463_v33 = vmov 35   ;;  %v11464_v46 = vmov 33   ;;  %v9573_v26 = vpop.permute.xlu0 %4108 }
 0x4df   :  { %v3767_v15 = vmul.f32 %v3763_v47, %v11460_v14  ;;  %v11465_v20 = vmov 34   ;;  %v11466_v44 = vmov 1   ;;  %v11469_v59 = vmov 0  }
 0x4e0   :  { %v3742_v17 = vadd.f32 %v3738_v28, %v3714_v41  ;;  %v3743_v30 = vadd.f32 %v3739_v7, %v3715_v54  ;;  %v9533_v31 = vpop.permute.xlu1 %4180  ;;  %v4326_v16 = vrot.slane %v9470_v55, %v6871_v62  ;;  %v4330_v28 = vrot.slane %v9479_v24, %v6871_v62 }
 0x4e1   :  { %v4298_v47 = vrot.slane %v9470_v55, %v6862_v56  ;;  %vm11477_vm10 = vcmp.lt.s32.totalorder %v6868_v61, 17 }
 0x4e2   :  { %v3770_v42 = vadd.f32 %v3766_v32, %v3742_v17  ;;  %3782 = vrot.lane.b32.xlu1 %v9479_v24, %s6553_s20  ;;  %v3771_v19 = vadd.f32 %v3767_v15, %v3743_v30  ;;  %v9577_v34 = vpop.permute.xlu0 %4208  ;;  %v4302_v17 = vrot.slane %v9479_v24, %v6862_v56  ;;  %vm11478_vm7 = vmmov %vm11477_vm10 }
 0x4e4   :  { %v9485_v11 = vmax.f32 %v3770_v42, 0.0  ;;  %v9491_v9 = vmax.f32 %v3771_v19, 0.0  ;;  %v9539_v14 = vpop.permute.xlu1 %4264 }
 0x4e6   :  { %3907 = vrot.lane.b32.xlu1 %v9470_v55, %s6557_s4  ;;  %3780 = vrot.lane.b32.xlu0 %v9485_v11, %s6553_s20  ;;  %v9582_v18 = vpop.permute.xlu0 %4236  ;;  %v4306_v37 = vrot.slane %v9485_v11, %v6862_v56  ;;  %v4310_v60 = vrot.slane %v9491_v9, %v6862_v56 }
 0x4e8   :  { %v9549_v6 = vpop.permute.xlu1 %4292 }
 0x4ea   :  { %3911 = vrot.lane.b32.xlu1 %v9479_v24, %s6557_s4  ;;  %3784 = vrot.lane.b32.xlu0 %v9491_v9, %s6553_s20  ;;  %v4321_v3 = vpop.permute.xlu0 %4320 }
 0x4eb   :  { %v9600_v54 = vmul.f32 %v4326_v16, %v4321_v3  ;;  %v9602_v7 = vmul.f32 %v4330_v28, %v4321_v3 }
 0x4ec   :  { %v9553_v35 = vpop.permute.xlu1 %4348 }
 0x4ee   :  { %4037 = vrot.lane.b32.xlu1 %v9485_v11, %s6562_s21  ;;  %3909 = vrot.lane.b32.xlu0 %v9485_v11, %s6557_s4  ;;  %v9588_v53 = vpop.permute.xlu0 %4420 }
 0x4ef   :  { %11473 = vst [vmem:[#allocation59_spill] sm:$0xff] %v9588_v53 }
 0x4f0   :  { %v9562_v1 = vpop.permute.xlu1 %4376 }
 0x4f2   :  { %4041 = vrot.lane.b32.xlu1 %v9491_v9, %s6562_s21  ;;  %3913 = vrot.lane.b32.xlu0 %v9491_v9, %s6557_s4  ;;  %v9592_v8 = vpop.permute.xlu0 %4504 }
 0x4f3   :  { %11475 = vst [vmem:[#allocation44_spill] sm:$0xff] %v9592_v8 }
 0x4f4   :  { %v9569_v38 = vpop.permute.xlu1 %4448 }
 0x4f5   :  { %11467 = vst [vmem:[#allocation37_spill] sm:$0xff] %v9569_v38 }
 0x4f6   :  { %4163 = vrot.lane.b32.xlu1 %v9470_v55, %s6567_s22  ;;  %4035 = vrot.lane.b32.xlu0 %v9470_v55, %s6562_s21  ;;  %v9598_v41 = vpop.permute.xlu0 %4604 }
 0x4f7   :  { %11476 = vst [vmem:[#allocation38_spill] sm:$0xff] %v9598_v41 }
 0x4f8   :  { %v9575_v2 = vpop.permute.xlu1 %4476 }
 0x4f9   :  { %11468 = vst [vmem:[#allocation35_spill] sm:$0xff] %v9575_v2 }
 0x4fa   :  { %4165 = vrot.lane.b32.xlu1 %v9485_v11, %s6567_s22  ;;  %4039 = vrot.lane.b32.xlu0 %v9479_v24, %s6562_s21 }
 0x4fd   :  { %v9580_v10 = vpop.permute.xlu1 %4548 }
 0x4fe   :  { %4760 = vperm.xlu1 %6355, %v6420_v36   ;;  %4704 = vperm.xlu0 %6353, %v6420_v36   ;;  %11470 = vst [vmem:[#allocation34_spill] sm:$0xff] %v9580_v10 }
 0x502   :  { %6356 = vset.pattern.permute.xlu1 %v11461_v13  ;;  %4167 = vrot.lane.b32.xlu0 %v9479_v24, %s6567_s22  ;;  %v9584_v52 = vpop.permute.xlu1 %4576 }
 0x503   :  { %4804 = vperm.xlu1 %6356, %v6420_v36   ;;  %6354 = vset.pattern.permute.xlu0 %v11462_v63  ;;  %11471 = vst [vmem:[#allocation36_spill] sm:$0xff] %v9584_v52 }
 0x506   :  { %4732 = vperm.xlu0 %6354, %v6420_v36  }
 0x507   :  { %4169 = vrot.lane.b32.xlu1 %v9491_v9, %s6567_s22  ;;  %v9586_v48 = vpop.permute.xlu1 %4632 }
 0x508   :  { %6359 = vset.pattern.permute.xlu1 %v11463_v33  ;;  %11472 = vst [vmem:[#allocation61_spill] sm:$0xff] %v9586_v48 }
 0x50a   :  { %4405 = vrot.lane.b32.xlu0 %v9485_v11, %s6573_s23 }
 0x50b   :  { %4403 = vrot.lane.b32.xlu1 %v9470_v55, %s6573_s23  ;;  %6357 = vset.pattern.permute.xlu0 %v11464_v46  ;;  %v11481_v46 = vld [vmem:[#allocation58_spill] sm:$0xff] }
 0x50c   :  { %v9590_v23 = vpop.permute.xlu1 %4676 }
 0x50d   :  { %11474 = vst [vmem:[#allocation60_spill] sm:$0xff] %v9590_v23 }
 0x50e   :  { %4409 = vrot.lane.b32.xlu0 %v9491_v9, %s6573_s23 }
 0x50f   :  { %4407 = vrot.lane.b32.xlu1 %v9479_v24, %s6573_s23 }
 0x512   :  { %4531 = vrot.lane.b32.xlu0 %v9470_v55, %s6575_s24 }
 0x513   :  { %4533 = vrot.lane.b32.xlu1 %v9485_v11, %s6575_s24 }
 0x516   :  { %4535 = vrot.lane.b32.xlu0 %v9479_v24, %s6575_s24 }
 0x517   :  { %4537 = vrot.lane.b32.xlu1 %v9491_v9, %s6575_s24 }
 0x51a   :  { %4663 = vrot.lane.b32.xlu0 %v9479_v24, %s6581_s25 }
 0x51b   :  { %4659 = vrot.lane.b32.xlu1 %v9470_v55, %s6581_s25 }
 0x51e   :  { %4832 = vperm.xlu0 %6357, %v6420_v36  }
 0x51f   :  { %4661 = vrot.lane.b32.xlu1 %v9485_v11, %s6581_s25 }
 0x522   :  { %4791 = vrot.lane.b32.xlu0 %v9479_v24, %s6586_s26 }
 0x523   :  { %4665 = vrot.lane.b32.xlu1 %v9491_v9, %s6581_s25  ;;  %6358 = vset.pattern.permute.xlu0 %v11465_v20 }
 0x526   :  { %4860 = vperm.xlu0 %6358, %v6420_v36  }
 0x527   :  { %4787 = vrot.lane.b32.xlu1 %v9470_v55, %s6586_s26 }
 0x52a   :  { %6361 = vset.pattern.permute.xlu0 %v11466_v44  ;;  %v4338_v44 = vrot.slane %v9491_v9, %v6871_v62 }
 0x52b   :  { %4789 = vrot.lane.b32.xlu1 %v9485_v11, %s6586_s26 }
 0x52f   :  { %4793 = vrot.lane.b32.xlu1 %v9491_v9, %s6586_s26 }
 0x533   :  { %4888 = vperm.xlu1 %6359, %v6420_v36  }
 0x537   :  { %6360 = vset.pattern.permute.xlu1 %v11469_v59 }
 0x550   :  { %v3779_v4 = vpop.permute.xlu1 %3778 }
 0x554   :  { %v3783_v30 = vpop.permute.xlu1 %3782 }
 0x555   :  { %v3786_v42 = vsel %vm11477_vm10, %v3779_v4, %v3783_v30  ;;  %v3788_v19 = vsel %vm11478_vm7, %v3783_v30, %v3779_v4  ;;  %v4334_v30 = vrot.slane %v9485_v11, %v6871_v62  ;;  %vm11483_vm10 = vcmp.lt.s32.totalorder %v6868_v61, 16 }
 0x556   :  { %v3790_v16 = vsel %vm6889_vm5, %v3788_v19, 0.0  ;;  %v3791_v32 = vsel %vm6918_vm6, %v3786_v42, 0.0  ;;  %vm11484_vm7 = vmmov %vm11483_vm10 }
 0x557   :  { %v3802_v15 = vrot.slane %v3790_v16, %v6862_v56  ;;  %v3806_v13 = vrot.slane %v3791_v32, %v6862_v56  ;;  %v3830_v33 = vrot.slane %v3790_v16, %v6871_v62  ;;  %v3834_v4 = vrot.slane %v3791_v32, %v6871_v62 }
 0x558   :  { %v3858_v36 = vrot.slane %v3790_v16, %v6885_v50  ;;  %v3862_v19 = vrot.slane %v3791_v32, %v6885_v50  ;;  %v3908_v20 = vpop.permute.xlu1 %3907  ;;  %v3781_v42 = vpop.permute.xlu0 %3780  ;;  %v3886_v48 = vrot.slane %v3790_v16, %v6894_v43  ;;  %v3890_v41 = vrot.slane %v3791_v32, %v6894_v43 }
 0x559   :  { %v3815_v63 = vmul.f32 %v3802_v15, %v11481_v46  ;;  %v3816_v45 = vmul.f32 %v3806_v13, %v11481_v46  ;;  %v3843_v29 = vmul.f32 %v3830_v33, %v9065_v57  ;;  %v3844_v23 = vmul.f32 %v3834_v4, %v9065_v57  ;;  %v11488_v33 = vld [vmem:[#allocation33_spill] sm:$0xff] }
 0x55a   :  { %v3871_v15 = vmul.f32 %v3858_v36, %v9095_v40  ;;  %v3872_v13 = vmul.f32 %v3862_v19, %v9095_v40  ;;  %v9646_v12 = vmul.f32 %v4334_v30, %v4321_v3  ;;  %v9661_v36 = vmul.f32 %v4298_v47, %v9549_v6 }
 0x55b   :  { %v3847_v52 = vadd.f32 %v3843_v29, %v3815_v63  ;;  %v3848_v10 = vadd.f32 %v3844_v23, %v3816_v45  ;;  %v9658_v23 = vmul.f32 %v4338_v44, %v4321_v3 }
 0x55c   :  { %11482 = vst [vmem:[#allocation43_spill] sm:$0xff] %v9646_v12  ;;  %v3912_v16 = vpop.permute.xlu1 %3911  ;;  %v3785_v8 = vpop.permute.xlu0 %3784  ;;  %v9685_v12 = vmul.f32 %v4306_v37, %v9549_v6 }
 0x55d   :  { %v3875_v32 = vadd.f32 %v3871_v15, %v3847_v52  ;;  %v3876_v29 = vadd.f32 %v3872_v13, %v3848_v10  ;;  %v3915_v45 = vsel %vm11483_vm10, %v3908_v20, %v3912_v16  ;;  %v3917_v63 = vsel %vm11484_vm7, %v3912_v16, %v3908_v20  ;;  %11485 = vst [vmem:[#allocation46_spill] sm:$0xff] %v9658_v23 }
 0x55e   :  { %v3919_v19 = vsel %vm6954_vm8, %v3917_v63, 0.0  ;;  %v3920_v51 = vsel %vm6958_vm9, %v3915_v45, 0.0  ;;  %v3899_v52 = vmul.f32 %v3886_v48, %v11488_v33  ;;  %v3900_v10 = vmul.f32 %v3890_v41, %v11488_v33  ;;  %11491 = vst [vmem:[#allocation64_spill] sm:$0xff] %v9685_v12 }
 0x55f   :  { %v3930_v15 = vrot.slane %v3919_v19, %v6862_v56  ;;  %v3934_v13 = vrot.slane %v3920_v51, %v6862_v56  ;;  %v3958_v20 = vrot.slane %v3919_v19, %v6871_v62  ;;  %v3962_v3 = vrot.slane %v3920_v51, %v6871_v62 }
 0x560   :  { %vm11489_vm10 = vcmp.lt.s32.totalorder %v6868_v61, 17  ;;  %v9677_v16 = vpop.permute.xlu0 %3909  ;;  %v3903_v45 = vadd.f32 %v3899_v52, %v3875_v32  ;;  %v3904_v48 = vadd.f32 %v3900_v10, %v3876_v29  ;;  %v4038_v2 = vpop.permute.xlu1 %4037  ;;  %v9682_v23 = vmul.f32 %v4302_v17, %v9549_v6 }
 0x561   :  { %v3787_v47 = vsel %vm11489_vm10, %v3781_v42, %v3785_v8  ;;  %vm11490_vm7 = vmmov %vm11489_vm10  ;;  %v3943_v41 = vmul.f32 %v3930_v15, %v9332_v22  ;;  %v3944_v63 = vmul.f32 %v3934_v13, %v9332_v22  ;;  %v3986_v38 = vrot.slane %v3919_v19, %v6885_v50 }
 0x562   :  { %v3789_v44 = vsel %vm11490_vm7, %v3785_v8, %v3781_v42  ;;  %v3990_v53 = vrot.slane %v3920_v51, %v6885_v50  ;;  %v3971_v32 = vmul.f32 %v3958_v20, %v9271_v5  ;;  %v3972_v29 = vmul.f32 %v3962_v3, %v9271_v5 }
 0x563   :  { %v3947_v8 = vadd.f32 %v3943_v41, %v3903_v45  ;;  %v3948_v42 = vadd.f32 %v3944_v63, %v3904_v48  ;;  %v9692_v52 = vmul.f32 %v4310_v60, %v9549_v6  ;;  %v3792_v37 = vsel %vm6889_vm5, %v3789_v44, 0.0 }
 0x564   :  { %v3793_v10 = vsel %vm6918_vm6, %v3787_v47, 0.0  ;;  %v3810_v45 = vrot.slane %v3792_v37, %v6862_v56  ;;  %v3914_v48 = vpop.permute.xlu0 %3913  ;;  %v3838_v3 = vrot.slane %v3792_v37, %v6871_v62  ;;  %v3866_v6 = vrot.slane %v3792_v37, %v6885_v50 }
 0x565   :  { %11492 = vst [vmem:[#allocation45_spill] sm:$0xff] %v9692_v52  ;;  %v3975_v15 = vadd.f32 %v3971_v32, %v3947_v8  ;;  %v3976_v13 = vadd.f32 %v3972_v29, %v3948_v42  ;;  %v3814_v20 = vrot.slane %v3793_v10, %v6862_v56  ;;  %v3842_v60 = vrot.slane %v3793_v10, %v6871_v62  ;;  %v4042_v42 = vpop.permute.xlu1 %4041 }
 0x566   :  { %v3870_v41 = vrot.slane %v3793_v10, %v6885_v50  ;;  %v3999_v44 = vmul.f32 %v3986_v38, %v9286_v39  ;;  %v4000_v63 = vmul.f32 %v3990_v53, %v9286_v39  ;;  %v3817_v47 = vmul.f32 %v3810_v45, %v11481_v46 }
 0x567   :  { %v3818_v8 = vmul.f32 %v3814_v20, %v11481_v46  ;;  %v4014_v32 = vrot.slane %v3919_v19, %v6894_v43  ;;  %v4018_v29 = vrot.slane %v3920_v51, %v6894_v43  ;;  %v3845_v17 = vmul.f32 %v3838_v3, %v9065_v57 }
 0x568   :  { %v3846_v28 = vmul.f32 %v3842_v60, %v9065_v57  ;;  %v4003_v59 = vadd.f32 %v3999_v44, %v3975_v15  ;;  %v4004_v52 = vadd.f32 %v4000_v63, %v3976_v13  ;;  %v3873_v12 = vmul.f32 %v3866_v6, %v9095_v40 }
 0x569   :  { %v3874_v38 = vmul.f32 %v3870_v41, %v9095_v40  ;;  %v3849_v53 = vadd.f32 %v3845_v17, %v3817_v47  ;;  %vm11493_vm10 = vcmp.lt.s32.totalorder %v6868_v61, 15  ;;  %v3894_v51 = vrot.slane %v3792_v37, %v6894_v43  ;;  %v4036_v40 = vpop.permute.xlu0 %4035 }
 0x56a   :  { %v3850_v58 = vadd.f32 %v3846_v28, %v3818_v8  ;;  %v4044_v46 = vsel %vm11493_vm10, %v4038_v2, %v4042_v42  ;;  %vm11494_vm7 = vmmov %vm11493_vm10  ;;  %v3898_v45 = vrot.slane %v3793_v10, %v6894_v43  ;;  %v11497_v28 = vrot.slane %v9470_v55, %v6885_v50 }
 0x56b   :  { %v4046_v19 = vsel %vm11494_vm7, %v4042_v42, %v4038_v2  ;;  %v9728_v13 = vsel %vm7103_vm12, %v4044_v46, 0.0  ;;  %v11498_v2 = vrot.slane %v9479_v24, %v6885_v50  ;;  %v4027_v10 = vmul.f32 %v4014_v32, %v9564_v0 }
 0x56c   :  { %v9724_v57 = vsel %vm7096_vm11, %v4046_v19, 0.0  ;;  %v9734_v17 = vmul.f32 %v11497_v28, %v9553_v35  ;;  %v4028_v3 = vmul.f32 %v4018_v29, %v9564_v0  ;;  %v11499_v60 = vrot.slane %v9485_v11, %v6885_v50 }
 0x56d   :  { %v9740_v37 = vmul.f32 %v11498_v2, %v9553_v35  ;;  %v11500_v41 = vrot.slane %v9491_v9, %v6885_v50  ;;  %v3877_v63 = vadd.f32 %v3873_v12, %v3849_v53  ;;  %v3878_v47 = vadd.f32 %v3874_v38, %v3850_v58 }
 0x56e   :  { %v9748_v6 = vmul.f32 %v11499_v60, %v9553_v35  ;;  %v4031_v8 = vadd.f32 %v4027_v10, %v4003_v59  ;;  %v4032_v42 = vadd.f32 %v4028_v3, %v4004_v52  ;;  %v4066_v32 = vrot.slane %v9724_v57, %v6862_v56 }
 0x56f   :  { %v9754_v44 = vmul.f32 %v11500_v41, %v9553_v35  ;;  %v4070_v29 = vrot.slane %v9728_v13, %v6862_v56  ;;  %v3901_v46 = vmul.f32 %v3894_v51, %v11488_v33  ;;  %v3902_v19 = vmul.f32 %v3898_v45, %v11488_v33  ;;  %v4040_v45 = vpop.permute.xlu0 %4039 }
 0x570   :  { %v4094_v28 = vrot.slane %v9724_v57, %v6871_v62  ;;  %v4098_v35 = vrot.slane %v9728_v13, %v6871_v62  ;;  %vm11502_vm10 = vcmp.lt.s32.totalorder %v6868_v61, 16  ;;  %v4073_v2 = vmul.f32 %v4066_v32, %v9418_v49 }
 0x571   :  { %11501 = vst [vmem:[#allocation62_spill] sm:$0xff] %v9754_v44  ;;  %v3916_v59 = vsel %vm11502_vm10, %v9677_v16, %v3914_v48  ;;  %vm11503_vm7 = vmmov %vm11502_vm10  ;;  %v3905_v52 = vadd.f32 %v3901_v46, %v3877_v63  ;;  %v3906_v38 = vadd.f32 %v3902_v19, %v3878_v47  ;;  %v4074_v10 = vmul.f32 %v4070_v29, %v9418_v49  ;;  %v9788_v47 = vpop.permute.xlu1 %4163 }
 0x572   :  { %v3918_v33 = vsel %vm11503_vm7, %v3914_v48, %v9677_v16  ;;  %v3922_v51 = vsel %vm6958_vm9, %v3916_v59, 0.0  ;;  %vm11504_vm10 = vcmp.lt.s32.totalorder %v6868_v61, 15  ;;  %v4101_v59 = vmul.f32 %v4094_v28, %v9517_v25 }
 0x573   :  { %v3921_v53 = vsel %vm6954_vm8, %v3918_v33, 0.0  ;;  %v3942_v60 = vrot.slane %v3922_v51, %v6862_v56  ;;  %v3970_v16 = vrot.slane %v3922_v51, %v6871_v62  ;;  %v3998_v63 = vrot.slane %v3922_v51, %v6885_v50  ;;  %vm11505_vm7 = vmmov %vm11504_vm10 }
 0x574   :  { %v3938_v3 = vrot.slane %v3921_v53, %v6862_v56  ;;  %v3966_v41 = vrot.slane %v3921_v53, %v6871_v62  ;;  %v3994_v48 = vrot.slane %v3921_v53, %v6885_v50  ;;  %v4043_v29 = vsel %vm11504_vm10, %v4036_v40, %v4040_v45 }
 0x575   :  { %v3946_v32 = vmul.f32 %v3942_v60, %v9332_v22  ;;  %v4045_v19 = vsel %vm11505_vm7, %v4040_v45, %v4036_v40  ;;  %v4102_v33 = vmul.f32 %v4098_v35, %v9517_v25  ;;  %v4022_v58 = vrot.slane %v3921_v53, %v6894_v43  ;;  %v9812_v45 = vpop.permute.xlu1 %4165 }
 0x576   :  { %v3945_v46 = vmul.f32 %v3938_v3, %v9332_v22  ;;  %v4026_v12 = vrot.slane %v3922_v51, %v6894_v43  ;;  %v3973_v3 = vmul.f32 %v3966_v41, %v9271_v5  ;;  %v3974_v22 = vmul.f32 %v3970_v16, %v9271_v5 }
 0x577   :  { %v3950_v30 = vadd.f32 %v3946_v32, %v3906_v38  ;;  %v4001_v60 = vmul.f32 %v3994_v48, %v9286_v39  ;;  %v4002_v44 = vmul.f32 %v3998_v63, %v9286_v39  ;;  %v4047_v40 = vsel %vm7096_vm11, %v4045_v19, 0.0 }
 0x578   :  { %v3949_v4 = vadd.f32 %v3945_v46, %v3905_v52  ;;  %v4048_v28 = vsel %vm7103_vm12, %v4043_v29, 0.0  ;;  %v4058_v51 = vrot.slane %v4047_v40, %v6862_v56  ;;  %v4029_v38 = vmul.f32 %v4022_v58, %v9564_v0 }
 0x579   :  { %v3978_v53 = vadd.f32 %v3974_v22, %v3950_v30  ;;  %v4062_v52 = vrot.slane %v4048_v28, %v6862_v56  ;;  %v4030_v5 = vmul.f32 %v4026_v12, %v9564_v0  ;;  %v4086_v39 = vrot.slane %v4047_v40, %v6871_v62 }
 0x57a   :  { %v3977_v35 = vadd.f32 %v3973_v3, %v3949_v4  ;;  %v4090_v41 = vrot.slane %v4048_v28, %v6871_v62  ;;  %v4071_v63 = vmul.f32 %v4058_v51, %v9418_v49  ;;  %v4114_v58 = vrot.slane %v4047_v40, %v6885_v50 }
 0x57b   :  { %v4006_v48 = vadd.f32 %v4002_v44, %v3978_v53  ;;  %v4072_v4 = vmul.f32 %v4062_v52, %v9418_v49  ;;  %v4099_v30 = vmul.f32 %v4086_v39, %v9517_v25  ;;  %v4118_v0 = vrot.slane %v4048_v28, %v6885_v50 }
 0x57c   :  { %v4005_v16 = vadd.f32 %v4001_v60, %v3977_v35  ;;  %v4100_v46 = vmul.f32 %v4090_v41, %v9517_v25  ;;  %v4075_v29 = vadd.f32 %v4071_v63, %v4031_v8  ;;  %v4150_v3 = vrot.slane %v9724_v57, %v6894_v43 }
 0x57d   :  { %v4034_v32 = vadd.f32 %v4030_v5, %v4006_v48  ;;  %v4076_v19 = vadd.f32 %v4072_v4, %v4032_v42  ;;  %v4154_v44 = vrot.slane %v9728_v13, %v6894_v43  ;;  %v4142_v49 = vrot.slane %v4047_v40, %v6894_v43  ;;  %v9828_v60 = vpop.permute.xlu1 %4760  ;;  %v9830_v25 = vpop.permute.xlu0 %4704 }
 0x57e   :  { %v4033_v12 = vadd.f32 %v4029_v38, %v4005_v16  ;;  %v4146_v22 = vrot.slane %v4048_v28, %v6894_v43  ;;  %v4103_v51 = vadd.f32 %v4099_v30, %v4075_v29  ;;  %v11506_v8 = vrot.slane %v9470_v55, %v6894_v43 }
 0x57f   :  { %v4078_v53 = vadd.f32 %v4074_v10, %v4034_v32  ;;  %v4104_v52 = vadd.f32 %v4100_v46, %v4076_v19  ;;  %v11507_v40 = vrot.slane %v9479_v24, %v6894_v43  ;;  %v11508_v28 = vrot.slane %v9724_v57, %v6885_v50 }
 0x580   :  { %v4077_v35 = vadd.f32 %v4073_v2, %v4033_v12  ;;  %v9836_v42 = vmul.f32 %v11506_v8, %v9562_v1  ;;  %v11509_v10 = vrot.slane %v9728_v13, %v6885_v50  ;;  %v4127_v41 = vmul.f32 %v4114_v58, %v9573_v26 }
 0x581   :  { %v9842_v38 = vmul.f32 %v11507_v40, %v9562_v1  ;;  %v4129_v2 = vmul.f32 %v11508_v28, %v9573_v26  ;;  %v4106_v55 = vadd.f32 %v4102_v33, %v4078_v53  ;;  %v4128_v16 = vmul.f32 %v4118_v0, %v9573_v26  ;;  %v4168_v4 = vpop.permute.xlu0 %4167 }
 0x582   :  { %v4130_v5 = vmul.f32 %v11509_v10, %v9573_v26  ;;  %v4105_v39 = vadd.f32 %v4101_v59, %v4077_v35  ;;  %v4157_v24 = vmul.f32 %v4150_v3, %v9522_v21  ;;  %v4158_v48 = vmul.f32 %v4154_v44, %v9522_v21  ;;  %v9858_v12 = vpop.permute.xlu1 %4804 }
 0x583   :  { %v4155_v63 = vmul.f32 %v4142_v49, %v9522_v21  ;;  %v4156_v57 = vmul.f32 %v4146_v22, %v9522_v21  ;;  %v4131_v30 = vadd.f32 %v4127_v41, %v4103_v51  ;;  %v4132_v46 = vadd.f32 %v4128_v16, %v4104_v52 }
 0x584   :  { %vm11510_vm10 = vcmp.lt.s32.totalorder %v6868_v61, 1  ;;  %v4133_v21 = vadd.f32 %v4129_v2, %v4105_v39  ;;  %v4134_v32 = vadd.f32 %v4130_v5, %v4106_v55 }
 0x585   :  { %v4171_v13 = vsel %vm11510_vm10, %v9788_v47, %v4168_v4  ;;  %vm11511_vm7 = vmmov %vm11510_vm10  ;;  %v4159_v53 = vadd.f32 %v4155_v63, %v4131_v30  ;;  %v4160_v51 = vadd.f32 %v4156_v57, %v4132_v46 }
 0x586   :  { %v4173_v26 = vsel %vm11511_vm7, %v4168_v4, %v9788_v47  ;;  %v4176_v0 = vsel %vm7222_vm15, %v4171_v13, 0.0  ;;  %v4170_v40 = vpop.permute.xlu1 %4169  ;;  %v4161_v63 = vadd.f32 %v4157_v24, %v4133_v21  ;;  %v4162_v57 = vadd.f32 %v4158_v48, %v4134_v32  ;;  %vm11514_vm10 = vmmov %vm11511_vm7 }
 0x587   :  { %v4175_v33 = vsel %vm7215_vm14, %v4173_v26, 0.0  ;;  %v4190_v19 = vrot.slane %v4176_v0, %v6862_v56  ;;  %v4218_v44 = vrot.slane %v4176_v0, %v6871_v62  ;;  %v4246_v47 = vrot.slane %v4176_v0, %v6885_v50 }
 0x588   :  { %v4186_v29 = vrot.slane %v4175_v33, %v6862_v56  ;;  %v4214_v3 = vrot.slane %v4175_v33, %v6871_v62  ;;  %v4242_v49 = vrot.slane %v4175_v33, %v6885_v50  ;;  %v4270_v22 = vrot.slane %v4175_v33, %v6894_v43 }
 0x589   :  { %v4274_v35 = vrot.slane %v4176_v0, %v6894_v43  ;;  %v4200_v8 = vmul.f32 %v4190_v19, %v9533_v31  ;;  %v4228_v2 = vmul.f32 %v4218_v44, %v9577_v34  ;;  %v4256_v5 = vmul.f32 %v4246_v47, %v9582_v18  ;;  %v9902_v44 = vpop.permute.xlu0 %4732 }
 0x58a   :  { %v4199_v52 = vmul.f32 %v4186_v29, %v9533_v31  ;;  %v4227_v28 = vmul.f32 %v4214_v3, %v9577_v34  ;;  %v4255_v10 = vmul.f32 %v4242_v49, %v9582_v18  ;;  %v4283_v41 = vmul.f32 %v4270_v22, %v9539_v14  ;;  %v4404_v0 = vpop.permute.xlu1 %4403 }
 0x58b   :  { %v4204_v55 = vadd.f32 %v4200_v8, %v4160_v51  ;;  %v4284_v16 = vmul.f32 %v4274_v35, %v9539_v14  ;;  %v4172_v4 = vsel %vm11514_vm10, %v9812_v45, %v4170_v40  ;;  %v4174_v30 = vsel %vm11511_vm7, %v4170_v40, %v9812_v45 }
 0x58c   :  { %v4203_v39 = vadd.f32 %v4199_v52, %v4159_v53  ;;  %v4177_v26 = vsel %vm7215_vm14, %v4174_v30, 0.0  ;;  %v4178_v33 = vsel %vm7222_vm15, %v4172_v4, 0.0  ;;  %vm11515_vm10 = vcmp.lt.s32.totalorder %v6868_v61, 127 }
 0x58d   :  { %v4232_v13 = vadd.f32 %v4228_v2, %v4204_v55  ;;  %v4194_v24 = vrot.slane %v4177_v26, %v6862_v56  ;;  %v4198_v48 = vrot.slane %v4178_v33, %v6862_v56  ;;  %v4222_v21 = vrot.slane %v4177_v26, %v6871_v62  ;;  %vm11516_vm7 = vmmov %vm11515_vm10  ;;  %v4406_v30 = vpop.permute.xlu0 %4405 }
 0x58e   :  { %v4231_v46 = vadd.f32 %v4227_v28, %v4203_v39  ;;  %v4226_v32 = vrot.slane %v4178_v33, %v6871_v62  ;;  %v4250_v45 = vrot.slane %v4177_v26, %v6885_v50  ;;  %v4254_v3 = vrot.slane %v4178_v33, %v6885_v50  ;;  %v4408_v40 = vpop.permute.xlu1 %4407 }
 0x58f   :  { %v4260_v19 = vadd.f32 %v4256_v5, %v4232_v13  ;;  %v4201_v49 = vmul.f32 %v4194_v24, %v9533_v31  ;;  %v4202_v47 = vmul.f32 %v4198_v48, %v9533_v31  ;;  %v4229_v22 = vmul.f32 %v4222_v21, %v9577_v34 }
 0x590   :  { %v4259_v29 = vadd.f32 %v4255_v10, %v4231_v46  ;;  %v4230_v35 = vmul.f32 %v4226_v32, %v9577_v34  ;;  %v4257_v52 = vmul.f32 %v4250_v45, %v9582_v18  ;;  %v4258_v8 = vmul.f32 %v4254_v3, %v9582_v18  ;;  %v11520_v3 = vld [vmem:[#allocation59_spill] sm:$0xff] }
 0x591   :  { %v4288_v51 = vadd.f32 %v4284_v16, %v4260_v19  ;;  %v4205_v28 = vadd.f32 %v4201_v49, %v4161_v63  ;;  %v4206_v2 = vadd.f32 %v4202_v47, %v4162_v57  ;;  %v4278_v10 = vrot.slane %v4177_v26, %v6894_v43 }
 0x592   :  { %v4287_v53 = vadd.f32 %v4283_v41, %v4259_v29  ;;  %v4282_v5 = vrot.slane %v4178_v33, %v6894_v43  ;;  %v4411_v34 = vsel %vm11515_vm10, %v4404_v0, %v4408_v40  ;;  %v4413_v55 = vsel %vm11516_vm7, %v4408_v40, %v4404_v0  ;;  %v11523_v40 = vld [vmem:[#allocation37_spill] sm:$0xff]  ;;  %vm11528_vm10 = vmmov %vm11516_vm7 }
 0x593   :  { %v4316_v31 = vadd.f32 %v9682_v23, %v4288_v51  ;;  %v4233_v41 = vadd.f32 %v4229_v22, %v4205_v28  ;;  %v4234_v16 = vadd.f32 %v4230_v35, %v4206_v2  ;;  %v4285_v18 = vmul.f32 %v4278_v10, %v9539_v14  ;;  %v11521_v22 = vld [vmem:[#allocation64_spill] sm:$0xff]  ;;  %v11524_v2 = vld [vmem:[#allocation43_spill] sm:$0xff] }
 0x594   :  { %v4315_v39 = vadd.f32 %v9661_v36, %v4287_v53  ;;  %v4286_v63 = vmul.f32 %v4282_v5, %v9539_v14  ;;  %v4415_v23 = vsel %vm7398_vm2, %v4411_v34, 0.0  ;;  %v4416_v46 = vsel %vm7410_vm4, %v4413_v55, 0.0  ;;  %v11522_v53 = vld [vmem:[#allocation45_spill] sm:$0xff]  ;;  %v11525_v5 = vld [vmem:[#allocation46_spill] sm:$0xff] }
 0x595   :  { %v4344_v4 = vadd.f32 %v9602_v7, %v4316_v31  ;;  %v4261_v13 = vadd.f32 %v4257_v52, %v4233_v41  ;;  %v4262_v26 = vadd.f32 %v4258_v8, %v4234_v16  ;;  %v4426_v33 = vrot.slane %v4415_v23, %v6862_v56  ;;  %v11526_v16 = vld [vmem:[#allocation35_spill] sm:$0xff] }
 0x596   :  { %v4343_v57 = vadd.f32 %v9600_v54, %v4315_v39  ;;  %v4430_v0 = vrot.slane %v4416_v46, %v6862_v56  ;;  %v4454_v54 = vrot.slane %v4415_v23, %v6871_v62  ;;  %v4458_v7 = vrot.slane %v4416_v46, %v6871_v62 }
 0x597   :  { %v4372_v14 = vadd.f32 %v9740_v37, %v4344_v4  ;;  %v11518_v48 = vrot.slane %v9485_v11, %v6894_v43  ;;  %v11519_v32 = vrot.slane %v9491_v9, %v6894_v43  ;;  %v4289_v19 = vadd.f32 %v4285_v18, %v4261_v13  ;;  %v4534_v9 = vpop.permute.xlu1 %4533  ;;  %v11527_v4 = vld [vmem:[#allocation62_spill] sm:$0xff] }
 0x598   :  { %v4371_v24 = vadd.f32 %v9734_v17, %v4343_v57  ;;  %v4290_v45 = vadd.f32 %v4286_v63, %v4262_v26  ;;  %v4439_v49 = vmul.f32 %v4426_v33, %v11520_v3  ;;  %v4440_v47 = vmul.f32 %v4430_v0, %v11520_v3 }
 0x599   :  { %v4397_v21 = vmul.f32 %v11518_v48, %v9562_v1  ;;  %v4398_v29 = vmul.f32 %v11519_v32, %v9562_v1  ;;  %v4400_v37 = vadd.f32 %v9842_v38, %v4372_v14  ;;  %v4317_v35 = vadd.f32 %v11521_v22, %v4289_v19  ;;  %v4410_v38 = vpop.permute.xlu0 %4409  ;;  %v11529_v32 = vld [vmem:[#allocation44_spill] sm:$0xff] }
 0x59a   :  { %v4399_v17 = vadd.f32 %v9836_v42, %v4371_v24  ;;  %v4318_v11 = vadd.f32 %v11522_v53, %v4290_v45  ;;  %v4482_v51 = vrot.slane %v4415_v23, %v6885_v50  ;;  %v4486_v52 = vrot.slane %v4416_v46, %v6885_v50 }
 0x59b   :  { %v4444_v8 = vadd.f32 %v4440_v47, %v4400_v37  ;;  %v4467_v28 = vmul.f32 %v4454_v54, %v11523_v40  ;;  %v4468_v42 = vmul.f32 %v4458_v7, %v11523_v40  ;;  %v4345_v10 = vadd.f32 %v11524_v2, %v4317_v35  ;;  %v4538_v48 = vpop.permute.xlu1 %4537 }
 0x59c   :  { %v4443_v1 = vadd.f32 %v4439_v49, %v4399_v17  ;;  %v4346_v39 = vadd.f32 %v11525_v5, %v4318_v11  ;;  %v4510_v31 = vrot.slane %v4415_v23, %v6894_v43  ;;  %v4514_v34 = vrot.slane %v4416_v46, %v6894_v43  ;;  %v11532_v5 = vld [vmem:[#allocation19_spill] sm:$0xff] }
 0x59d   :  { %v4472_v41 = vadd.f32 %v4468_v42, %v4444_v8  ;;  %v4495_v18 = vmul.f32 %v4482_v51, %v11526_v16  ;;  %v4496_v63 = vmul.f32 %v4486_v52, %v11526_v16  ;;  %v4373_v57 = vadd.f32 %v9748_v6, %v4345_v10  ;;  %v4532_v37 = vpop.permute.xlu0 %4531 }
 0x59e   :  { %v4471_v55 = vadd.f32 %v4467_v28, %v4443_v1  ;;  %v4374_v13 = vadd.f32 %v11527_v4, %v4346_v39  ;;  %v4412_v26 = vsel %vm11528_vm10, %v4406_v30, %v4410_v38  ;;  %v4414_v33 = vsel %vm11516_vm7, %v4410_v38, %v4406_v30  ;;  %v11534_v39 = vld [vmem:[#allocation28_spill] sm:$0xff] }
 0x59f   :  { %v4500_v23 = vadd.f32 %v4496_v63, %v4472_v41  ;;  %v4417_v46 = vsel %vm7398_vm2, %v4412_v26, 0.0  ;;  %v4418_v24 = vsel %vm7410_vm4, %v4414_v33, 0.0  ;;  %v4401_v14 = vadd.f32 %v4397_v21, %v4373_v57  ;;  %v11536_v26 = vld [vmem:[#allocation34_spill] sm:$0xff] }
 0x5a0   :  { %v4499_v0 = vadd.f32 %v4495_v18, %v4471_v55  ;;  %v4402_v54 = vadd.f32 %v4398_v29, %v4374_v13  ;;  %v4434_v6 = vrot.slane %v4417_v46, %v6862_v56  ;;  %v4438_v7 = vrot.slane %v4418_v24, %v6862_v56 }
 0x5a1   :  { %v4523_v19 = vmul.f32 %v4510_v31, %v11529_v32  ;;  %v4524_v45 = vmul.f32 %v4514_v34, %v11529_v32  ;;  %v4462_v30 = vrot.slane %v4417_v46, %v6871_v62  ;;  %v4466_v17 = vrot.slane %v4418_v24, %v6871_v62  ;;  %v4660_v34 = vpop.permute.xlu1 %4659  ;;  %v4536_v63 = vpop.permute.xlu0 %4535 }
 0x5a2   :  { %v4441_v49 = vmul.f32 %v4434_v6, %v11520_v3  ;;  %v4442_v47 = vmul.f32 %v4438_v7, %v11520_v3  ;;  %v4490_v21 = vrot.slane %v4417_v46, %v6885_v50  ;;  %v4494_v29 = vrot.slane %v4418_v24, %v6885_v50 }
 0x5a3   :  { %v4527_v22 = vadd.f32 %v4523_v19, %v4499_v0  ;;  %v4528_v35 = vadd.f32 %v4524_v45, %v4500_v23  ;;  %v4469_v53 = vmul.f32 %v4462_v30, %v11523_v40  ;;  %v4470_v11 = vmul.f32 %v4466_v17, %v11523_v40 }
 0x5a4   :  { %v4445_v51 = vadd.f32 %v4441_v49, %v4401_v14  ;;  %v4446_v52 = vadd.f32 %v4442_v47, %v4402_v54  ;;  %v4518_v1 = vrot.slane %v4417_v46, %v6894_v43  ;;  %v4522_v8 = vrot.slane %v4418_v24, %v6894_v43  ;;  %v11537_v54 = vld [vmem:[#allocation36_spill] sm:$0xff] }
 0x5a5   :  { %v4497_v28 = vmul.f32 %v4490_v21, %v11526_v16  ;;  %v4498_v3 = vmul.f32 %v4494_v29, %v11526_v16  ;;  %vm11530_vm10 = vcmp.lt.s32.totalorder %v6868_v61, 113  ;;  %vm11533_vm4 = vnez %v11532_v5  ;;  %v4662_v21 = vpop.permute.xlu1 %4661  ;;  %v11539_v29 = vld [vmem:[#allocation38_spill] sm:$0xff] }
 0x5a6   :  { %v4540_v42 = vsel %vm11530_vm10, %v4534_v9, %v4538_v48  ;;  %vm11531_vm7 = vmmov %vm11530_vm10  ;;  %v4473_v2 = vadd.f32 %v4469_v53, %v4445_v51  ;;  %v4474_v10 = vadd.f32 %v4470_v11, %v4446_v52  ;;  %vm11535_vm2 = vnez %v11534_v39 }
 0x5a7   :  { %v4542_v38 = vsel %vm11531_vm7, %v4538_v48, %v4534_v9  ;;  %v4545_v40 = vsel %vm11533_vm4, %v4540_v42, 0.0  ;;  %v4525_v4 = vmul.f32 %v4518_v1, %v11529_v32  ;;  %v4526_v13 = vmul.f32 %v4522_v8, %v11529_v32  ;;  %vm11538_vm10 = vmmov %vm11531_vm7  ;;  %v4664_v1 = vpop.permute.xlu0 %4663 }
 0x5a8   :  { %v4546_v31 = vsel %vm11535_vm2, %v4542_v38, 0.0  ;;  %v4562_v55 = vrot.slane %v4545_v40, %v6862_v56  ;;  %v4590_v16 = vrot.slane %v4545_v40, %v6871_v62  ;;  %v4501_v57 = vadd.f32 %v4497_v28, %v4473_v2 }
 0x5a9   :  { %v4566_v41 = vrot.slane %v4546_v31, %v6862_v56  ;;  %v4594_v18 = vrot.slane %v4546_v31, %v6871_v62  ;;  %v4502_v9 = vadd.f32 %v4498_v3, %v4474_v10  ;;  %v4618_v23 = vrot.slane %v4545_v40, %v6885_v50 }
 0x5aa   :  { %v4569_v33 = vmul.f32 %v4562_v55, %v11536_v26  ;;  %v4622_v46 = vrot.slane %v4546_v31, %v6885_v50  ;;  %v4529_v24 = vadd.f32 %v4525_v4, %v4501_v57  ;;  %v4597_v6 = vmul.f32 %v4590_v16, %v11537_v54  ;;  %v11540_v55 = vld [vmem:[#allocation61_spill] sm:$0xff] }
 0x5ab   :  { %v4570_v0 = vmul.f32 %v4566_v41, %v11536_v26  ;;  %v4530_v14 = vadd.f32 %v4526_v13, %v4502_v9  ;;  %v4598_v7 = vmul.f32 %v4594_v18, %v11537_v54  ;;  %v4646_v48 = vrot.slane %v4545_v40, %v6894_v43 }
 0x5ac   :  { %v4650_v19 = vrot.slane %v4546_v31, %v6894_v43  ;;  %v4539_v32 = vsel %vm11538_vm10, %v4532_v37, %v4536_v63  ;;  %v4541_v45 = vsel %vm11531_vm7, %v4536_v63, %v4532_v37  ;;  %v4573_v30 = vadd.f32 %v4569_v33, %v4529_v24 }
 0x5ad   :  { %v4574_v17 = vadd.f32 %v4570_v0, %v4530_v14  ;;  %v4543_v49 = vsel %vm11533_vm4, %v4539_v32, 0.0  ;;  %v4544_v47 = vsel %vm11535_vm2, %v4541_v45, 0.0  ;;  %v4625_v53 = vmul.f32 %v4618_v23, %v11539_v29  ;;  %v4666_v0 = vpop.permute.xlu1 %4665 }
 0x5ae   :  { %v4626_v11 = vmul.f32 %v4622_v46, %v11539_v29  ;;  %v4554_v51 = vrot.slane %v4543_v49, %v6862_v56  ;;  %v4558_v52 = vrot.slane %v4544_v47, %v6862_v56  ;;  %v4601_v8 = vadd.f32 %v4597_v6, %v4573_v30 }
 0x5af   :  { %v4602_v37 = vadd.f32 %v4598_v7, %v4574_v17  ;;  %v4582_v28 = vrot.slane %v4543_v49, %v6871_v62  ;;  %v4586_v3 = vrot.slane %v4544_v47, %v6871_v62  ;;  %v4610_v2 = vrot.slane %v4543_v49, %v6885_v50 }
 0x5b0   :  { %v4567_v42 = vmul.f32 %v4554_v51, %v11536_v26  ;;  %v4568_v38 = vmul.f32 %v4558_v52, %v11536_v26  ;;  %v4614_v10 = vrot.slane %v4544_v47, %v6885_v50  ;;  %v4629_v40 = vadd.f32 %v4625_v53, %v4601_v8  ;;  %v11545_v51 = vld [vmem:[#allocation60_spill] sm:$0xff] }
 0x5b1   :  { %v4630_v31 = vadd.f32 %v4626_v11, %v4602_v37  ;;  %v4653_v41 = vmul.f32 %v4646_v48, %v11540_v55  ;;  %v4654_v16 = vmul.f32 %v4650_v19, %v11540_v55  ;;  %v4595_v57 = vmul.f32 %v4582_v28, %v11537_v54  ;;  %v4788_v28 = vpop.permute.xlu1 %4787 }
 0x5b2   :  { %v4571_v18 = vadd.f32 %v4567_v42, %v4527_v22  ;;  %v4572_v63 = vadd.f32 %v4568_v38, %v4528_v35  ;;  %v4596_v9 = vmul.f32 %v4586_v3, %v11537_v54  ;;  %v4623_v4 = vmul.f32 %v4610_v2, %v11539_v29  ;;  %v10034_v35 = vpop.permute.xlu0 %4832 }
 0x5b3   :  { %v4624_v13 = vmul.f32 %v4614_v10, %v11539_v29  ;;  %v4638_v26 = vrot.slane %v4543_v49, %v6894_v43  ;;  %v4642_v33 = vrot.slane %v4544_v47, %v6894_v43  ;;  %vm11541_vm10 = vcmp.lt.s32.totalorder %v6868_v61, 112 }
 0x5b4   :  { %v4599_v23 = vadd.f32 %v4595_v57, %v4571_v18  ;;  %v4600_v46 = vadd.f32 %v4596_v9, %v4572_v63  ;;  %v4667_v24 = vsel %vm11541_vm10, %v4660_v34, %v4664_v1  ;;  %vm11542_vm7 = vmmov %vm11541_vm10  ;;  %v4657_v8 = vadd.f32 %v4653_v41, %v4629_v40 }
 0x5b5   :  { %v4669_v22 = vsel %vm11542_vm7, %v4664_v1, %v4660_v34  ;;  %v4651_v14 = vmul.f32 %v4638_v26, %v11540_v55  ;;  %v4652_v54 = vmul.f32 %v4642_v33, %v11540_v55  ;;  %v4671_v7 = vsel %vm11444_vm13, %v4667_v24, 0.0  ;;  %vm11546_vm10 = vmmov %vm11542_vm7 }
 0x5b6   :  { %v4672_v19 = vsel %vm11446_vm1, %v4669_v22, 0.0  ;;  %v4627_v32 = vadd.f32 %v4623_v4, %v4599_v23  ;;  %v4628_v45 = vadd.f32 %v4624_v13, %v4600_v46  ;;  %v4682_v30 = vrot.slane %v4671_v7, %v6862_v56  ;;  %v4792_v10 = vpop.permute.xlu0 %4791 }
 0x5b7   :  { %v4686_v17 = vrot.slane %v4672_v19, %v6862_v56  ;;  %v4710_v34 = vrot.slane %v4671_v7, %v6871_v62  ;;  %v4714_v49 = vrot.slane %v4672_v19, %v6871_v62  ;;  %v4738_v47 = vrot.slane %v4671_v7, %v6885_v50 }
 0x5b8   :  { %v4742_v29 = vrot.slane %v4672_v19, %v6885_v50  ;;  %v4655_v53 = vadd.f32 %v4651_v14, %v4627_v32  ;;  %v4656_v11 = vadd.f32 %v4652_v54, %v4628_v45  ;;  %v4695_v52 = vmul.f32 %v4682_v30, %v11545_v51  ;;  %v4790_v54 = vpop.permute.xlu1 %4789 }
 0x5b9   :  { %v4696_v1 = vmul.f32 %v4686_v17, %v11545_v51  ;;  %v4658_v37 = vadd.f32 %v4654_v16, %v4630_v31  ;;  %v4723_v38 = vmul.f32 %v4710_v34, %v9830_v25  ;;  %v4724_v2 = vmul.f32 %v4714_v49, %v9830_v25 }
 0x5ba   :  { %v4699_v3 = vadd.f32 %v4695_v52, %v4655_v53  ;;  %v4766_v55 = vrot.slane %v4671_v7, %v6894_v43  ;;  %v4770_v18 = vrot.slane %v4672_v19, %v6894_v43  ;;  %v4668_v63 = vsel %vm11546_vm10, %v4662_v21, %v4666_v0 }
 0x5bb   :  { %v4700_v42 = vadd.f32 %v4696_v1, %v4656_v11  ;;  %v4670_v57 = vsel %vm11542_vm7, %v4666_v0, %v4662_v21  ;;  %v4751_v41 = vmul.f32 %v4738_v47, %v9902_v44  ;;  %v4752_v16 = vmul.f32 %v4742_v29, %v9902_v44 }
 0x5bc   :  { %v4727_v40 = vadd.f32 %v4723_v38, %v4699_v3  ;;  %v4673_v9 = vsel %vm11444_vm13, %v4668_v63, 0.0  ;;  %v4674_v4 = vsel %vm11446_vm1, %v4670_v57, 0.0  ;;  %vm11547_vm2 = vcmp.lt.s32.totalorder %v6868_v61, 111  ;;  %v4794_v63 = vpop.permute.xlu1 %4793 }
 0x5bd   :  { %v4728_v31 = vadd.f32 %v4724_v2, %v4700_v42  ;;  %v4795_v13 = vsel %vm11547_vm2, %v4788_v28, %v4792_v10  ;;  %vm11548_vm10 = vmmov %vm11547_vm2  ;;  %v4690_v0 = vrot.slane %v4673_v9, %v6862_v56  ;;  %v4694_v23 = vrot.slane %v4674_v4, %v6862_v56 }
 0x5be   :  { %v4797_v26 = vsel %vm11548_vm10, %v4792_v10, %v4788_v28  ;;  %v4755_v33 = vadd.f32 %v4751_v41, %v4727_v40  ;;  %v4779_v46 = vmul.f32 %v4766_v55, %v9828_v60  ;;  %v4780_v24 = vmul.f32 %v4770_v18, %v9828_v60  ;;  %vm11551_vm7 = vmmov %vm11547_vm2 }
 0x5bf   :  { %v4756_v21 = vadd.f32 %v4752_v16, %v4728_v31  ;;  %v4718_v22 = vrot.slane %v4673_v9, %v6871_v62  ;;  %v4722_v14 = vrot.slane %v4674_v4, %v6871_v62  ;;  %v4697_v7 = vmul.f32 %v4690_v0, %v11545_v51 }
 0x5c0   :  { %v4698_v19 = vmul.f32 %v4694_v23, %v11545_v51  ;;  %v4799_v45 = vsel %vm11298_vm0, %v4795_v13, 0.0  ;;  %v4800_v17 = vsel %vm11300_vm3, %v4797_v26, 0.0  ;;  %v4783_v34 = vadd.f32 %v4779_v46, %v4755_v33  ;;  %v4861_v26 = vpop.permute.xlu0 %4860 }
 0x5c1   :  { %v4784_v49 = vadd.f32 %v4780_v24, %v4756_v21  ;;  %v4746_v47 = vrot.slane %v4673_v9, %v6885_v50  ;;  %v4750_v29 = vrot.slane %v4674_v4, %v6885_v50  ;;  %v4701_v53 = vadd.f32 %v4697_v7, %v4657_v8 }
 0x5c2   :  { %v4702_v11 = vadd.f32 %v4698_v19, %v4658_v37  ;;  %v4725_v52 = vmul.f32 %v4718_v22, %v9830_v25  ;;  %v4726_v1 = vmul.f32 %v4722_v14, %v9830_v25  ;;  %v4810_v51 = vrot.slane %v4799_v45, %v6862_v56 }
 0x5c3   :  { %v4814_v28 = vrot.slane %v4800_v17, %v6862_v56  ;;  %v4838_v3 = vrot.slane %v4799_v45, %v6871_v62  ;;  %v4842_v42 = vrot.slane %v4800_v17, %v6871_v62  ;;  %v4774_v10 = vrot.slane %v4673_v9, %v6894_v43 }
 0x5c4   :  { %v4729_v38 = vadd.f32 %v4725_v52, %v4701_v53  ;;  %v4730_v2 = vadd.f32 %v4726_v1, %v4702_v11  ;;  %v4778_v55 = vrot.slane %v4674_v4, %v6894_v43  ;;  %v4753_v8 = vmul.f32 %v4746_v47, %v9902_v44  ;;  %v4889_v47 = vpop.permute.xlu1 %4888 }
 0x5c5   :  { %v4754_v37 = vmul.f32 %v4750_v29, %v9902_v44  ;;  %v4823_v25 = vmul.f32 %v4810_v51, %v9858_v12  ;;  %v4824_v18 = vmul.f32 %v4814_v28, %v9858_v12  ;;  %v4851_v57 = vmul.f32 %v4838_v3, %v10034_v35 }
 0x5c6   :  { %v4852_v40 = vmul.f32 %v4842_v42, %v10034_v35  ;;  %v4866_v31 = vrot.slane %v4799_v45, %v6885_v50  ;;  %v4870_v41 = vrot.slane %v4800_v17, %v6885_v50  ;;  %v4757_v16 = vadd.f32 %v4753_v8, %v4729_v38 }
 0x5c7   :  { %v4758_v9 = vadd.f32 %v4754_v37, %v4730_v2  ;;  %v4827_v4 = vadd.f32 %v4823_v25, %v4783_v34  ;;  %v4828_v13 = vadd.f32 %v4824_v18, %v4784_v49  ;;  %v4781_v44 = vmul.f32 %v4774_v10, %v9828_v60 }
 0x5c8   :  { %v4782_v33 = vmul.f32 %v4778_v55, %v9828_v60  ;;  %v4894_v21 = vrot.slane %v4799_v45, %v6894_v43  ;;  %v4898_v0 = vrot.slane %v4800_v17, %v6894_v43  ;;  %v4796_v24 = vsel %vm11547_vm2, %v4790_v54, %v4794_v63 }
 0x5c9   :  { %v4855_v23 = vadd.f32 %v4851_v57, %v4827_v4  ;;  %v4856_v46 = vadd.f32 %v4852_v40, %v4828_v13  ;;  %v4798_v22 = vsel %vm11551_vm7, %v4794_v63, %v4790_v54  ;;  %v4879_v14 = vmul.f32 %v4866_v31, %v4861_v26 }
 0x5ca   :  { %v4880_v7 = vmul.f32 %v4870_v41, %v4861_v26  ;;  %v4801_v19 = vsel %vm11298_vm0, %v4796_v24, 0.0  ;;  %v4802_v60 = vsel %vm11300_vm3, %v4798_v22, 0.0  ;;  %v4785_v34 = vadd.f32 %v4781_v44, %v4757_v16 }
 0x5cb   :  { %v4786_v45 = vadd.f32 %v4782_v33, %v4758_v9  ;;  %v4818_v17 = vrot.slane %v4801_v19, %v6862_v56  ;;  %v4822_v49 = vrot.slane %v4802_v60, %v6862_v56  ;;  %v4883_v29 = vadd.f32 %v4879_v14, %v4855_v23  ;;  %v10146_v14 = vld [vmem:[#allocation5 + $0x10] sm:$0xf] }
 0x5cc   :  { %v4884_v53 = vadd.f32 %v4880_v7, %v4856_v46  ;;  %v4846_v11 = vrot.slane %v4801_v19, %v6871_v62  ;;  %v4850_v54 = vrot.slane %v4802_v60, %v6871_v62  ;;  %v4874_v51 = vrot.slane %v4801_v19, %v6885_v50 }
 0x5cd   :  { %v4825_v52 = vmul.f32 %v4818_v17, %v9858_v12  ;;  %v4826_v1 = vmul.f32 %v4822_v49, %v9858_v12  ;;  %v4878_v28 = vrot.slane %v4802_v60, %v6885_v50  ;;  %v4902_v3 = vrot.slane %v4801_v19, %v6894_v43 }
 0x5ce   :  { %v4906_v42 = vrot.slane %v4802_v60, %v6894_v43  ;;  %v4907_v38 = vmul.f32 %v4894_v21, %v4889_v47  ;;  %v4908_v2 = vmul.f32 %v4898_v0, %v4889_v47  ;;  %v4853_v8 = vmul.f32 %v4846_v11, %v10034_v35 }
 0x5cf   :  { %v4829_v10 = vadd.f32 %v4825_v52, %v4785_v34  ;;  %v4830_v55 = vadd.f32 %v4826_v1, %v4786_v45  ;;  %v4854_v37 = vmul.f32 %v4850_v54, %v10034_v35  ;;  %v4881_v57 = vmul.f32 %v4874_v51, %v4861_v26  ;;  %v4932_v54 = vld [vmem:[#allocation7 + $0x4] sm:$0xf] }
 0x5d0   :  { %v10122_v25 = vadd.f32 %v4907_v38, %v4883_v29  ;;  %v10124_v18 = vadd.f32 %v4908_v2, %v4884_v53  ;;  %v4882_v40 = vmul.f32 %v4878_v28, %v4861_v26  ;;  %v4909_v16 = vmul.f32 %v4902_v3, %v4889_v47 }
 0x5d1   :  { %v4857_v12 = vadd.f32 %v4853_v8, %v4829_v10  ;;  %v4858_v63 = vadd.f32 %v4854_v37, %v4830_v55  ;;  %v4910_v9 = vmul.f32 %v4906_v42, %v4889_v47  ;;  %vm11552_vm10 = vcmask 1043456  }
 0x5d2   :  { %v4915_v31 = vmax.f32 %v10122_v25, 0.0  ;;  %v4916_v41 = vmax.f32 %v10124_v18, 0.0  ;;  %vm11553_vm2 = vmmov %vm11552_vm10  ;;  %v11556_v7 = vmov 2   ;;  %v11557_v19 = vmov 3  }
 0x5d3   :  { %v4885_v4 = vadd.f32 %v4881_v57, %v4857_v12  ;;  %v4886_v13 = vadd.f32 %v4882_v40, %v4858_v63  ;;  %vm11554_vm7 = vmmov %vm11553_vm2  ;;  %v11558_v60 = vmov 5   ;;  %v11559_v34 = vmov 4  }
 0x5d4   :  { %v4919_v35 = vsel %vm11552_vm10, %v4915_v31, 0.0  ;;  %v4920_v44 = vsel %vm11553_vm2, %v4916_v41, 0.0  ;;  %vm11555_vm10 = vmmov %vm11553_vm2  ;;  %v11560_v45 = vmov 6   ;;  %v11561_v17 = vmov 7  }
 0x5d5   :  { %v4921_v33 = vadd.f32 %v4920_v44, %v4919_v35  ;;  %v10134_v21 = vadd.f32 %v4909_v16, %v4885_v4  ;;  %v10136_v26 = vadd.f32 %v4910_v9, %v4886_v13  ;;  %v11562_v49 = vmov 9   ;;  %v6159_v4 = vld [vmem:[%s10918_s3 + $0x4] sm:$0xf]  ;;  %s6595_s3 = smov [#allocation10]  }
 0x5d6   :  { %v11563_v47 = vmov 8   ;;  %v11564_v29 = vmov 10   ;;  %v11565_v53 = vmov 13   ;;  %v11566_v11 = vmov 14   ;;  %s6143_s0 = sshll.u32 %s6595_s3, 4  ;;  %s6144_s0 = int_to_ptr.vmem [resolvable:$true] %s6143_s0 }
 0x5d7   :  { %4922 = vadd.xlane.f32.xlu1 %v4921_v33  ;;  %v4917_v0 = vmax.f32 %v10134_v21, 0.0  ;;  %v4918_v23 = vmax.f32 %v10136_v26, 0.0  ;;  %vm11567_vm2 = vcmask 27648   ;;  %s6511_s8 = scalar_lea.vmem %s6144_s0, 256  ;;  %p6516_p5 = scmp.lt.s32.totalorder %s6144_s0, %s6144_s0 }
 0x5d8   :  { %p6512_p4 = scmp.ne.s32.totalorder %s6144_s0, %s6511_s8  ;;  %p6517_p6 = scmp.lt.s32.totalorder %s6511_s8, %s6511_s8 }
 0x5d9   :  { %v4924_v46 = vsel %vm11554_vm7, %v4917_v0, 0.0  ;;  %v4925_v24 = vsel %vm11555_vm10, %v4918_v23, 0.0  ;;  %vm11568_vm7 = vmmov %vm11567_vm2 }
 0x5da   :  { %v4926_v22 = vadd.f32 %v4925_v24, %v4924_v46  ;;  %vm11569_vm10 = vmmov %vm11567_vm2  ;;  %p6518_p7 = por %p6517_p6, %p6516_p5 }
 0x5dc   :  { %4927 = vadd.xlane.f32.xlu0 %v4926_v22  ;;  %p6519_p8 = pnand %p6518_p7, %p6512_p4 }
 0x5e8   :  { %5001 = vperm.xlu1 %6360, %v10146_v14  }
 0x5ec   :  { %6362 = vset.pattern.permute.xlu1 %v11556_v7 }
 0x5ed   :  { %5057 = vperm.xlu1 %6362, %v10146_v14  }
 0x5f1   :  { %6363 = vset.pattern.permute.xlu1 %v11557_v19  ;;  %v11570_v19 = vmov 11  }
 0x5f2   :  { %5085 = vperm.xlu1 %6363, %v10146_v14   ;;  %5029 = vperm.xlu0 %6361, %v10146_v14  }
 0x5f6   :  { %6365 = vset.pattern.permute.xlu1 %v11558_v60  ;;  %6364 = vset.pattern.permute.xlu0 %v11559_v34  ;;  %v11571_v60 = vmov 16   ;;  %v11572_v34 = vmov 12  }
 0x5f7   :  { %5157 = vperm.xlu1 %6365, %v10146_v14   ;;  %5129 = vperm.xlu0 %6364, %v10146_v14  }
 0x5fb   :  { %6366 = vset.pattern.permute.xlu1 %v11560_v45  ;;  %6367 = vset.pattern.permute.xlu0 %v11561_v17  ;;  %v11573_v45 = vmov 17   ;;  %v11574_v17 = vmov 15  }
 0x5fc   :  { %5185 = vperm.xlu1 %6366, %v10146_v14   ;;  %5213 = vperm.xlu0 %6367, %v10146_v14  }
 0x600   :  { %6369 = vset.pattern.permute.xlu1 %v11562_v49  ;;  %6368 = vset.pattern.permute.xlu0 %v11563_v47  ;;  %v11575_v49 = vmov 19   ;;  %v11576_v47 = vmov 18  }
 0x601   :  { %5285 = vperm.xlu1 %6369, %v10146_v14  }
 0x605   :  { %6370 = vset.pattern.permute.xlu1 %v11564_v29  ;;  %v11577_v29 = vmov 20  }
 0x606   :  { %5313 = vperm.xlu1 %6370, %v10146_v14  }
 0x60a   :  { %6373 = vset.pattern.permute.xlu1 %v11565_v53  ;;  %v11578_v53 = vmov 21  }
 0x60b   :  { %5413 = vperm.xlu1 %6373, %v10146_v14  }
 0x60f   :  { %6374 = vset.pattern.permute.xlu1 %v11566_v11  ;;  %v11579_v11 = vmov 23  }
 0x664   :  { %v4923_v52 = vpop.xlane.xlu1 %4922 }
 0x665   :  { %v4929_v1 = vmul.f32 0.00390625, %v4923_v52  ;;  %v11581_v52 = vmov 24  }
 0x667   :  { %v4933_v51 = vmul.f32 %v4932_v54, %v4929_v1  ;;  %v11582_v1 = vmov 25  }
 0x669   :  { %v4935_v28 = vsel %vm11567_vm2, %v4933_v51, 0.0  ;;  %v4928_v3 = vpop.xlane.xlu0 %4927  ;;  %v11583_v51 = vmov 27  }
 0x66a   :  { %v4936_v42 = vrot.slane %v4935_v28, 4  ;;  %v4930_v38 = vmul.f32 0.00390625, %v4928_v3  ;;  %v10207_v3 = vpop.permute.xlu1 %5001 }
 0x66c   :  { %v4937_v2 = vadd.f32 %v4936_v42, %v4935_v28  ;;  %v4934_v10 = vmul.f32 %v4932_v54, %v4930_v38  ;;  %v11580_v54 = vmov 22   ;;  %v11584_v28 = vmov 26  }
 0x66e   :  { %v4938_v55 = vrot.slane %v4937_v2, 2  ;;  %v4942_v8 = vsel %vm11568_vm7, %v4934_v10, 0.0  ;;  %v10209_v42 = vpop.permute.xlu1 %5057  ;;  %vm11606_vm7 = vcmp.lt.s32.totalorder %v6868_v61, 17 }
 0x66f   :  { %v4943_v37 = vrot.slane %v4942_v8, 4 }
 0x670   :  { %v4939_v12 = vadd.f32 %v4938_v55, %v4937_v2 }
 0x671   :  { %v4944_v63 = vadd.f32 %v4943_v37, %v4942_v8  ;;  %v10217_v55 = vpop.permute.xlu0 %5029 }
 0x672   :  { %v4940_v57 = vrot.slane %v4939_v12, 1  ;;  %v10211_v38 = vpop.permute.xlu1 %5085 }
 0x673   :  { %v4945_v40 = vrot.slane %v4944_v63, 2 }
 0x674   :  { %v4941_v16 = vadd.f32 %v4940_v57, %v4939_v12 }
 0x675   :  { %v4946_v9 = vadd.f32 %v4945_v40, %v4944_v63 }
 0x676   :  { %v4949_v13 = vmax.f32 %v4941_v16, 0.0  ;;  %v10213_v2 = vpop.permute.xlu1 %5157  ;;  %v10221_v37 = vpop.permute.xlu0 %5129 }
 0x677   :  { %v4947_v35 = vrot.slane %v4946_v9, 1 }
 0x678   :  { %v4953_v44 = vmul.f32 %v6159_v4, %v4949_v13 }
 0x679   :  { %v4948_v33 = vadd.f32 %v4947_v35, %v4946_v9 }
 0x67a   :  { %v4955_v46 = vsel %vm11569_vm10, %v4953_v44, 0.0  ;;  %vm11607_vm10 = vmmov %vm11606_vm7 }
 0x67b   :  { %4956 = vadd.xlane.f32.xlu0 %v4955_v46  ;;  %v4950_v24 = vmax.f32 %v4948_v33, 0.0  ;;  %v10215_v10 = vpop.permute.xlu1 %5185  ;;  %v10225_v63 = vpop.permute.xlu0 %5213 }
 0x67d   :  { %v4954_v22 = vmul.f32 %v6159_v4, %v4950_v24 }
 0x67f   :  { %v4958_v7 = vsel %vm11567_vm2, %v4954_v22, 0.0  ;;  %vm11608_vm2 = vmmov %vm11606_vm7 }
 0x680   :  { %4959 = vadd.xlane.f32.xlu1 %v4958_v7  ;;  %v10219_v8 = vpop.permute.xlu1 %5285  ;;  %vm11609_vm3 = vmmov %vm11608_vm2 }
 0x685   :  { %v10223_v12 = vpop.permute.xlu1 %5313 }
 0x68a   :  { %v10227_v40 = vpop.permute.xlu1 %5413 }
 0x691   :  { %5257 = vperm.xlu0 %6368, %v10146_v14   ;;  %5441 = vperm.xlu1 %6374, %v10146_v14  }
 0x695   :  { %6371 = vset.pattern.permute.xlu0 %v11570_v19  ;;  %6376 = vset.pattern.permute.xlu1 %v11571_v60  ;;  %v11585_v60 = vld [vmem:[#allocation39_spill] sm:$0xff] }
 0x696   :  { %5341 = vperm.xlu0 %6371, %v10146_v14   ;;  %5497 = vperm.xlu1 %6376, %v10146_v14  }
 0x69a   :  { %6372 = vset.pattern.permute.xlu0 %v11572_v34  ;;  %6377 = vset.pattern.permute.xlu1 %v11573_v45  ;;  %v11586_v45 = vld [vmem:[#allocation42_spill] sm:$0xff] }
 0x69b   :  { %5385 = vperm.xlu0 %6372, %v10146_v14   ;;  %5525 = vperm.xlu1 %6377, %v10146_v14  }
 0x69f   :  { %6375 = vset.pattern.permute.xlu0 %v11574_v17  ;;  %6379 = vset.pattern.permute.xlu1 %v11575_v49 }
 0x6a0   :  { %5469 = vperm.xlu0 %6375, %v10146_v14   ;;  %5581 = vperm.xlu1 %6379, %v10146_v14  }
 0x6a4   :  { %6378 = vset.pattern.permute.xlu0 %v11576_v47  ;;  %6380 = vset.pattern.permute.xlu1 %v11577_v29 }
 0x6a5   :  { %5553 = vperm.xlu0 %6378, %v10146_v14   ;;  %5625 = vperm.xlu1 %6380, %v10146_v14  }
 0x6a9   :  { %6381 = vset.pattern.permute.xlu0 %v11578_v53  ;;  %6383 = vset.pattern.permute.xlu1 %v11579_v11  ;;  %v11589_v11 = vld [vmem:[#allocation40_spill] sm:$0xff] }
 0x6aa   :  { %5653 = vperm.xlu0 %6381, %v10146_v14   ;;  %5709 = vperm.xlu1 %6383, %v10146_v14  }
 0x6ae   :  { %6382 = vset.pattern.permute.xlu0 %v11580_v54  ;;  %6384 = vset.pattern.permute.xlu1 %v11581_v52  ;;  %v11590_v52 = vld [vmem:[#allocation41_spill] sm:$0xff] }
 0x6af   :  { %5681 = vperm.xlu0 %6382, %v10146_v14   ;;  %5753 = vperm.xlu1 %6384, %v10146_v14  }
 0x6b3   :  { %6385 = vset.pattern.permute.xlu0 %v11582_v1  ;;  %6387 = vset.pattern.permute.xlu1 %v11583_v51 }
 0x6b4   :  { %5781 = vperm.xlu0 %6385, %v10146_v14  }
 0x6b8   :  { %6386 = vset.pattern.permute.xlu0 %v11584_v28  ;;  %v11594_v28 = vmov 30  }
 0x708   :  { %v4957_v57 = vpop.xlane.xlu0 %4956 }
 0x709   :  { %v6160_v16 = vmul.f32 -1.442695, %v4957_v57  ;;  %v11595_v57 = vmov 31  }
 0x70b   :  { %6407 = vpow2.f32 %v6160_v16  ;;  %v11596_v16 = vmov 33  }
 0x70d   :  { %v4960_v9 = vpop.xlane.xlu1 %4959 }
 0x70e   :  { %v6161_v4 = vmul.f32 -1.442695, %v4960_v9  ;;  %v11597_v9 = vmov 34  }
 0x710   :  { %6409 = vpow2.f32 %v6161_v4  ;;  %v11598_v4 = vmov 35  }
 0x711   :  { %v10229_v33 = vpop.permute.xlu1 %5441 }
 0x715   :  { %v6408_v13 = vpop.eup %6407  ;;  %v10231_v24 = vpop.permute.xlu1 %5497 }
 0x716   :  { %v4967_v35 = vadd.f32 1.0, %v6408_v13  ;;  %v11599_v13 = vmov 32  }
 0x718   :  { %6411 = vrcp.f32 %v4967_v35  ;;  %v10333_v35 = vpop.permute.xlu0 %5257 }
 0x71a   :  { %v6410_v44 = vpop.eup %6409  ;;  %v10243_v49 = vpop.permute.xlu1 %5525 }
 0x71b   :  { %v4968_v46 = vadd.f32 1.0, %v6410_v44 }
 0x71c   :  { %v10338_v44 = vpop.permute.xlu0 %5341 }
 0x71d   :  { %6413 = vrcp.f32 %v4968_v46 }
 0x71f   :  { %v10271_v21 = vpop.permute.xlu1 %5581 }
 0x720   :  { %v10344_v46 = vpop.permute.xlu0 %5385 }
 0x722   :  { %v6412_v22 = vpop.eup %6411 }
 0x723   :  { %v4973_v7 = vmul.f32 %v6412_v22, %v4915_v31  ;;  %v4974_v19 = vmul.f32 %v6412_v22, %v4916_v41 }
 0x724   :  { %v10348_v22 = vpop.permute.xlu0 %5469 }
 0x725   :  { %v10238_v34 = vadd.f32 %v4973_v7, %v11585_v60  ;;  %v10241_v17 = vadd.f32 %v4974_v19, %v11586_v45  ;;  %v10362_v60 = vpop.permute.xlu1 %5625 }
 0x726   :  { %11601 = vst [vmem:[#allocation51_spill] sm:$0xff] %v10362_v60 }
 0x727   :  { %v6414_v47 = vpop.eup %6413  ;;  %v5507_v29 = vrot.slane %v10241_v17, %v6862_v56  ;;  %v5535_v53 = vrot.slane %v10241_v17, %v6871_v62  ;;  %4983 = vrot.lane.b32.xlu0 %v10238_v34, %s6553_s20  ;;  %v5591_v51 = vrot.slane %v10241_v17, %v6894_v43 }
 0x728   :  { %v4975_v25 = vmul.f32 %v6414_v47, %v4917_v0  ;;  %v4976_v18 = vmul.f32 %v6414_v47, %v4918_v23  ;;  %v11592_v0 = vmov 29   ;;  %v11593_v23 = vmov 28   ;;  %v10354_v7 = vpop.permute.xlu0 %5553 }
 0x729   :  { %v10256_v31 = vmul.f32 %v5507_v29, %v10231_v24  ;;  %v10259_v41 = vmul.f32 %v5535_v53, %v10243_v49  ;;  %v10276_v26 = vmul.f32 %v5591_v51, %v10271_v21  ;;  %v10370_v47 = vpop.permute.xlu1 %5709 }
 0x72a   :  { %v10262_v54 = vadd.f32 %v4975_v25, %v11589_v11  ;;  %v10265_v1 = vadd.f32 %v4976_v18, %v11590_v52  ;;  %11603 = vst [vmem:[#allocation52_spill] sm:$0xff] %v10370_v47 }
 0x72b   :  { %11587 = vst [vmem:[#allocation63_spill] sm:$0xff] %v10256_v31  ;;  %11588 = vst [vmem:[#allocation47_spill] sm:$0xff] %v10259_v41 }
 0x72c   :  { %4985 = vrot.lane.b32.xlu1 %v10262_v54, %s6553_s20  ;;  %4989 = vrot.lane.b32.xlu0 %v10265_v1, %s6553_s20  ;;  %11591 = vst [vmem:[#allocation48_spill] sm:$0xff] %v10276_v26  ;;  %v10358_v19 = vpop.permute.xlu0 %5653  ;;  %v5563_v26 = vrot.slane %v10241_v17, %v6885_v50 }
 0x72d   :  { %11600 = vst [vmem:[#allocation49_spill] sm:$0xff] %v10358_v19 }
 0x72e   :  { %v10375_v53 = vpop.permute.xlu1 %5753 }
 0x72f   :  { %11605 = vst [vmem:[#allocation55_spill] sm:$0xff] %v10375_v53 }
 0x730   :  { %4987 = vrot.lane.b32.xlu1 %v10241_v17, %s6553_s20  ;;  %5112 = vrot.lane.b32.xlu0 %v10238_v34, %s6557_s4  ;;  %v10364_v45 = vpop.permute.xlu0 %5681 }
 0x731   :  { %11602 = vst [vmem:[#allocation50_spill] sm:$0xff] %v10364_v45 }
 0x734   :  { %5114 = vrot.lane.b32.xlu1 %v10262_v54, %s6557_s4  ;;  %5116 = vrot.lane.b32.xlu0 %v10241_v17, %s6557_s4  ;;  %v10372_v29 = vpop.permute.xlu0 %5781 }
 0x735   :  { %11604 = vst [vmem:[#allocation53_spill] sm:$0xff] %v10372_v29 }
 0x738   :  { %5118 = vrot.lane.b32.xlu1 %v10265_v1, %s6557_s4  ;;  %5244 = vrot.lane.b32.xlu0 %v10241_v17, %s6562_s21 }
 0x73c   :  { %5240 = vrot.lane.b32.xlu1 %v10238_v34, %s6562_s21  ;;  %5809 = vperm.xlu0 %6386, %v10146_v14  }
 0x740   :  { %5242 = vrot.lane.b32.xlu1 %v10262_v54, %s6562_s21  ;;  %5372 = vrot.lane.b32.xlu0 %v10241_v17, %s6567_s22 }
 0x741   :  { %6389 = vset.pattern.permute.xlu0 %v11592_v0 }
 0x744   :  { %5837 = vperm.xlu1 %6387, %v10146_v14   ;;  %5909 = vperm.xlu0 %6389, %v10146_v14  }
 0x748   :  { %6388 = vset.pattern.permute.xlu1 %v11593_v23  ;;  %5612 = vrot.lane.b32.xlu0 %v10241_v17, %s6573_s23 }
 0x749   :  { %5881 = vperm.xlu1 %6388, %v10146_v14   ;;  %6390 = vset.pattern.permute.xlu0 %v11594_v28 }
 0x74c   :  { %5937 = vperm.xlu0 %6390, %v10146_v14  }
 0x74d   :  { %5246 = vrot.lane.b32.xlu1 %v10265_v1, %s6562_s21 }
 0x74e   :  { %6391 = vset.pattern.permute.xlu1 %v11595_v57 }
 0x750   :  { %5740 = vrot.lane.b32.xlu0 %v10241_v17, %s6575_s24 }
 0x751   :  { %5368 = vrot.lane.b32.xlu1 %v10238_v34, %s6567_s22  ;;  %6393 = vset.pattern.permute.xlu0 %v11596_v16 }
 0x754   :  { %5868 = vrot.lane.b32.xlu0 %v10241_v17, %s6581_s25 }
 0x755   :  { %5370 = vrot.lane.b32.xlu1 %v10262_v54, %s6567_s22 }
 0x758   :  { %6037 = vperm.xlu0 %6393, %v10146_v14  }
 0x759   :  { %5374 = vrot.lane.b32.xlu1 %v10265_v1, %s6567_s22 }
 0x75c   :  { %5996 = vrot.lane.b32.xlu0 %v10241_v17, %s6586_s26 }
 0x75d   :  { %5608 = vrot.lane.b32.xlu1 %v10238_v34, %s6573_s23  ;;  %6394 = vset.pattern.permute.xlu0 %v11597_v9 }
 0x760   :  { %6065 = vperm.xlu0 %6394, %v10146_v14  }
 0x761   :  { %5610 = vrot.lane.b32.xlu1 %v10262_v54, %s6573_s23 }
 0x764   :  { %6396 = vset.pattern.permute.xlu0 %v11598_v4 }
 0x765   :  { %5965 = vperm.xlu1 %6391, %v10146_v14  }
 0x769   :  { %6392 = vset.pattern.permute.xlu1 %v11599_v13 }
 0x76a   :  { %6009 = vperm.xlu1 %6392, %v10146_v14  }
 0x76e   :  { %5614 = vrot.lane.b32.xlu1 %v10265_v1, %s6573_s23 }
 0x76f   :  { %6395 = vset.pattern.permute.xlu1 %v11598_v4 }
 0x772   :  { %5736 = vrot.lane.b32.xlu1 %v10238_v34, %s6575_s24 }
 0x776   :  { %5738 = vrot.lane.b32.xlu1 %v10262_v54, %s6575_s24 }
 0x77a   :  { %5742 = vrot.lane.b32.xlu1 %v10265_v1, %s6575_s24 }
 0x77e   :  { %5864 = vrot.lane.b32.xlu1 %v10238_v34, %s6581_s25 }
 0x782   :  { %5866 = vrot.lane.b32.xlu1 %v10262_v54, %s6581_s25 }
 0x786   :  { %5870 = vrot.lane.b32.xlu1 %v10265_v1, %s6581_s25 }
 0x78a   :  { %5992 = vrot.lane.b32.xlu1 %v10238_v34, %s6586_s26 }
 0x78e   :  { %5994 = vrot.lane.b32.xlu1 %v10262_v54, %s6586_s26 }
 0x792   :  { %5998 = vrot.lane.b32.xlu1 %v10265_v1, %s6586_s26 }
 0x796   :  { %6093 = vperm.xlu1 %6395, %v10146_v14  }
 0x799   :  { %v4984_v25 = vpop.permute.xlu0 %4983 }
 0x79e   :  { %v4986_v18 = vpop.permute.xlu1 %4985  ;;  %v4990_v11 = vpop.permute.xlu0 %4989 }
 0x79f   :  { %v4992_v0 = vsel %vm11606_vm7, %v4986_v18, %v4990_v11  ;;  %v4994_v23 = vsel %vm11607_vm10, %v4990_v11, %v4986_v18 }
 0x7a0   :  { %v10387_v16 = vsel %vm6889_vm5, %v4994_v23, 0.0  ;;  %v10391_v4 = vsel %vm6918_vm6, %v4992_v0, 0.0 }
 0x7a1   :  { %v5015_v14 = vrot.slane %v10387_v16, %v6862_v56 }
 0x7a2   :  { %v4988_v52 = vpop.permute.xlu1 %4987  ;;  %v5113_v51 = vpop.permute.xlu0 %5112 }
 0x7a3   :  { %v4991_v28 = vsel %vm11608_vm2, %v4984_v25, %v4988_v52  ;;  %v4993_v57 = vsel %vm11609_vm3, %v4988_v52, %v4984_v25 }
 0x7a4   :  { %v4995_v13 = vsel %vm6889_vm5, %v4993_v57, 0.0  ;;  %v4996_v18 = vsel %vm6918_vm6, %v4991_v28, 0.0  ;;  %v5019_v57 = vrot.slane %v10391_v4, %v6862_v56  ;;  %vm11612_vm5 = vcmp.lt.s32.totalorder %v6868_v61, 16 }
 0x7a5   :  { %v5007_v11 = vrot.slane %v4995_v13, %v6862_v56  ;;  %v5011_v30 = vrot.slane %v4996_v18, %v6862_v56  ;;  %v5035_v25 = vrot.slane %v4995_v13, %v6871_v62  ;;  %v5039_v52 = vrot.slane %v4996_v18, %v6871_v62  ;;  %vm11613_vm6 = vmmov %vm11612_vm5 }
 0x7a6   :  { %v5063_v23 = vrot.slane %v4995_v13, %v6885_v50  ;;  %v5067_v32 = vrot.slane %v4996_v18, %v6885_v50  ;;  %v5117_v0 = vpop.permute.xlu0 %5116  ;;  %v5115_v48 = vpop.permute.xlu1 %5114  ;;  %v5091_v5 = vrot.slane %v4995_v13, %v6894_v43  ;;  %v5095_v47 = vrot.slane %v4996_v18, %v6894_v43  ;;  %vm11616_vm3 = vmmov %vm11612_vm5 }
 0x7a7   :  { %v5020_v28 = vmul.f32 %v5007_v11, %v10207_v3  ;;  %v5021_v9 = vmul.f32 %v5011_v30, %v10207_v3  ;;  %v5048_v6 = vmul.f32 %v5035_v25, %v10217_v55  ;;  %v5049_v29 = vmul.f32 %v5039_v52, %v10217_v55  ;;  %vm11617_vm7 = vmmov %vm11616_vm3 }
 0x7a8   :  { %v5076_v53 = vmul.f32 %v5063_v23, %v10209_v42  ;;  %v5077_v39 = vmul.f32 %v5067_v32, %v10209_v42  ;;  %v5120_v45 = vsel %vm11612_vm5, %v5113_v51, %v5117_v0  ;;  %v5122_v11 = vsel %vm11613_vm6, %v5117_v0, %v5113_v51 }
 0x7a9   :  { %v5052_v30 = vadd.f32 %v5048_v6, %v5020_v28  ;;  %v5053_v19 = vadd.f32 %v5049_v29, %v5021_v9  ;;  %v10421_v25 = vsel %vm6954_vm8, %v5122_v11, 0.0  ;;  %v10425_v23 = vsel %vm6958_vm9, %v5120_v45, 0.0 }
 0x7aa   :  { %v5043_v32 = vrot.slane %v10387_v16, %v6871_v62  ;;  %v5047_v13 = vrot.slane %v10391_v4, %v6871_v62  ;;  %v5135_v18 = vrot.slane %v10421_v25, %v6862_v56  ;;  %v5139_v6 = vrot.slane %v10425_v23, %v6862_v56  ;;  %v5119_v36 = vpop.permute.xlu1 %5118 }
 0x7ab   :  { %v5080_v29 = vadd.f32 %v5076_v53, %v5052_v30  ;;  %v5081_v51 = vadd.f32 %v5077_v39, %v5053_v19  ;;  %v5104_v0 = vmul.f32 %v5091_v5, %v10211_v38  ;;  %v5105_v28 = vmul.f32 %v5095_v47, %v10211_v38 }
 0x7ac   :  { %v5503_v45 = vrot.slane %v10238_v34, %v6862_v56  ;;  %v5531_v9 = vrot.slane %v10238_v34, %v6871_v62  ;;  %v5559_v11 = vrot.slane %v10238_v34, %v6885_v50  ;;  %v5148_v39 = vmul.f32 %v5135_v18, %v10221_v37 }
 0x7ad   :  { %v5108_v27 = vadd.f32 %v5104_v0, %v5080_v29  ;;  %v5109_v53 = vadd.f32 %v5105_v28, %v5081_v51  ;;  %v5149_v5 = vmul.f32 %v5139_v6, %v10221_v37  ;;  %v5022_v19 = vmul.f32 %v5015_v14, %v10207_v3  ;;  %v5245_v28 = vpop.permute.xlu0 %5244 }
 0x7ae   :  { %v5023_v47 = vmul.f32 %v5019_v57, %v10207_v3  ;;  %v5050_v30 = vmul.f32 %v5043_v32, %v10217_v55  ;;  %v5051_v41 = vmul.f32 %v5047_v13, %v10217_v55  ;;  %v5163_v31 = vrot.slane %v10421_v25, %v6871_v62 }
 0x7af   :  { %v5167_v17 = vrot.slane %v10425_v23, %v6871_v62  ;;  %v5121_v29 = vsel %vm11616_vm3, %v5115_v48, %v5119_v36  ;;  %v5123_v18 = vsel %vm11617_vm7, %v5119_v36, %v5115_v48  ;;  %v5071_v14 = vrot.slane %v10387_v16, %v6885_v50 }
 0x7b0   :  { %v5075_v3 = vrot.slane %v10391_v4, %v6885_v50  ;;  %v5099_v55 = vrot.slane %v10387_v16, %v6894_v43  ;;  %v5103_v57 = vrot.slane %v10391_v4, %v6894_v43  ;;  %v5152_v32 = vadd.f32 %v5148_v39, %v5108_v27 }
 0x7b1   :  { %v5153_v13 = vadd.f32 %v5149_v5, %v5109_v53  ;;  %v10469_v6 = vsel %vm6954_vm8, %v5123_v18, 0.0  ;;  %v10473_v36 = vsel %vm6958_vm9, %v5121_v29, 0.0  ;;  %v10476_v48 = vmul.f32 %v5503_v45, %v10231_v24  ;;  %v5241_v53 = vpop.permute.xlu1 %5240 }
 0x7b2   :  { %v10479_v51 = vmul.f32 %v5531_v9, %v10243_v49  ;;  %v5054_v16 = vadd.f32 %v5050_v30, %v5022_v19  ;;  %v5055_v0 = vadd.f32 %v5051_v41, %v5023_v47  ;;  %v5176_v4 = vmul.f32 %v5163_v31, %v10213_v2 }
 0x7b3   :  { %v5177_v27 = vmul.f32 %v5167_v17, %v10213_v2  ;;  %v5191_v60 = vrot.slane %v10421_v25, %v6885_v50  ;;  %v5195_v52 = vrot.slane %v10425_v23, %v6885_v50  ;;  %v5078_v45 = vmul.f32 %v5071_v14, %v10209_v42 }
 0x7b4   :  { %v5079_v39 = vmul.f32 %v5075_v3, %v10209_v42  ;;  %v5143_v9 = vrot.slane %v10469_v6, %v6862_v56  ;;  %v5147_v31 = vrot.slane %v10473_v36, %v6862_v56  ;;  %v5106_v41 = vmul.f32 %v5099_v55, %v10211_v38 }
 0x7b5   :  { %v5107_v5 = vmul.f32 %v5103_v57, %v10211_v38  ;;  %v5180_v19 = vadd.f32 %v5176_v4, %v5152_v32  ;;  %v5181_v47 = vadd.f32 %v5177_v27, %v5153_v13  ;;  %v5082_v30 = vadd.f32 %v5078_v45, %v5054_v16 }
 0x7b6   :  { %v5083_v17 = vadd.f32 %v5079_v39, %v5055_v0  ;;  %vm11618_vm8 = vcmp.lt.s32.totalorder %v6868_v61, 15  ;;  %v5204_v18 = vmul.f32 %v5191_v60, %v10215_v10  ;;  %v5205_v14 = vmul.f32 %v5195_v52, %v10215_v10 }
 0x7b7   :  { %v5248_v29 = vsel %vm11618_vm8, %v5241_v53, %v5245_v28  ;;  %vm11619_vm9 = vmmov %vm11618_vm8  ;;  %v5219_v3 = vrot.slane %v10421_v25, %v6894_v43  ;;  %v5223_v38 = vrot.slane %v10425_v23, %v6894_v43  ;;  %v5150_v55 = vmul.f32 %v5143_v9, %v10221_v37 }
 0x7b8   :  { %v5250_v42 = vsel %vm11619_vm9, %v5245_v28, %v5241_v53  ;;  %v5151_v57 = vmul.f32 %v5147_v31, %v10221_v37  ;;  %v10513_v13 = vsel %vm7103_vm12, %v5248_v29, 0.0  ;;  %v10516_v16 = vmul.f32 %v5559_v11, %v10354_v7  ;;  %v5243_v53 = vpop.permute.xlu1 %5242  ;;  %vm11620_vm10 = vmmov %vm11618_vm8 }
 0x7b9   :  { %v10509_v32 = vsel %vm7096_vm11, %v5250_v42, 0.0  ;;  %v10519_v25 = vmul.f32 %v5563_v26, %v10354_v7  ;;  %v5208_v0 = vadd.f32 %v5204_v18, %v5180_v19  ;;  %v5209_v23 = vadd.f32 %v5205_v14, %v5181_v47  ;;  %vm11621_vm2 = vmmov %vm11618_vm8 }
 0x7ba   :  { %v5110_v4 = vadd.f32 %v5106_v41, %v5082_v30  ;;  %v5111_v27 = vadd.f32 %v5107_v5, %v5083_v17  ;;  %v5171_v37 = vrot.slane %v10469_v6, %v6871_v62  ;;  %v5175_v60 = vrot.slane %v10473_v36, %v6871_v62 }
 0x7bb   :  { %v5232_v52 = vmul.f32 %v5219_v3, %v10225_v63  ;;  %v5233_v28 = vmul.f32 %v5223_v38, %v10225_v63  ;;  %v5263_v11 = vrot.slane %v10509_v32, %v6862_v56  ;;  %v5267_v26 = vrot.slane %v10513_v13, %v6862_v56 }
 0x7bc   :  { %v5511_v45 = vrot.slane %v10262_v54, %v6862_v56  ;;  %v5587_v39 = vrot.slane %v10238_v34, %v6894_v43  ;;  %v5154_v9 = vadd.f32 %v5150_v55, %v5110_v4  ;;  %v5155_v31 = vadd.f32 %v5151_v57, %v5111_v27 }
 0x7bd   :  { %v5515_v41 = vrot.slane %v10265_v1, %v6862_v56  ;;  %v5539_v5 = vrot.slane %v10262_v54, %v6871_v62  ;;  %v5236_v19 = vadd.f32 %v5232_v52, %v5208_v0  ;;  %v5237_v47 = vadd.f32 %v5233_v28, %v5209_v23 }
 0x7be   :  { %v5178_v30 = vmul.f32 %v5171_v37, %v10213_v2  ;;  %v5179_v17 = vmul.f32 %v5175_v60, %v10213_v2  ;;  %v5199_v29 = vrot.slane %v10469_v6, %v6885_v50  ;;  %v5203_v34 = vrot.slane %v10473_v36, %v6885_v50 }
 0x7bf   :  { %v5276_v42 = vmul.f32 %v5263_v11, %v10333_v35  ;;  %v5277_v18 = vmul.f32 %v5267_v26, %v10333_v35  ;;  %v5291_v14 = vrot.slane %v10509_v32, %v6871_v62  ;;  %v5295_v3 = vrot.slane %v10513_v13, %v6871_v62 }
 0x7c0   :  { %v5543_v2 = vrot.slane %v10265_v1, %v6871_v62  ;;  %v5567_v55 = vrot.slane %v10262_v54, %v6885_v50  ;;  %v5182_v57 = vadd.f32 %v5178_v30, %v5154_v9  ;;  %v5183_v0 = vadd.f32 %v5179_v17, %v5155_v31 }
 0x7c1   :  { %v5571_v23 = vrot.slane %v10265_v1, %v6885_v50  ;;  %v5595_v4 = vrot.slane %v10262_v54, %v6894_v43  ;;  %v5280_v27 = vadd.f32 %v5276_v42, %v5236_v19  ;;  %v5281_v37 = vadd.f32 %v5277_v18, %v5237_v47 }
 0x7c2   :  { %v5206_v60 = vmul.f32 %v5199_v29, %v10215_v10  ;;  %v5207_v52 = vmul.f32 %v5203_v34, %v10215_v10  ;;  %v5227_v28 = vrot.slane %v10469_v6, %v6894_v43  ;;  %v5231_v11 = vrot.slane %v10473_v36, %v6894_v43 }
 0x7c3   :  { %v10551_v38 = vpop.permute.xlu1 %5837  ;;  %v5304_v26 = vmul.f32 %v5291_v14, %v10219_v8  ;;  %v5305_v9 = vmul.f32 %v5295_v3, %v10219_v8  ;;  %v5319_v31 = vrot.slane %v10509_v32, %v6885_v50  ;;  %v5323_v19 = vrot.slane %v10513_v13, %v6885_v50 }
 0x7c4   :  { %v10574_v47 = vmul.f32 %v5511_v45, %v10231_v24  ;;  %v5599_v10 = vrot.slane %v10265_v1, %v6894_v43  ;;  %v5210_v6 = vadd.f32 %v5206_v60, %v5182_v57  ;;  %v5211_v30 = vadd.f32 %v5207_v52, %v5183_v0 }
 0x7c5   :  { %v10581_v36 = vmul.f32 %v5515_v41, %v10231_v24  ;;  %v10584_v29 = vmul.f32 %v5539_v5, %v10243_v49  ;;  %v5308_v34 = vadd.f32 %v5304_v26, %v5280_v27  ;;  %v5309_v42 = vadd.f32 %v5305_v9, %v5281_v37  ;;  %v10606_v37 = vpop.permute.xlu0 %5809 }
 0x7c6   :  { %v5234_v18 = vmul.f32 %v5227_v28, %v10225_v63  ;;  %v5235_v45 = vmul.f32 %v5231_v11, %v10225_v63  ;;  %v5347_v14 = vrot.slane %v10509_v32, %v6894_v43  ;;  %v5351_v3 = vrot.slane %v10513_v13, %v6894_v43 }
 0x7c7   :  { %v10593_v57 = vmul.f32 %v5543_v2, %v10243_v49  ;;  %v10596_v24 = vmul.f32 %v5567_v55, %v10354_v7  ;;  %v5332_v41 = vmul.f32 %v5319_v31, %v10223_v12  ;;  %v5333_v5 = vmul.f32 %v5323_v19, %v10223_v12 }
 0x7c8   :  { %v10578_v17 = vpop.permute.xlu1 %5881  ;;  %v10601_v0 = vmul.f32 %v5571_v23, %v10354_v7  ;;  %v10604_v63 = vmul.f32 %v5587_v39, %v10271_v21  ;;  %v5238_v32 = vadd.f32 %v5234_v18, %v5210_v6  ;;  %v5239_v27 = vadd.f32 %v5235_v45, %v5211_v30 }
 0x7c9   :  { %v5336_v49 = vadd.f32 %v5332_v41, %v5308_v34  ;;  %v5337_v2 = vadd.f32 %v5333_v5, %v5309_v42  ;;  %v5360_v52 = vmul.f32 %v5347_v14, %v10338_v44  ;;  %v5361_v7 = vmul.f32 %v5351_v3, %v10338_v44  ;;  %v5373_v18 = vpop.permute.xlu0 %5372 }
 0x7cb   :  { %v5364_v30 = vadd.f32 %v5360_v52, %v5336_v49  ;;  %v5365_v15 = vadd.f32 %v5361_v7, %v5337_v2 }
 0x7cc   :  { %v5247_v13 = vpop.permute.xlu1 %5246 }
 0x7cd   :  { %v5249_v55 = vsel %vm11620_vm10, %v5243_v53, %v5247_v13  ;;  %v5251_v60 = vsel %vm11621_vm2, %v5247_v13, %v5243_v53  ;;  %vm11641_vm10 = vcmp.lt.s32.totalorder %v6868_v61, 113 }
 0x7ce   :  { %v5254_v39 = vsel %vm7096_vm11, %v5251_v60, 0.0  ;;  %v5255_v23 = vsel %vm7103_vm12, %v5249_v55, 0.0  ;;  %vm11622_vm11 = vcmp.lt.s32.totalorder %v6868_v61, 1  ;;  %vm11642_vm2 = vmmov %vm11641_vm10 }
 0x7cf   :  { %v5271_v28 = vrot.slane %v5254_v39, %v6862_v56  ;;  %v5275_v11 = vrot.slane %v5255_v23, %v6862_v56  ;;  %v5299_v26 = vrot.slane %v5254_v39, %v6871_v62  ;;  %v5303_v9 = vrot.slane %v5255_v23, %v6871_v62  ;;  %vm11623_vm12 = vmmov %vm11622_vm11 }
 0x7d0   :  { %v5327_v53 = vrot.slane %v5254_v39, %v6885_v50  ;;  %v5331_v31 = vrot.slane %v5255_v23, %v6885_v50  ;;  %v5355_v19 = vrot.slane %v5254_v39, %v6894_v43  ;;  %v5359_v20 = vrot.slane %v5255_v23, %v6894_v43  ;;  %v5369_v6 = vpop.permute.xlu1 %5368  ;;  %vm11624_vm5 = vmmov %vm11622_vm11 }
 0x7d1   :  { %v5278_v34 = vmul.f32 %v5271_v28, %v10333_v35  ;;  %v5279_v42 = vmul.f32 %v5275_v11, %v10333_v35  ;;  %v5306_v45 = vmul.f32 %v5299_v26, %v10219_v8  ;;  %v5307_v14 = vmul.f32 %v5303_v9, %v10219_v8  ;;  %vm11625_vm6 = vmmov %vm11624_vm5 }
 0x7d2   :  { %v5334_v3 = vmul.f32 %v5327_v53, %v10223_v12  ;;  %v5335_v41 = vmul.f32 %v5331_v31, %v10223_v12  ;;  %v5376_v55 = vsel %vm11622_vm11, %v5369_v6, %v5373_v18  ;;  %v5378_v49 = vsel %vm11623_vm12, %v5373_v18, %v5369_v6  ;;  %vm11648_vm12 = vmmov %vm11642_vm2 }
 0x7d3   :  { %v5282_v5 = vadd.f32 %v5278_v34, %v5238_v32  ;;  %v5283_v13 = vadd.f32 %v5279_v42, %v5239_v27  ;;  %v5362_v2 = vmul.f32 %v5355_v19, %v10338_v44  ;;  %v5363_v35 = vmul.f32 %v5359_v20, %v10338_v44 }
 0x7d4   :  { %v5380_v60 = vsel %vm7215_vm14, %v5378_v49, 0.0  ;;  %v5381_v8 = vsel %vm7222_vm15, %v5376_v55, 0.0  ;;  %v5371_v52 = vpop.permute.xlu1 %5370  ;;  %v10660_v55 = vpop.permute.xlu0 %5909 }
 0x7d5   :  { %v5310_v12 = vadd.f32 %v5306_v45, %v5282_v5  ;;  %v5311_v32 = vadd.f32 %v5307_v14, %v5283_v13  ;;  %v5391_v27 = vrot.slane %v5380_v60, %v6862_v56  ;;  %v5395_v7 = vrot.slane %v5381_v8, %v6862_v56 }
 0x7d6   :  { %v5419_v39 = vrot.slane %v5380_v60, %v6871_v62  ;;  %v5423_v23 = vrot.slane %v5381_v8, %v6871_v62  ;;  %v5447_v28 = vrot.slane %v5380_v60, %v6885_v50  ;;  %v5451_v44 = vrot.slane %v5381_v8, %v6885_v50 }
 0x7d7   :  { %v5338_v11 = vadd.f32 %v5334_v3, %v5310_v12  ;;  %v5339_v26 = vadd.f32 %v5335_v41, %v5311_v32  ;;  %v5404_v9 = vmul.f32 %v5391_v27, %v10344_v46  ;;  %v5405_v53 = vmul.f32 %v5395_v7, %v10344_v46 }
 0x7d8   :  { %v5432_v31 = vmul.f32 %v5419_v39, %v10227_v40  ;;  %v5433_v19 = vmul.f32 %v5423_v23, %v10227_v40  ;;  %v5460_v20 = vmul.f32 %v5447_v28, %v10229_v33  ;;  %v5461_v6 = vmul.f32 %v5451_v44, %v10229_v33  ;;  %v5375_v34 = vpop.permute.xlu1 %5374 }
 0x7d9   :  { %v5366_v42 = vadd.f32 %v5362_v2, %v5338_v11  ;;  %v5367_v18 = vadd.f32 %v5363_v35, %v5339_v26  ;;  %v5408_v45 = vadd.f32 %v5404_v9, %v5364_v30  ;;  %v5409_v14 = vadd.f32 %v5405_v53, %v5365_v15 }
 0x7da   :  { %v5475_v3 = vrot.slane %v5380_v60, %v6894_v43  ;;  %v5479_v41 = vrot.slane %v5381_v8, %v6894_v43  ;;  %v5377_v5 = vsel %vm11624_vm5, %v5371_v52, %v5375_v34  ;;  %v5379_v13 = vsel %vm11625_vm6, %v5375_v34, %v5371_v52  ;;  %v5613_v34 = vpop.permute.xlu0 %5612  ;;  %vm11649_vm5 = vmmov %vm11642_vm2 }
 0x7db   :  { %v5436_v49 = vadd.f32 %v5432_v31, %v5408_v45  ;;  %v5437_v12 = vadd.f32 %v5433_v19, %v5409_v14  ;;  %v5382_v2 = vsel %vm7215_vm14, %v5379_v13, 0.0  ;;  %v5383_v30 = vsel %vm7222_vm15, %v5377_v5, 0.0  ;;  %v11626_v45 = vld [vmem:[#allocation63_spill] sm:$0xff] }
 0x7dc   :  { %v5488_v15 = vmul.f32 %v5475_v3, %v10348_v22  ;;  %v5489_v35 = vmul.f32 %v5479_v41, %v10348_v22  ;;  %v5399_v60 = vrot.slane %v5382_v2, %v6862_v56  ;;  %v5403_v8 = vrot.slane %v5383_v30, %v6862_v56  ;;  %v5609_v32 = vpop.permute.xlu1 %5608 }
 0x7dd   :  { %v5464_v52 = vadd.f32 %v5460_v20, %v5436_v49  ;;  %v5465_v27 = vadd.f32 %v5461_v6, %v5437_v12  ;;  %v5427_v7 = vrot.slane %v5382_v2, %v6871_v62  ;;  %v5431_v39 = vrot.slane %v5383_v30, %v6871_v62 }
 0x7de   :  { %v5406_v59 = vmul.f32 %v5399_v60, %v10344_v46  ;;  %v5407_v58 = vmul.f32 %v5403_v8, %v10344_v46  ;;  %v5455_v23 = vrot.slane %v5382_v2, %v6885_v50  ;;  %v5459_v28 = vrot.slane %v5383_v30, %v6885_v50  ;;  %v11632_v60 = vld [vmem:[#allocation27_spill] sm:$0xff] }
 0x7df   :  { %v5492_v44 = vadd.f32 %v5488_v15, %v5464_v52  ;;  %v5493_v11 = vadd.f32 %v5489_v35, %v5465_v27  ;;  %v5434_v26 = vmul.f32 %v5427_v7, %v10227_v40  ;;  %v5435_v9 = vmul.f32 %v5431_v39, %v10227_v40  ;;  %v11630_v35 = vld [vmem:[#allocation26_spill] sm:$0xff] }
 0x7e0   :  { %v5410_v53 = vadd.f32 %v5406_v59, %v5366_v42  ;;  %v5411_v31 = vadd.f32 %v5407_v58, %v5367_v18  ;;  %v5462_v19 = vmul.f32 %v5455_v23, %v10229_v33  ;;  %v5463_v20 = vmul.f32 %v5459_v28, %v10229_v33  ;;  %v5611_v6 = vpop.permute.xlu1 %5610  ;;  %v11629_v18 = vld [vmem:[#allocation47_spill] sm:$0xff]  ;;  %v11634_v28 = vld [vmem:[#allocation48_spill] sm:$0xff] }
 0x7e1   :  { %v5520_v46 = vadd.f32 %v10476_v48, %v5492_v44  ;;  %v5521_v14 = vadd.f32 %v11626_v45, %v5493_v11  ;;  %v5483_v3 = vrot.slane %v5382_v2, %v6894_v43  ;;  %v5487_v41 = vrot.slane %v5383_v30, %v6894_v43  ;;  %v11635_v11 = vld [vmem:[#allocation51_spill] sm:$0xff] }
 0x7e2   :  { %v5438_v5 = vadd.f32 %v5434_v26, %v5410_v53  ;;  %v5439_v13 = vadd.f32 %v5435_v9, %v5411_v31  ;;  %vm11627_vm14 = vcmp.lt.s32.totalorder %v6868_v61, 127  ;;  %vm11631_vm3 = vnez %v11630_v35  ;;  %v11636_v53 = vld [vmem:[#allocation49_spill] sm:$0xff] }
 0x7e3   :  { %v5616_v40 = vsel %vm11627_vm14, %v5609_v32, %v5613_v34  ;;  %vm11628_vm15 = vmmov %vm11627_vm14  ;;  %v5548_v33 = vadd.f32 %v10479_v51, %v5520_v46  ;;  %v5549_v49 = vadd.f32 %v11629_v18, %v5521_v14  ;;  %v5490_v48 = vmul.f32 %v5483_v3, %v10348_v22 }
 0x7e4   :  { %v5618_v42 = vsel %vm11628_vm15, %v5613_v34, %v5609_v32  ;;  %v5491_v12 = vmul.f32 %v5487_v41, %v10348_v22  ;;  %v5466_v15 = vadd.f32 %v5462_v19, %v5438_v5  ;;  %v5467_v2 = vadd.f32 %v5463_v20, %v5439_v13  ;;  %v10696_v52 = vpop.permute.xlu1 %5965  ;;  %v11637_v13 = vld [vmem:[#allocation50_spill] sm:$0xff]  ;;  %vm11638_vm8 = vmmov %vm11627_vm14 }
 0x7e5   :  { %v5620_v30 = vsel %vm11631_vm3, %v5616_v40, 0.0  ;;  %vm11633_vm7 = vnez %v11632_v60  ;;  %v5576_v32 = vadd.f32 %v10516_v16, %v5548_v33  ;;  %v5577_v51 = vadd.f32 %v10519_v25, %v5549_v49  ;;  %v10732_v49 = vpop.permute.xlu0 %5937  ;;  %vm11639_vm9 = vmmov %vm11638_vm8 }
 0x7e6   :  { %v5621_v8 = vsel %vm11633_vm7, %v5618_v42, 0.0  ;;  %v5631_v27 = vrot.slane %v5620_v30, %v6862_v56  ;;  %v5494_v39 = vadd.f32 %v5490_v48, %v5466_v15  ;;  %v5495_v22 = vadd.f32 %v5491_v12, %v5467_v2 }
 0x7e7   :  { %v5635_v7 = vrot.slane %v5621_v8, %v6862_v56  ;;  %v5659_v59 = vrot.slane %v5620_v30, %v6871_v62  ;;  %v5663_v58 = vrot.slane %v5621_v8, %v6871_v62  ;;  %v5604_v23 = vadd.f32 %v10604_v63, %v5576_v32 }
 0x7e8   :  { %v5605_v44 = vadd.f32 %v11634_v28, %v5577_v51  ;;  %v5644_v26 = vmul.f32 %v5631_v27, %v11635_v11  ;;  %v5522_v25 = vadd.f32 %v10574_v47, %v5494_v39  ;;  %v5523_v9 = vadd.f32 %v10581_v36, %v5495_v22 }
 0x7e9   :  { %v5645_v16 = vmul.f32 %v5635_v7, %v11635_v11  ;;  %v5672_v31 = vmul.f32 %v5659_v59, %v11636_v53  ;;  %v5673_v19 = vmul.f32 %v5663_v58, %v11636_v53  ;;  %v5687_v46 = vrot.slane %v5620_v30, %v6885_v50  ;;  %v10714_v45 = vpop.permute.xlu1 %6009  ;;  %v5741_v28 = vpop.permute.xlu0 %5740 }
 0x7ea   :  { %v5648_v20 = vadd.f32 %v5644_v26, %v5604_v23  ;;  %v5691_v63 = vrot.slane %v5621_v8, %v6885_v50  ;;  %v5550_v14 = vadd.f32 %v10584_v29, %v5522_v25  ;;  %v5551_v3 = vadd.f32 %v10593_v57, %v5523_v9 }
 0x7eb   :  { %v5649_v34 = vadd.f32 %v5645_v16, %v5605_v44  ;;  %v5715_v47 = vrot.slane %v5620_v30, %v6894_v43  ;;  %v5719_v36 = vrot.slane %v5621_v8, %v6894_v43  ;;  %v5700_v40 = vmul.f32 %v5687_v46, %v11637_v13  ;;  %v11640_v8 = vld [vmem:[#allocation52_spill] sm:$0xff] }
 0x7ec   :  { %v5676_v41 = vadd.f32 %v5672_v31, %v5648_v20  ;;  %v5701_v42 = vmul.f32 %v5691_v63, %v11637_v13  ;;  %v5602_v33 = vmul.f32 %v5595_v4, %v10271_v21  ;;  %v5603_v29 = vmul.f32 %v5599_v10, %v10271_v21 }
 0x7ed   :  { %v5677_v5 = vadd.f32 %v5673_v19, %v5649_v34  ;;  %v5578_v57 = vadd.f32 %v10596_v24, %v5550_v14  ;;  %v5579_v18 = vadd.f32 %v10601_v0, %v5551_v3  ;;  %v5615_v15 = vpop.permute.xlu1 %5614  ;;  %v5728_v1 = vmul.f32 %v5715_v47, %v11640_v8 }
 0x7ee   :  { %v5704_v48 = vadd.f32 %v5700_v40, %v5676_v41  ;;  %v5617_v54 = vsel %vm11638_vm8, %v5611_v6, %v5615_v15  ;;  %v5619_v4 = vsel %vm11639_vm9, %v5615_v15, %v5611_v6  ;;  %v5729_v21 = vmul.f32 %v5719_v36, %v11640_v8  ;;  %v11647_v15 = vld [vmem:[#allocation53_spill] sm:$0xff] }
 0x7ef   :  { %v5705_v12 = vadd.f32 %v5701_v42, %v5677_v5  ;;  %v5606_v2 = vadd.f32 %v5602_v33, %v5578_v57  ;;  %v5607_v30 = vadd.f32 %v5603_v29, %v5579_v18  ;;  %v5622_v10 = vsel %vm11631_vm3, %v5617_v54, 0.0  ;;  %v11646_v18 = vld [vmem:[#allocation55_spill] sm:$0xff] }
 0x7f0   :  { %v5623_v24 = vsel %vm11633_vm7, %v5619_v4, 0.0  ;;  %v5639_v0 = vrot.slane %v5622_v10, %v6862_v56  ;;  %v5667_v51 = vrot.slane %v5622_v10, %v6871_v62  ;;  %v5695_v6 = vrot.slane %v5622_v10, %v6885_v50 }
 0x7f1   :  { %v5643_v32 = vrot.slane %v5623_v24, %v6862_v56  ;;  %v5671_v27 = vrot.slane %v5623_v24, %v6871_v62  ;;  %v5699_v7 = vrot.slane %v5623_v24, %v6885_v50  ;;  %v5723_v39 = vrot.slane %v5622_v10, %v6894_v43  ;;  %v5737_v22 = vpop.permute.xlu1 %5736 }
 0x7f2   :  { %v5727_v35 = vrot.slane %v5623_v24, %v6894_v43  ;;  %v5732_v59 = vadd.f32 %v5728_v1, %v5704_v48  ;;  %v5733_v60 = vadd.f32 %v5729_v21, %v5705_v12  ;;  %v5646_v58 = vmul.f32 %v5639_v0, %v11635_v11 }
 0x7f3   :  { %v5647_v23 = vmul.f32 %v5643_v32, %v11635_v11  ;;  %v5674_v44 = vmul.f32 %v5667_v51, %v11636_v53  ;;  %v5675_v26 = vmul.f32 %v5671_v27, %v11636_v53  ;;  %v5702_v16 = vmul.f32 %v5695_v6, %v11637_v13  ;;  %v11644_v53 = vld [vmem:[#allocation28_spill] sm:$0xff] }
 0x7f4   :  { %v5703_v25 = vmul.f32 %v5699_v7, %v11637_v13  ;;  %v5650_v9 = vadd.f32 %v5646_v58, %v5606_v2  ;;  %v5744_v19 = vsel %vm11641_vm10, %v5737_v22, %v5741_v28  ;;  %v5746_v20 = vsel %vm11642_vm2, %v5741_v28, %v5737_v22 }
 0x7f5   :  { %v5651_v31 = vadd.f32 %v5647_v23, %v5607_v30  ;;  %v5730_v34 = vmul.f32 %v5723_v39, %v11640_v8  ;;  %v5731_v11 = vmul.f32 %v5727_v35, %v11640_v8  ;;  %v5748_v63 = vsel %vm11533_vm4, %v5744_v19, 0.0  ;;  %v5739_v3 = vpop.permute.xlu1 %5738 }
 0x7f6   :  { %vm11645_vm11 = vnez %v11644_v53  ;;  %v5678_v47 = vadd.f32 %v5674_v44, %v5650_v9  ;;  %v5759_v41 = vrot.slane %v5748_v63, %v6862_v56  ;;  %v5787_v13 = vrot.slane %v5748_v63, %v6871_v62 }
 0x7f7   :  { %v5749_v14 = vsel %vm11645_vm11, %v5746_v20, 0.0  ;;  %v5679_v36 = vadd.f32 %v5675_v26, %v5651_v31  ;;  %v5815_v42 = vrot.slane %v5748_v63, %v6885_v50  ;;  %v5843_v0 = vrot.slane %v5748_v63, %v6894_v43  ;;  %v5869_v63 = vpop.permute.xlu0 %5868 }
 0x7f8   :  { %v5763_v5 = vrot.slane %v5749_v14, %v6862_v56  ;;  %v5791_v40 = vrot.slane %v5749_v14, %v6871_v62  ;;  %v5819_v33 = vrot.slane %v5749_v14, %v6885_v50  ;;  %v5706_v29 = vadd.f32 %v5702_v16, %v5678_v47 }
 0x7f9   :  { %v5707_v57 = vadd.f32 %v5703_v25, %v5679_v36  ;;  %v5772_v48 = vmul.f32 %v5759_v41, %v11646_v18  ;;  %v5800_v2 = vmul.f32 %v5787_v13, %v11647_v15  ;;  %v5828_v54 = vmul.f32 %v5815_v42, %v10606_v37  ;;  %v5743_v8 = vpop.permute.xlu1 %5742 }
 0x7fa   :  { %v5773_v12 = vmul.f32 %v5763_v5, %v11646_v18  ;;  %v5801_v30 = vmul.f32 %v5791_v40, %v11647_v15  ;;  %v5829_v4 = vmul.f32 %v5819_v33, %v10606_v37  ;;  %v5734_v1 = vadd.f32 %v5730_v34, %v5706_v29 }
 0x7fb   :  { %v5735_v21 = vadd.f32 %v5731_v11, %v5707_v57  ;;  %v5776_v10 = vadd.f32 %v5772_v48, %v5732_v59  ;;  %v5847_v32 = vrot.slane %v5749_v14, %v6894_v43  ;;  %v5745_v51 = vsel %vm11648_vm12, %v5739_v3, %v5743_v8 }
 0x7fc   :  { %v5777_v24 = vadd.f32 %v5773_v12, %v5733_v60  ;;  %v5747_v27 = vsel %vm11649_vm5, %v5743_v8, %v5739_v3  ;;  %v5750_v39 = vsel %vm11533_vm4, %v5745_v51, 0.0  ;;  %v5856_v22 = vmul.f32 %v5843_v0, %v10551_v38 }
 0x7fd   :  { %v5804_v6 = vadd.f32 %v5800_v2, %v5776_v10  ;;  %v5751_v35 = vsel %vm11645_vm11, %v5747_v27, 0.0  ;;  %v5857_v59 = vmul.f32 %v5847_v32, %v10551_v38  ;;  %v5767_v60 = vrot.slane %v5750_v39, %v6862_v56  ;;  %v5865_v23 = vpop.permute.xlu1 %5864 }
 0x7fe   :  { %v5805_v7 = vadd.f32 %v5801_v30, %v5777_v24  ;;  %v5771_v58 = vrot.slane %v5751_v35, %v6862_v56  ;;  %v5795_v26 = vrot.slane %v5750_v39, %v6871_v62  ;;  %v5799_v16 = vrot.slane %v5751_v35, %v6871_v62 }
 0x7ff   :  { %v5832_v28 = vadd.f32 %v5828_v54, %v5804_v6  ;;  %v5774_v25 = vmul.f32 %v5767_v60, %v11646_v18  ;;  %v5823_v31 = vrot.slane %v5750_v39, %v6885_v50  ;;  %v5827_v19 = vrot.slane %v5751_v35, %v6885_v50 }
 0x800   :  { %v5833_v44 = vadd.f32 %v5829_v4, %v5805_v7  ;;  %v5775_v9 = vmul.f32 %v5771_v58, %v11646_v18  ;;  %v5802_v11 = vmul.f32 %v5795_v26, %v11647_v15  ;;  %v5803_v46 = vmul.f32 %v5799_v16, %v11647_v15 }
 0x801   :  { %v5860_v20 = vadd.f32 %v5856_v22, %v5832_v28  ;;  %v5778_v53 = vadd.f32 %v5774_v25, %v5734_v1  ;;  %v5830_v3 = vmul.f32 %v5823_v31, %v10606_v37  ;;  %v5831_v47 = vmul.f32 %v5827_v19, %v10606_v37  ;;  %v5867_v36 = vpop.permute.xlu1 %5866  ;;  %v10828_v22 = vpop.permute.xlu0 %6037 }
 0x802   :  { %v5861_v34 = vadd.f32 %v5857_v59, %v5833_v44  ;;  %v5779_v14 = vadd.f32 %v5775_v9, %v5735_v21  ;;  %v5851_v41 = vrot.slane %v5750_v39, %v6894_v43  ;;  %v5855_v5 = vrot.slane %v5751_v35, %v6894_v43 }
 0x803   :  { %vm11650_vm4 = vcmp.lt.s32.totalorder %v6868_v61, 112  ;;  %v5806_v42 = vadd.f32 %v5802_v11, %v5778_v53 }
 0x804   :  { %v5872_v13 = vsel %vm11650_vm4, %v5865_v23, %v5869_v63  ;;  %vm11651_vm6 = vmmov %vm11650_vm4  ;;  %v5807_v33 = vadd.f32 %v5803_v46, %v5779_v14  ;;  %v5858_v37 = vmul.f32 %v5851_v41, %v10551_v38  ;;  %v5859_v12 = vmul.f32 %v5855_v5, %v10551_v38 }
 0x805   :  { %v5874_v40 = vsel %vm11651_vm6, %v5869_v63, %v5865_v23  ;;  %v5876_v57 = vsel %vm11444_vm13, %v5872_v13, 0.0  ;;  %v5834_v30 = vadd.f32 %v5830_v3, %v5806_v42  ;;  %v5871_v1 = vpop.permute.xlu1 %5870  ;;  %vm11654_vm14 = vmmov %vm11650_vm4  ;;  %v5997_v42 = vpop.permute.xlu0 %5996 }
 0x806   :  { %v5877_v48 = vsel %vm11446_vm1, %v5874_v40, 0.0  ;;  %v5887_v15 = vrot.slane %v5876_v57, %v6862_v56  ;;  %v5835_v54 = vadd.f32 %v5831_v47, %v5807_v33  ;;  %v5915_v4 = vrot.slane %v5876_v57, %v6871_v62  ;;  %vm11655_vm15 = vmmov %vm11650_vm4 }
 0x807   :  { %v5891_v2 = vrot.slane %v5877_v48, %v6862_v56  ;;  %v5919_v8 = vrot.slane %v5877_v48, %v6871_v62  ;;  %v5943_v24 = vrot.slane %v5876_v57, %v6885_v50  ;;  %v5947_v0 = vrot.slane %v5877_v48, %v6885_v50 }
 0x808   :  { %v5900_v21 = vmul.f32 %v5887_v15, %v10578_v17  ;;  %v5862_v38 = vadd.f32 %v5858_v37, %v5834_v30  ;;  %v5863_v32 = vadd.f32 %v5859_v12, %v5835_v54  ;;  %v5928_v51 = vmul.f32 %v5915_v4, %v10660_v55  ;;  %v11659_v54 = vld [vmem:[#allocation32_spill] sm:$0xff] }
 0x809   :  { %v5901_v10 = vmul.f32 %v5891_v2, %v10578_v17  ;;  %v5929_v27 = vmul.f32 %v5919_v8, %v10660_v55  ;;  %v5956_v39 = vmul.f32 %v5943_v24, %v10732_v49  ;;  %v5957_v35 = vmul.f32 %v5947_v0, %v10732_v49  ;;  %v5993_v28 = vpop.permute.xlu1 %5992 }
 0x80a   :  { %v5904_v6 = vadd.f32 %v5900_v21, %v5860_v20  ;;  %v5971_v59 = vrot.slane %v5876_v57, %v6894_v43  ;;  %v5975_v60 = vrot.slane %v5877_v48, %v6894_v43  ;;  %v5873_v58 = vsel %vm11654_vm14, %v5867_v36, %v5871_v1 }
 0x80b   :  { %v5905_v7 = vadd.f32 %v5901_v10, %v5861_v34  ;;  %v5875_v23 = vsel %vm11655_vm15, %v5871_v1, %v5867_v36  ;;  %v5878_v16 = vsel %vm11444_vm13, %v5873_v58, 0.0  ;;  %vm11656_vm13 = vcmp.lt.s32.totalorder %v6868_v61, 111 }
 0x80c   :  { %v5932_v44 = vadd.f32 %v5928_v51, %v5904_v6  ;;  %v5879_v25 = vsel %vm11446_vm1, %v5875_v23, 0.0  ;;  %v5984_v9 = vmul.f32 %v5971_v59, %v10696_v52  ;;  %v5985_v31 = vmul.f32 %v5975_v60, %v10696_v52  ;;  %vm11657_vm1 = vmmov %vm11656_vm13 }
 0x80d   :  { %v5933_v26 = vadd.f32 %v5929_v27, %v5905_v7  ;;  %v5895_v19 = vrot.slane %v5878_v16, %v6862_v56  ;;  %v5899_v20 = vrot.slane %v5879_v25, %v6862_v56  ;;  %v5923_v46 = vrot.slane %v5878_v16, %v6871_v62  ;;  %v5995_v40 = vpop.permute.xlu1 %5994  ;;  %v6066_v27 = vpop.permute.xlu0 %6065  ;;  %vm11661_vm7 = vmmov %vm11657_vm1 }
 0x80e   :  { %v5960_v34 = vadd.f32 %v5956_v39, %v5932_v44  ;;  %v5927_v63 = vrot.slane %v5879_v25, %v6871_v62  ;;  %v5951_v3 = vrot.slane %v5878_v16, %v6885_v50  ;;  %v5955_v47 = vrot.slane %v5879_v25, %v6885_v50  ;;  %vm11662_vm8 = vmmov %vm11657_vm1 }
 0x80f   :  { %v5961_v11 = vadd.f32 %v5957_v35, %v5933_v26  ;;  %v5902_v53 = vmul.f32 %v5895_v19, %v10578_v17  ;;  %v5903_v14 = vmul.f32 %v5899_v20, %v10578_v17  ;;  %v5930_v5 = vmul.f32 %v5923_v46, %v10660_v55 }
 0x810   :  { %v5988_v36 = vadd.f32 %v5984_v9, %v5960_v34  ;;  %v5931_v13 = vmul.f32 %v5927_v63, %v10660_v55  ;;  %v5958_v57 = vmul.f32 %v5951_v3, %v10732_v49  ;;  %v5959_v18 = vmul.f32 %v5955_v47, %v10732_v49 }
 0x811   :  { %v5989_v41 = vadd.f32 %v5985_v31, %v5961_v11  ;;  %v5906_v33 = vadd.f32 %v5902_v53, %v5862_v38  ;;  %v5907_v29 = vadd.f32 %v5903_v14, %v5863_v32  ;;  %v5979_v17 = vrot.slane %v5878_v16, %v6894_v43 }
 0x812   :  { %v5983_v48 = vrot.slane %v5879_v25, %v6894_v43  ;;  %v6000_v37 = vsel %vm11656_vm13, %v5993_v28, %v5997_v42  ;;  %v6002_v12 = vsel %vm11657_vm1, %v5997_v42, %v5993_v28  ;;  %vm11660_vm3 = vnez %v11659_v54  ;;  %v11663_v54 = vld [vmem:[#allocation15_spill] sm:$0xff] }
 0x813   :  { %v5934_v15 = vadd.f32 %v5930_v5, %v5906_v33  ;;  %v5935_v55 = vadd.f32 %v5931_v13, %v5907_v29  ;;  %v6004_v30 = vsel %vm11298_vm0, %v6000_v37, 0.0  ;;  %v6005_v4 = vsel %vm11660_vm3, %v6002_v12, 0.0 }
 0x814   :  { %v5986_v49 = vmul.f32 %v5979_v17, %v10696_v52  ;;  %v5987_v8 = vmul.f32 %v5983_v48, %v10696_v52  ;;  %v6015_v1 = vrot.slane %v6004_v30, %v6862_v56  ;;  %v6019_v21 = vrot.slane %v6005_v4, %v6862_v56  ;;  %v5999_v52 = vpop.permute.xlu1 %5998 }
 0x815   :  { %v5962_v10 = vadd.f32 %v5958_v57, %v5934_v15  ;;  %v5963_v24 = vadd.f32 %v5959_v18, %v5935_v55  ;;  %v6043_v0 = vrot.slane %v6004_v30, %v6871_v62  ;;  %v6047_v38 = vrot.slane %v6005_v4, %v6871_v62 }
 0x816   :  { %v6028_v32 = vmul.f32 %v6015_v1, %v10714_v45  ;;  %v6029_v51 = vmul.f32 %v6019_v21, %v10714_v45  ;;  %v6071_v6 = vrot.slane %v6004_v30, %v6885_v50  ;;  %v6075_v7 = vrot.slane %v6005_v4, %v6885_v50  ;;  %v6422_v21 = vld [vmem:[#allocation2 + $0x8] sm:$0xff] }
 0x817   :  { %v5990_v39 = vadd.f32 %v5986_v49, %v5962_v10  ;;  %v5991_v35 = vadd.f32 %v5987_v8, %v5963_v24  ;;  %v6056_v59 = vmul.f32 %v6043_v0, %v10828_v22  ;;  %v6057_v60 = vmul.f32 %v6047_v38, %v10828_v22  ;;  %v11664_v24 = vld [vmem:[#allocation16_spill] sm:$0xff] }
 0x818   :  { %v6032_v58 = vadd.f32 %v6028_v32, %v5988_v36  ;;  %v6033_v23 = vadd.f32 %v6029_v51, %v5989_v41  ;;  %v6084_v28 = vmul.f32 %v6071_v6, %v6066_v27  ;;  %v6085_v44 = vmul.f32 %v6075_v7, %v6066_v27  ;;  %v6094_v3 = vpop.permute.xlu1 %6093 }
 0x819   :  { %v6001_v26 = vsel %vm11661_vm7, %v5995_v40, %v5999_v52  ;;  %v6003_v16 = vsel %vm11662_vm8, %v5999_v52, %v5995_v40  ;;  %v6099_v53 = vrot.slane %v6004_v30, %v6894_v43  ;;  %v6103_v14 = vrot.slane %v6005_v4, %v6894_v43  ;;  %v6421_v30 = vld [vmem:[#allocation2] sm:$0xff] }
 0x81a   :  { %v6060_v25 = vadd.f32 %v6056_v59, %v6032_v58  ;;  %v6061_v9 = vadd.f32 %v6057_v60, %v6033_v23  ;;  %v6006_v31 = vsel %vm11298_vm0, %v6001_v26, 0.0  ;;  %v6007_v19 = vsel %vm11660_vm3, %v6003_v16, 0.0 }
 0x81b   :  { %v6023_v20 = vrot.slane %v6006_v31, %v6862_v56  ;;  %v6027_v34 = vrot.slane %v6007_v19, %v6862_v56  ;;  %v6051_v11 = vrot.slane %v6006_v31, %v6871_v62  ;;  %v6055_v46 = vrot.slane %v6007_v19, %v6871_v62 }
 0x81c   :  { %v6079_v63 = vrot.slane %v6006_v31, %v6885_v50  ;;  %v6083_v61 = vrot.slane %v6007_v19, %v6885_v50  ;;  %v6088_v47 = vadd.f32 %v6084_v28, %v6060_v25  ;;  %v6089_v36 = vadd.f32 %v6085_v44, %v6061_v9 }
 0x81d   :  { %v6030_v41 = vmul.f32 %v6023_v20, %v10714_v45  ;;  %v6031_v5 = vmul.f32 %v6027_v34, %v10714_v45  ;;  %v6058_v56 = vmul.f32 %v6051_v11, %v10828_v22  ;;  %v6059_v13 = vmul.f32 %v6055_v46, %v10828_v22 }
 0x81e   :  { %v6107_v62 = vrot.slane %v6006_v31, %v6894_v43  ;;  %v6111_v40 = vrot.slane %v6007_v19, %v6894_v43  ;;  %v6112_v33 = vmul.f32 %v6099_v53, %v6094_v3  ;;  %v6113_v29 = vmul.f32 %v6103_v14, %v6094_v3 }
 0x81f   :  { %v6034_v50 = vadd.f32 %v6030_v41, %v5990_v39  ;;  %v6035_v42 = vadd.f32 %v6031_v5, %v5991_v35  ;;  %v6086_v57 = vmul.f32 %v6079_v63, %v6066_v27  ;;  %v6087_v18 = vmul.f32 %v6083_v61, %v6066_v27 }
 0x820   :  { %v6116_v37 = vadd.f32 %v6112_v33, %v6088_v47  ;;  %v6117_v12 = vadd.f32 %v6113_v29, %v6089_v36  ;;  %v6114_v15 = vmul.f32 %v6107_v62, %v6094_v3  ;;  %v6115_v45 = vmul.f32 %v6111_v40, %v6094_v3 }
 0x821   :  { %v6062_v17 = vadd.f32 %v6058_v56, %v6034_v50  ;;  %v6063_v48 = vadd.f32 %v6059_v13, %v6035_v42 }
 0x822   :  { %v6120_v22 = vadd.f32 %v6421_v30, %v6116_v37  ;;  %v6121_v4 = vadd.f32 %v6117_v12, %v11663_v54 }
 0x823   :  { %v6090_v55 = vadd.f32 %v6086_v57, %v6062_v17  ;;  %v6091_v2 = vadd.f32 %v6087_v18, %v6063_v48 }
 0x824   :  { %v6124_v8 = vmax.f32 %v6120_v22, 0.0  ;;  %v6125_v1 = vmax.f32 %v6121_v4, 0.0 }
 0x825   :  { %v6118_v49 = vadd.f32 %v6114_v15, %v6090_v55  ;;  %v6119_v43 = vadd.f32 %v6115_v45, %v6091_v2 }
 0x826   :  { %v6132_v38 = vcombine.low %v6124_v8, %v6125_v1 }
 0x827   :  { %v6122_v10 = vadd.f32 %v6422_v21, %v6118_v49  ;;  %v6123_v0 = vadd.f32 %v6119_v43, %v11664_v24 }
 0x828   :  { %6136 = vst [vmem:[#allocation10] sm:$0xff] %v6132_v38 }
 0x829   :  { %v6126_v32 = vmax.f32 %v6122_v10, 0.0  ;;  %v6127_v51 = vmax.f32 %v6123_v0, 0.0 }
 0x82b   :  { %v6133_v27 = vcombine.low %v6126_v32, %v6127_v51 }
 0x82d   :  { %6137 = vst [vmem:[#allocation10 + $0x8] sm:$0xff] %v6133_v27 }
 0x82e   :  { %6522 = shalt.err (!%p6519_p8)
}
 0x82f   :  { %s6523_s11 = scalar_lea.hbm %s10920_s5, 256 }
 0x830   :  { %p6524_p9 = scmp.ne.s32.totalorder %s10920_s5, %s6523_s11  ;;  %p6527_p10 = scmp.lt.u32.totalorder %s6523_s11, %s10920_s5 }
 0x832   :  { %p6529_p11 = pnand %p6527_p10, %p6524_p9 }
 0x834   :  { %6532 = shalt.err (!%p6529_p11)
}
 0x835   :  { %6149 = dma.vmem_to_hbm [thread:$0]  %s6144_s0, 256, %s10920_s5, [#allocation4], %s6545_s1, %s6545_s1, %s6546_s17  }
 0x836   :  { %6539 = dma.done.wait [#allocation4], 256  }
 0x837   :  { %6540 = vsyncadd [#allocation4], 4294967040 }
 0x838   :  { %6153 = vsyncpa [#allocation3], 1 }
 0x839   :  { %6154 = vsyncpa [#allocation6], 1 }
 0x83a   :  { %6155 = vsyncpa [#allocation9], 1 }
 0x83b   :  { %6156 = vsyncpa [#allocation4], 1 }

</bundles_post_ra>
